<compile_context>
chip_gen: v7x
topology: tpu7x:2x2x1
jax: 0.10.0
libtpu: 0.0.40
codegen_flags: <defaults>
</compile_context>

<pallas_src>
import jax
import jax.numpy as jnp
from jax.experimental import pallas as pl
from jax.experimental.pallas import tpu as pltpu


def _round_up(x, m):
    return ((x + m - 1) // m) * m


def _make_resblock_kernel(H, W, Wp, Cp, K, eps, off2, S):
    M = H * Wp              # conv-output rows in the padded-column frame
    KK = K * K
    inv_n = 1.0 / float(H * W)
    base2 = off2 - (Wp + 1)  # conv-#2 tap base inside the scratch frame (static)

    def kernel(x_ref, w1_ref, w2_ref, o_ref, ypad_ref):
        # Valid-column mask built in-kernel (no HBM input / VMEM buffer for it).
        row = jax.lax.broadcasted_iota(jnp.int32, (M, 1), 0)
        mask = ((row % Wp) < W).astype(jnp.float32)             # (M, 1): 1 on valid cols

        def conv(src_ref, w_ref, base):
            # 3x3 conv as K*K shifted (M,Cp)x(Cp,Cp) bf16 MXU matmuls, f32 accumulation.
            # Two independent accumulators so the f32 adds overlap the MXU drain.
            acc0 = jnp.zeros((M, Cp), jnp.float32)
            acc1 = jnp.zeros((M, Cp), jnp.float32)
            for k in range(KK):
                di, dj = divmod(k, K)
                off = base + di * Wp + dj                       # static offset
                d = jnp.dot(src_ref[off:off + M, :], w_ref[k],
                            preferred_element_type=jnp.float32)
                if k % 2 == 0:
                    acc0 = acc0 + d
                else:
                    acc1 = acc1 + d
            return acc0 + acc1

        def instance_norm(y):
            # One-pass masked stats over the H*W valid positions (biased variance,
            # like nn.InstanceNorm2d).
            ym = y * mask
            mean = jnp.sum(ym, axis=0, keepdims=True) * inv_n
            ey2 = jnp.sum(ym * ym, axis=0, keepdims=True) * inv_n
            var = ey2 - mean * mean
            return (y - mean) * jax.lax.rsqrt(var + eps)

        # --- Conv2dBlock #1: zero-pad -> conv -> InstanceNorm -> ReLU
        # (conv bias is omitted: it is exactly cancelled by the affine-less IN)
        y = instance_norm(conv(x_ref, w1_ref, 0))
        y = jnp.maximum(y, 0.0) * mask      # junk/pad cols -> 0 (they become conv-#2 padding)

        # Re-embed the intermediate into the bf16 scratch frame for conv #2.
        # Only the border rows are re-zeroed; the interior is fully overwritten.
        ypad_ref[0:off2, :] = jnp.zeros((off2, Cp), jnp.bfloat16)
        ypad_ref[off2 + M:S, :] = jnp.zeros((S - off2 - M, Cp), jnp.bfloat16)
        ypad_ref[off2:off2 + M, :] = y.astype(jnp.bfloat16)

        # --- Conv2dBlock #2: zero-pad -> conv -> InstanceNorm (no activation)
        z = instance_norm(conv(ypad_ref, w2_ref, base2))

        # --- Residual add (interior of the padded input slab). Junk columns are
        # left as-is and sliced off on the host.
        res = x_ref[Wp + 1:Wp + 1 + M, :]
        o_ref[...] = (z + res).astype(jnp.bfloat16)

    return kernel


def resblock_forward(x, w1, b1, w2, b2, *, eps=1e-5):
    """ResBlock forward.  x: [B, C, H, W] (NCHW); w*: [C, C, 3, 3]; b*: [C].

    Note: the conv biases are accepted for API parity but not sent to the kernel —
    a per-channel bias is exactly cancelled by the following affine-less InstanceNorm.
    """
    del b1, b2
    B, C, H, W = x.shape
    K, PAD = 3, 1
    assert w1.shape == (C, C, K, K) and w2.shape == (C, C, K, K)
    Hp = H + 2 * PAD
    Wp = _round_up(W + 2 * PAD, 8)          # sublane-aligned row pitch (di*Wp shifts aligned)
    Cp = _round_up(C, 128)                  # lane-dense channels (no-op for C >= 128)
    M = H * Wp                              # conv-output rows per image (junk cols masked)
    L = _round_up(Hp * Wp + 2, 16)          # flat padded rows (+tail so shifted reads stay in bounds)
    off2 = _round_up(Wp + PAD, 16)          # bf16-tile-aligned interior start in the scratch frame
    S = _round_up(off2 + M + Wp + 1, 16)    # scratch rows for the conv-#2 frame

    # NCHW -> NHWC once; bf16 once at the boundary; spatial zero-pad (incl. row-pitch
    # alignment columns) + channel pad; flatten per image.
    # TODO(synk): if the surrounding network can stay channels-last/bf16, these
    #             boundary transposes/pads disappear entirely.
    xh = jnp.transpose(x, (0, 2, 3, 1)).astype(jnp.bfloat16)                 # (B,H,W,C)
    xh = jnp.pad(xh, ((0, 0), (PAD, PAD), (PAD, Wp - W - PAD), (0, Cp - C)))  # (B,Hp,Wp,Cp)
    xf = xh.reshape(B, Hp * Wp, Cp)
    xf = jnp.pad(xf, ((0, 0), (0, L - Hp * Wp), (0, 0)))                     # (B,L,Cp)

    def prep_w(w):   # (Cout,Cin,K,K) -> (K*K, Cin_p, Cout_p), bf16 for the MXU
        wk = jnp.transpose(w, (2, 3, 1, 0)).reshape(K * K, C, C)
        return jnp.pad(wk, ((0, 0), (0, Cp - C), (0, Cp - C))).astype(jnp.bfloat16)

    w1p, w2p = prep_w(w1), prep_w(w2)

    kernel = _make_resblock_kernel(H, W, Wp, Cp, K, eps, off2, S)

    # Per-step VMEM footprint: double-buffered ins/outs + scratch + f32 temporaries.
    est = (2 * L * Cp * 2 + 4 * K * K * Cp * Cp * 2 + 2 * M * Cp * 2
           + S * Cp * 2 + 6 * M * Cp * 4)
    vmem_limit = int(min(96 * 2 ** 20, max(32 * 2 ** 20, 2 * est)))

    out_flat = pl.pallas_call(
        kernel,
        out_shape=jax.ShapeDtypeStruct((B, M, Cp), jnp.bfloat16),
        grid_spec=pltpu.PrefetchScalarGridSpec(
            num_scalar_prefetch=0,
            grid=(B,),
            in_specs=[
                pl.BlockSpec((None, L, Cp), lambda b: (b, 0, 0)),    # padded bf16 image slab
                pl.BlockSpec((K * K, Cp, Cp), lambda b: (0, 0, 0)),  # conv1 weights (bf16)
                pl.BlockSpec((K * K, Cp, Cp), lambda b: (0, 0, 0)),  # conv2 weights (bf16)
            ],
            out_specs=pl.BlockSpec((None, M, Cp), lambda b: (b, 0, 0)),
            scratch_shapes=[pltpu.VMEM((S, Cp), jnp.bfloat16)],      # padded frame for conv #2
        ),
        compiler_params=pltpu.CompilerParams(
            dimension_semantics=("parallel",),   # batch across TCs on v7x megacore
            vmem_limit_bytes=vmem_limit,
        ),
    )(xf, w1p, w2p)

    # Drop padded columns / channels; back to NCHW once at the boundary.
    out = out_flat.reshape(B, H, Wp, Cp)[:, :, :W, :C]
    return jnp.transpose(out, (0, 3, 1, 2)).astype(x.dtype)


def _reference(x, w1, b1, w2, b2, eps=1e-5):
    """Pure-JAX ResBlock reference (conv+bias -> InstanceNorm -> ReLU, conv+bias -> IN, +x)."""
    def conv_block(h, w, b, relu):
        y = jax.lax.conv_general_dilated(
            h, w, window_strides=(1, 1), padding=((1, 1), (1, 1)),
            dimension_numbers=("NCHW", "OIHW", "NCHW"))
        y = y + b.reshape(1, -1, 1, 1)
        mean = y.mean(axis=(2, 3), keepdims=True)
        var = y.var(axis=(2, 3), keepdims=True)        # biased, like nn.InstanceNorm2d
        y = (y - mean) / jnp.sqrt(var + eps)
        return jnp.maximum(y, 0.0) if relu else y

    y = conv_block(x.astype(jnp.float32), w1.astype(jnp.float32), b1.astype(jnp.float32), True)
    y = conv_block(y, w2.astype(jnp.float32), b2.astype(jnp.float32), False)
    return y + x


if __name__ == "__main__":
    # ResBlock(dim=4, norm='in', activation='relu', pad_type='zero')
    B, C, H, W = 2, 4, 16, 16
    K = 3

    key = jax.random.PRNGKey(0)
    kx, kw1, kb1, kw2, kb2 = jax.random.split(key, 5)
    x = jax.random.normal(kx, (B, C, H, W), dtype=jnp.float32)
    bound = 1.0 / (C * K * K) ** 0.5                    # Conv2d-style uniform bound
    w1 = jax.random.uniform(kw1, (C, C, K, K), minval=-bound, maxval=bound, dtype=jnp.float32)
    b1 = jax.random.uniform(kb1, (C,), minval=-bound, maxval=bound, dtype=jnp.float32)
    w2 = jax.random.uniform(kw2, (C, C, K, K), minval=-bound, maxval=bound, dtype=jnp.float32)
    b2 = jax.random.uniform(kb2, (C,), minval=-bound, maxval=bound, dtype=jnp.float32)

    out = jax.block_until_ready(resblock_forward(x, w1, b1, w2, b2))
    ref = _reference(x, w1, b1, w2, b2)

    assert out.shape == (B, C, H, W), out.shape
    max_err = float(jnp.max(jnp.abs(out - ref)))
    # bf16 slab / bf16 MXU operands / bf16 output with f32 accumulation -> loosened tolerance.
    assert jnp.allclose(out, ref, atol=8e-2, rtol=5e-2), max_err

    print("KERNEL_OK")
</pallas_src>

<mosaic_0001>
module attributes {stable_mosaic.version = 11 : i64} {
  func.func @kernel(%arg0: i32, %arg1: memref<1x448x128xbf16, #tpu.memory_space<vmem>>, %arg2: memref<9x128x128xbf16, #tpu.memory_space<vmem>>, %arg3: memref<9x128x128xbf16, #tpu.memory_space<vmem>>, %arg4: memref<1x384x128xbf16, #tpu.memory_space<vmem>>, %arg5: memref<448x128xbf16, #tpu.memory_space<vmem>>) attributes {dimension_semantics = [#tpu.dimension_semantics<parallel>], iteration_bounds = array<i64: 2>, scalar_prefetch = 0 : i64, scratch_operands = 1 : i64, tpu.core_type = #tpu.core_type<tc>, window_params = [{transform_indices = @transform_0, window_bounds = array<i64: 1, 448, 128>}, {pipeline_mode = #tpu.pipeline_mode<synchronous>, transform_indices = @transform_1, window_bounds = array<i64: 9, 128, 128>}, {pipeline_mode = #tpu.pipeline_mode<synchronous>, transform_indices = @transform_2, window_bounds = array<i64: 9, 128, 128>}, {transform_indices = @transform_3, window_bounds = array<i64: 1, 384, 128>}]} {
    %0 = tpu.iota {dimensions = array<i32: 0>} : vector<384x1xi32>
    %c24_i32 = arith.constant 24 : i32
    %c0_i32 = arith.constant 0 : i32
    %1 = arith.cmpi eq, %c24_i32, %c0_i32 : i32
    %c1_i32 = arith.constant 1 : i32
    %2 = arith.select %1, %c1_i32, %c24_i32 : i32
    %3 = vector.broadcast %2 : i32 to vector<384x1xi32>
    %4 = arith.remsi %0, %3 : vector<384x1xi32>
    %c0_i32_0 = arith.constant 0 : i32
    %5 = vector.broadcast %c0_i32_0 : i32 to vector<384x1xi32>
    %6 = arith.cmpi ne, %4, %5 : vector<384x1xi32>
    %c0_i32_1 = arith.constant 0 : i32
    %7 = vector.broadcast %c0_i32_1 : i32 to vector<384x1xi32>
    %8 = arith.cmpi slt, %4, %7 : vector<384x1xi32>
    %c0_i32_2 = arith.constant 0 : i32
    %9 = arith.cmpi slt, %2, %c0_i32_2 : i32
    %10 = vector.broadcast %9 : i1 to vector<384x1xi1>
    %11 = vector.broadcast %10 : vector<384x1xi1> to vector<384x1xi1>
    %12 = arith.xori %8, %11 : vector<384x1xi1>
    %13 = arith.andi %12, %6 : vector<384x1xi1>
    %14 = vector.broadcast %2 : i32 to vector<384x1xi32>
    %15 = arith.addi %4, %14 : vector<384x1xi32>
    %16 = arith.select %13, %15, %4 : vector<384x1xi1>, vector<384x1xi32>
    %c16_i32 = arith.constant 16 : i32
    %17 = vector.broadcast %c16_i32 : i32 to vector<384x1xi32>
    %18 = arith.cmpi slt, %16, %17 : vector<384x1xi32>
    %19 = arith.extui %18 : vector<384x1xi1> to vector<384x1xi32>
    %20 = arith.sitofp %19 : vector<384x1xi32> to vector<384x1xf32>
    %cst = arith.constant 0.000000e+00 : f32
    %21 = vector.broadcast %cst : f32 to vector<384x128xf32>
    %cst_3 = arith.constant 0.000000e+00 : f32
    %22 = vector.broadcast %cst_3 : f32 to vector<384x128xf32>
    %c0 = arith.constant 0 : index
    %c0_4 = arith.constant 0 : index
    %c0_5 = arith.constant 0 : index
    %23 = vector.load %arg1[%c0, %c0_4, %c0_5] : memref<1x448x128xbf16, #tpu.memory_space<vmem>>, vector<1x384x128xbf16>
    %24 = vector.shape_cast %23 : vector<1x384x128xbf16> to vector<384x128xbf16>
    %c0_6 = arith.constant 0 : index
    %c0_7 = arith.constant 0 : index
    %c0_8 = arith.constant 0 : index
    %25 = vector.load %arg2[%c0_6, %c0_7, %c0_8] : memref<9x128x128xbf16, #tpu.memory_space<vmem>>, vector<1x128x128xbf16>
    %26 = vector.shape_cast %25 : vector<1x128x128xbf16> to vector<128x128xbf16>
    %cst_9 = arith.constant dense<0.000000e+00> : vector<384x128xf32>
    %27 = tpu.matmul %24, %26, %cst_9 {dimension_numbers = #tpu.dot_dimension_numbers<[1], [0], [0], [1], [0, 0, 1, 1], [], []>} : vector<384x128xbf16>, vector<128x128xbf16>, vector<384x128xf32> -> vector<384x128xf32>
    %28 = arith.addf %21, %27 : vector<384x128xf32>
    %c0_10 = arith.constant 0 : index
    %c1 = arith.constant 1 : index
    %c0_11 = arith.constant 0 : index
    %29 = vector.load %arg1[%c0_10, %c1, %c0_11] : memref<1x448x128xbf16, #tpu.memory_space<vmem>>, vector<1x384x128xbf16>
    %30 = vector.shape_cast %29 : vector<1x384x128xbf16> to vector<384x128xbf16>
    %c1_12 = arith.constant 1 : index
    %c0_13 = arith.constant 0 : index
    %c0_14 = arith.constant 0 : index
    %31 = vector.load %arg2[%c1_12, %c0_13, %c0_14] : memref<9x128x128xbf16, #tpu.memory_space<vmem>>, vector<1x128x128xbf16>
    %32 = vector.shape_cast %31 : vector<1x128x128xbf16> to vector<128x128xbf16>
    %cst_15 = arith.constant dense<0.000000e+00> : vector<384x128xf32>
    %33 = tpu.matmul %30, %32, %cst_15 {dimension_numbers = #tpu.dot_dimension_numbers<[1], [0], [0], [1], [0, 0, 1, 1], [], []>} : vector<384x128xbf16>, vector<128x128xbf16>, vector<384x128xf32> -> vector<384x128xf32>
    %34 = arith.addf %22, %33 : vector<384x128xf32>
    %c0_16 = arith.constant 0 : index
    %c2 = arith.constant 2 : index
    %c0_17 = arith.constant 0 : index
    %35 = vector.load %arg1[%c0_16, %c2, %c0_17] : memref<1x448x128xbf16, #tpu.memory_space<vmem>>, vector<1x384x128xbf16>
    %36 = vector.shape_cast %35 : vector<1x384x128xbf16> to vector<384x128xbf16>
    %c2_18 = arith.constant 2 : index
    %c0_19 = arith.constant 0 : index
    %c0_20 = arith.constant 0 : index
    %37 = vector.load %arg2[%c2_18, %c0_19, %c0_20] : memref<9x128x128xbf16, #tpu.memory_space<vmem>>, vector<1x128x128xbf16>
    %38 = vector.shape_cast %37 : vector<1x128x128xbf16> to vector<128x128xbf16>
    %cst_21 = arith.constant dense<0.000000e+00> : vector<384x128xf32>
    %39 = tpu.matmul %36, %38, %cst_21 {dimension_numbers = #tpu.dot_dimension_numbers<[1], [0], [0], [1], [0, 0, 1, 1], [], []>} : vector<384x128xbf16>, vector<128x128xbf16>, vector<384x128xf32> -> vector<384x128xf32>
    %40 = arith.addf %28, %39 : vector<384x128xf32>
    %c0_22 = arith.constant 0 : index
    %c24 = arith.constant 24 : index
    %c0_23 = arith.constant 0 : index
    %41 = vector.load %arg1[%c0_22, %c24, %c0_23] : memref<1x448x128xbf16, #tpu.memory_space<vmem>>, vector<1x384x128xbf16>
    %42 = vector.shape_cast %41 : vector<1x384x128xbf16> to vector<384x128xbf16>
    %c3 = arith.constant 3 : index
    %c0_24 = arith.constant 0 : index
    %c0_25 = arith.constant 0 : index
    %43 = vector.load %arg2[%c3, %c0_24, %c0_25] : memref<9x128x128xbf16, #tpu.memory_space<vmem>>, vector<1x128x128xbf16>
    %44 = vector.shape_cast %43 : vector<1x128x128xbf16> to vector<128x128xbf16>
    %cst_26 = arith.constant dense<0.000000e+00> : vector<384x128xf32>
    %45 = tpu.matmul %42, %44, %cst_26 {dimension_numbers = #tpu.dot_dimension_numbers<[1], [0], [0], [1], [0, 0, 1, 1], [], []>} : vector<384x128xbf16>, vector<128x128xbf16>, vector<384x128xf32> -> vector<384x128xf32>
    %46 = arith.addf %34, %45 : vector<384x128xf32>
    %c0_27 = arith.constant 0 : index
    %c25 = arith.constant 25 : index
    %c0_28 = arith.constant 0 : index
    %47 = vector.load %arg1[%c0_27, %c25, %c0_28] : memref<1x448x128xbf16, #tpu.memory_space<vmem>>, vector<1x384x128xbf16>
    %48 = vector.shape_cast %47 : vector<1x384x128xbf16> to vector<384x128xbf16>
    %c4 = arith.constant 4 : index
    %c0_29 = arith.constant 0 : index
    %c0_30 = arith.constant 0 : index
    %49 = vector.load %arg2[%c4, %c0_29, %c0_30] : memref<9x128x128xbf16, #tpu.memory_space<vmem>>, vector<1x128x128xbf16>
    %50 = vector.shape_cast %49 : vector<1x128x128xbf16> to vector<128x128xbf16>
    %cst_31 = arith.constant dense<0.000000e+00> : vector<384x128xf32>
    %51 = tpu.matmul %48, %50, %cst_31 {dimension_numbers = #tpu.dot_dimension_numbers<[1], [0], [0], [1], [0, 0, 1, 1], [], []>} : vector<384x128xbf16>, vector<128x128xbf16>, vector<384x128xf32> -> vector<384x128xf32>
    %52 = arith.addf %40, %51 : vector<384x128xf32>
    %c0_32 = arith.constant 0 : index
    %c26 = arith.constant 26 : index
    %c0_33 = arith.constant 0 : index
    %53 = vector.load %arg1[%c0_32, %c26, %c0_33] : memref<1x448x128xbf16, #tpu.memory_space<vmem>>, vector<1x384x128xbf16>
    %54 = vector.shape_cast %53 : vector<1x384x128xbf16> to vector<384x128xbf16>
    %c5 = arith.constant 5 : index
    %c0_34 = arith.constant 0 : index
    %c0_35 = arith.constant 0 : index
    %55 = vector.load %arg2[%c5, %c0_34, %c0_35] : memref<9x128x128xbf16, #tpu.memory_space<vmem>>, vector<1x128x128xbf16>
    %56 = vector.shape_cast %55 : vector<1x128x128xbf16> to vector<128x128xbf16>
    %cst_36 = arith.constant dense<0.000000e+00> : vector<384x128xf32>
    %57 = tpu.matmul %54, %56, %cst_36 {dimension_numbers = #tpu.dot_dimension_numbers<[1], [0], [0], [1], [0, 0, 1, 1], [], []>} : vector<384x128xbf16>, vector<128x128xbf16>, vector<384x128xf32> -> vector<384x128xf32>
    %58 = arith.addf %46, %57 : vector<384x128xf32>
    %c0_37 = arith.constant 0 : index
    %c48 = arith.constant 48 : index
    %c0_38 = arith.constant 0 : index
    %59 = vector.load %arg1[%c0_37, %c48, %c0_38] : memref<1x448x128xbf16, #tpu.memory_space<vmem>>, vector<1x384x128xbf16>
    %60 = vector.shape_cast %59 : vector<1x384x128xbf16> to vector<384x128xbf16>
    %c6 = arith.constant 6 : index
    %c0_39 = arith.constant 0 : index
    %c0_40 = arith.constant 0 : index
    %61 = vector.load %arg2[%c6, %c0_39, %c0_40] : memref<9x128x128xbf16, #tpu.memory_space<vmem>>, vector<1x128x128xbf16>
    %62 = vector.shape_cast %61 : vector<1x128x128xbf16> to vector<128x128xbf16>
    %cst_41 = arith.constant dense<0.000000e+00> : vector<384x128xf32>
    %63 = tpu.matmul %60, %62, %cst_41 {dimension_numbers = #tpu.dot_dimension_numbers<[1], [0], [0], [1], [0, 0, 1, 1], [], []>} : vector<384x128xbf16>, vector<128x128xbf16>, vector<384x128xf32> -> vector<384x128xf32>
    %64 = arith.addf %52, %63 : vector<384x128xf32>
    %c0_42 = arith.constant 0 : index
    %c49 = arith.constant 49 : index
    %c0_43 = arith.constant 0 : index
    %65 = vector.load %arg1[%c0_42, %c49, %c0_43] : memref<1x448x128xbf16, #tpu.memory_space<vmem>>, vector<1x384x128xbf16>
    %66 = vector.shape_cast %65 : vector<1x384x128xbf16> to vector<384x128xbf16>
    %c7 = arith.constant 7 : index
    %c0_44 = arith.constant 0 : index
    %c0_45 = arith.constant 0 : index
    %67 = vector.load %arg2[%c7, %c0_44, %c0_45] : memref<9x128x128xbf16, #tpu.memory_space<vmem>>, vector<1x128x128xbf16>
    %68 = vector.shape_cast %67 : vector<1x128x128xbf16> to vector<128x128xbf16>
    %cst_46 = arith.constant dense<0.000000e+00> : vector<384x128xf32>
    %69 = tpu.matmul %66, %68, %cst_46 {dimension_numbers = #tpu.dot_dimension_numbers<[1], [0], [0], [1], [0, 0, 1, 1], [], []>} : vector<384x128xbf16>, vector<128x128xbf16>, vector<384x128xf32> -> vector<384x128xf32>
    %70 = arith.addf %58, %69 : vector<384x128xf32>
    %c0_47 = arith.constant 0 : index
    %c50 = arith.constant 50 : index
    %c0_48 = arith.constant 0 : index
    %71 = vector.load %arg1[%c0_47, %c50, %c0_48] : memref<1x448x128xbf16, #tpu.memory_space<vmem>>, vector<1x384x128xbf16>
    %72 = vector.shape_cast %71 : vector<1x384x128xbf16> to vector<384x128xbf16>
    %c8 = arith.constant 8 : index
    %c0_49 = arith.constant 0 : index
    %c0_50 = arith.constant 0 : index
    %73 = vector.load %arg2[%c8, %c0_49, %c0_50] : memref<9x128x128xbf16, #tpu.memory_space<vmem>>, vector<1x128x128xbf16>
    %74 = vector.shape_cast %73 : vector<1x128x128xbf16> to vector<128x128xbf16>
    %cst_51 = arith.constant dense<0.000000e+00> : vector<384x128xf32>
    %75 = tpu.matmul %72, %74, %cst_51 {dimension_numbers = #tpu.dot_dimension_numbers<[1], [0], [0], [1], [0, 0, 1, 1], [], []>} : vector<384x128xbf16>, vector<128x128xbf16>, vector<384x128xf32> -> vector<384x128xf32>
    %76 = arith.addf %64, %75 : vector<384x128xf32>
    %77 = arith.addf %76, %70 : vector<384x128xf32>
    %78 = vector.broadcast %20 : vector<384x1xf32> to vector<384x128xf32>
    %79 = arith.mulf %77, %78 : vector<384x128xf32>
    %cst_52 = arith.constant dense<0.000000e+00> : vector<128xf32>
    %80 = vector.multi_reduction <add>, %79, %cst_52 [0] : vector<384x128xf32> to vector<128xf32>
    %81 = vector.shape_cast %80 : vector<128xf32> to vector<1x128xf32>
    %cst_53 = arith.constant 3.906250e-03 : f32
    %82 = vector.broadcast %cst_53 : f32 to vector<1x128xf32>
    %83 = arith.mulf %81, %82 : vector<1x128xf32>
    %84 = arith.mulf %79, %79 : vector<384x128xf32>
    %cst_54 = arith.constant dense<0.000000e+00> : vector<128xf32>
    %85 = vector.multi_reduction <add>, %84, %cst_54 [0] : vector<384x128xf32> to vector<128xf32>
    %86 = vector.shape_cast %85 : vector<128xf32> to vector<1x128xf32>
    %cst_55 = arith.constant 3.906250e-03 : f32
    %87 = vector.broadcast %cst_55 : f32 to vector<1x128xf32>
    %88 = arith.mulf %86, %87 : vector<1x128xf32>
    %89 = arith.mulf %83, %83 : vector<1x128xf32>
    %90 = arith.subf %88, %89 : vector<1x128xf32>
    %91 = vector.broadcast %83 : vector<1x128xf32> to vector<384x128xf32>
    %92 = arith.subf %77, %91 : vector<384x128xf32>
    %cst_56 = arith.constant 9.99999974E-6 : f32
    %93 = vector.broadcast %cst_56 : f32 to vector<1x128xf32>
    %94 = arith.addf %90, %93 : vector<1x128xf32>
    %95 = math.rsqrt %94 : vector<1x128xf32>
    %96 = vector.broadcast %95 : vector<1x128xf32> to vector<384x128xf32>
    %97 = arith.mulf %92, %96 : vector<384x128xf32>
    %cst_57 = arith.constant 0.000000e+00 : f32
    %98 = vector.broadcast %cst_57 : f32 to vector<384x128xf32>
    %99 = arith.maximumf %97, %98 : vector<384x128xf32>
    %100 = vector.broadcast %20 : vector<384x1xf32> to vector<384x128xf32>
    %101 = arith.mulf %99, %100 : vector<384x128xf32>
    %cst_58 = arith.constant 0.000000e+00 : bf16
    %102 = vector.broadcast %cst_58 : bf16 to vector<32x128xbf16>
    %c0_59 = arith.constant 0 : index
    %c0_60 = arith.constant 0 : index
    %103 = vector.load %arg5[%c0_59, %c0_60] : memref<448x128xbf16, #tpu.memory_space<vmem>>, vector<32x128xbf16>
    tpu.vector_store %arg5[%c0_59, %c0_60], %102 {strides = array<i32>} : memref<448x128xbf16, #tpu.memory_space<vmem>>, vector<32x128xbf16>,
    %cst_61 = arith.constant 0.000000e+00 : bf16
    %104 = vector.broadcast %cst_61 : bf16 to vector<32x128xbf16>
    %c416 = arith.constant 416 : index
    %c0_62 = arith.constant 0 : index
    %105 = vector.load %arg5[%c416, %c0_62] : memref<448x128xbf16, #tpu.memory_space<vmem>>, vector<32x128xbf16>
    tpu.vector_store %arg5[%c416, %c0_62], %104 {strides = array<i32>} : memref<448x128xbf16, #tpu.memory_space<vmem>>, vector<32x128xbf16>,
    %106 = arith.truncf %101 : vector<384x128xf32> to vector<384x128xbf16>
    %c32 = arith.constant 32 : index
    %c0_63 = arith.constant 0 : index
    %107 = vector.load %arg5[%c32, %c0_63] : memref<448x128xbf16, #tpu.memory_space<vmem>>, vector<384x128xbf16>
    tpu.vector_store %arg5[%c32, %c0_63], %106 {strides = array<i32>} : memref<448x128xbf16, #tpu.memory_space<vmem>>, vector<384x128xbf16>,
    %cst_64 = arith.constant 0.000000e+00 : f32
    %108 = vector.broadcast %cst_64 : f32 to vector<384x128xf32>
    %cst_65 = arith.constant 0.000000e+00 : f32
    %109 = vector.broadcast %cst_65 : f32 to vector<384x128xf32>
    %c7_66 = arith.constant 7 : index
    %c0_67 = arith.constant 0 : index
    %110 = vector.load %arg5[%c7_66, %c0_67] : memref<448x128xbf16, #tpu.memory_space<vmem>>, vector<384x128xbf16>
    %c0_68 = arith.constant 0 : index
    %c0_69 = arith.constant 0 : index
    %c0_70 = arith.constant 0 : index
    %111 = vector.load %arg3[%c0_68, %c0_69, %c0_70] : memref<9x128x128xbf16, #tpu.memory_space<vmem>>, vector<1x128x128xbf16>
    %112 = vector.shape_cast %111 : vector<1x128x128xbf16> to vector<128x128xbf16>
    %cst_71 = arith.constant dense<0.000000e+00> : vector<384x128xf32>
    %113 = tpu.matmul %110, %112, %cst_71 {dimension_numbers = #tpu.dot_dimension_numbers<[1], [0], [0], [1], [0, 0, 1, 1], [], []>} : vector<384x128xbf16>, vector<128x128xbf16>, vector<384x128xf32> -> vector<384x128xf32>
    %114 = arith.addf %108, %113 : vector<384x128xf32>
    %c8_72 = arith.constant 8 : index
    %c0_73 = arith.constant 0 : index
    %115 = vector.load %arg5[%c8_72, %c0_73] : memref<448x128xbf16, #tpu.memory_space<vmem>>, vector<384x128xbf16>
    %c1_74 = arith.constant 1 : index
    %c0_75 = arith.constant 0 : index
    %c0_76 = arith.constant 0 : index
    %116 = vector.load %arg3[%c1_74, %c0_75, %c0_76] : memref<9x128x128xbf16, #tpu.memory_space<vmem>>, vector<1x128x128xbf16>
    %117 = vector.shape_cast %116 : vector<1x128x128xbf16> to vector<128x128xbf16>
    %cst_77 = arith.constant dense<0.000000e+00> : vector<384x128xf32>
    %118 = tpu.matmul %115, %117, %cst_77 {dimension_numbers = #tpu.dot_dimension_numbers<[1], [0], [0], [1], [0, 0, 1, 1], [], []>} : vector<384x128xbf16>, vector<128x128xbf16>, vector<384x128xf32> -> vector<384x128xf32>
    %119 = arith.addf %109, %118 : vector<384x128xf32>
    %c9 = arith.constant 9 : index
    %c0_78 = arith.constant 0 : index
    %120 = vector.load %arg5[%c9, %c0_78] : memref<448x128xbf16, #tpu.memory_space<vmem>>, vector<384x128xbf16>
    %c2_79 = arith.constant 2 : index
    %c0_80 = arith.constant 0 : index
    %c0_81 = arith.constant 0 : index
    %121 = vector.load %arg3[%c2_79, %c0_80, %c0_81] : memref<9x128x128xbf16, #tpu.memory_space<vmem>>, vector<1x128x128xbf16>
    %122 = vector.shape_cast %121 : vector<1x128x128xbf16> to vector<128x128xbf16>
    %cst_82 = arith.constant dense<0.000000e+00> : vector<384x128xf32>
    %123 = tpu.matmul %120, %122, %cst_82 {dimension_numbers = #tpu.dot_dimension_numbers<[1], [0], [0], [1], [0, 0, 1, 1], [], []>} : vector<384x128xbf16>, vector<128x128xbf16>, vector<384x128xf32> -> vector<384x128xf32>
    %124 = arith.addf %114, %123 : vector<384x128xf32>
    %c31 = arith.constant 31 : index
    %c0_83 = arith.constant 0 : index
    %125 = vector.load %arg5[%c31, %c0_83] : memref<448x128xbf16, #tpu.memory_space<vmem>>, vector<384x128xbf16>
    %c3_84 = arith.constant 3 : index
    %c0_85 = arith.constant 0 : index
    %c0_86 = arith.constant 0 : index
    %126 = vector.load %arg3[%c3_84, %c0_85, %c0_86] : memref<9x128x128xbf16, #tpu.memory_space<vmem>>, vector<1x128x128xbf16>
    %127 = vector.shape_cast %126 : vector<1x128x128xbf16> to vector<128x128xbf16>
    %cst_87 = arith.constant dense<0.000000e+00> : vector<384x128xf32>
    %128 = tpu.matmul %125, %127, %cst_87 {dimension_numbers = #tpu.dot_dimension_numbers<[1], [0], [0], [1], [0, 0, 1, 1], [], []>} : vector<384x128xbf16>, vector<128x128xbf16>, vector<384x128xf32> -> vector<384x128xf32>
    %129 = arith.addf %119, %128 : vector<384x128xf32>
    %c32_88 = arith.constant 32 : index
    %c0_89 = arith.constant 0 : index
    %130 = vector.load %arg5[%c32_88, %c0_89] : memref<448x128xbf16, #tpu.memory_space<vmem>>, vector<384x128xbf16>
    %c4_90 = arith.constant 4 : index
    %c0_91 = arith.constant 0 : index
    %c0_92 = arith.constant 0 : index
    %131 = vector.load %arg3[%c4_90, %c0_91, %c0_92] : memref<9x128x128xbf16, #tpu.memory_space<vmem>>, vector<1x128x128xbf16>
    %132 = vector.shape_cast %131 : vector<1x128x128xbf16> to vector<128x128xbf16>
    %cst_93 = arith.constant dense<0.000000e+00> : vector<384x128xf32>
    %133 = tpu.matmul %130, %132, %cst_93 {dimension_numbers = #tpu.dot_dimension_numbers<[1], [0], [0], [1], [0, 0, 1, 1], [], []>} : vector<384x128xbf16>, vector<128x128xbf16>, vector<384x128xf32> -> vector<384x128xf32>
    %134 = arith.addf %124, %133 : vector<384x128xf32>
    %c33 = arith.constant 33 : index
    %c0_94 = arith.constant 0 : index
    %135 = vector.load %arg5[%c33, %c0_94] : memref<448x128xbf16, #tpu.memory_space<vmem>>, vector<384x128xbf16>
    %c5_95 = arith.constant 5 : index
    %c0_96 = arith.constant 0 : index
    %c0_97 = arith.constant 0 : index
    %136 = vector.load %arg3[%c5_95, %c0_96, %c0_97] : memref<9x128x128xbf16, #tpu.memory_space<vmem>>, vector<1x128x128xbf16>
    %137 = vector.shape_cast %136 : vector<1x128x128xbf16> to vector<128x128xbf16>
    %cst_98 = arith.constant dense<0.000000e+00> : vector<384x128xf32>
    %138 = tpu.matmul %135, %137, %cst_98 {dimension_numbers = #tpu.dot_dimension_numbers<[1], [0], [0], [1], [0, 0, 1, 1], [], []>} : vector<384x128xbf16>, vector<128x128xbf16>, vector<384x128xf32> -> vector<384x128xf32>
    %139 = arith.addf %129, %138 : vector<384x128xf32>
    %c55 = arith.constant 55 : index
    %c0_99 = arith.constant 0 : index
    %140 = vector.load %arg5[%c55, %c0_99] : memref<448x128xbf16, #tpu.memory_space<vmem>>, vector<384x128xbf16>
    %c6_100 = arith.constant 6 : index
    %c0_101 = arith.constant 0 : index
    %c0_102 = arith.constant 0 : index
    %141 = vector.load %arg3[%c6_100, %c0_101, %c0_102] : memref<9x128x128xbf16, #tpu.memory_space<vmem>>, vector<1x128x128xbf16>
    %142 = vector.shape_cast %141 : vector<1x128x128xbf16> to vector<128x128xbf16>
    %cst_103 = arith.constant dense<0.000000e+00> : vector<384x128xf32>
    %143 = tpu.matmul %140, %142, %cst_103 {dimension_numbers = #tpu.dot_dimension_numbers<[1], [0], [0], [1], [0, 0, 1, 1], [], []>} : vector<384x128xbf16>, vector<128x128xbf16>, vector<384x128xf32> -> vector<384x128xf32>
    %144 = arith.addf %134, %143 : vector<384x128xf32>
    %c56 = arith.constant 56 : index
    %c0_104 = arith.constant 0 : index
    %145 = vector.load %arg5[%c56, %c0_104] : memref<448x128xbf16, #tpu.memory_space<vmem>>, vector<384x128xbf16>
    %c7_105 = arith.constant 7 : index
    %c0_106 = arith.constant 0 : index
    %c0_107 = arith.constant 0 : index
    %146 = vector.load %arg3[%c7_105, %c0_106, %c0_107] : memref<9x128x128xbf16, #tpu.memory_space<vmem>>, vector<1x128x128xbf16>
    %147 = vector.shape_cast %146 : vector<1x128x128xbf16> to vector<128x128xbf16>
    %cst_108 = arith.constant dense<0.000000e+00> : vector<384x128xf32>
    %148 = tpu.matmul %145, %147, %cst_108 {dimension_numbers = #tpu.dot_dimension_numbers<[1], [0], [0], [1], [0, 0, 1, 1], [], []>} : vector<384x128xbf16>, vector<128x128xbf16>, vector<384x128xf32> -> vector<384x128xf32>
    %149 = arith.addf %139, %148 : vector<384x128xf32>
    %c57 = arith.constant 57 : index
    %c0_109 = arith.constant 0 : index
    %150 = vector.load %arg5[%c57, %c0_109] : memref<448x128xbf16, #tpu.memory_space<vmem>>, vector<384x128xbf16>
    %c8_110 = arith.constant 8 : index
    %c0_111 = arith.constant 0 : index
    %c0_112 = arith.constant 0 : index
    %151 = vector.load %arg3[%c8_110, %c0_111, %c0_112] : memref<9x128x128xbf16, #tpu.memory_space<vmem>>, vector<1x128x128xbf16>
    %152 = vector.shape_cast %151 : vector<1x128x128xbf16> to vector<128x128xbf16>
    %cst_113 = arith.constant dense<0.000000e+00> : vector<384x128xf32>
    %153 = tpu.matmul %150, %152, %cst_113 {dimension_numbers = #tpu.dot_dimension_numbers<[1], [0], [0], [1], [0, 0, 1, 1], [], []>} : vector<384x128xbf16>, vector<128x128xbf16>, vector<384x128xf32> -> vector<384x128xf32>
    %154 = arith.addf %144, %153 : vector<384x128xf32>
    %155 = arith.addf %154, %149 : vector<384x128xf32>
    %156 = vector.broadcast %20 : vector<384x1xf32> to vector<384x128xf32>
    %157 = arith.mulf %155, %156 : vector<384x128xf32>
    %cst_114 = arith.constant dense<0.000000e+00> : vector<128xf32>
    %158 = vector.multi_reduction <add>, %157, %cst_114 [0] : vector<384x128xf32> to vector<128xf32>
    %159 = vector.shape_cast %158 : vector<128xf32> to vector<1x128xf32>
    %cst_115 = arith.constant 3.906250e-03 : f32
    %160 = vector.broadcast %cst_115 : f32 to vector<1x128xf32>
    %161 = arith.mulf %159, %160 : vector<1x128xf32>
    %162 = arith.mulf %157, %157 : vector<384x128xf32>
    %cst_116 = arith.constant dense<0.000000e+00> : vector<128xf32>
    %163 = vector.multi_reduction <add>, %162, %cst_116 [0] : vector<384x128xf32> to vector<128xf32>
    %164 = vector.shape_cast %163 : vector<128xf32> to vector<1x128xf32>
    %cst_117 = arith.constant 3.906250e-03 : f32
    %165 = vector.broadcast %cst_117 : f32 to vector<1x128xf32>
    %166 = arith.mulf %164, %165 : vector<1x128xf32>
    %167 = arith.mulf %161, %161 : vector<1x128xf32>
    %168 = arith.subf %166, %167 : vector<1x128xf32>
    %169 = vector.broadcast %161 : vector<1x128xf32> to vector<384x128xf32>
    %170 = arith.subf %155, %169 : vector<384x128xf32>
    %cst_118 = arith.constant 9.99999974E-6 : f32
    %171 = vector.broadcast %cst_118 : f32 to vector<1x128xf32>
    %172 = arith.addf %168, %171 : vector<1x128xf32>
    %173 = math.rsqrt %172 : vector<1x128xf32>
    %174 = vector.broadcast %173 : vector<1x128xf32> to vector<384x128xf32>
    %175 = arith.mulf %170, %174 : vector<384x128xf32>
    %c0_119 = arith.constant 0 : index
    %c25_120 = arith.constant 25 : index
    %c0_121 = arith.constant 0 : index
    %176 = vector.load %arg1[%c0_119, %c25_120, %c0_121] : memref<1x448x128xbf16, #tpu.memory_space<vmem>>, vector<1x384x128xbf16>
    %177 = vector.shape_cast %176 : vector<1x384x128xbf16> to vector<384x128xbf16>
    %178 = arith.extf %177 : vector<384x128xbf16> to vector<384x128xf32>
    %179 = arith.addf %175, %178 : vector<384x128xf32>
    %180 = arith.truncf %179 : vector<384x128xf32> to vector<384x128xbf16>
    %c0_122 = arith.constant 0 : index
    %c0_123 = arith.constant 0 : index
    %c0_124 = arith.constant 0 : index
    %181 = vector.load %arg4[%c0_122, %c0_123, %c0_124] : memref<1x384x128xbf16, #tpu.memory_space<vmem>>, vector<1x384x128xbf16>
    %182 = vector.shape_cast %181 : vector<1x384x128xbf16> to vector<384x128xbf16>
    %183 = vector.shape_cast %180 : vector<384x128xbf16> to vector<1x384x128xbf16>
    tpu.vector_store %arg4[%c0_122, %c0_123, %c0_124], %183 {strides = array<i32>} : memref<1x384x128xbf16, #tpu.memory_space<vmem>>, vector<1x384x128xbf16>,
    return
  }
  func.func @transform_0(%arg0: i32) -> (i32, i32, i32) {
    %c0_i32 = arith.constant 0 : i32
    %c0_i32_0 = arith.constant 0 : i32
    %c0_i32_1 = arith.constant 0 : i32
    return %arg0, %c0_i32, %c0_i32_0 : i32, i32, i32
  }
  func.func @transform_1(%arg0: i32) -> (i32, i32, i32) {
    %c0_i32 = arith.constant 0 : i32
    %c0_i32_0 = arith.constant 0 : i32
    %c0_i32_1 = arith.constant 0 : i32
    %c0_i32_2 = arith.constant 0 : i32
    return %c0_i32, %c0_i32_0, %c0_i32_1 : i32, i32, i32
  }
  func.func @transform_2(%arg0: i32) -> (i32, i32, i32) {
    %c0_i32 = arith.constant 0 : i32
    %c0_i32_0 = arith.constant 0 : i32
    %c0_i32_1 = arith.constant 0 : i32
    %c0_i32_2 = arith.constant 0 : i32
    return %c0_i32, %c0_i32_0, %c0_i32_1 : i32, i32, i32
  }
  func.func @transform_3(%arg0: i32) -> (i32, i32, i32) {
    %c0_i32 = arith.constant 0 : i32
    %c0_i32_0 = arith.constant 0 : i32
    %c0_i32_1 = arith.constant 0 : i32
    return %arg0, %c0_i32, %c0_i32_0 : i32, i32, i32
  }
}

</mosaic_0001>

<bundles_post_ra>
// kernel: tpu_custom_call.1
= control target key start
LH: loop header
LB: loop body
LE: loop exit
PB: predicated region body
PF: predicated region fallthrough
CT: control target
= control target key end

     0   :  { %8 = vsyncpa [#allocation4], 0  ;;  %s20531_s0 = inlined_call_operand.hbm [shape: bf16[2,448,128], index: 0, kind: input, shape index: {}]   ;;  %s20532_s1 = inlined_call_operand.hbm [shape: bf16[9,128,128], index: 1, kind: input, shape index: {}]   ;;  %s20533_s2 = inlined_call_operand.hbm [shape: bf16[9,128,128], index: 2, kind: input, shape index: {}]   ;;  %s20534_s3 = inlined_call_operand.hbm [shape: bf16[2,384,128], index: 3, kind: output, shape index: {}]  }
   0x1   :  { %10 = vsyncpa [#allocation4 + $0x1], 0 }
   0x2   :  { %11 = vsyncpa [#allocation7], 0 }
   0x3   :  { %12 = vsyncpa [#allocation5], 0 }
   0x4   :  { %14 = vsyncpa [#allocation5 + $0x1], 0  ;;  %s15625_s12 = smov 0   ;;  %s15627_s13 = smov 0  }
   0x5   :  { %s15629_s14 = smov 0   ;;  %s15631_s15 = smov 0  }
   0x6 LB: > { %s15646_s16 = sadd.s32 4294967295, %s15593_s15   ;;  %s11740_s17 = sadd.s32 4294967294, %s15593_s15   ;;  %s15593_s15 = sphi %s15631_s15, %s21669_s15   ;;  %s15589_s14 = sphi %s15629_s14, %s21668_s14   ;;  %s15585_s13 = sphi %s15627_s13, %s21667_s13   ;;  %s15581_s12 = sphi %s15625_s12, %s21666_s12  }
   0x7   : > { %p40_p0 = scmp.ne.s32.totalorder %s15585_s13, %s15581_s12  ;;  %p20535_p1 = scmp.eq.s32.totalorder %s15646_s16, 0 }
   0x8   : > { %p112_p3 = scmp.eq.s32.totalorder %s11740_s17, 1  ;;  %p11741_p5 = scmp.ge.s32.totalorder %s15593_s15, 1 }
   0x9   : > { %p15655_p4 = por %p20535_p1, %p40_p0  ;;  %p119_p7 = scmp.lt.s32.totalorder %s15593_s15, 3 }
   0xa   : > { %p15660_p6 = por %p112_p3, %p40_p0  ;;  %s15595_s21 = smov [#allocation6]  }
   0xb   : > { %s20753_s18 = scalar_select %p15655_p4, 1, 0 }
   0xc   : > { %s20754_s19 = scalar_select %p15660_p6, 1, 0 }
   0xd   : > { %p15665_p8 = pnand %p11741_p5, %p119_p7  ;;  %s131_s22 = sshll.u32 %s15595_s21, 4  ;;  %s15669_s22 = int_to_ptr.vmem [resolvable:$true] %s131_s22 }
   0xe   : > { %s15596_s24 = smov [#allocation8]   ;;  %s15437_s28 = scalar_lea.hbm %s20532_s1, 9216 }
   0xf   : > { %p15033_p9 = pneg %p15665_p8  ;;  %s144_s25 = sshll.u32 %s15596_s24, 4  ;;  %s15680_s25 = int_to_ptr.vmem [resolvable:$true] %s144_s25 }
  0x10   : > { %p15438_p12 = scmp.ne.s32.totalorder %s20532_s1, %s15437_s28  ;;  %p15444_p5 = scmp.lt.u32.totalorder %s15437_s28, %s20532_s1 }
  0x11   : > { %p15676_p11 = pnand %p15033_p9, %p20535_p1 }
  0x13   : > { %p15439_p13 = pneg %p15676_p11 }
  0x15   : > { %p15440_p0 = pnand %p15439_p13, %p15438_p12 }
  0x17   : > { %p15441_p3 = pneg %p15440_p0 }
  0x19   : > { %p15446_p7 = pnand %p15444_p5, %p15441_p3 }
  0x1b   : > { %15449 = shalt.err (!%p15446_p7)
}
  0x1c   : > { %s15450_s6 = scalar_lea.vmem %s15669_s22, 9216  ;;  %p15458_p2 = scmp.lt.s32.totalorder %s15669_s22, %s15669_s22 }
  0x1d   : > { %p15451_p9 = scmp.ne.s32.totalorder %s15669_s22, %s15450_s6  ;;  %p15459_p12 = scmp.lt.s32.totalorder %s15450_s6, %s15450_s6 }
  0x1f   : > { %p15453_p10 = pnand %p15451_p9, %p15439_p13  ;;  %p15460_p0 = por %p15459_p12, %p15458_p2 }
  0x21   : > { %p15454_p1 = pneg %p15453_p10 }
  0x23   : > { %p15461_p6 = pnand %p15460_p0, %p15454_p1 }
  0x25   : > { %15464 = shalt.err (!%p15461_p6)
}
  0x26   : > { %s15597_s7 = smov 64   ;;  %s15598_s8 = smov 4  }
  0x27   : > { %15036 = dma.hbm_to_vmem [thread:$0]  (!%p15676_p11), %s20532_s1, 9216, %s15669_s22, [#allocation7], %s15597_s7, %s15597_s7, %s15598_s8  }
  0x28   : > { %s15465_s21 = scalar_lea.hbm %s20533_s2, 9216 }
  0x29   : > { %p15466_p1 = scmp.ne.s32.totalorder %s20533_s2, %s15465_s21  ;;  %p15472_p10 = scmp.lt.u32.totalorder %s15465_s21, %s20533_s2 }
  0x2b   : > { %p15468_p2 = pnand %p15466_p1, %p15439_p13 }
  0x2d   : > { %p15469_p6 = pneg %p15468_p2 }
  0x2f   : > { %p15474_p3 = pnand %p15472_p10, %p15469_p6 }
  0x31   : > { %15477 = shalt.err (!%p15474_p3)
}
  0x32   : > { %s15478_s22 = scalar_lea.vmem %s15680_s25, 9216  ;;  %p15486_p12 = scmp.lt.s32.totalorder %s15680_s25, %s15680_s25 }
  0x33   : > { %p15479_p5 = scmp.ne.s32.totalorder %s15680_s25, %s15478_s22  ;;  %p15487_p0 = scmp.lt.s32.totalorder %s15478_s22, %s15478_s22 }
  0x35   : > { %p15481_p7 = pnand %p15479_p5, %p15439_p13  ;;  %p15488_p1 = por %p15487_p0, %p15486_p12 }
  0x37   : > { %p15482_p9 = pneg %p15481_p7 }
  0x39   : > { %p15489_p2 = pnand %p15488_p1, %p15482_p9 }
  0x3b   : > { %15492 = shalt.err (!%p15489_p2)
}
  0x3c   : > { %15039 = dma.hbm_to_vmem [thread:$0]  (!%p15676_p11), %s20533_s2, 9216, %s15680_s25, [#allocation7], %s15597_s7, %s15597_s7, %s15598_s8  }
  0x3d   : > { %s15741_s23 = sadd.s32 1, %s15593_s15   ;;  %s27_s4 = sadd.s32 1, %s15589_s14 }
  0x3e   : > { %s24_s5 = ssub.s32 %s15593_s15, %s15741_s23  ;;  %p34_p13 = scmp.ne.s32.totalorder %s15589_s14, %s15585_s13 }
  0x3f   : > { %p25_p6 = scmp.eq.s32.totalorder %s24_s5, 0  ;;  %p35_p10 = scmp.eq.s32.totalorder %s15593_s15, 0 }
  0x40   : > { %p20757_p3 = scmp.eq.s32.totalorder %s15646_s16, 1  ;;  %p15050_p7 = scmp.lt.s32.totalorder %s15593_s15, 2 }
  0x41   : > { %s15757_s9 = scalar_select %p25_p6, %s15589_s14, %s27_s4  }
  0x42   : > { %p15751_p5 = por %p20757_p3, %p34_p13  ;;  %p36_p9 = por %p35_p10, %p34_p13 }
  0x43   : > { %s158_s10 = sand.u32 1, %s15589_s14   ;;  %s14921_s25 = smul.u32 3584, %s15593_s15 }
  0x44   : > { %s20758_s6 = scalar_select %p15751_p5, 1, 0 }
  0x45   : > { %s14920_s11 = smul.u32 224, %s158_s10  ;;  %p15761_p11 = pnand %p15050_p7, %p36_p9 }
  0x46   : > { %s15768_s26 = scalar_lea.hbm %s20531_s0, %s14921_s25  ;;  %s15772_s22 = scalar_lea.sflag [#allocation4], %s158_s10 }
  0x47   : > { %s162_s27 = scalar_lea.vmem [#allocation3], %s14920_s11  ;;  %s15493_s29 = scalar_lea.hbm %s15768_s26, 3584 }
  0x48   : > { %s169_s28 = sshll.u32 %s162_s27, 4  ;;  %p15494_p12 = scmp.ne.s32.totalorder %s15768_s26, %s15493_s29  ;;  %s15770_s28 = int_to_ptr.vmem [resolvable:$true] %s169_s28 }
  0x49   : > { %p15495_p0 = pneg %p15761_p11  ;;  %s15498_s5 = scalar_lea.hbm %s20531_s0, 7168 }
  0x4a   : > { %p15499_p13 = scmp.lt.u32.totalorder %s15768_s26, %s20531_s0  ;;  %p15500_p6 = scmp.lt.u32.totalorder %s15498_s5, %s15493_s29 }
  0x4b   : > { %p15496_p1 = pnand %p15495_p0, %p15494_p12  ;;  %p15502_p3 = scmp.lt.u32.totalorder %s15493_s29, %s15768_s26 }
  0x4c   : > { %p15501_p10 = por %p15500_p6, %p15499_p13 }
  0x4d   : > { %p15497_p2 = pneg %p15496_p1 }
  0x4e   : > { %p15503_p7 = por %p15502_p3, %p15501_p10 }
  0x50   : > { %p15504_p9 = pnand %p15503_p7, %p15497_p2 }
  0x52   : > { %15507 = shalt.err (!%p15504_p9)
}
  0x53   : > { %s15508_s10 = scalar_lea.vmem %s15770_s28, 3584  ;;  %s15599_s11 = smov [#allocation3]  }
  0x54   : > { %p15509_p12 = scmp.ne.s32.totalorder %s15770_s28, %s15508_s10  ;;  %s15513_s24 = sshll.u32 %s15599_s11, 4  ;;  %s15514_s24 = int_to_ptr.vmem [resolvable:$false] %s15513_s24 }
  0x55   : > { %s15515_s27 = scalar_lea.vmem %s15514_s24, 7168  ;;  %p15516_p4 = scmp.lt.s32.totalorder %s15770_s28, %s15514_s24 }
  0x56   : > { %p15511_p1 = pnand %p15509_p12, %p15495_p0  ;;  %p15517_p13 = scmp.lt.s32.totalorder %s15515_s27, %s15508_s10 }
  0x58   : > { %p15512_p5 = pneg %p15511_p1  ;;  %p15518_p6 = por %p15517_p13, %p15516_p4 }
  0x5a   : > { %p15519_p10 = pnand %p15518_p6, %p15512_p5 }
  0x5c   : > { %15522 = shalt.err (!%p15519_p10)
}
  0x5d   : > { %15043 = dma.hbm_to_vmem [thread:$0]  (!%p15761_p11), %s15768_s26, 3584, %s15770_s28, %s15772_s22, %s15597_s7, %s15597_s7, %s15598_s8  }
  0x5e   : > { %181 = sbr.rel (%p15665_p8) target bundleno = 2475 (0x9ab), region = 32 }
  0x65   : > { %s15806_s29 = sand.u32 1, %s15585_s13   ;;  %p20760_p4 = scmp.ne.s32.totalorder %s20753_s18, 0 }
  0x66   : > { %s14922_s30 = smul.u32 224, %s15806_s29  ;;  %s184_s4 = scalar_lea.sflag [#allocation4], %s15806_s29 }
  0x68   : > { %s15810_s5 = scalar_lea.vmem [#allocation3], %s14922_s30 }
  0x69   : > { %15568 = dma.done.wait (%p20760_p4), %s184_s4, 3584  }
  0x6a   : > { %15570 = vsyncadd (%p20760_p4), %s184_s4, 4294963712  ;;  %p20761_p5 = scmp.eq.s32.totalorder %s15646_s16, 0 }
  0x6c   : > { %15572 = dma.done.wait (%p20761_p5), [#allocation7], 18432   ;;  %p20762_p8 = pmov %p20761_p5 }
  0x6d   : > { %v15094_v0 = vld [vmem:[#allocation6 + $0x80] sm:$0xff]   ;;  %v15095_v1 = vld [vmem:[#allocation6 + $0x88] sm:$0xff]   ;;  %v15096_v2 = vld [vmem:[#allocation6 + $0x90] sm:$0xff]   ;;  %vm1403_vm0 = vcmask 1046528   ;;  %vm2532_vm1 = vsmask.f32 7424 }
  0x6e   : > { %15574 = vsyncadd (%p20762_p8), [#allocation7], 4294948864  ;;  %13000 = vmatprep.subr.bf16.mxu0 %v15094_v0  ;;  %v15097_v3 = vld [vmem:[#allocation6 + $0x98] sm:$0xff]   ;;  %v15821_v4 = vld [vmem:[%s15810_s5 + $0x4] sm:$0xf]  ;;  %s14923_s18 = smul.u32 192, %s15806_s29 }
  0x6f   : > { %13001 = vmatpush3.bf16.msra.mxu0 %v15094_v0  ;;  %v1262_v5 = vld [vmem:[%s15810_s5] sm:$0xe]  ;;  %v15825_v6 = vld [vmem:[%s15810_s5 + $0x8] sm:$0xff]   ;;  %v15100_v13 = vld [vmem:[#allocation6 + $0xb0] sm:$0xff]   ;;  %s15020_s7 = smul.u32 3072, %s15646_s16  ;;  %s11635_s16 = scalar_lea.sflag [#allocation5], %s15806_s29 }
  0x70   : > { %13002 = vmatprep.subr.bf16.mxu0 %v15095_v1  ;;  %v11797_v7 = vcombine.low %v1262_v5, %v15821_v4  ;;  %v1405_v8 = vrot.slane %v15825_v6, 1  ;;  %v15098_v9 = vld [vmem:[#allocation6 + $0xa0] sm:$0xff]   ;;  %v15099_v12 = vld [vmem:[#allocation6 + $0xa8] sm:$0xff]   ;;  %v15101_v14 = vld [vmem:[#allocation6 + $0xb8] sm:$0xff]   ;;  %s20325_s20 = scalar_lea.vmem [#allocation9], %s14923_s18  ;;  %p21663_p0 = scmp.ne.s32.totalorder %s20758_s6, 0 }
  0x71   : > { %v15831_v15 = vld [vmem:[%s15810_s5 + $0x10] sm:$0xff]   ;;  %v15834_v16 = vld [vmem:[%s15810_s5 + $0x18] sm:$0xff]   ;;  %v15105_v18 = vld [vmem:[#allocation6] sm:$0xff]   ;;  %s11648_s8 = sshll.u32 %s20325_s20, 4  ;;  %s20473_s28 = scalar_lea.hbm %s20534_s3, %s15020_s7  ;;  %s20479_s8 = int_to_ptr.vmem [resolvable:$true] %s11648_s8 }
  0x72   : > { %v1404_v10 = vrot.slane %v11797_v7, 1  ;;  %v1407_v17 = vrot.slane %v15831_v15, 1  ;;  %v1409_v19 = vrot.slane %v15834_v16, 1  ;;  %v15839_v20 = vld [vmem:[%s15810_s5 + $0x20] sm:$0xff]   ;;  %v15108_v22 = vld [vmem:[#allocation6 + $0x8] sm:$0xff]   ;;  %v15847_v25 = vld [vmem:[%s15810_s5 + $0x30] sm:$0xff]  }
  0x73   : > { %13003 = vmatpush3.bf16.msra.mxu0 %v15095_v1  ;;  %v15844_v24 = vld [vmem:[%s15810_s5 + $0x28] sm:$0xff]   ;;  %v1411_v26 = vrot.slane %v15839_v20, 1  ;;  %v15851_v27 = vld [vmem:[%s15810_s5 + $0x38] sm:$0xff]   ;;  %v15854_v28 = vld [vmem:[%s15810_s5 + $0x40] sm:$0xff]   ;;  %v1415_v36 = vrot.slane %v15847_v25, 1  ;;  %s15523_s22 = scalar_lea.vmem %s20479_s8, 3072 }
  0x74   : > { %13004 = vmatprep.subr.bf16.mxu0 %v15096_v2  ;;  %v1406_v11 = vsel %vm1403_vm0, %v1404_v10, %v1405_v8  ;;  %v1408_v21 = vsel %vm1403_vm0, %v1405_v8, %v1407_v17  ;;  %v1410_v23 = vsel %vm1403_vm0, %v1407_v17, %v1409_v19  ;;  %v1413_v29 = vrot.slane %v15844_v24, 1  ;;  %v15113_v30 = vld [vmem:[#allocation6 + $0x10] sm:$0xff]   ;;  %v15858_v31 = vld [vmem:[%s15810_s5 + $0x48] sm:$0xff]   ;;  %v15865_v34 = vld [vmem:[%s15810_s5 + $0x58] sm:$0xff]   ;;  %p15524_p11 = scmp.ne.s32.totalorder %s20479_s8, %s15523_s22  ;;  %s15602_s25 = smov [#allocation9]  }
  0x75   : > { %13016 = vmatprep.mubr.bf16.mxu0 %v1406_v11  ;;  %v15861_v32 = vld [vmem:[%s15810_s5 + $0x50] sm:$0xff]   ;;  %v1412_v33 = vsel %vm1403_vm0, %v1409_v19, %v1411_v26  ;;  %v15116_v37 = vld [vmem:[#allocation6 + $0x18] sm:$0xff]   ;;  %v1417_v38 = vrot.slane %v15851_v27, 1  ;;  %v1419_v39 = vrot.slane %v15854_v28, 1  ;;  %v1421_v40 = vrot.slane %v15858_v31, 1  ;;  %v15121_v43 = vld [vmem:[#allocation6 + $0x20] sm:$0xff]  }
  0x76   : > { %v1414_v35 = vsel %vm1403_vm0, %v1411_v26, %v1413_v29  ;;  %v1423_v41 = vrot.slane %v15861_v32, 1  ;;  %v1425_v42 = vrot.slane %v15865_v34, 1  ;;  %v15875_v44 = vld [vmem:[%s15810_s5 + $0x60] sm:$0xff]   ;;  %v15124_v45 = vld [vmem:[#allocation6 + $0x28] sm:$0xff]   ;;  %v1416_v46 = vsel %vm1403_vm0, %v1413_v29, %v1415_v36  ;;  %v15129_v49 = vld [vmem:[#allocation6 + $0x30] sm:$0xff]   ;;  %p15525_p2 = pnand %p15524_p11, %p21663_p0  ;;  %s15527_s21 = sshll.u32 %s15602_s25, 4  ;;  %s15528_s21 = int_to_ptr.vmem [resolvable:$false] %s15527_s21 }
  0x77   : > { %13005 = vmatpush3.bf16.msra.mxu0 %v15096_v2  ;;  %v1418_v47 = vsel %vm1403_vm0, %v1415_v36, %v1417_v38  ;;  %v1427_v48 = vrot.slane %v15875_v44, 1  ;;  %v15881_v50 = vld [vmem:[%s15810_s5 + $0x68] sm:$0xff]   ;;  %v15132_v51 = vld [vmem:[#allocation6 + $0x38] sm:$0xff]   ;;  %v1420_v52 = vsel %vm1403_vm0, %v1417_v38, %v1419_v39  ;;  %v1422_v53 = vsel %vm1403_vm0, %v1419_v39, %v1421_v40  ;;  %v15136_v55 = vld [vmem:[#allocation6 + $0xc0] sm:$0xff]   ;;  %s15529_s10 = scalar_lea.vmem %s15528_s21, 6144  ;;  %p15530_p7 = scmp.lt.s32.totalorder %s20479_s8, %s15528_s21 }
  0x78   : > { %13006 = vmatprep.subr.bf16.mxu0 %v15097_v3  ;;  %v1429_v54 = vrot.slane %v15881_v50, 1  ;;  %v1424_v56 = vsel %vm1403_vm0, %v1421_v40, %v1423_v41  ;;  %v1426_v57 = vsel %vm1403_vm0, %v1423_v41, %v1425_v42  ;;  %v15889_v58 = vld [vmem:[%s15810_s5 + $0x70] sm:$0xff]   ;;  %v15892_v59 = vld [vmem:[%s15810_s5 + $0x78] sm:$0xff]   ;;  %v15899_v0 = vld [vmem:[%s15810_s5 + $0x80] sm:$0xff]   ;;  %p15526_p3 = pneg %p15525_p2  ;;  %p15531_p9 = scmp.lt.s32.totalorder %s15529_s10, %s15523_s22 }
  0x79   : > { %v1428_v60 = vsel %vm1403_vm0, %v1425_v42, %v1427_v48  ;;  %v1431_v62 = vrot.slane %v15889_v58, 1  ;;  %v1433_v63 = vrot.slane %v15892_v59, 1  ;;  %v15902_v1 = vld [vmem:[%s15810_s5 + $0x88] sm:$0xff]   ;;  %v1435_v5 = vrot.slane %v15899_v0, 1  ;;  %v15909_v8 = vld [vmem:[%s15810_s5 + $0x90] sm:$0xff]   ;;  %v15932_v26 = vld [vmem:[%s15810_s5 + $0xb8] sm:$0xff]  }
  0x7a   : > { %v1430_v61 = vsel %vm1403_vm0, %v1427_v48, %v1429_v54  ;;  %v1437_v7 = vrot.slane %v15902_v1, 1  ;;  %v15922_v17 = vld [vmem:[%s15810_s5 + $0xa8] sm:$0xff]   ;;  %v15134_v36 = vld [vmem:[%s15810_s5 + $0xc0] ss:$0 sps:$4 sm:$0x11]   ;;  %v15151_v48 = vld [vmem:[%s15810_s5 + $0x34] sm:$0xff]   ;;  %p15532_p12 = por %p15531_p9, %p15530_p7 }
  0x7b   : > { %13007 = vmatpush3.bf16.msra.mxu0 %v15097_v3  ;;  %v1432_v2 = vsel %vm1403_vm0, %v1429_v54, %v1431_v62  ;;  %v1434_v3 = vsel %vm1403_vm0, %v1431_v62, %v1433_v63  ;;  %v1436_v10 = vsel %vm1403_vm0, %v1433_v63, %v1435_v5  ;;  %v1180_v39 = vld [vmem:[%s15810_s5] sm:$0xf]  ;;  %v1451_v40 = vrot.slane %v15134_v36, 1  ;;  %v15173_v54 = vld [vmem:[#allocation6 + $0x78] sm:$0xff]   ;;  %v15164_v62 = vld [vmem:[%s15810_s5 + $0x84] sm:$0xff]  }
  0x7c   : > { %13008 = vmatprep.subr.bf16.mxu0 %v15098_v9  ;;  %v1438_v11 = vsel %vm1403_vm0, %v1435_v5, %v1437_v7  ;;  %v15944_v42 = vcombine.low %v1180_v39, %v15821_v4  ;;  %v15140_v4 = vld [vmem:[#allocation6 + $0xe0] sm:$0xff]   ;;  %v15166_v63 = vld [vmem:[%s15810_s5 + $0x8c] sm:$0xff]   ;;  %p15533_p1 = pnand %p15532_p12, %p15526_p3 }
  0x7e   : > { %v2536_v5 = vshll.u32 %v15944_v42, 16 }
  0x7f   : > { %13009 = vmatpush3.bf16.msra.mxu0 %v15098_v9  ;;  %v15912_v9 = vld [vmem:[%s15810_s5 + $0x98] sm:$0xff]  }
  0x80   : > { %13010 = vmatprep.subr.bf16.mxu0 %v15099_v12 }
  0x83   : > { %13011 = vmatpush3.bf16.msra.mxu0 %v15099_v12  ;;  %v1439_v12 = vrot.slane %v15909_v8, 1 }
  0x84   : > { %13012 = vmatprep.subr.bf16.mxu0 %v15100_v13 }
  0x87   : > { %13013 = vmatpush3.bf16.msra.mxu0 %v15100_v13  ;;  %v1441_v13 = vrot.slane %v15912_v9, 1 }
  0x88   : > { %13014 = vmatprep.subr.bf16.mxu0 %v15101_v14 }
  0x89   : > { %v1442_v19 = vsel %vm1403_vm0, %v1439_v12, %v1441_v13 }
  0x8b   : > { %13015 = vmatpush3.bf16.msra.mxu0 %v15101_v14  ;;  %v15919_v14 = vld [vmem:[%s15810_s5 + $0xa0] sm:$0xff]  }
  0x8c   : > { %13064 = vmatprep.subr.bf16.mxu0 %v15105_v18 }
  0x8e   : > { %13017 = vmatmul.mubr.bf16.vlgmr.msra.gmra.mrb[0].mxu0 %v1408_v21  ;;  %v1443_v21 = vrot.slane %v15919_v14, 1 }
  0x8f   : > { %13065 = vmatpush3.bf16.msra.mxu0 %v15105_v18  ;;  %13020 = vmatprep.mubr.bf16.mxu0 %v1410_v23  ;;  %v1440_v18 = vsel %vm1403_vm0, %v1437_v7, %v1439_v12  ;;  %v15929_v23 = vld [vmem:[%s15810_s5 + $0xb0] sm:$0xff]  }
  0x90   : > { %13066 = vmatprep.subr.bf16.mxu0 %v15108_v22  ;;  %v1444_v29 = vsel %vm1403_vm0, %v1441_v13, %v1443_v21  ;;  %v15172_v7 = vld [vmem:[%s15810_s5 + $0xb4] sm:$0xff]  }
  0x93   : > { %13067 = vmatpush3.bf16.msra.mxu0 %v15108_v22  ;;  %v1445_v22 = vrot.slane %v15922_v17, 1 }
  0x94   : > { %13068 = vmatprep.subr.bf16.mxu0 %v15113_v30 }
  0x96   : > { %13021 = vmatmul.mubr.bf16.gmra.mrb[4].mxu0 %v1412_v33  ;;  %v1447_v33 = vrot.slane %v15929_v23, 1 }
  0x97   : > { %13024 = vmatprep.mubr.bf16.mxu0 %v1414_v35  ;;  %13069 = vmatpush3.bf16.msra.mxu0 %v15113_v30  ;;  %v1446_v30 = vsel %vm1403_vm0, %v1443_v21, %v1445_v22  ;;  %v1449_v35 = vrot.slane %v15932_v26, 1 }
  0x98   : > { %13070 = vmatprep.subr.bf16.mxu0 %v15116_v37 }
  0x99   : > { %v1450_v38 = vsel %vm1403_vm0, %v1447_v33, %v1449_v35  ;;  %v1452_v41 = vsel %vm1403_vm0, %v1449_v35, %v1451_v40 }
  0x9b   : > { %13071 = vmatpush3.bf16.msra.mxu0 %v15116_v37  ;;  %v1448_v37 = vsel %vm1403_vm0, %v1445_v22, %v1447_v33 }
  0x9c   : > { %13072 = vmatprep.subr.bf16.mxu0 %v15121_v43 }
  0x9e   : > { %13025 = vmatmul.mubr.bf16.gmra.mrb[8].mxu0 %v1416_v46  ;;  %v15139_v46 = vld [vmem:[#allocation6 + $0xd8] sm:$0xff]  }
  0x9f   : > { %13028 = vmatprep.mubr.bf16.mxu0 %v1418_v47  ;;  %13073 = vmatpush3.bf16.msra.mxu0 %v15121_v43  ;;  %v15137_v43 = vld [vmem:[#allocation6 + $0xc8] sm:$0xff]  }
  0xa0   : > { %13074 = vmatprep.subr.bf16.mxu0 %v15124_v45  ;;  %v15141_v47 = vld [vmem:[#allocation6 + $0xe8] sm:$0xff]  }
  0xa3   : > { %13075 = vmatpush3.bf16.msra.mxu0 %v15124_v45  ;;  %v15138_v45 = vld [vmem:[#allocation6 + $0xd0] sm:$0xff]  }
  0xa4   : > { %13076 = vmatprep.subr.bf16.mxu0 %v15129_v49 }
  0xa6   : > { %13029 = vmatmul.mubr.bf16.gmra.mrb[12].mxu0 %v1420_v52  ;;  %v15153_v52 = vld [vmem:[%s15810_s5 + $0x44] sm:$0xff]  }
  0xa7   : > { %13032 = vmatprep.mubr.bf16.mxu0 %v1422_v53  ;;  %13077 = vmatpush3.bf16.msra.mxu0 %v15129_v49  ;;  %v15152_v49 = vld [vmem:[%s15810_s5 + $0x3c] sm:$0xff]   ;;  %v15155_v53 = vld [vmem:[%s15810_s5 + $0x4c] sm:$0xff]  }
  0xa8   : > { %13078 = vmatprep.subr.bf16.mxu0 %v15132_v51 }
  0xab   : > { %13079 = vmatpush3.bf16.msra.mxu0 %v15132_v51  ;;  %v15170_v51 = vld [vmem:[#allocation6 + $0x70] sm:$0xff]  }
  0xac   : > { %13128 = vmatprep.subr.bf16.mxu0 %v15136_v55 }
  0xae   : > { %13033 = vmatmul.mubr.bf16.gmra.mrb[16].mxu0 %v1424_v56  ;;  %v15156_v56 = vld [vmem:[%s15810_s5 + $0x54] sm:$0xff]  }
  0xaf   : > { %13036 = vmatprep.mubr.bf16.mxu0 %v1426_v57  ;;  %v15158_v57 = vld [vmem:[%s15810_s5 + $0x5c] sm:$0xff]  }
  0xb6   : > { %13037 = vmatmul.mubr.bf16.gmra.mrb[20].mxu0 %v1428_v60  ;;  %v15161_v60 = vld [vmem:[%s15810_s5 + $0x74] sm:$0xff]  }
  0xb7   : > { %13040 = vmatprep.mubr.bf16.mxu0 %v1430_v61  ;;  %v15163_v61 = vld [vmem:[%s15810_s5 + $0x7c] sm:$0xff]  }
  0xbe   : > { %13041 = vmatmul.mubr.bf16.gmra.mrb[24].mxu0 %v1432_v2  ;;  %v15169_v2 = vld [vmem:[%s15810_s5 + $0xa4] sm:$0xff]  }
  0xbf   : > { %13044 = vmatprep.mubr.bf16.mxu0 %v1434_v3  ;;  %v15171_v3 = vld [vmem:[%s15810_s5 + $0xac] sm:$0xff]  }
  0xc6   : > { %13045 = vmatmul.mubr.bf16.gmra.mrb[28].mxu0 %v1436_v10  ;;  %v2538_v10 = vrot.slane %v2536_v5, 1 }
  0xc7   : > { %13048 = vmatprep.mubr.bf16.mxu0 %v1438_v11  ;;  %v15368_v11 = vld [vmem:[%s15810_s5 + $0x8] sm:$0xff]  }
  0xc8   : > { %v2541_v12 = vshll.u32 %v15368_v11, 16  ;;  %v2545_v21 = vshrl.u32 %v15368_v11, 16  ;;  %v15378_v11 = vld [vmem:[%s15810_s5 + $0x58] sm:$0xff]  }
  0xce   : > { %13049 = vmatmul.mubr.bf16.gmra.mrb[32].mxu0 %v1440_v18  ;;  %v15369_v18 = vld [vmem:[%s15810_s5 + $0x10] sm:$0xff]  }
  0xcf   : > { %13052 = vmatprep.mubr.bf16.mxu0 %v1442_v19  ;;  %v2549_v19 = vshll.u32 %v15369_v18, 16 }
  0xd6   : > { %13053 = vmatmul.mubr.bf16.gmra.mrb[36].mxu0 %v1444_v29 }
  0xd7   : > { %13056 = vmatprep.mubr.bf16.mxu0 %v1446_v30  ;;  %v2551_v30 = vrot.slane %v2549_v19, 1 }
  0xde   : > { %13057 = vmatmul.mubr.bf16.gmra.mrb[40].mxu0 %v1448_v37  ;;  %v15371_v37 = vld [vmem:[%s15810_s5 + $0x20] sm:$0xff]  }
  0xdf   : > { %13060 = vmatprep.mubr.bf16.mxu0 %v1450_v38  ;;  %v2565_v38 = vshll.u32 %v15371_v37, 16 }
  0xe6   : > { %13061 = vmatmul.mubr.bf16.gmra.mrb[44].mxu0 %v1452_v41 }
  0xe7   : > { %13080 = vmatprep.mubr.bf16.mxu0 %v15944_v42 }
  0xee   : > { %13081 = vmatmul.mubr.bf16.vlgmr.msra.gmra.mrb[0].mxu0 %v15825_v6  ;;  %v15142_v6 = vld [vmem:[#allocation6 + $0xf0] sm:$0xff]  }
  0xef   : > { %13129 = vmatpush3.bf16.msra.mxu0 %v15136_v55  ;;  %13084 = vmatprep.mubr.bf16.mxu0 %v15831_v15  ;;  %v15143_v15 = vld [vmem:[#allocation6 + $0xf8] sm:$0xff]   ;;  %v15979_v55 = vld [vmem:[#allocation6 + $0x100] sm:$0xff]  }
  0xf0   : > { %13130 = vmatprep.subr.bf16.mxu0 %v15137_v43 }
  0xf3   : > { %13131 = vmatpush3.bf16.msra.mxu0 %v15137_v43  ;;  %v2569_v43 = vshrl.u32 %v15371_v37, 16 }
  0xf4   : > { %13132 = vmatprep.subr.bf16.mxu0 %v15138_v45 }
  0xf6   : > { %13085 = vmatmul.mubr.bf16.gmra.mrb[4].mxu0 %v15834_v16  ;;  %v15146_v16 = vld [vmem:[#allocation6 + $0x40] sm:$0xff]  }
  0xf7   : > { %13088 = vmatprep.mubr.bf16.mxu0 %v15839_v20  ;;  %13133 = vmatpush3.bf16.msra.mxu0 %v15138_v45  ;;  %v15144_v20 = vld [vmem:[%s15810_s5 + $0xc] sm:$0xff]  }
  0xf8   : > { %13134 = vmatprep.subr.bf16.mxu0 %v15139_v46  ;;  %v15372_v45 = vld [vmem:[%s15810_s5 + $0x28] sm:$0xff]  }
  0xfb   : > { %13135 = vmatpush3.bf16.msra.mxu0 %v15139_v46  ;;  %v2573_v46 = vshll.u32 %v15372_v45, 16 }
  0xfc   : > { %13136 = vmatprep.subr.bf16.mxu0 %v15140_v4 }
  0xfe   : > { %13089 = vmatmul.mubr.bf16.gmra.mrb[8].mxu0 %v15844_v24  ;;  %v15145_v24 = vld [vmem:[%s15810_s5 + $0x14] sm:$0xff]  }
  0xff   : > { %13092 = vmatprep.mubr.bf16.mxu0 %v15847_v25  ;;  %13137 = vmatpush3.bf16.msra.mxu0 %v15140_v4  ;;  %v15147_v25 = vld [vmem:[%s15810_s5 + $0x1c] sm:$0xff]   ;;  %v2567_v4 = vrot.slane %v2565_v38, 1 }
 0x100   : > { %13138 = vmatprep.subr.bf16.mxu0 %v15141_v47 }
 0x103   : > { %13139 = vmatpush3.bf16.msra.mxu0 %v15141_v47 }
 0x104   : > { %13140 = vmatprep.subr.bf16.mxu0 %v15142_v6 }
 0x106   : > { %13093 = vmatmul.mubr.bf16.gmra.mrb[12].mxu0 %v15851_v27  ;;  %v15149_v27 = vld [vmem:[#allocation6 + $0x48] sm:$0xff]  }
 0x107   : > { %13096 = vmatprep.mubr.bf16.mxu0 %v15854_v28  ;;  %13141 = vmatpush3.bf16.msra.mxu0 %v15142_v6  ;;  %v15154_v28 = vld [vmem:[#allocation6 + $0x50] sm:$0xff]   ;;  %v2571_v6 = vor.u32 %v2569_v43, %v2567_v4 }
 0x108   : > { %13142 = vmatprep.subr.bf16.mxu0 %v15143_v15 }
 0x10b   : > { %13143 = vmatpush3.bf16.msra.mxu0 %v15143_v15  ;;  %v2575_v15 = vrot.slane %v2573_v46, 1 }
 0x10c   : > { %13192 = vmatprep.subr.bf16.mxu0 %v15146_v16 }
 0x10e   : > { %13097 = vmatmul.mubr.bf16.gmra.mrb[16].mxu0 %v15858_v31  ;;  %v15148_v31 = vld [vmem:[%s15810_s5 + $0x24] sm:$0xff]  }
 0x10f   : > { %13100 = vmatprep.mubr.bf16.mxu0 %v15861_v32  ;;  %v15150_v32 = vld [vmem:[%s15810_s5 + $0x2c] sm:$0xff]  }
 0x116   : > { %13101 = vmatmul.mubr.bf16.gmra.mrb[20].mxu0 %v15865_v34  ;;  %v15157_v34 = vld [vmem:[#allocation6 + $0x58] sm:$0xff]  }
 0x117   : > { %13104 = vmatprep.mubr.bf16.mxu0 %v15875_v44  ;;  %v15162_v44 = vld [vmem:[#allocation6 + $0x60] sm:$0xff]  }
 0x11e   : > { %13105 = vmatmul.mubr.bf16.gmra.mrb[24].mxu0 %v15881_v50  ;;  %v15165_v50 = vld [vmem:[#allocation6 + $0x68] sm:$0xff]  }
 0x11f   : > { %13108 = vmatprep.mubr.bf16.mxu0 %v15889_v58  ;;  %v15159_v58 = vld [vmem:[%s15810_s5 + $0x64] sm:$0xff]  }
 0x126   : > { %13109 = vmatmul.mubr.bf16.gmra.mrb[28].mxu0 %v15892_v59  ;;  %v15160_v59 = vld [vmem:[%s15810_s5 + $0x6c] sm:$0xff]  }
 0x127   : > { %13112 = vmatprep.mubr.bf16.mxu0 %v15899_v0  ;;  %v15167_v0 = vld [vmem:[%s15810_s5 + $0x94] sm:$0xff]  }
 0x12e   : > { %13113 = vmatmul.mubr.bf16.gmra.mrb[32].mxu0 %v15902_v1  ;;  %v15168_v1 = vld [vmem:[%s15810_s5 + $0x9c] sm:$0xff]  }
 0x12f   : > { %13116 = vmatprep.mubr.bf16.mxu0 %v15909_v8  ;;  %v15174_v8 = vld [vmem:[%s15810_s5 + $0xbc] sm:$0xff]  }
 0x136   : > { %13117 = vmatmul.mubr.bf16.gmra.mrb[36].mxu0 %v15912_v9  ;;  %v2534_v9 = vshrl.u32 %v15944_v42, 16  ;;  %v15177_v42 = vld [vmem:[#allocation6 + $0x108] sm:$0xff]  }
 0x137   : > { %13120 = vmatprep.mubr.bf16.mxu0 %v15919_v14  ;;  %v2543_v14 = vrot.slane %v2541_v12, 1  ;;  %v2621_v12 = vshll.u32 %v15378_v11, 16 }
 0x138   : > { %v2539_v13 = vor.u32 %v2538_v10, %v2534_v9 }
 0x139   : > { %v2547_v33 = vor.u32 %v2545_v21, %v2543_v14  ;;  %v2623_v19 = vrot.slane %v2621_v12, 1  ;;  %v16020_v21 = vld [vmem:[#allocation6 + $0x140] sm:$0xff]  }
 0x13a   : > { %v2544_v22 = vsel %vm2532_vm1, %v2539_v13, %v2543_v14  ;;  %v15183_v13 = vld [vmem:[#allocation6 + $0x138] sm:$0xff]  }
 0x13b   : > { %v2552_v39 = vsel %vm2532_vm1, %v2547_v33, %v2551_v30 }
 0x13e   : > { %13121 = vmatmul.mubr.bf16.gmra.mrb[40].mxu0 %v15922_v17  ;;  %v15175_v17 = vld [vmem:[%s15810_s5 + $0xc4] sm:$0xff]  }
 0x13f   : > { %13124 = vmatprep.mubr.bf16.mxu0 %v15929_v23  ;;  %v2553_v23 = vshrl.u32 %v15369_v18, 16 }
 0x141   : > { %v2555_v35 = vor.u32 %v2553_v23, %v2551_v30 }
 0x146   : > { %13125 = vmatmul.mubr.bf16.gmra.mrb[44].mxu0 %v15932_v26  ;;  %v15370_v26 = vld [vmem:[%s15810_s5 + $0x18] sm:$0xff]  }
 0x147   : > { %13144 = vmatprep.mubr.bf16.mxu0 %v15144_v20  ;;  %v2557_v29 = vshll.u32 %v15370_v26, 16  ;;  %v2561_v40 = vshrl.u32 %v15370_v26, 16  ;;  %v15373_v20 = vld [vmem:[%s15810_s5 + $0x30] sm:$0xff]  }
 0x149   : > { %v2559_v36 = vrot.slane %v2557_v29, 1  ;;  %v2625_v29 = vshrl.u32 %v15378_v11, 16 }
 0x14b   : > { %v2560_v41 = vsel %vm2532_vm1, %v2555_v35, %v2559_v36  ;;  %v2563_v47 = vor.u32 %v2561_v40, %v2559_v36  ;;  %v15380_v35 = vld [vmem:[%s15810_s5 + $0x68] sm:$0xff]   ;;  %v2627_v38 = vor.u32 %v2625_v29, %v2623_v19 }
 0x14c   : > { %v2637_v36 = vshll.u32 %v15380_v35, 16 }
 0x14e   : > { %13145 = vmatmul.mubr.bf16.vlgmr.msra.gmra.mrb[0].mxu0 %v15145_v24  ;;  %v2581_v24 = vshll.u32 %v15373_v20, 16  ;;  %v2639_v40 = vrot.slane %v2637_v36, 1 }
 0x14f   : > { %13193 = vmatpush3.bf16.msra.mxu0 %v15146_v16  ;;  %13148 = vmatprep.mubr.bf16.mxu0 %v15147_v25  ;;  %v15178_v16 = vld [vmem:[#allocation6 + $0x110] sm:$0xff]   ;;  %v2568_v25 = vsel %vm2532_vm1, %v2563_v47, %v2567_v4  ;;  %v15382_v47 = vld [vmem:[%s15810_s5 + $0x78] sm:$0xff]  }
 0x150   : > { %13194 = vmatprep.subr.bf16.mxu0 %v15149_v27 }
 0x153   : > { %13195 = vmatpush3.bf16.msra.mxu0 %v15149_v27  ;;  %v2577_v27 = vshrl.u32 %v15372_v45, 16  ;;  %v2641_v45 = vshrl.u32 %v15380_v35, 16 }
 0x154   : > { %13196 = vmatprep.subr.bf16.mxu0 %v15154_v28 }
 0x156   : > { %13149 = vmatmul.mubr.bf16.gmra.mrb[4].mxu0 %v15148_v31  ;;  %v2585_v31 = vshrl.u32 %v15373_v20, 16 }
 0x157   : > { %13152 = vmatprep.mubr.bf16.mxu0 %v15150_v32  ;;  %13197 = vmatpush3.bf16.msra.mxu0 %v15154_v28  ;;  %v2576_v28 = vsel %vm2532_vm1, %v2571_v6, %v2575_v15  ;;  %v15374_v32 = vld [vmem:[%s15810_s5 + $0x38] sm:$0xff]   ;;  %v2653_v6 = vshll.u32 %v15382_v47, 16 }
 0x158   : > { %13198 = vmatprep.subr.bf16.mxu0 %v15157_v34 }
 0x15b   : > { %13199 = vmatpush3.bf16.msra.mxu0 %v15157_v34  ;;  %v2589_v34 = vshll.u32 %v15374_v32, 16 }
 0x15c   : > { %13200 = vmatprep.subr.bf16.mxu0 %v15162_v44 }
 0x15e   : > { %13153 = vmatmul.mubr.bf16.gmra.mrb[8].mxu0 %v15151_v48  ;;  %v2583_v48 = vrot.slane %v2581_v24, 1  ;;  %v2655_v24 = vrot.slane %v2653_v6, 1 }
 0x15f   : > { %13156 = vmatprep.mubr.bf16.mxu0 %v15152_v49  ;;  %13201 = vmatpush3.bf16.msra.mxu0 %v15162_v44  ;;  %v15179_v44 = vld [vmem:[#allocation6 + $0x118] sm:$0xff]   ;;  %v2579_v49 = vor.u32 %v2577_v27, %v2575_v15 }
 0x160   : > { %13202 = vmatprep.subr.bf16.mxu0 %v15165_v50 }
 0x163   : > { %13203 = vmatpush3.bf16.msra.mxu0 %v15165_v50  ;;  %v2587_v50 = vor.u32 %v2585_v31, %v2583_v48  ;;  %v2657_v31 = vshrl.u32 %v15382_v47, 16 }
 0x164   : > { %13204 = vmatprep.subr.bf16.mxu0 %v15170_v51 }
 0x166   : > { %13157 = vmatmul.mubr.bf16.gmra.mrb[12].mxu0 %v15153_v52  ;;  %v15180_v52 = vld [vmem:[#allocation6 + $0x120] sm:$0xff]  }
 0x167   : > { %13160 = vmatprep.mubr.bf16.mxu0 %v15155_v53  ;;  %13205 = vmatpush3.bf16.msra.mxu0 %v15170_v51  ;;  %v2591_v51 = vrot.slane %v2589_v34, 1  ;;  %v15375_v53 = vld [vmem:[%s15810_s5 + $0x40] sm:$0xff]  }
 0x168   : > { %13206 = vmatprep.subr.bf16.mxu0 %v15173_v54 }
 0x16b   : > { %13207 = vmatpush3.bf16.msra.mxu0 %v15173_v54  ;;  %v2597_v54 = vshll.u32 %v15375_v53, 16 }
 0x16c   : > { %13256 = vmatprep.subr.bf16.mxu0 %v15979_v55 }
 0x16e   : > { %13161 = vmatmul.mubr.bf16.gmra.mrb[16].mxu0 %v15156_v56  ;;  %v2593_v56 = vshrl.u32 %v15374_v32, 16 }
 0x16f   : > { %13164 = vmatprep.mubr.bf16.mxu0 %v15158_v57  ;;  %v2592_v57 = vsel %vm2532_vm1, %v2587_v50, %v2591_v51  ;;  %v2659_v50 = vor.u32 %v2657_v31, %v2655_v24  ;;  %v16063_v31 = vld [vmem:[%s15810_s5 + $0x24] sm:$0xff]  }
 0x176   : > { %13165 = vmatmul.mubr.bf16.gmra.mrb[20].mxu0 %v15159_v58  ;;  %v2601_v58 = vshrl.u32 %v15375_v53, 16  ;;  %v15385_v53 = vld [vmem:[%s15810_s5 + $0x90] sm:$0xff]  }
 0x177   : > { %13168 = vmatprep.mubr.bf16.mxu0 %v15160_v59  ;;  %v15376_v59 = vld [vmem:[%s15810_s5 + $0x48] sm:$0xff]  }
 0x17e   : > { %13169 = vmatmul.mubr.bf16.gmra.mrb[24].mxu0 %v15161_v60  ;;  %v2605_v60 = vshll.u32 %v15376_v59, 16 }
 0x17f   : > { %13172 = vmatprep.mubr.bf16.mxu0 %v15163_v61  ;;  %v15181_v61 = vld [vmem:[#allocation6 + $0x128] sm:$0xff]  }
 0x186   : > { %13173 = vmatmul.mubr.bf16.gmra.mrb[28].mxu0 %v15164_v62  ;;  %v2599_v62 = vrot.slane %v2597_v54, 1  ;;  %v2677_v54 = vshll.u32 %v15385_v53, 16 }
 0x187   : > { %13176 = vmatprep.mubr.bf16.mxu0 %v15166_v63  ;;  %v2595_v63 = vor.u32 %v2593_v56, %v2591_v51 }
 0x18e   : > { %13177 = vmatmul.mubr.bf16.gmra.mrb[32].mxu0 %v15167_v0  ;;  %v2603_v0 = vor.u32 %v2601_v58, %v2599_v62  ;;  %v2681_v58 = vshrl.u32 %v15385_v53, 16 }
 0x18f   : > { %13180 = vmatprep.mubr.bf16.mxu0 %v15168_v1  ;;  %v2607_v1 = vrot.slane %v2605_v60, 1 }
 0x191   : > { %v2608_v9 = vsel %vm2532_vm1, %v2603_v0, %v2607_v1 }
 0x196   : > { %13181 = vmatmul.mubr.bf16.gmra.mrb[36].mxu0 %v15169_v2  ;;  %v15182_v2 = vld [vmem:[#allocation6 + $0x130] sm:$0xff]  }
 0x197   : > { %13184 = vmatprep.mubr.bf16.mxu0 %v15171_v3  ;;  %v15377_v3 = vld [vmem:[%s15810_s5 + $0x50] sm:$0xff]  }
 0x198   : > { %v2613_v5 = vshll.u32 %v15377_v3, 16  ;;  %v2617_v10 = vshrl.u32 %v15377_v3, 16 }
 0x19a   : > { %v2615_v14 = vrot.slane %v2613_v5, 1 }
 0x19c   : > { %v2619_v18 = vor.u32 %v2617_v10, %v2615_v14 }
 0x19e   : > { %13185 = vmatmul.mubr.bf16.gmra.mrb[40].mxu0 %v15172_v7  ;;  %v2600_v7 = vsel %vm2532_vm1, %v2595_v63, %v2599_v62  ;;  %v2624_v30 = vsel %vm2532_vm1, %v2619_v18, %v2623_v19  ;;  %v16045_v18 = vld [vmem:[%s15810_s5 + $0x10] sm:$0xf] }
 0x19f   : > { %13188 = vmatprep.mubr.bf16.mxu0 %v15174_v8  ;;  %v2609_v8 = vshrl.u32 %v15376_v59, 16  ;;  %v15386_v59 = vld [vmem:[%s15810_s5 + $0x98] sm:$0xff]   ;;  %v15389_v19 = vld [vmem:[%s15810_s5 + $0xb0] sm:$0xff]  }
 0x1a0   : > { %v2685_v60 = vshll.u32 %v15386_v59, 16  ;;  %v2689_v5 = vshrl.u32 %v15386_v59, 16  ;;  %v3243_v59 = vshrl.u32 %v16063_v31, 16 }
 0x1a2   : > { %v2687_v0 = vrot.slane %v2685_v60, 1 }
 0x1a4   : > { %v2691_v12 = vor.u32 %v2689_v5, %v2687_v0 }
 0x1a6   : > { %13189 = vmatmul.mubr.bf16.gmra.mrb[44].mxu0 %v15175_v17  ;;  %v2611_v17 = vor.u32 %v2609_v8, %v2607_v1  ;;  %v15387_v1 = vld [vmem:[%s15810_s5 + $0xa0] sm:$0xff]  }
 0x1a7   : > { %13208 = vmatprep.mubr.bf16.mxu0 %v2544_v22  ;;  %v15379_v22 = vld [vmem:[%s15810_s5 + $0x60] sm:$0xff]   ;;  %v2697_v8 = vshrl.u32 %v15387_v1, 16 }
 0x1a8   : > { %v2629_v23 = vshll.u32 %v15379_v22, 16  ;;  %v2616_v26 = vsel %vm2532_vm1, %v2611_v17, %v2615_v14  ;;  %v2633_v33 = vshrl.u32 %v15379_v22, 16  ;;  %v3026_v17 = vld [vmem:[%s15810_s5 + $0xc] sm:$0xf]  ;;  %v2709_v22 = vshll.u32 %v15389_v19, 16 }
 0x1a9   : > { %v11879_v36 = vcombine.low %v3026_v17, %v16045_v18 }
 0x1aa   : > { %v2631_v37 = vrot.slane %v2629_v23, 1 }
 0x1ab   : > { %v3216_v6 = vshrl.u32 %v11879_v36, 16 }
 0x1ac   : > { %v2632_v43 = vsel %vm2532_vm1, %v2627_v38, %v2631_v37 }
 0x1ae   : > { %13209 = vmatmul.mubr.bf16.vlgmr.msra.gmra.mrb[0].mxu0 %v2552_v39  ;;  %v2635_v39 = vor.u32 %v2633_v33, %v2631_v37  ;;  %v15390_v33 = vld [vmem:[%s15810_s5 + $0xb8] sm:$0xff]   ;;  %v2711_v37 = vrot.slane %v2709_v22, 1 }
 0x1af   : > { %13257 = vmatpush3.bf16.msra.mxu0 %v15979_v55  ;;  %13212 = vmatprep.mubr.bf16.mxu0 %v2560_v41  ;;  %v2584_v55 = vsel %vm2532_vm1, %v2579_v49, %v2583_v48  ;;  %v15381_v41 = vld [vmem:[%s15810_s5 + $0x70] sm:$0xff]   ;;  %v2717_v35 = vshll.u32 %v15390_v33, 16 }
 0x1b0   : > { %13258 = vmatprep.subr.bf16.mxu0 %v15177_v42  ;;  %v2640_v46 = vsel %vm2532_vm1, %v2635_v39, %v2639_v40  ;;  %v2649_v4 = vshrl.u32 %v15381_v41, 16 }
 0x1b3   : > { %13259 = vmatpush3.bf16.msra.mxu0 %v15177_v42  ;;  %v2645_v42 = vshll.u32 %v15381_v41, 16  ;;  %v16053_v41 = vld [vmem:[%s15810_s5 + $0x14] sm:$0xff]  }
 0x1b4   : > { %13260 = vmatprep.subr.bf16.mxu0 %v15178_v16 }
 0x1b5   : > { %v2647_v15 = vrot.slane %v2645_v42, 1  ;;  %v3218_v42 = vshll.u32 %v11879_v36, 16 }
 0x1b6   : > { %13213 = vmatmul.mubr.bf16.gmra.mrb[4].mxu0 %v2568_v25  ;;  %v15383_v25 = vld [vmem:[%s15810_s5 + $0x80] sm:$0xff]  }
 0x1b7   : > { %13216 = vmatprep.mubr.bf16.mxu0 %v2576_v28  ;;  %13261 = vmatpush3.bf16.msra.mxu0 %v15178_v16  ;;  %v2643_v16 = vor.u32 %v2641_v45, %v2639_v40  ;;  %v2651_v20 = vor.u32 %v2649_v4, %v2647_v15  ;;  %v2661_v27 = vshll.u32 %v15383_v25, 16  ;;  %v2665_v34 = vshrl.u32 %v15383_v25, 16 }
 0x1b8   : > { %13262 = vmatprep.subr.bf16.mxu0 %v15179_v44  ;;  %v2719_v40 = vrot.slane %v2717_v35, 1  ;;  %v2721_v45 = vshrl.u32 %v15390_v33, 16 }
 0x1b9   : > { %v2648_v28 = vsel %vm2532_vm1, %v2643_v16, %v2647_v15  ;;  %v2656_v32 = vsel %vm2532_vm1, %v2651_v20, %v2655_v24  ;;  %v2663_v49 = vrot.slane %v2661_v27, 1  ;;  %v3220_v15 = vrot.slane %v3218_v42, 1  ;;  %v16060_v20 = vld [vmem:[%s15810_s5 + $0x1c] sm:$0xff]  }
 0x1ba   : > { %v3223_v16 = vshll.u32 %v16053_v41, 16  ;;  %v2723_v24 = vor.u32 %v2721_v45, %v2719_v40 }
 0x1bb   : > { %13263 = vmatpush3.bf16.msra.mxu0 %v15179_v44  ;;  %v15384_v44 = vld [vmem:[%s15810_s5 + $0x88] sm:$0xff]   ;;  %v2667_v51 = vor.u32 %v2665_v34, %v2663_v49  ;;  %v3221_v27 = vor.u32 %v3220_v15, %v3216_v6  ;;  %v15211_v6 = vld [vmem:[#allocation6 + $0x170] sm:$0xff]  }
 0x1bc   : > { %13264 = vmatprep.subr.bf16.mxu0 %v15180_v52  ;;  %v2669_v48 = vshll.u32 %v15384_v44, 16  ;;  %v2673_v56 = vshrl.u32 %v15384_v44, 16  ;;  %v3227_v44 = vshrl.u32 %v16053_v41, 16 }
 0x1be   : > { %13217 = vmatmul.mubr.bf16.gmra.mrb[8].mxu0 %v2584_v55  ;;  %v2664_v55 = vsel %vm2532_vm1, %v2659_v50, %v2663_v49  ;;  %v3235_v49 = vshrl.u32 %v16060_v20, 16  ;;  %v3239_v50 = vshll.u32 %v16063_v31, 16 }
 0x1bf   : > { %13220 = vmatprep.mubr.bf16.mxu0 %v2592_v57  ;;  %13265 = vmatpush3.bf16.msra.mxu0 %v15180_v52  ;;  %v2671_v52 = vrot.slane %v2669_v48, 1 }
 0x1c0   : > { %13266 = vmatprep.subr.bf16.mxu0 %v15181_v61 }
 0x1c1   : > { %v2672_v57 = vsel %vm2532_vm1, %v2667_v51, %v2671_v52  ;;  %v2675_v62 = vor.u32 %v2673_v56, %v2671_v52  ;;  %v16072_v52 = vld [vmem:[%s15810_s5 + $0x2c] sm:$0xff]   ;;  %v16075_v56 = vld [vmem:[%s15810_s5 + $0x34] sm:$0xff]  }
 0x1c3   : > { %13267 = vmatpush3.bf16.msra.mxu0 %v15181_v61  ;;  %v2679_v61 = vrot.slane %v2677_v54, 1 }
 0x1c4   : > { %13268 = vmatprep.subr.bf16.mxu0 %v15182_v2 }
 0x1c5   : > { %v2683_v63 = vor.u32 %v2681_v58, %v2679_v61  ;;  %v2680_v3 = vsel %vm2532_vm1, %v2675_v62, %v2679_v61  ;;  %v15190_v61 = vld [vmem:[#allocation6 + $0x148] sm:$0xff]   ;;  %v3251_v62 = vshrl.u32 %v16072_v52, 16 }
 0x1c6   : > { %13221 = vmatmul.mubr.bf16.gmra.mrb[12].mxu0 %v2600_v7 }
 0x1c7   : > { %13224 = vmatprep.mubr.bf16.mxu0 %v2608_v9  ;;  %13269 = vmatpush3.bf16.msra.mxu0 %v15182_v2  ;;  %v2693_v2 = vshll.u32 %v15387_v1, 16  ;;  %v2688_v7 = vsel %vm2532_vm1, %v2683_v63, %v2687_v0  ;;  %v15388_v9 = vld [vmem:[%s15810_s5 + $0xa8] sm:$0xff]   ;;  %v3255_v63 = vshll.u32 %v16075_v56, 16  ;;  %v16084_v1 = vld [vmem:[%s15810_s5 + $0x3c] sm:$0xff]  }
 0x1c8   : > { %13270 = vmatprep.subr.bf16.mxu0 %v15183_v13  ;;  %v2701_v10 = vshll.u32 %v15388_v9, 16 }
 0x1c9   : > { %v2695_v11 = vrot.slane %v2693_v2, 1  ;;  %v3257_v5 = vrot.slane %v3255_v63, 1 }
 0x1ca   : > { %v2703_v14 = vrot.slane %v2701_v10, 1 }
 0x1cb   : > { %13271 = vmatpush3.bf16.msra.mxu0 %v15183_v13  ;;  %v2699_v13 = vor.u32 %v2697_v8, %v2695_v11  ;;  %v2696_v23 = vsel %vm2532_vm1, %v2691_v12, %v2695_v11  ;;  %v15195_v8 = vld [vmem:[#allocation6 + $0x150] sm:$0xff]   ;;  %v3259_v11 = vshrl.u32 %v16075_v56, 16 }
 0x1cc   : > { %13320 = vmatprep.subr.bf16.mxu0 %v16020_v21 }
 0x1cd   : > { %v2704_v29 = vsel %vm2532_vm1, %v2699_v13, %v2703_v14  ;;  %v3261_v22 = vor.u32 %v3259_v11, %v3257_v5 }
 0x1ce   : > { %13225 = vmatmul.mubr.bf16.gmra.mrb[16].mxu0 %v2616_v26  ;;  %v2705_v26 = vshrl.u32 %v15388_v9, 16  ;;  %v3263_v9 = vshll.u32 %v16084_v1, 16 }
 0x1cf   : > { %13228 = vmatprep.mubr.bf16.mxu0 %v2624_v30  ;;  %v2713_v30 = vshrl.u32 %v15389_v19, 16  ;;  %v16097_v19 = vld [vmem:[%s15810_s5 + $0x4c] sm:$0xff]  }
 0x1d0   : > { %v2707_v38 = vor.u32 %v2705_v26, %v2703_v14  ;;  %v15198_v14 = vld [vmem:[#allocation6 + $0x158] sm:$0xff]   ;;  %v3265_v17 = vrot.slane %v3263_v9, 1  ;;  %v3279_v33 = vshll.u32 %v16097_v19, 16 }
 0x1d1   : > { %v2715_v39 = vor.u32 %v2713_v30, %v2711_v37  ;;  %v15203_v30 = vld [vmem:[#allocation6 + $0x160] sm:$0xff]  }
 0x1d2   : > { %v3266_v35 = vsel %vm2532_vm1, %v3261_v22, %v3265_v17  ;;  %v3281_v42 = vrot.slane %v3279_v33, 1 }
 0x1d3   : > { %v2720_v47 = vsel %vm2532_vm1, %v2715_v39, %v2719_v40  ;;  %v15206_v40 = vld [vmem:[#allocation6 + $0x168] sm:$0xff]  }
 0x1d6   : > { %13229 = vmatmul.mubr.bf16.gmra.mrb[20].mxu0 %v2632_v43  ;;  %v2712_v43 = vsel %vm2532_vm1, %v2707_v38, %v2711_v37  ;;  %v3283_v38 = vshrl.u32 %v16097_v19, 16 }
 0x1d7   : > { %13232 = vmatprep.mubr.bf16.mxu0 %v2640_v46  ;;  %v15391_v46 = vld [vmem:[%s15810_s5 + $0xc0] ss:$0 sps:$4 sm:$0x11]  }
 0x1d8   : > { %v2725_v4 = vshll.u32 %v15391_v46, 16  ;;  %v3285_v46 = vor.u32 %v3283_v38, %v3281_v42 }
 0x1da   : > { %v2727_v25 = vrot.slane %v2725_v4, 1 }
 0x1dc   : > { %v2728_v34 = vsel %vm2532_vm1, %v2723_v24, %v2727_v25 }
 0x1de   : > { %13233 = vmatmul.mubr.bf16.gmra.mrb[24].mxu0 %v2648_v28  ;;  %v3225_v28 = vrot.slane %v3223_v16, 1 }
 0x1df   : > { %13236 = vmatprep.mubr.bf16.mxu0 %v2656_v32  ;;  %v3231_v32 = vshll.u32 %v16060_v20, 16 }
 0x1e0   : > { %v3226_v48 = vsel %vm2532_vm1, %v3221_v27, %v3225_v28  ;;  %v3229_v53 = vor.u32 %v3227_v44, %v3225_v28  ;;  %v16121_v44 = vld [vmem:[%s15810_s5 + $0x6c] sm:$0xff]  }
 0x1e1   : > { %v3233_v51 = vrot.slane %v3231_v32, 1  ;;  %v15214_v32 = vld [vmem:[#allocation6 + $0x178] sm:$0xff]  }
 0x1e3   : > { %v3237_v54 = vor.u32 %v3235_v49, %v3233_v51  ;;  %v3234_v58 = vsel %vm2532_vm1, %v3229_v53, %v3233_v51  ;;  %v16124_v51 = vld [vmem:[%s15810_s5 + $0x74] sm:$0xff]   ;;  %v16126_v53 = vld [vmem:[#allocation6 + $0x180] sm:$0xff]  }
 0x1e4   : > { %v3323_v9 = vshrl.u32 %v16124_v51, 16 }
 0x1e6   : > { %13237 = vmatmul.mubr.bf16.gmra.mrb[28].mxu0 %v2664_v55  ;;  %v3241_v55 = vrot.slane %v3239_v50, 1 }
 0x1e7   : > { %13240 = vmatprep.mubr.bf16.mxu0 %v2672_v57  ;;  %v3247_v57 = vshll.u32 %v16072_v52, 16 }
 0x1e8   : > { %v3242_v60 = vsel %vm2532_vm1, %v3237_v54, %v3241_v55  ;;  %v3245_v2 = vor.u32 %v3243_v59, %v3241_v55  ;;  %v3311_v54 = vshll.u32 %v16121_v44, 16  ;;  %v3315_v59 = vshrl.u32 %v16121_v44, 16 }
 0x1e9   : > { %v3249_v0 = vrot.slane %v3247_v57, 1 }
 0x1eb   : > { %v3250_v10 = vsel %vm2532_vm1, %v3245_v2, %v3249_v0 }
 0x1ee   : > { %13241 = vmatmul.mubr.bf16.gmra.mrb[32].mxu0 %v2680_v3  ;;  %v3253_v3 = vor.u32 %v3251_v62, %v3249_v0  ;;  %v16136_v62 = vld [vmem:[%s15810_s5 + $0x7c] sm:$0xff]  }
 0x1ef   : > { %13244 = vmatprep.mubr.bf16.mxu0 %v2688_v7  ;;  %v16088_v7 = vld [vmem:[%s15810_s5 + $0x44] sm:$0xff]   ;;  %v3331_v11 = vshrl.u32 %v16136_v62, 16 }
 0x1f0   : > { %v3258_v12 = vsel %vm2532_vm1, %v3253_v3, %v3257_v5  ;;  %v3271_v13 = vshll.u32 %v16088_v7, 16  ;;  %v3275_v36 = vshrl.u32 %v16088_v7, 16  ;;  %v16139_v3 = vld [vmem:[%s15810_s5 + $0x84] sm:$0xff]   ;;  %v3327_v5 = vshll.u32 %v16136_v62, 16 }
 0x1f1   : > { %v3339_v33 = vshrl.u32 %v16139_v3, 16 }
 0x1f2   : > { %v3273_v26 = vrot.slane %v3271_v13, 1  ;;  %v16148_v13 = vld [vmem:[%s15810_s5 + $0x8c] sm:$0xff]  }
 0x1f4   : > { %v3277_v45 = vor.u32 %v3275_v36, %v3273_v26  ;;  %v3347_v36 = vshrl.u32 %v16148_v13, 16 }
 0x1f6   : > { %13245 = vmatmul.mubr.bf16.gmra.mrb[36].mxu0 %v2696_v23  ;;  %v3282_v16 = vsel %vm2532_vm1, %v3277_v45, %v3281_v42 }
 0x1f7   : > { %13248 = vmatprep.mubr.bf16.mxu0 %v2704_v29  ;;  %v16100_v29 = vld [vmem:[%s15810_s5 + $0x54] sm:$0xff]  }
 0x1f8   : > { %v3287_v39 = vshll.u32 %v16100_v29, 16  ;;  %v3291_v24 = vshrl.u32 %v16100_v29, 16 }
 0x1fa   : > { %v3289_v4 = vrot.slane %v3287_v39, 1  ;;  %v16160_v39 = vld [vmem:[%s15810_s5 + $0x9c] sm:$0xff]  }
 0x1fc   : > { %v3290_v25 = vsel %vm2532_vm1, %v3285_v46, %v3289_v4  ;;  %v16163_v46 = vld [vmem:[%s15810_s5 + $0xa4] sm:$0xff]  }
 0x1fe   : > { %13249 = vmatmul.mubr.bf16.gmra.mrb[40].mxu0 %v2712_v43  ;;  %v16109_v43 = vld [vmem:[%s15810_s5 + $0x5c] sm:$0xff]  }
 0x1ff   : > { %13252 = vmatprep.mubr.bf16.mxu0 %v2720_v47  ;;  %v16112_v47 = vld [vmem:[%s15810_s5 + $0x64] sm:$0xff]   ;;  %v3295_v15 = vshll.u32 %v16109_v43, 16  ;;  %v3299_v27 = vshrl.u32 %v16109_v43, 16 }
 0x200   : > { %v3303_v28 = vshll.u32 %v16112_v47, 16  ;;  %v3307_v57 = vshrl.u32 %v16112_v47, 16 }
 0x202   : > { %v3305_v50 = vrot.slane %v3303_v28, 1  ;;  %v16172_v28 = vld [vmem:[%s15810_s5 + $0xac] sm:$0xff]  }
 0x204   : > { %v3309_v63 = vor.u32 %v3307_v57, %v3305_v50 }
 0x206   : > { %13253 = vmatmul.mubr.bf16.gmra.mrb[44].mxu0 %v2728_v34  ;;  %v3297_v34 = vrot.slane %v3295_v15, 1 }
 0x207   : > { %13272 = vmatprep.mubr.bf16.mxu0 %v3226_v48  ;;  %v3293_v48 = vor.u32 %v3291_v24, %v3289_v4  ;;  %v3359_v4 = vshll.u32 %v16160_v39, 16  ;;  %v3363_v24 = vshrl.u32 %v16160_v39, 16 }
 0x208   : > { %v3301_v49 = vor.u32 %v3299_v27, %v3297_v34 }
 0x209   : > { %v3298_v55 = vsel %vm2532_vm1, %v3293_v48, %v3297_v34  ;;  %v3361_v27 = vrot.slane %v3359_v4, 1 }
 0x20b   : > { %v3365_v34 = vor.u32 %v3363_v24, %v3361_v27  ;;  %v3780_v24 = vrot.slane %v16060_v20, 1 }
 0x20e   : > { %13273 = vmatmul.mubr.bf16.vlgmr.msra.gmra.mrb[0].mxu0 %v3234_v58  ;;  %v3306_v58 = vsel %vm2532_vm1, %v3301_v49, %v3305_v50  ;;  %v16175_v49 = vld [vmem:[%s15810_s5 + $0xb4] sm:$0xff]   ;;  %v3375_v50 = vshll.u32 %v16172_v28, 16 }
 0x20f   : > { %13321 = vmatpush3.bf16.msra.mxu0 %v16020_v21  ;;  %13276 = vmatprep.mubr.bf16.mxu0 %v3242_v60  ;;  %v3267_v21 = vshrl.u32 %v16084_v1, 16  ;;  %v3319_v60 = vshll.u32 %v16124_v51, 16 }
 0x210   : > { %13322 = vmatprep.subr.bf16.mxu0 %v15190_v61 }
 0x211   : > { %v3269_v23 = vor.u32 %v3267_v21, %v3265_v17  ;;  %v3321_v2 = vrot.slane %v3319_v60, 1  ;;  %v3329_v21 = vrot.slane %v3327_v5, 1  ;;  %v3377_v60 = vrot.slane %v3375_v50, 1  ;;  %v16187_v5 = vld [vmem:[%s15810_s5 + $0xc4] sm:$0xff]  }
 0x213   : > { %13323 = vmatpush3.bf16.msra.mxu0 %v15190_v61  ;;  %v3274_v37 = vsel %vm2532_vm1, %v3269_v23, %v3273_v26  ;;  %v3313_v61 = vrot.slane %v3311_v54, 1  ;;  %v3333_v17 = vor.u32 %v3331_v11, %v3329_v21  ;;  %v16151_v23 = vld [vmem:[%s15810_s5 + $0x94] sm:$0xff]   ;;  %v3343_v26 = vshll.u32 %v16148_v13, 16 }
 0x214   : > { %13324 = vmatprep.subr.bf16.mxu0 %v15195_v8  ;;  %v3355_v15 = vshrl.u32 %v16151_v23, 16 }
 0x215   : > { %v3317_v0 = vor.u32 %v3315_v59, %v3313_v61  ;;  %v3345_v38 = vrot.slane %v3343_v26, 1  ;;  %v3383_v59 = vshll.u32 %v16175_v49, 16 }
 0x216   : > { %13277 = vmatmul.mubr.bf16.gmra.mrb[4].mxu0 %v3250_v10 }
 0x217   : > { %13280 = vmatprep.mubr.bf16.mxu0 %v3258_v12  ;;  %13325 = vmatpush3.bf16.msra.mxu0 %v15195_v8  ;;  %v3314_v8 = vsel %vm2532_vm1, %v3309_v63, %v3313_v61  ;;  %v3322_v10 = vsel %vm2532_vm1, %v3317_v0, %v3321_v2  ;;  %v3335_v12 = vshll.u32 %v16139_v3, 16  ;;  %v3349_v42 = vor.u32 %v3347_v36, %v3345_v38  ;;  %v16184_v61 = vld [vmem:[%s15810_s5 + $0xbc] sm:$0xff]  }
 0x218   : > { %13326 = vmatprep.subr.bf16.mxu0 %v15198_v14  ;;  %v3403_v36 = vshrl.u32 %v16187_v5, 16 }
 0x219   : > { %v3337_v22 = vrot.slane %v3335_v12, 1  ;;  %v3395_v12 = vshrl.u32 %v16184_v61, 16 }
 0x21b   : > { %13327 = vmatpush3.bf16.msra.mxu0 %v15198_v14  ;;  %v3325_v14 = vor.u32 %v3323_v9, %v3321_v2  ;;  %v3385_v2 = vrot.slane %v3383_v59, 1  ;;  %v3794_v59 = vrot.slane %v16100_v29, 1 }
 0x21c   : > { %13328 = vmatprep.subr.bf16.mxu0 %v15203_v30 }
 0x21e   : > { %13281 = vmatmul.mubr.bf16.gmra.mrb[8].mxu0 %v3266_v35  ;;  %v3338_v35 = vsel %vm2532_vm1, %v3333_v17, %v3337_v22 }
 0x21f   : > { %13284 = vmatprep.mubr.bf16.mxu0 %v3274_v37  ;;  %13329 = vmatpush3.bf16.msra.mxu0 %v15203_v30  ;;  %v3330_v30 = vsel %vm2532_vm1, %v3325_v14, %v3329_v21  ;;  %v3351_v37 = vshll.u32 %v16151_v23, 16  ;;  %v3399_v21 = vshll.u32 %v16187_v5, 16 }
 0x220   : > { %13330 = vmatprep.subr.bf16.mxu0 %v15206_v40 }
 0x221   : > { %v3353_v45 = vrot.slane %v3351_v37, 1 }
 0x223   : > { %13331 = vmatpush3.bf16.msra.mxu0 %v15206_v40  ;;  %v3341_v40 = vor.u32 %v3339_v33, %v3337_v22  ;;  %v16196_v22 = vld [vmem:[%s15810_s5 + $0xcc] ss:$0 sps:$4 sm:$0x11]   ;;  %v3756_v33 = vld [vmem:[%s15810_s5 + $0xc] sm:$0xe] }
 0x224   : > { %13332 = vmatprep.subr.bf16.mxu0 %v15211_v6  ;;  %v3407_v37 = vshll.u32 %v16196_v22, 16 }
 0x226   : > { %13285 = vmatmul.mubr.bf16.gmra.mrb[12].mxu0 %v3282_v16  ;;  %v3354_v16 = vsel %vm2532_vm1, %v3349_v42, %v3353_v45 }
 0x227   : > { %13288 = vmatprep.mubr.bf16.mxu0 %v3290_v25  ;;  %13333 = vmatpush3.bf16.msra.mxu0 %v15211_v6  ;;  %v3346_v6 = vsel %vm2532_vm1, %v3341_v40, %v3345_v38  ;;  %v3367_v25 = vshll.u32 %v16163_v46, 16  ;;  %v11912_v40 = vcombine.low %v3756_v33, %v16045_v18 }
 0x228   : > { %13334 = vmatprep.subr.bf16.mxu0 %v15214_v32 }
 0x229   : > { %v3369_v48 = vrot.slane %v3367_v25, 1  ;;  %v3777_v4 = vrot.slane %v11912_v40, 1  ;;  %v3782_v25 = vrot.slane %v16063_v31, 1  ;;  %v15221_v31 = vld [vmem:[#allocation6 + $0x198] sm:$0xff]  }
 0x22a   : > { %v15226_v40 = vld [vmem:[%s15810_s5 + $0x18] sm:$0xff]  }
 0x22b   : > { %13335 = vmatpush3.bf16.msra.mxu0 %v15214_v32  ;;  %v3357_v32 = vor.u32 %v3355_v15, %v3353_v45  ;;  %v3370_v57 = vsel %vm2532_vm1, %v3365_v34, %v3369_v48  ;;  %v3409_v45 = vrot.slane %v3407_v37, 1  ;;  %v3783_v18 = vsel %vm1403_vm0, %v3780_v24, %v3782_v25 }
 0x22c   : > { %13384 = vmatprep.subr.bf16.mxu0 %v16126_v53  ;;  %v3786_v34 = vrot.slane %v16075_v56, 1 }
 0x22d   : > { %v3362_v54 = vsel %vm2532_vm1, %v3357_v32, %v3361_v27  ;;  %v15219_v32 = vld [vmem:[#allocation6 + $0x188] sm:$0xff]  }
 0x22e   : > { %13289 = vmatmul.mubr.bf16.gmra.mrb[16].mxu0 %v3298_v55  ;;  %v3371_v55 = vshrl.u32 %v16163_v46, 16 }
 0x22f   : > { %13292 = vmatprep.mubr.bf16.mxu0 %v3306_v58  ;;  %v3379_v58 = vshrl.u32 %v16172_v28, 16 }
 0x230   : > { %v3373_v63 = vor.u32 %v3371_v55, %v3369_v48  ;;  %v15220_v48 = vld [vmem:[#allocation6 + $0x190] sm:$0xff]  }
 0x231   : > { %v3381_v0 = vor.u32 %v3379_v58, %v3377_v60  ;;  %v3792_v58 = vrot.slane %v16097_v19, 1  ;;  %v15228_v19 = vld [vmem:[#allocation6 + $0x1c0] sm:$0xff]  }
 0x232   : > { %v3378_v9 = vsel %vm2532_vm1, %v3373_v63, %v3377_v60  ;;  %v15225_v63 = vld [vmem:[#allocation6 + $0x1b8] sm:$0xff]  }
 0x233   : > { %v3386_v11 = vsel %vm2532_vm1, %v3381_v0, %v3385_v2  ;;  %v3795_v60 = vsel %vm1403_vm0, %v3792_v58, %v3794_v59  ;;  %v3796_v0 = vrot.slane %v16109_v43, 1 }
 0x235   : > { %v3797_v29 = vsel %vm1403_vm0, %v3794_v59, %v3796_v0  ;;  %v16278_v59 = vld [vmem:[%s15810_s5 + $0x1c] sm:$0xf] }
 0x236   : > { %13293 = vmatmul.mubr.bf16.gmra.mrb[20].mxu0 %v3314_v8  ;;  %v3391_v8 = vshll.u32 %v16184_v61, 16 }
 0x237   : > { %13296 = vmatprep.mubr.bf16.mxu0 %v3322_v10  ;;  %v3387_v10 = vshrl.u32 %v16175_v49, 16 }
 0x238   : > { %v3393_v14 = vrot.slane %v3391_v8, 1 }
 0x239   : > { %v3389_v17 = vor.u32 %v3387_v10, %v3385_v2  ;;  %v3798_v2 = vrot.slane %v16112_v47, 1  ;;  %v3802_v10 = vrot.slane %v16124_v51, 1  ;;  %v3804_v47 = vrot.slane %v16136_v62, 1 }
 0x23a   : > { %v3397_v26 = vor.u32 %v3395_v12, %v3393_v14  ;;  %v3806_v12 = vrot.slane %v16139_v3, 1  ;;  %v3810_v51 = vrot.slane %v16151_v23, 1  ;;  %v3812_v62 = vrot.slane %v16160_v39, 1 }
 0x23b   : > { %v3799_v8 = vsel %vm1403_vm0, %v3796_v0, %v3798_v2  ;;  %v3814_v3 = vrot.slane %v16163_v46, 1  ;;  %v3818_v23 = vrot.slane %v16175_v49, 1  ;;  %v3820_v39 = vrot.slane %v16184_v61, 1  ;;  %v15231_v61 = vld [vmem:[#allocation6 + $0x1c8] sm:$0xff]  }
 0x23c   : > { %v3822_v46 = vrot.slane %v16187_v5, 1  ;;  %v15236_v5 = vld [vmem:[#allocation6 + $0x1d0] sm:$0xff]  }
 0x23d   : > { %v3815_v33 = vsel %vm1403_vm0, %v3812_v62, %v3814_v3  ;;  %v3821_v37 = vsel %vm1403_vm0, %v3818_v23, %v3820_v39 }
 0x23e   : > { %13297 = vmatmul.mubr.bf16.gmra.mrb[24].mxu0 %v3330_v30  ;;  %v3401_v30 = vrot.slane %v3399_v21, 1  ;;  %v3805_v21 = vsel %vm1403_vm0, %v3802_v10, %v3804_v47 }
 0x23f   : > { %13300 = vmatprep.mubr.bf16.mxu0 %v3338_v35  ;;  %v3394_v35 = vsel %vm2532_vm1, %v3389_v17, %v3393_v14  ;;  %v3807_v14 = vsel %vm1403_vm0, %v3804_v47, %v3806_v12  ;;  %v16293_v47 = vld [vmem:[%s15810_s5 + $0x30] sm:$0xff]  }
 0x240   : > { %v3402_v38 = vsel %vm2532_vm1, %v3397_v26, %v3401_v30  ;;  %v3405_v42 = vor.u32 %v3403_v36, %v3401_v30  ;;  %v3813_v30 = vsel %vm1403_vm0, %v3810_v51, %v3812_v62  ;;  %v16302_v62 = vld [vmem:[%s15810_s5 + $0x38] sm:$0xff]  }
 0x242   : > { %v3410_v15 = vsel %vm2532_vm1, %v3405_v42, %v3409_v45  ;;  %v15227_v42 = vld [vmem:[%s15810_s5 + $0x20] sm:$0xff]   ;;  %v15229_v45 = vld [vmem:[%s15810_s5 + $0x28] sm:$0xff]  }
 0x246   : > { %13301 = vmatmul.mubr.bf16.gmra.mrb[28].mxu0 %v3346_v6  ;;  %v3778_v6 = vrot.slane %v16053_v41, 1  ;;  %v3784_v41 = vrot.slane %v16072_v52, 1  ;;  %v15222_v52 = vld [vmem:[#allocation6 + $0x1a0] sm:$0xff]  }
 0x247   : > { %13304 = vmatprep.mubr.bf16.mxu0 %v3354_v16 }
 0x248   : > { %v3779_v16 = vsel %vm1403_vm0, %v3777_v4, %v3778_v6  ;;  %v3781_v27 = vsel %vm1403_vm0, %v3778_v6, %v3780_v24  ;;  %v3785_v50 = vsel %vm1403_vm0, %v3782_v25, %v3784_v41  ;;  %v3787_v20 = vsel %vm1403_vm0, %v3784_v41, %v3786_v34  ;;  %v15230_v4 = vld [vmem:[%s15810_s5 + $0x30] sm:$0xff]   ;;  %v15232_v6 = vld [vmem:[%s15810_s5 + $0x38] sm:$0xff]   ;;  %v15234_v24 = vld [vmem:[%s15810_s5 + $0x48] sm:$0xff]  }
 0x249   : > { %v15247_v25 = vld [vmem:[#allocation6 + $0x1e8] sm:$0xff]   ;;  %v15255_v41 = vld [vmem:[#allocation6 + $0x1f8] sm:$0xff]  }
 0x24e   : > { %13305 = vmatmul.mubr.bf16.gmra.mrb[32].mxu0 %v3362_v54  ;;  %v3788_v54 = vrot.slane %v16084_v1, 1  ;;  %v15224_v1 = vld [vmem:[#allocation6 + $0x1b0] sm:$0xff]  }
 0x24f   : > { %13308 = vmatprep.mubr.bf16.mxu0 %v3370_v57  ;;  %v15223_v57 = vld [vmem:[#allocation6 + $0x1a8] sm:$0xff]  }
 0x250   : > { %v3789_v55 = vsel %vm1403_vm0, %v3786_v34, %v3788_v54  ;;  %v16263_v34 = vld [vmem:[#allocation6 + $0x200] sm:$0xff]  }
 0x256   : > { %13309 = vmatmul.mubr.bf16.gmra.mrb[36].mxu0 %v3378_v9  ;;  %v3800_v9 = vrot.slane %v16121_v44, 1  ;;  %v3808_v44 = vrot.slane %v16148_v13, 1  ;;  %v3816_v13 = vrot.slane %v16172_v28, 1  ;;  %v3824_v28 = vrot.slane %v16196_v22, 1  ;;  %v15239_v22 = vld [vmem:[#allocation6 + $0x1d8] sm:$0xff]  }
 0x257   : > { %13312 = vmatprep.mubr.bf16.mxu0 %v3386_v11 }
 0x258   : > { %v3801_v11 = vsel %vm1403_vm0, %v3798_v2, %v3800_v9  ;;  %v3803_v43 = vsel %vm1403_vm0, %v3800_v9, %v3802_v10  ;;  %v3809_v17 = vsel %vm1403_vm0, %v3806_v12, %v3808_v44  ;;  %v3811_v26 = vsel %vm1403_vm0, %v3808_v44, %v3810_v51  ;;  %v15254_v2 = vld [vmem:[%s15810_s5 + $0xc0] sm:$0xff]   ;;  %v16290_v10 = vld [vmem:[%s15810_s5 + $0x28] sm:$0xff]   ;;  %v15257_v12 = vld [vmem:[%s15810_s5 + $0xd0] sm:$0xff]  }
 0x259   : > { %v3819_v36 = vsel %vm1403_vm0, %v3816_v13, %v3818_v23  ;;  %v3825_v49 = vsel %vm1403_vm0, %v3822_v46, %v3824_v28  ;;  %v4910_v51 = vshrl.u32 %v16290_v10, 16  ;;  %v4922_v23 = vshll.u32 %v16302_v62, 16 }
 0x25b   : > { %v4924_v28 = vrot.slane %v4922_v23, 1 }
 0x25e   : > { %13313 = vmatmul.mubr.bf16.gmra.mrb[40].mxu0 %v3394_v35  ;;  %v3817_v35 = vsel %vm1403_vm0, %v3814_v3, %v3816_v13  ;;  %v16305_v13 = vld [vmem:[%s15810_s5 + $0x40] sm:$0xff]  }
 0x25f   : > { %13316 = vmatprep.mubr.bf16.mxu0 %v3402_v38  ;;  %v3823_v38 = vsel %vm1403_vm0, %v3820_v39, %v3822_v46  ;;  %v15264_v46 = vld [vmem:[#allocation6 + $0x208] sm:$0xff]  }
 0x266   : > { %13317 = vmatmul.mubr.bf16.gmra.mrb[44].mxu0 %v3410_v15  ;;  %v15244_v15 = vld [vmem:[#allocation6 + $0x1e0] sm:$0xff]  }
 0x267   : > { %13336 = vmatprep.mubr.bf16.mxu0 %v3779_v16  ;;  %v15233_v16 = vld [vmem:[%s15810_s5 + $0x40] sm:$0xff]  }
 0x26e   : > { %13337 = vmatmul.mubr.bf16.vlgmr.msra.gmra.mrb[0].mxu0 %v3781_v27  ;;  %v15252_v27 = vld [vmem:[#allocation6 + $0x1f0] sm:$0xff]  }
 0x26f   : > { %13385 = vmatpush3.bf16.msra.mxu0 %v16126_v53  ;;  %13340 = vmatprep.mubr.bf16.mxu0 %v3783_v18  ;;  %v3790_v53 = vrot.slane %v16088_v7, 1  ;;  %v15235_v18 = vld [vmem:[%s15810_s5 + $0x50] sm:$0xff]  }
 0x270   : > { %13386 = vmatprep.subr.bf16.mxu0 %v15219_v32 }
 0x271   : > { %v3791_v56 = vsel %vm1403_vm0, %v3788_v54, %v3790_v53  ;;  %v3793_v7 = vsel %vm1403_vm0, %v3790_v53, %v3792_v58  ;;  %v15243_v54 = vld [vmem:[%s15810_s5 + $0x80] sm:$0xff]   ;;  %v15245_v53 = vld [vmem:[%s15810_s5 + $0x88] sm:$0xff]   ;;  %v4701_v58 = vld [vmem:[%s15810_s5 + $0x18] sm:$0xf] }
 0x273   : > { %13387 = vmatpush3.bf16.msra.mxu0 %v15219_v32  ;;  %v15237_v32 = vld [vmem:[%s15810_s5 + $0x58] sm:$0xff]  }
 0x274   : > { %13388 = vmatprep.subr.bf16.mxu0 %v15220_v48 }
 0x276   : > { %13341 = vmatmul.mubr.bf16.gmra.mrb[4].mxu0 %v3785_v50  ;;  %v15240_v50 = vld [vmem:[%s15810_s5 + $0x68] sm:$0xff]  }
 0x277   : > { %13344 = vmatprep.mubr.bf16.mxu0 %v3787_v20  ;;  %13389 = vmatpush3.bf16.msra.mxu0 %v15220_v48  ;;  %v15238_v48 = vld [vmem:[%s15810_s5 + $0x60] sm:$0xff]   ;;  %v15241_v20 = vld [vmem:[%s15810_s5 + $0x70] sm:$0xff]  }
 0x278   : > { %13390 = vmatprep.subr.bf16.mxu0 %v15221_v31 }
 0x27b   : > { %13391 = vmatpush3.bf16.msra.mxu0 %v15221_v31  ;;  %v15242_v31 = vld [vmem:[%s15810_s5 + $0x78] sm:$0xff]  }
 0x27c   : > { %13392 = vmatprep.subr.bf16.mxu0 %v15222_v52 }
 0x27e   : > { %13345 = vmatmul.mubr.bf16.gmra.mrb[8].mxu0 %v3789_v55  ;;  %v15248_v55 = vld [vmem:[%s15810_s5 + $0x98] sm:$0xff]  }
 0x27f   : > { %13348 = vmatprep.mubr.bf16.mxu0 %v3791_v56  ;;  %13393 = vmatpush3.bf16.msra.mxu0 %v15222_v52  ;;  %v15246_v52 = vld [vmem:[%s15810_s5 + $0x90] sm:$0xff]   ;;  %v15249_v56 = vld [vmem:[%s15810_s5 + $0xa0] sm:$0xff]  }
 0x280   : > { %13394 = vmatprep.subr.bf16.mxu0 %v15223_v57 }
 0x283   : > { %13395 = vmatpush3.bf16.msra.mxu0 %v15223_v57  ;;  %v15250_v57 = vld [vmem:[%s15810_s5 + $0xa8] sm:$0xff]  }
 0x284   : > { %13396 = vmatprep.subr.bf16.mxu0 %v15224_v1 }
 0x286   : > { %13349 = vmatmul.mubr.bf16.gmra.mrb[12].mxu0 %v3793_v7  ;;  %v15253_v7 = vld [vmem:[%s15810_s5 + $0xb8] sm:$0xff]  }
 0x287   : > { %13352 = vmatprep.mubr.bf16.mxu0 %v3795_v60  ;;  %13397 = vmatpush3.bf16.msra.mxu0 %v15224_v1  ;;  %v15251_v1 = vld [vmem:[%s15810_s5 + $0xb0] sm:$0xff]   ;;  %v11953_v60 = vcombine.low %v4701_v58, %v16278_v59  ;;  %v16339_v58 = vld [vmem:[%s15810_s5 + $0x68] sm:$0xff]  }
 0x288   : > { %13398 = vmatprep.subr.bf16.mxu0 %v15225_v63 }
 0x289   : > { %v4893_v0 = vshll.u32 %v11953_v60, 16 }
 0x28b   : > { %13399 = vmatpush3.bf16.msra.mxu0 %v15225_v63  ;;  %v16284_v63 = vld [vmem:[%s15810_s5 + $0x20] sm:$0xff]  }
 0x28c   : > { %13448 = vmatprep.subr.bf16.mxu0 %v15228_v19  ;;  %v4898_v9 = vshll.u32 %v16284_v63, 16 }
 0x28e   : > { %13353 = vmatmul.mubr.bf16.gmra.mrb[16].mxu0 %v3797_v29  ;;  %v4891_v29 = vshrl.u32 %v11953_v60, 16 }
 0x28f   : > { %13356 = vmatprep.mubr.bf16.mxu0 %v3799_v8  ;;  %v4895_v8 = vrot.slane %v4893_v0, 1  ;;  %v16342_v0 = vld [vmem:[%s15810_s5 + $0x70] sm:$0xff]  }
 0x296   : > { %13357 = vmatmul.mubr.bf16.gmra.mrb[20].mxu0 %v3801_v11  ;;  %v4896_v11 = vor.u32 %v4895_v8, %v4891_v29 }
 0x297   : > { %13360 = vmatprep.mubr.bf16.mxu0 %v3803_v43  ;;  %v4900_v43 = vrot.slane %v4898_v9, 1 }
 0x299   : > { %v4901_v44 = vsel %vm2532_vm1, %v4896_v11, %v4900_v43  ;;  %v4974_v11 = vshrl.u32 %v16339_v58, 16 }
 0x29e   : > { %13361 = vmatmul.mubr.bf16.gmra.mrb[24].mxu0 %v3805_v21  ;;  %v4906_v21 = vshll.u32 %v16290_v10, 16 }
 0x29f   : > { %13364 = vmatprep.mubr.bf16.mxu0 %v3807_v14  ;;  %v4902_v14 = vshrl.u32 %v16284_v63, 16 }
 0x2a1   : > { %v4904_v3 = vor.u32 %v4902_v14, %v4900_v43  ;;  %v4978_v43 = vshll.u32 %v16342_v0, 16  ;;  %v16351_v14 = vld [vmem:[%s15810_s5 + $0x78] sm:$0xff]  }
 0x2a6   : > { %13365 = vmatmul.mubr.bf16.gmra.mrb[28].mxu0 %v3809_v17  ;;  %v4914_v17 = vshll.u32 %v16293_v47, 16 }
 0x2a7   : > { %13368 = vmatprep.mubr.bf16.mxu0 %v3811_v26  ;;  %v4908_v26 = vrot.slane %v4906_v21, 1 }
 0x2ae   : > { %13369 = vmatmul.mubr.bf16.gmra.mrb[32].mxu0 %v3813_v30  ;;  %v4912_v30 = vor.u32 %v4910_v51, %v4908_v26 }
 0x2af   : > { %13372 = vmatprep.mubr.bf16.mxu0 %v3815_v33  ;;  %v4916_v33 = vrot.slane %v4914_v17, 1  ;;  %v4980_v17 = vrot.slane %v4978_v43, 1 }
 0x2b1   : > { %v4917_v39 = vsel %vm2532_vm1, %v4912_v30, %v4916_v33 }
 0x2b6   : > { %13373 = vmatmul.mubr.bf16.gmra.mrb[36].mxu0 %v3817_v35  ;;  %v4909_v35 = vsel %vm2532_vm1, %v4904_v3, %v4908_v26  ;;  %v16354_v26 = vld [vmem:[%s15810_s5 + $0x80] sm:$0xff]   ;;  %v4986_v3 = vshll.u32 %v16351_v14, 16 }
 0x2b7   : > { %13376 = vmatprep.mubr.bf16.mxu0 %v3819_v36  ;;  %v4918_v36 = vshrl.u32 %v16293_v47, 16 }
 0x2be   : > { %13377 = vmatmul.mubr.bf16.gmra.mrb[40].mxu0 %v3821_v37  ;;  %v4926_v37 = vshrl.u32 %v16302_v62, 16 }
 0x2bf   : > { %13380 = vmatprep.mubr.bf16.mxu0 %v3823_v38  ;;  %v4930_v38 = vshll.u32 %v16305_v13, 16 }
 0x2c6   : > { %13381 = vmatmul.mubr.bf16.gmra.mrb[44].mxu0 %v3825_v49  ;;  %v16314_v49 = vld [vmem:[%s15810_s5 + $0x48] sm:$0xff]  }
 0x2c7   : > { %13400 = vmatprep.mubr.bf16.mxu0 %v15226_v40  ;;  %v4920_v40 = vor.u32 %v4918_v36, %v4916_v33  ;;  %v4982_v33 = vshrl.u32 %v16342_v0, 16  ;;  %v4994_v36 = vshll.u32 %v16354_v26, 16 }
 0x2ce   : > { %13401 = vmatmul.mubr.bf16.vlgmr.msra.gmra.mrb[0].mxu0 %v15227_v42  ;;  %v4928_v42 = vor.u32 %v4926_v37, %v4924_v28  ;;  %v4984_v37 = vor.u32 %v4982_v33, %v4980_v17 }
 0x2cf   : > { %13449 = vmatpush3.bf16.msra.mxu0 %v15228_v19  ;;  %13404 = vmatprep.mubr.bf16.mxu0 %v15229_v45  ;;  %v15256_v19 = vld [vmem:[%s15810_s5 + $0xc8] sm:$0xff]   ;;  %v4932_v45 = vrot.slane %v4930_v38, 1 }
 0x2d0   : > { %13450 = vmatprep.subr.bf16.mxu0 %v15231_v61 }
 0x2d3   : > { %13451 = vmatpush3.bf16.msra.mxu0 %v15231_v61  ;;  %v16318_v61 = vld [vmem:[%s15810_s5 + $0x50] sm:$0xff]  }
 0x2d4   : > { %13452 = vmatprep.subr.bf16.mxu0 %v15236_v5 }
 0x2d6   : > { %13405 = vmatmul.mubr.bf16.gmra.mrb[4].mxu0 %v15230_v4  ;;  %v4938_v4 = vshll.u32 %v16314_v49, 16 }
 0x2d7   : > { %13408 = vmatprep.mubr.bf16.mxu0 %v15232_v6  ;;  %13453 = vmatpush3.bf16.msra.mxu0 %v15236_v5  ;;  %v15269_v5 = vld [vmem:[#allocation6 + $0x210] sm:$0xff]   ;;  %v4925_v6 = vsel %vm2532_vm1, %v4920_v40, %v4924_v28  ;;  %v4996_v28 = vrot.slane %v4994_v36, 1  ;;  %v16411_v36 = vld [vmem:[%s15810_s5 + $0xc8] sm:$0xff]  }
 0x2d8   : > { %13454 = vmatprep.subr.bf16.mxu0 %v15239_v22  ;;  %v16366_v40 = vld [vmem:[%s15810_s5 + $0x90] sm:$0xff]  }
 0x2db   : > { %13455 = vmatpush3.bf16.msra.mxu0 %v15239_v22  ;;  %v4934_v22 = vshrl.u32 %v16305_v13, 16 }
 0x2dc   : > { %13456 = vmatprep.subr.bf16.mxu0 %v15244_v15 }
 0x2de   : > { %13409 = vmatmul.mubr.bf16.gmra.mrb[8].mxu0 %v15233_v16  ;;  %v4942_v16 = vshrl.u32 %v16314_v49, 16 }
 0x2df   : > { %13412 = vmatprep.mubr.bf16.mxu0 %v15234_v24  ;;  %13457 = vmatpush3.bf16.msra.mxu0 %v15244_v15  ;;  %v4933_v15 = vsel %vm2532_vm1, %v4928_v42, %v4932_v45  ;;  %v4946_v24 = vshll.u32 %v16318_v61, 16 }
 0x2e0   : > { %13458 = vmatprep.subr.bf16.mxu0 %v15247_v25 }
 0x2e3   : > { %13459 = vmatpush3.bf16.msra.mxu0 %v15247_v25  ;;  %v15272_v25 = vld [vmem:[#allocation6 + $0x218] sm:$0xff]  }
 0x2e4   : > { %13460 = vmatprep.subr.bf16.mxu0 %v15252_v27 }
 0x2e6   : > { %13413 = vmatmul.mubr.bf16.gmra.mrb[12].mxu0 %v15235_v18  ;;  %v16327_v18 = vld [vmem:[%s15810_s5 + $0x58] sm:$0xff]  }
 0x2e7   : > { %13416 = vmatprep.mubr.bf16.mxu0 %v15237_v32  ;;  %13461 = vmatpush3.bf16.msra.mxu0 %v15252_v27  ;;  %v4940_v27 = vrot.slane %v4938_v4, 1  ;;  %v4936_v32 = vor.u32 %v4934_v22, %v4932_v45  ;;  %v5010_v22 = vshll.u32 %v16366_v40, 16 }
 0x2e8   : > { %13462 = vmatprep.subr.bf16.mxu0 %v15255_v41 }
 0x2eb   : > { %13463 = vmatpush3.bf16.msra.mxu0 %v15255_v41  ;;  %v4944_v41 = vor.u32 %v4942_v16, %v4940_v27  ;;  %v16375_v16 = vld [vmem:[%s15810_s5 + $0x98] sm:$0xff]  }
 0x2ec   : > { %13512 = vmatprep.subr.bf16.mxu0 %v16263_v34 }
 0x2ee   : > { %13417 = vmatmul.mubr.bf16.gmra.mrb[16].mxu0 %v15238_v48  ;;  %v16330_v48 = vld [vmem:[%s15810_s5 + $0x60] sm:$0xff]  }
 0x2ef   : > { %13420 = vmatprep.mubr.bf16.mxu0 %v15240_v50  ;;  %v15277_v50 = vld [vmem:[#allocation6 + $0x220] sm:$0xff]   ;;  %v4966_v8 = vshrl.u32 %v16330_v48, 16 }
 0x2f6   : > { %13421 = vmatmul.mubr.bf16.gmra.mrb[20].mxu0 %v15241_v20  ;;  %v4954_v20 = vshll.u32 %v16327_v18, 16 }
 0x2f7   : > { %13424 = vmatprep.mubr.bf16.mxu0 %v15242_v31  ;;  %v4941_v31 = vsel %vm2532_vm1, %v4936_v32, %v4940_v27  ;;  %v5012_v27 = vrot.slane %v5010_v22, 1  ;;  %v16378_v32 = vld [vmem:[%s15810_s5 + $0xa0] sm:$0xff]  }
 0x2fe   : > { %13425 = vmatmul.mubr.bf16.gmra.mrb[24].mxu0 %v15243_v54  ;;  %v4950_v54 = vshrl.u32 %v16318_v61, 16 }
 0x2ff   : > { %13428 = vmatprep.mubr.bf16.mxu0 %v15245_v53 }
 0x306   : > { %13429 = vmatmul.mubr.bf16.gmra.mrb[28].mxu0 %v15246_v52  ;;  %v4958_v52 = vshrl.u32 %v16327_v18, 16 }
 0x307   : > { %13432 = vmatprep.mubr.bf16.mxu0 %v15248_v55  ;;  %v4962_v55 = vshll.u32 %v16330_v48, 16 }
 0x309   : > { %v4964_v60 = vrot.slane %v4962_v55, 1 }
 0x30e   : > { %13433 = vmatmul.mubr.bf16.gmra.mrb[32].mxu0 %v15249_v56  ;;  %v15280_v56 = vld [vmem:[#allocation6 + $0x228] sm:$0xff]  }
 0x30f   : > { %13436 = vmatprep.mubr.bf16.mxu0 %v15250_v57  ;;  %v4956_v57 = vrot.slane %v4954_v20, 1 }
 0x316   : > { %13437 = vmatmul.mubr.bf16.gmra.mrb[36].mxu0 %v15251_v1 }
 0x317   : > { %13440 = vmatprep.mubr.bf16.mxu0 %v15253_v7  ;;  %v4960_v7 = vor.u32 %v4958_v52, %v4956_v57  ;;  %v16387_v52 = vld [vmem:[%s15810_s5 + $0xa8] sm:$0xff]  }
 0x319   : > { %v4965_v9 = vsel %vm2532_vm1, %v4960_v7, %v4964_v60  ;;  %v5034_v7 = vshll.u32 %v16387_v52, 16 }
 0x31e   : > { %13441 = vmatmul.mubr.bf16.gmra.mrb[40].mxu0 %v15254_v2  ;;  %v15285_v2 = vld [vmem:[#allocation6 + $0x230] sm:$0xff]  }
 0x31f   : > { %13444 = vmatprep.mubr.bf16.mxu0 %v15256_v19  ;;  %v4970_v19 = vshll.u32 %v16339_v58, 16 }
 0x321   : > { %v4972_v21 = vrot.slane %v4970_v19, 1 }
 0x323   : > { %v4976_v51 = vor.u32 %v4974_v11, %v4972_v21  ;;  %v16399_v11 = vld [vmem:[%s15810_s5 + $0xb8] sm:$0xff]  }
 0x324   : > { %v5054_v33 = vshrl.u32 %v16399_v11, 16 }
 0x325   : > { %v4981_v23 = vsel %vm2532_vm1, %v4976_v51, %v4980_v17  ;;  %v5050_v51 = vshll.u32 %v16399_v11, 16 }
 0x326   : > { %13445 = vmatmul.mubr.bf16.gmra.mrb[44].mxu0 %v15257_v12  ;;  %v15288_v12 = vld [vmem:[#allocation6 + $0x238] sm:$0xff]  }
 0x327   : > { %13464 = vmatprep.mubr.bf16.mxu0 %v4901_v44  ;;  %v4968_v44 = vor.u32 %v4966_v8, %v4964_v60 }
 0x329   : > { %v4973_v30 = vsel %vm2532_vm1, %v4968_v44, %v4972_v21  ;;  %v16402_v44 = vld [vmem:[%s15810_s5 + $0xc0] sm:$0xff]  }
 0x32e   : > { %13465 = vmatmul.mubr.bf16.vlgmr.msra.gmra.mrb[0].mxu0 %v4909_v35  ;;  %v4990_v35 = vshrl.u32 %v16351_v14, 16 }
 0x32f   : > { %13513 = vmatpush3.bf16.msra.mxu0 %v16263_v34  ;;  %13468 = vmatprep.mubr.bf16.mxu0 %v4917_v39  ;;  %v4948_v34 = vrot.slane %v4946_v24, 1  ;;  %v4988_v39 = vrot.slane %v4986_v3, 1 }
 0x330   : > { %13514 = vmatprep.subr.bf16.mxu0 %v15264_v46 }
 0x331   : > { %v4949_v53 = vsel %vm2532_vm1, %v4944_v41, %v4948_v34  ;;  %v4952_v1 = vor.u32 %v4950_v54, %v4948_v34  ;;  %v4992_v38 = vor.u32 %v4990_v35, %v4988_v39  ;;  %v4989_v45 = vsel %vm2532_vm1, %v4984_v37, %v4988_v39 }
 0x332   : > { %v5018_v41 = vshll.u32 %v16375_v16, 16  ;;  %v5026_v54 = vshll.u32 %v16378_v32, 16  ;;  %v5052_v35 = vrot.slane %v5050_v51, 1 }
 0x333   : > { %13515 = vmatpush3.bf16.msra.mxu0 %v15264_v46  ;;  %v4957_v29 = vsel %vm2532_vm1, %v4952_v1, %v4956_v57  ;;  %v16363_v46 = vld [vmem:[%s15810_s5 + $0x88] sm:$0xff]   ;;  %v4997_v4 = vsel %vm2532_vm1, %v4992_v38, %v4996_v28  ;;  %v16390_v1 = vld [vmem:[%s15810_s5 + $0xb0] sm:$0xff]  }
 0x334   : > { %13516 = vmatprep.subr.bf16.mxu0 %v15269_v5  ;;  %v5002_v42 = vshll.u32 %v16363_v46, 16  ;;  %v5028_v57 = vrot.slane %v5026_v54, 1  ;;  %v5042_v8 = vshll.u32 %v16390_v1, 16  ;;  %v5046_v3 = vshrl.u32 %v16390_v1, 16 }
 0x335   : > { %v5056_v37 = vor.u32 %v5054_v33, %v5052_v35 }
 0x336   : > { %13469 = vmatmul.mubr.bf16.gmra.mrb[4].mxu0 %v4925_v6  ;;  %v5006_v6 = vshrl.u32 %v16363_v46, 16  ;;  %v5044_v21 = vrot.slane %v5042_v8, 1 }
 0x337   : > { %13472 = vmatprep.mubr.bf16.mxu0 %v4933_v15  ;;  %13517 = vmatpush3.bf16.msra.mxu0 %v15269_v5  ;;  %v4998_v5 = vshrl.u32 %v16354_v26, 16  ;;  %v5004_v15 = vrot.slane %v5002_v42, 1  ;;  %v5066_v42 = vshll.u32 %v16411_v36, 16 }
 0x338   : > { %13518 = vmatprep.subr.bf16.mxu0 %v15272_v25  ;;  %v5048_v39 = vor.u32 %v5046_v3, %v5044_v21 }
 0x339   : > { %v5000_v24 = vor.u32 %v4998_v5, %v4996_v28  ;;  %v16414_v28 = vld [vmem:[%s15810_s5 + $0xd0] sm:$0xff]   ;;  %v5062_v5 = vshrl.u32 %v16402_v44, 16 }
 0x33a   : > { %v5074_v22 = vshll.u32 %v16414_v28, 16 }
 0x33b   : > { %13519 = vmatpush3.bf16.msra.mxu0 %v15272_v25  ;;  %v5008_v25 = vor.u32 %v5006_v6, %v5004_v15  ;;  %v5005_v34 = vsel %vm2532_vm1, %v5000_v24, %v5004_v15  ;;  %v5070_v6 = vshrl.u32 %v16411_v36, 16  ;;  %v5068_v15 = vrot.slane %v5066_v42, 1 }
 0x33c   : > { %13520 = vmatprep.subr.bf16.mxu0 %v15277_v50 }
 0x33d   : > { %v5013_v20 = vsel %vm2532_vm1, %v5008_v25, %v5012_v27  ;;  %v16423_v25 = vld [vmem:[%s15810_s5 + $0xd8] ss:$0 sps:$4 sm:$0x11]  }
 0x33e   : > { %13473 = vmatmul.mubr.bf16.gmra.mrb[8].mxu0 %v4941_v31  ;;  %v5022_v31 = vshrl.u32 %v16375_v16, 16 }
 0x33f   : > { %13476 = vmatprep.mubr.bf16.mxu0 %v4949_v53  ;;  %13521 = vmatpush3.bf16.msra.mxu0 %v15277_v50  ;;  %v5014_v50 = vshrl.u32 %v16366_v40, 16  ;;  %v5020_v53 = vrot.slane %v5018_v41, 1  ;;  %v5076_v41 = vrot.slane %v5074_v22, 1 }
 0x340   : > { %13522 = vmatprep.subr.bf16.mxu0 %v15280_v56 }
 0x341   : > { %v5016_v55 = vor.u32 %v5014_v50, %v5012_v27  ;;  %v5072_v27 = vor.u32 %v5070_v6, %v5068_v15 }
 0x343   : > { %13523 = vmatpush3.bf16.msra.mxu0 %v15280_v56  ;;  %v5024_v56 = vor.u32 %v5022_v31, %v5020_v53  ;;  %v5021_v60 = vsel %vm2532_vm1, %v5016_v55, %v5020_v53  ;;  %v5082_v31 = vshll.u32 %v16423_v25, 16  ;;  %v5077_v54 = vsel %vm2532_vm1, %v5072_v27, %v5076_v41 }
 0x344   : > { %13524 = vmatprep.subr.bf16.mxu0 %v15285_v2 }
 0x345   : > { %v5029_v19 = vsel %vm2532_vm1, %v5024_v56, %v5028_v57  ;;  %v5084_v56 = vrot.slane %v5082_v31, 1 }
 0x346   : > { %13477 = vmatmul.mubr.bf16.gmra.mrb[12].mxu0 %v4957_v29  ;;  %v5038_v29 = vshrl.u32 %v16387_v52, 16 }
 0x347   : > { %13480 = vmatprep.mubr.bf16.mxu0 %v4965_v9  ;;  %13525 = vmatpush3.bf16.msra.mxu0 %v15285_v2  ;;  %v5030_v2 = vshrl.u32 %v16378_v32, 16  ;;  %v5036_v9 = vrot.slane %v5034_v7, 1  ;;  %v5453_v7 = vrot.slane %v16284_v63, 1  ;;  %v5461_v63 = vrot.slane %v16305_v13, 1 }
 0x348   : > { %13526 = vmatprep.subr.bf16.mxu0 %v15288_v12  ;;  %v5469_v13 = vrot.slane %v16330_v48, 1  ;;  %v5477_v48 = vrot.slane %v16354_v26, 1  ;;  %v5485_v26 = vrot.slane %v16378_v32, 1  ;;  %v5493_v32 = vrot.slane %v16402_v44, 1 }
 0x349   : > { %v5032_v43 = vor.u32 %v5030_v2, %v5028_v57 }
 0x34b   : > { %13527 = vmatpush3.bf16.msra.mxu0 %v15288_v12  ;;  %v5040_v12 = vor.u32 %v5038_v29, %v5036_v9  ;;  %v5037_v17 = vsel %vm2532_vm1, %v5032_v43, %v5036_v9  ;;  %v5457_v29 = vrot.slane %v16293_v47, 1  ;;  %v5459_v9 = vrot.slane %v16302_v62, 1 }
 0x34c   : > { %v5465_v47 = vrot.slane %v16318_v61, 1  ;;  %v5467_v62 = vrot.slane %v16327_v18, 1  ;;  %v5473_v61 = vrot.slane %v16342_v0, 1  ;;  %v5475_v18 = vrot.slane %v16351_v14, 1 }
 0x34d   : > { %v5460_v43 = vsel %vm1403_vm0, %v5457_v29, %v5459_v9  ;;  %v5481_v0 = vrot.slane %v16366_v40, 1  ;;  %v5483_v14 = vrot.slane %v16375_v16, 1  ;;  %v5489_v40 = vrot.slane %v16390_v1, 1 }
 0x34e   : > { %13481 = vmatmul.mubr.bf16.gmra.mrb[16].mxu0 %v4973_v30  ;;  %v5045_v30 = vsel %vm2532_vm1, %v5040_v12, %v5044_v21  ;;  %v5462_v12 = vsel %vm1403_vm0, %v5459_v9, %v5461_v63  ;;  %v5470_v3 = vsel %vm1403_vm0, %v5467_v62, %v5469_v13  ;;  %v5491_v16 = vrot.slane %v16399_v11, 1 }
 0x34f   : > { %13484 = vmatprep.mubr.bf16.mxu0 %v4981_v23  ;;  %v5058_v23 = vshll.u32 %v16402_v44, 16  ;;  %v5486_v42 = vsel %vm1403_vm0, %v5483_v14, %v5485_v26  ;;  %v5497_v1 = vrot.slane %v16414_v28, 1  ;;  %v5499_v11 = vrot.slane %v16423_v25, 1 }
 0x350   : > { %v5494_v6 = vsel %vm1403_vm0, %v5491_v16, %v5493_v32 }
 0x351   : > { %v5060_v38 = vrot.slane %v5058_v23, 1  ;;  %v5476_v23 = vsel %vm1403_vm0, %v5473_v61, %v5475_v18  ;;  %v5500_v44 = vsel %vm1403_vm0, %v5497_v1, %v5499_v11 }
 0x353   : > { %v5064_v24 = vor.u32 %v5062_v5, %v5060_v38 }
 0x355   : > { %v5069_v50 = vsel %vm2532_vm1, %v5064_v24, %v5068_v15  ;;  %v219_v24 = vlaneseq }
 0x356   : > { %13485 = vmatmul.mubr.bf16.gmra.mrb[20].mxu0 %v4989_v45  ;;  %v5053_v45 = vsel %vm2532_vm1, %v5048_v39, %v5052_v35  ;;  %v5478_v35 = vsel %vm1403_vm0, %v5475_v18, %v5477_v48 }
 0x357   : > { %13488 = vmatprep.mubr.bf16.mxu0 %v4997_v4  ;;  %v5061_v4 = vsel %vm2532_vm1, %v5056_v37, %v5060_v38  ;;  %v5484_v38 = vsel %vm1403_vm0, %v5481_v0, %v5483_v14  ;;  %v16480_v27 = vshrl.u32 %v219_v24, 7 }
 0x359   : > { %v221_v25 = vadd.s32 8, %v16480_v27  ;;  %v16573_v24 = vadd.s32 72, %v16480_v27 }
 0x35e   : > { %13489 = vmatmul.mubr.bf16.gmra.mrb[24].mxu0 %v5005_v34  ;;  %v5431_v34 = vld [vmem:[%s15810_s5 + $0x18] sm:$0xe] }
 0x35f   : > { %13492 = vmatprep.mubr.bf16.mxu0 %v5013_v20  ;;  %v5078_v20 = vshrl.u32 %v16414_v28, 16  ;;  %v11986_v53 = vcombine.low %v5431_v34, %v16278_v59  ;;  %v223_v28 = vadd.s32 24, %v16480_v27 }
 0x361   : > { %v5080_v55 = vor.u32 %v5078_v20, %v5076_v41  ;;  %v5452_v57 = vrot.slane %v11986_v53, 1  ;;  %v222_v41 = vadd.s32 16, %v16480_v27 }
 0x363   : > { %v5454_v2 = vsel %vm1403_vm0, %v5452_v57, %v5453_v7 }
 0x366   : > { %13493 = vmatmul.mubr.bf16.gmra.mrb[28].mxu0 %v5021_v60  ;;  %v5085_v60 = vsel %vm2532_vm1, %v5080_v55, %v5084_v56  ;;  %v226_v55 = vadd.s32 48, %v16480_v27 }
 0x367   : > { %13496 = vmatprep.mubr.bf16.mxu0 %v5029_v19  ;;  %v5455_v19 = vrot.slane %v16290_v10, 1  ;;  %v5463_v10 = vrot.slane %v16314_v49, 1  ;;  %v5471_v49 = vrot.slane %v16339_v58, 1  ;;  %v5479_v58 = vrot.slane %v16363_v46, 1 }
 0x368   : > { %v5487_v46 = vrot.slane %v16387_v52, 1  ;;  %v5495_v52 = vrot.slane %v16411_v36, 1  ;;  %v16483_v34 = vmul.u32.u64.low 2863311531, %v222_v41  ;;  %v16484_v36 = vmul.u32.u64.high 2863311531, %v222_v41, %v16483_v34 }
 0x369   : > { %v5456_v8 = vsel %vm1403_vm0, %v5453_v7, %v5455_v19  ;;  %v5458_v59 = vsel %vm1403_vm0, %v5455_v19, %v5457_v29  ;;  %v5464_v21 = vsel %vm1403_vm0, %v5461_v63, %v5463_v10  ;;  %v5466_v51 = vsel %vm1403_vm0, %v5463_v10, %v5465_v47 }
 0x36a   : > { %v5474_v33 = vsel %vm1403_vm0, %v5471_v49, %v5473_v61  ;;  %v5480_v39 = vsel %vm1403_vm0, %v5477_v48, %v5479_v58  ;;  %v5482_v37 = vsel %vm1403_vm0, %v5479_v58, %v5481_v0  ;;  %v5490_v5 = vsel %vm1403_vm0, %v5487_v46, %v5489_v40 }
 0x36b   : > { %v5496_v22 = vsel %vm1403_vm0, %v5493_v32, %v5495_v52  ;;  %v5498_v15 = vsel %vm1403_vm0, %v5495_v52, %v5497_v1  ;;  %v296_v53 = vshrl.u32 %v16484_v36, 4  ;;  %v16557_v32 = vadd.s32 88, %v16480_v27 }
 0x36c   : > { %v16498_v57 = vmul.u32.u64.low 2863311531, %v221_v25  ;;  %v16499_v7 = vmul.u32.u64.high 2863311531, %v221_v25, %v16498_v57  ;;  %v16502_v19 = vmul.u32.u64.low 2863311531, %v226_v55  ;;  %v16503_v29 = vmul.u32.u64.high 2863311531, %v226_v55, %v16502_v19 }
 0x36d   : > { %v16580_v34 = vadd.s32 112, %v16480_v27  ;;  %v16583_v36 = vadd.s32 96, %v16480_v27 }
 0x36e   : > { %13497 = vmatmul.mubr.bf16.gmra.mrb[32].mxu0 %v5037_v17  ;;  %v5468_v17 = vsel %vm1403_vm0, %v5465_v47, %v5467_v62  ;;  %v285_v47 = vshrl.u32 %v16499_v7, 4  ;;  %v340_v62 = vshrl.u32 %v16503_v29, 4 }
 0x36f   : > { %13500 = vmatprep.mubr.bf16.mxu0 %v5045_v30  ;;  %v5472_v30 = vsel %vm1403_vm0, %v5469_v13, %v5471_v49  ;;  %v16519_v13 = vadd.s32 80, %v16480_v27 }
 0x370   : > { %v286_v49 = vmul.u32 24, %v285_v47  ;;  %v341_v58 = vmul.u32 24, %v340_v62  ;;  %v20538_v47 = vmov 0.0  }
 0x376   : > { %13501 = vmatmul.mubr.bf16.gmra.mrb[36].mxu0 %v5053_v45  ;;  %v5488_v45 = vsel %vm1403_vm0, %v5485_v26, %v5487_v46  ;;  %v287_v26 = vsub.s32 %v221_v25, %v286_v49 }
 0x377   : > { %13504 = vmatprep.mubr.bf16.mxu0 %v5061_v4  ;;  %v5492_v4 = vsel %vm1403_vm0, %v5489_v40, %v5491_v16  ;;  %v342_v16 = vsub.s32 %v226_v55, %v341_v58 }
 0x378   : > { %vm797_vm12 = vcmp.ne.s32.totalorder %v287_v26, 0  ;;  %vm845_vm13 = vcmp.lt.s32.totalorder %v287_v26, 0 }
 0x379   : > { %vm802_vm14 = vcmp.ne.s32.totalorder %v342_v16, 0  ;;  %vm850_vm15 = vcmp.lt.s32.totalorder %v342_v16, 0 }
 0x37e   : > { %13505 = vmatmul.mubr.bf16.gmra.mrb[40].mxu0 %v5069_v50  ;;  %v16488_v50 = vmul.u32.u64.low 2863311531, %v16480_v27  ;;  %v16489_v20 = vmul.u32.u64.high 2863311531, %v16480_v27, %v16488_v50 }
 0x37f   : > { %13508 = vmatprep.mubr.bf16.mxu0 %v5077_v54  ;;  %v16491_v31 = vmul.u32.u64.low 2863311531, %v223_v28  ;;  %v16492_v54 = vmul.u32.u64.high 2863311531, %v223_v28, %v16491_v31  ;;  %v16875_v50 = vadd.s32 184, %v16480_v27 }
 0x380   : > { %v274_v56 = vshrl.u32 %v16489_v20, 4  ;;  %v941_v20 = vadd.s32 24, %v287_v26  ;;  %v946_v31 = vadd.s32 24, %v342_v16 }
 0x386   : > { %13509 = vmatmul.mubr.bf16.gmra.mrb[44].mxu0 %v5085_v60  ;;  %v224_v60 = vadd.s32 32, %v16480_v27 }
 0x387   : > { %13528 = vmatprep.mubr.bf16.mxu0 %v5454_v2  ;;  %v297_v2 = vmul.u32 24, %v296_v53 }
 0x388   : > { %v16506_v9 = vmul.u32.u64.low 2863311531, %v224_v60  ;;  %v16507_v63 = vmul.u32.u64.high 2863311531, %v224_v60, %v16506_v9 }
 0x38a   : > { %v318_v18 = vshrl.u32 %v16507_v63, 4 }
 0x38c   : > { %v319_v46 = vmul.u32 24, %v318_v18 }
 0x38e   : > { %13529 = vmatmul.mubr.bf16.vlgmr.msra.gmra.mrb[0].mxu0 %v5456_v8  ;;  %v307_v8 = vshrl.u32 %v16492_v54, 4 }
 0x38f   : > { %13532 = vmatprep.mubr.bf16.mxu0 %v5458_v59  ;;  %v275_v59 = vmul.u32 24, %v274_v56 }
 0x391   : > { %v276_v10 = vsub.s32 %v16480_v27, %v275_v59 }
 0x393   : > { %vm796_vm4 = vcmp.ne.s32.totalorder %v276_v10, 0  ;;  %vm844_vm6 = vcmp.lt.s32.totalorder %v276_v10, 0  ;;  %v940_v14 = vadd.s32 24, %v276_v10 }
 0x394   : > { %vm16544_vm9 = vmand %vm844_vm6, %vm796_vm4 }
 0x396   : > { %13533 = vmatmul.mubr.bf16.gmra.mrb[4].mxu0 %v5460_v43  ;;  %v298_v43 = vsub.s32 %v222_v41, %v297_v2  ;;  %v16610_v2 = vmul.u32.u64.low 2863311531, %v16580_v34  ;;  %v16611_v19 = vmul.u32.u64.high 2863311531, %v16580_v34, %v16610_v2 }
 0x397   : > { %13536 = vmatprep.mubr.bf16.mxu0 %v5462_v12  ;;  %v308_v12 = vmul.u32 24, %v307_v8  ;;  %v16614_v29 = vmul.u32.u64.low 2863311531, %v16583_v36  ;;  %v16615_v8 = vmul.u32.u64.high 2863311531, %v16583_v36, %v16614_v29 }
 0x398   : > { %vm798_vm2 = vcmp.ne.s32.totalorder %v298_v43, 0  ;;  %vm846_vm3 = vcmp.lt.s32.totalorder %v298_v43, 0 }
 0x399   : > { %vm16525_vm5 = vmand %vm846_vm3, %vm798_vm2 }
 0x39a   : > { %vm16590_vm3 = vmand %vm845_vm13, %vm797_vm12 }
 0x39b   : > { %v989_v59 = vsel %vm16590_vm3, %v941_v20, %v287_v26  ;;  %v428_v26 = vshrl.u32 %v16611_v19, 4 }
 0x39e   : > { %13537 = vmatmul.mubr.bf16.gmra.mrb[8].mxu0 %v5464_v21  ;;  %v16512_v21 = vadd.s32 56, %v16480_v27 }
 0x39f   : > { %13540 = vmatprep.mubr.bf16.mxu0 %v5466_v51  ;;  %v16515_v51 = vadd.s32 40, %v16480_v27 }
 0x3a6   : > { %13541 = vmatmul.mubr.bf16.gmra.mrb[12].mxu0 %v5468_v17  ;;  %v942_v17 = vadd.s32 24, %v298_v43 }
 0x3a7   : > { %13544 = vmatprep.mubr.bf16.mxu0 %v5470_v3  ;;  %v309_v3 = vsub.s32 %v223_v28, %v308_v12 }
 0x3a9   : > { %vm799_vm7 = vcmp.ne.s32.totalorder %v309_v3, 0  ;;  %vm847_vm8 = vcmp.lt.s32.totalorder %v309_v3, 0 }
 0x3aa   : > { %vm16552_vm10 = vmand %vm847_vm8, %vm799_vm7 }
 0x3ae   : > { %13545 = vmatmul.mubr.bf16.gmra.mrb[16].mxu0 %v5472_v30  ;;  %v16522_v61 = vmul.u32.u64.low 2863311531, %v16512_v21  ;;  %v16523_v30 = vmul.u32.u64.high 2863311531, %v16512_v21, %v16522_v61 }
 0x3af   : > { %13548 = vmatprep.mubr.bf16.mxu0 %v5474_v33 }
 0x3b0   : > { %v351_v52 = vshrl.u32 %v16523_v30, 4 }
 0x3b2   : > { %v352_v54 = vmul.u32 24, %v351_v52 }
 0x3b4   : > { %v353_v63 = vsub.s32 %v16512_v21, %v352_v54 }
 0x3b6   : > { %13549 = vmatmul.mubr.bf16.gmra.mrb[20].mxu0 %v5476_v23  ;;  %v16531_v48 = vmul.u32.u64.low 2863311531, %v16515_v51  ;;  %v16532_v23 = vmul.u32.u64.high 2863311531, %v16515_v51, %v16531_v48  ;;  %vm851_vm12 = vcmp.lt.s32.totalorder %v353_v63, 0  ;;  %v947_v18 = vadd.s32 24, %v353_v63 }
 0x3b7   : > { %13552 = vmatprep.mubr.bf16.mxu0 %v5478_v35  ;;  %v16535_v35 = vadd.s32 64, %v16480_v27  ;;  %v16663_v48 = vadd.s32 104, %v16480_v27 }
 0x3be   : > { %13553 = vmatmul.mubr.bf16.gmra.mrb[24].mxu0 %v5480_v39  ;;  %v16538_v0 = vmul.u32.u64.low 2863311531, %v16519_v13  ;;  %v16539_v39 = vmul.u32.u64.high 2863311531, %v16519_v13, %v16538_v0 }
 0x3bf   : > { %13556 = vmatprep.mubr.bf16.mxu0 %v5482_v37  ;;  %v990_v37 = vsel %vm16525_vm5, %v942_v17, %v298_v43  ;;  %vm16598_vm5 = vmand %vm850_vm15, %vm802_vm14 }
 0x3c0   : > { %vm16559_vm11 = vcmp.lt.s32.totalorder %v990_v37, 16  ;;  %v384_v11 = vshrl.u32 %v16539_v39, 4  ;;  %v994_v9 = vsel %vm16598_vm5, %v946_v31, %v342_v16  ;;  %v16677_v37 = vadd.s32 144, %v16480_v27 }
 0x3c1   : > { %v16629_v62 = vsel %vm16559_vm11, 1.0, %v20538_v47  ;;  %vm803_vm11 = vcmp.ne.s32.totalorder %v353_v63, 0 }
 0x3c2   : > { %v385_v57 = vmul.u32 24, %v384_v11  ;;  %20779 = vst [vmem:[#allocation13_spill] sm:$0xff] %v16629_v62 }
 0x3c4   : > { %v386_v30 = vsub.s32 %v16519_v13, %v385_v57 }
 0x3c6   : > { %13557 = vmatmul.mubr.bf16.gmra.mrb[28].mxu0 %v5484_v38  ;;  %vm806_vm15 = vcmp.ne.s32.totalorder %v386_v30, 0  ;;  %v406_v38 = vshrl.u32 %v16615_v8, 4  ;;  %vm854_vm3 = vcmp.lt.s32.totalorder %v386_v30, 0 }
 0x3c7   : > { %13560 = vmatprep.mubr.bf16.mxu0 %v5486_v42  ;;  %v943_v42 = vadd.s32 24, %v309_v3 }
 0x3c9   : > { %v991_v1 = vsel %vm16552_vm10, %v943_v42, %v309_v3  ;;  %v16650_v3 = vadd.s32 120, %v16480_v27  ;;  %vm16656_vm10 = vcmp.lt.s32.totalorder %v994_v9, 16  ;;  %v16766_v9 = vadd.s32 136, %v16480_v27 }
 0x3ca   : > { %vm16594_vm4 = vcmp.lt.s32.totalorder %v991_v1, 16  ;;  %v16706_v52 = vmul.u32.u64.low 2863311531, %v16677_v37  ;;  %v16707_v1 = vmul.u32.u64.high 2863311531, %v16677_v37, %v16706_v52  ;;  %v16733_v25 = vsel %vm16656_vm10, 1.0, %v20538_v47 }
 0x3cb   : > { %v16639_v21 = vsel %vm16594_vm4, 1.0, %v20538_v47  ;;  %v16673_v0 = vmul.u32.u64.low 2863311531, %v16650_v3  ;;  %v16674_v39 = vmul.u32.u64.high 2863311531, %v16650_v3, %v16673_v0  ;;  %20797 = vst [vmem:[#allocation17_spill] sm:$0xff] %v16733_v25 }
 0x3cc   : > { %20781 = vst [vmem:[#allocation15_spill] sm:$0xff] %v16639_v21 }
 0x3cd   : > { %v439_v8 = vshrl.u32 %v16674_v39, 4 }
 0x3ce   : > { %13561 = vmatmul.mubr.bf16.gmra.mrb[32].mxu0 %v5488_v45  ;;  %v16549_v40 = vmul.u32.u64.low 2863311531, %v16535_v35  ;;  %v16550_v45 = vmul.u32.u64.high 2863311531, %v16535_v35, %v16549_v40 }
 0x3cf   : > { %13564 = vmatprep.mubr.bf16.mxu0 %v5490_v5  ;;  %v16691_v40 = vadd.s32 128, %v16480_v27  ;;  %v16695_v5 = vadd.s32 152, %v16480_v27 }
 0x3d0   : > { %v362_v56 = vshrl.u32 %v16550_v45, 4 }
 0x3d1   : > { %v16727_v31 = vmul.u32.u64.low 2863311531, %v16691_v40  ;;  %v16728_v54 = vmul.u32.u64.high 2863311531, %v16691_v40, %v16727_v31 }
 0x3d3   : > { %v450_v61 = vshrl.u32 %v16728_v54, 4 }
 0x3d5   : > { %v451_v52 = vmul.u32 24, %v450_v61 }
 0x3d6   : > { %13565 = vmatmul.mubr.bf16.gmra.mrb[36].mxu0 %v5492_v4  ;;  %v950_v4 = vadd.s32 24, %v386_v30 }
 0x3d7   : > { %13568 = vmatprep.mubr.bf16.mxu0 %v5494_v6  ;;  %v988_v6 = vsel %vm16544_vm9, %v940_v14, %v276_v10  ;;  %v363_v10 = vmul.u32 24, %v362_v56  ;;  %vm16652_vm9 = vcmp.lt.s32.totalorder %v989_v59, 16  ;;  %v452_v54 = vsub.s32 %v16691_v40, %v451_v52 }
 0x3d8   : > { %vm16585_vm2 = vcmp.lt.s32.totalorder %v988_v6, 16  ;;  %v16719_v28 = vsel %vm16652_vm9, 1.0, %v20538_v47 }
 0x3d9   : > { %v16634_v17 = vsel %vm16585_vm2, 1.0, %v20538_v47  ;;  %v364_v58 = vsub.s32 %v16535_v35, %v363_v10  ;;  %vm16682_vm2 = vmand %vm851_vm12, %vm803_vm11  ;;  %20794 = vst [vmem:[#allocation16_spill] sm:$0xff] %v16719_v28  ;;  %v956_v10 = vadd.s32 24, %v452_v54 }
 0x3da   : > { %20780 = vst [vmem:[#allocation14_spill] sm:$0xff] %v16634_v17 }
 0x3db   : > { %vm804_vm4 = vcmp.ne.s32.totalorder %v364_v58, 0  ;;  %vm852_vm5 = vcmp.lt.s32.totalorder %v364_v58, 0  ;;  %v948_v11 = vadd.s32 24, %v364_v58 }
 0x3de   : > { %13569 = vmatmul.mubr.bf16.gmra.mrb[40].mxu0 %v5496_v22  ;;  %v16568_v22 = vsub.s32 %v224_v60, %v319_v46  ;;  %v16606_v7 = vmul.u32.u64.low 2863311531, %v16573_v24  ;;  %v16607_v60 = vmul.u32.u64.high 2863311531, %v16573_v24, %v16606_v7 }
 0x3df   : > { %13572 = vmatprep.mubr.bf16.mxu0 %v5498_v15  ;;  %v329_v15 = vshrl.u32 %v16532_v23, 4  ;;  %v16687_v35 = vmul.u32.u64.low 2863311531, %v16663_v48  ;;  %v16688_v46 = vmul.u32.u64.high 2863311531, %v16663_v48, %v16687_v35 }
 0x3e0   : > { %vm800_vm6 = vcmp.ne.s32.totalorder %v16568_v22, 0  ;;  %vm848_vm7 = vcmp.lt.s32.totalorder %v16568_v22, 0  ;;  %v944_v43 = vadd.s32 24, %v16568_v22  ;;  %v373_v13 = vshrl.u32 %v16607_v60, 4 }
 0x3e1   : > { %v330_v55 = vmul.u32 24, %v329_v15  ;;  %vm16645_vm8 = vmand %vm848_vm7, %vm800_vm6  ;;  %v417_v59 = vshrl.u32 %v16688_v46, 4 }
 0x3e2   : > { %v992_v23 = vsel %vm16645_vm8, %v944_v43, %v16568_v22  ;;  %v374_v6 = vmul.u32 24, %v373_v13  ;;  %v995_v22 = vsel %vm16682_vm2, %v947_v18, %v353_v63  ;;  %vm16712_vm7 = vmand %vm854_vm3, %vm806_vm15  ;;  %v17042_v63 = vadd.s32 224, %v16480_v27 }
 0x3e3   : > { %v16624_v12 = vsub.s32 %v16515_v51, %v330_v55  ;;  %vm16721_vm8 = vmand %vm852_vm5, %vm804_vm4  ;;  %vm16735_vm11 = vcmp.lt.s32.totalorder %v992_v23, 16  ;;  %v16740_v55 = vmul.u32.u64.low 2863311531, %v16695_v5  ;;  %v16741_v56 = vmul.u32.u64.high 2863311531, %v16695_v5, %v16740_v55 }
 0x3e4   : > { %vm16743_vm9 = vcmp.lt.s32.totalorder %v995_v22, 16  ;;  %v998_v7 = vsel %vm16712_vm7, %v950_v4, %v386_v30  ;;  %v16753_v60 = vsub.s32 %v16573_v24, %v374_v6  ;;  %v996_v2 = vsel %vm16721_vm8, %v948_v11, %v364_v58 }
 0x3e5   : > { %vm801_vm13 = vcmp.ne.s32.totalorder %v16624_v12, 0  ;;  %vm849_vm14 = vcmp.lt.s32.totalorder %v16624_v12, 0  ;;  %v945_v45 = vadd.s32 24, %v16624_v12  ;;  %vm16779_vm15 = vcmp.lt.s32.totalorder %v996_v2, 16 }
 0x3e6   : > { %13573 = vmatmul.mubr.bf16.gmra.mrb[44].mxu0 %v5500_v44  ;;  %v16576_v44 = vmul.u32.u64.low 2863311531, %v16557_v32  ;;  %v16577_v41 = vmul.u32.u64.high 2863311531, %v16557_v32, %v16576_v44  ;;  %vm16701_vm6 = vmand %vm849_vm14, %vm801_vm13  ;;  %vm16772_vm14 = vcmp.lt.s32.totalorder %v998_v7, 16  ;;  %vm805_vm2 = vcmp.ne.s32.totalorder %v16753_v60, 0 }
 0x3e7   : > { %v429_v44 = vmul.u32 24, %v428_v26  ;;  %vm853_vm3 = vcmp.lt.s32.totalorder %v16753_v60, 0  ;;  %v440_v51 = vmul.u32 24, %v439_v8  ;;  %v483_v18 = vshrl.u32 %v16741_v56, 4 }
 0x3e8   : > { %v395_v33 = vshrl.u32 %v16577_v41, 4  ;;  %v407_v41 = vmul.u32 24, %v406_v38  ;;  %v418_v49 = vmul.u32 24, %v417_v59  ;;  %v949_v39 = vadd.s32 24, %v16753_v60 }
 0x3e9   : > { %v16758_v19 = vsub.s32 %v16580_v34, %v429_v44  ;;  %v16817_v38 = vsel %vm16735_vm11, 1.0, %v20538_v47  ;;  %v16822_v42 = vsel %vm16743_vm9, 1.0, %v20538_v47  ;;  %v16842_v4 = vsel %vm16772_vm14, 1.0, %v20538_v47 }
 0x3ea   : > { %v396_v14 = vmul.u32 24, %v395_v33  ;;  %v16761_v29 = vsub.s32 %v16583_v36, %v407_v41  ;;  %v16777_v36 = vadd.s32 176, %v16480_v27  ;;  %20812 = vst [vmem:[#allocation18_spill] sm:$0xff] %v16817_v38  ;;  %20813 = vst [vmem:[#allocation19_spill] sm:$0xff] %v16822_v42  ;;  %v484_v15 = vmul.u32 24, %v483_v18 }
 0x3eb   : > { %vm810_vm5 = vcmp.ne.s32.totalorder %v16758_v19, 0  ;;  %v16795_v30 = vmul.u32.u64.low 2863311531, %v16766_v9  ;;  %v16796_v33 = vmul.u32.u64.high 2863311531, %v16766_v9, %v16795_v30  ;;  %20817 = vst [vmem:[#allocation21_spill] sm:$0xff] %v16842_v4  ;;  %v16865_v11 = vadd.s32 160, %v16480_v27 }
 0x3ec   : > { %v397_v20 = vsub.s32 %v16557_v32, %v396_v14  ;;  %v993_v32 = vsel %vm16701_vm6, %v945_v45, %v16624_v12  ;;  %v472_v12 = vshrl.u32 %v16707_v1, 4  ;;  %vm858_vm6 = vcmp.lt.s32.totalorder %v16758_v19, 0 }
 0x3ed   : > { %vm16768_vm13 = vcmp.lt.s32.totalorder %v993_v32, 16  ;;  %vm808_vm7 = vcmp.ne.s32.totalorder %v16761_v29, 0  ;;  %vm856_vm8 = vcmp.lt.s32.totalorder %v16761_v29, 0  ;;  %v954_v14 = vadd.s32 24, %v16758_v19 }
 0x3ee   : > { %vm807_vm10 = vcmp.ne.s32.totalorder %v397_v20, 0  ;;  %vm855_vm12 = vcmp.lt.s32.totalorder %v397_v20, 0  ;;  %v951_v34 = vadd.s32 24, %v397_v20  ;;  %v473_v26 = vmul.u32 24, %v472_v12  ;;  %vm16848_vm11 = vmand %vm856_vm8, %vm808_vm7 }
 0x3ef   : > { %vm16786_vm4 = vmand %vm855_vm12, %vm807_vm10  ;;  %v16801_v23 = vmul.u32.u64.low 2863311531, %v16777_v36  ;;  %v16802_v58 = vmul.u32.u64.high 2863311531, %v16777_v36, %v16801_v23  ;;  %v952_v46 = vadd.s32 24, %v16761_v29  ;;  %v441_v45 = vsub.s32 %v16650_v3, %v440_v51 }
 0x3f0   : > { %v999_v13 = vsel %vm16786_vm4, %v951_v34, %v397_v20  ;;  %vm16808_vm10 = vmand %vm853_vm3, %vm805_vm2  ;;  %v16837_v16 = vsel %vm16768_vm13, 1.0, %v20538_v47  ;;  %v16853_v3 = vsub.s32 %v16663_v48, %v418_v49  ;;  %v16858_v1 = vsel %vm16779_vm15, 1.0, %v20538_v47 }
 0x3f1   : > { %vm16828_vm12 = vmand %vm858_vm6, %vm810_vm5  ;;  %20816 = vst [vmem:[#allocation20_spill] sm:$0xff] %v16837_v16  ;;  %vm16860_vm9 = vcmp.lt.s32.totalorder %v999_v13, 16  ;;  %v997_v44 = vsel %vm16808_vm10, %v949_v39, %v16753_v60  ;;  %v474_v41 = vsub.s32 %v16677_v37, %v473_v26  ;;  %v1000_v20 = vsel %vm16848_vm11, %v952_v46, %v16761_v29 }
 0x3f2   : > { %20820 = vst [vmem:[#allocation22_spill] sm:$0xff] %v16858_v1  ;;  %v1002_v48 = vsel %vm16828_vm12, %v954_v14, %v16758_v19  ;;  %vm811_vm13 = vcmp.ne.s32.totalorder %v441_v45, 0  ;;  %vm859_vm14 = vcmp.lt.s32.totalorder %v441_v45, 0  ;;  %v955_v31 = vadd.s32 24, %v441_v45 }
 0x3f3   : > { %vm809_vm15 = vcmp.ne.s32.totalorder %v16853_v3, 0  ;;  %vm857_vm2 = vcmp.lt.s32.totalorder %v16853_v3, 0  ;;  %v461_v53 = vshrl.u32 %v16796_v33, 4  ;;  %v16885_v37 = vsub.s32 %v16695_v5, %v484_v15  ;;  %vm16892_vm3 = vmand %vm859_vm14, %vm811_vm13 }
 0x3f4   : > { %v516_v55 = vshrl.u32 %v16802_v58, 4  ;;  %v16889_v56 = vmul.u32.u64.low 2863311531, %v16865_v11  ;;  %v16890_v57 = vmul.u32.u64.high 2863311531, %v16865_v11, %v16889_v56  ;;  %vm814_vm4 = vcmp.ne.s32.totalorder %v474_v41, 0  ;;  %vm16917_vm7 = vmand %vm857_vm2, %vm809_vm15 }
 0x3f5   : > { %vm862_vm5 = vcmp.lt.s32.totalorder %v474_v41, 0  ;;  %v16897_v7 = vmul.u32.u64.low 2863311531, %v16875_v50  ;;  %v16898_v40 = vmul.u32.u64.high 2863311531, %v16875_v50, %v16897_v7  ;;  %v16903_v5 = vsel %vm16860_vm9, 1.0, %v20538_v47 }
 0x3f6   : > { %20825 = vst [vmem:[#allocation23_spill] sm:$0xff] %v16903_v5  ;;  %vm16905_vm6 = vcmp.lt.s32.totalorder %v997_v44, 16  ;;  %v16910_v2 = vadd.s32 168, %v16480_v27  ;;  %v16913_v19 = vadd.s32 208, %v16480_v27  ;;  %v953_v8 = vadd.s32 24, %v16853_v3  ;;  %vm16933_vm9 = vmand %vm862_vm5, %vm814_vm4 }
 0x3f7   : > { %v958_v59 = vadd.s32 24, %v474_v41  ;;  %vm812_vm8 = vcmp.ne.s32.totalorder %v452_v54, 0  ;;  %vm860_vm10 = vcmp.lt.s32.totalorder %v452_v54, 0  ;;  %vm16922_vm12 = vcmp.lt.s32.totalorder %v1002_v48, 16 }
 0x3f8   : > { %vm16926_vm11 = vcmp.lt.s32.totalorder %v1000_v20, 16  ;;  %v1003_v34 = vsel %vm16892_vm3, %v955_v31, %v441_v45  ;;  %v462_v12 = vmul.u32 24, %v461_v53  ;;  %vm815_vm13 = vcmp.ne.s32.totalorder %v16885_v37, 0  ;;  %vm16939_vm15 = vmand %vm860_vm10, %vm812_vm8 }
 0x3f9   : > { %vm863_vm14 = vcmp.lt.s32.totalorder %v16885_v37, 0  ;;  %v517_v51 = vmul.u32 24, %v516_v55  ;;  %v16944_v61 = vmul.u32.u64.low 2863311531, %v16910_v2  ;;  %v16945_v30 = vmul.u32.u64.high 2863311531, %v16910_v2, %v16944_v61 }
 0x3fa   : > { %v16948_v33 = vmul.u32.u64.low 2863311531, %v16913_v19  ;;  %v16949_v18 = vmul.u32.u64.high 2863311531, %v16913_v19, %v16948_v33  ;;  %vm1051_vm2 = vcmp.lt.s32.totalorder %v1003_v34, 16  ;;  %v1001_v23 = vsel %vm16917_vm7, %v953_v8, %v16853_v3  ;;  %vm16982_vm3 = vmand %vm863_vm14, %vm815_vm13 }
 0x3fb   : > { %v1006_v58 = vsel %vm16933_vm9, %v958_v59, %v474_v41  ;;  %v16957_v13 = vadd.s32 192, %v16480_v27  ;;  %v16962_v0 = vsel %vm16905_vm6, 1.0, %v20538_v47  ;;  %v16967_v39 = vsel %vm16922_vm12, 1.0, %v20538_v47 }
 0x3fc   : > { %20838 = vst [vmem:[#allocation24_spill] sm:$0xff] %v16962_v0  ;;  %20839 = vst [vmem:[#allocation25_spill] sm:$0xff] %v16967_v39  ;;  %v959_v14 = vadd.s32 24, %v16885_v37  ;;  %v494_v26 = vshrl.u32 %v16890_v57, 4  ;;  %v16974_v35 = vsel %vm16926_vm11, 1.0, %v20538_v47  ;;  %v1004_v46 = vsel %vm16939_vm15, %v956_v10, %v452_v54 }
 0x3fd   : > { %20840 = vst [vmem:[#allocation26_spill] sm:$0xff] %v16974_v35  ;;  %v463_v6 = vsub.s32 %v16766_v9, %v462_v12  ;;  %v527_v3 = vshrl.u32 %v16898_v40, 4  ;;  %v16989_v52 = vsel %vm1051_vm2, 1.0, %v20538_v47  ;;  %vm16991_vm4 = vcmp.lt.s32.totalorder %v1001_v23, 16 }
 0x3fe   : > { %20843 = vst [vmem:[#allocation27_spill] sm:$0xff] %v16989_v52  ;;  %vm16995_vm5 = vcmp.lt.s32.totalorder %v1006_v58, 16  ;;  %v518_v44 = vsub.s32 %v16777_v36, %v517_v51  ;;  %v17001_v48 = vmul.u32.u64.low 2863311531, %v16957_v13  ;;  %v17002_v41 = vmul.u32.u64.high 2863311531, %v16957_v13, %v17001_v48 }
 0x3ff   : > { %v17005_v9 = vadd.s32 216, %v16480_v27  ;;  %v17008_v20 = vadd.s32 200, %v16480_v27  ;;  %vm17010_vm6 = vcmp.lt.s32.totalorder %v1004_v46, 16  ;;  %v1007_v54 = vsel %vm16982_vm3, %v959_v14, %v16885_v37 }
 0x400   : > { %v495_v53 = vmul.u32 24, %v494_v26  ;;  %v17018_v36 = vadd.s32 240, %v16480_v27  ;;  %vm813_vm7 = vcmp.ne.s32.totalorder %v463_v6, 0  ;;  %vm861_vm8 = vcmp.lt.s32.totalorder %v463_v6, 0 }
 0x401   : > { %v957_v55 = vadd.s32 24, %v463_v6  ;;  %v528_v56 = vmul.u32 24, %v527_v3  ;;  %vm818_vm10 = vcmp.ne.s32.totalorder %v518_v44, 0  ;;  %vm866_vm12 = vcmp.lt.s32.totalorder %v518_v44, 0  ;;  %vm17030_vm11 = vmand %vm861_vm8, %vm813_vm7 }
 0x402   : > { %v505_v57 = vshrl.u32 %v16945_v30, 4  ;;  %v560_v32 = vshrl.u32 %v16949_v18, 4  ;;  %v17023_v7 = vmul.u32.u64.low 2863311531, %v17005_v9  ;;  %v17024_v40 = vmul.u32.u64.high 2863311531, %v17005_v9, %v17023_v7  ;;  %vm17064_vm9 = vmand %vm866_vm12, %vm818_vm10 }
 0x403   : > { %v17027_v37 = vmul.u32.u64.low 2863311531, %v17008_v20  ;;  %v17028_v60 = vmul.u32.u64.high 2863311531, %v17008_v20, %v17027_v37  ;;  %v17035_v8 = vsub.s32 %v16865_v11, %v495_v53  ;;  %v17047_v34 = vsel %vm16991_vm4, 1.0, %v20538_v47 }
 0x404   : > { %v17038_v59 = vmul.u32.u64.low 2863311531, %v17018_v36  ;;  %v17039_v24 = vmul.u32.u64.high 2863311531, %v17018_v36, %v17038_v59  ;;  %20852 = vst [vmem:[#allocation28_spill] sm:$0xff] %v17047_v34  ;;  %v17052_v43 = vsel %vm16995_vm5, 1.0, %v20538_v47  ;;  %v962_v12 = vadd.s32 24, %v518_v44 }
 0x405   : > { %20853 = vst [vmem:[#allocation29_spill] sm:$0xff] %v17052_v43  ;;  %v17055_v11 = vadd.s32 248, %v16480_v27  ;;  %v17060_v10 = vsel %vm17010_vm6, 1.0, %v20538_v47  ;;  %v506_v49 = vmul.u32 24, %v505_v57  ;;  %v561_v61 = vmul.u32 24, %v560_v32 }
 0x406   : > { %20854 = vst [vmem:[#allocation30_spill] sm:$0xff] %v17060_v10  ;;  %v17069_v30 = vadd.s32 232, %v16480_v27  ;;  %vm17071_vm13 = vcmp.lt.s32.totalorder %v1007_v54, 16  ;;  %v1005_v18 = vsel %vm17030_vm11, %v957_v55, %v463_v6  ;;  %v17078_v23 = vsub.s32 %v16875_v50, %v528_v56 }
 0x407   : > { %v538_v58 = vshrl.u32 %v17002_v41, 4  ;;  %vm816_vm14 = vcmp.ne.s32.totalorder %v17035_v8, 0  ;;  %vm864_vm15 = vcmp.lt.s32.totalorder %v17035_v8, 0  ;;  %v1010_v46 = vsel %vm17064_vm9, %v962_v12, %v518_v44 }
 0x408   : > { %v17084_v14 = vmul.u32.u64.low 2863311531, %v17042_v63  ;;  %v17085_v26 = vmul.u32.u64.high 2863311531, %v17042_v63, %v17084_v14  ;;  %v960_v45 = vadd.s32 24, %v17035_v8  ;;  %v17095_v50 = vsub.s32 %v16910_v2, %v506_v49  ;;  %vm17109_vm2 = vmand %vm864_vm15, %vm816_vm14 }
 0x409   : > { %v17091_v6 = vmul.u32.u64.low 2863311531, %v17055_v11  ;;  %v17092_v3 = vmul.u32.u64.high 2863311531, %v17055_v11, %v17091_v6  ;;  %v17098_v22 = vsub.s32 %v16913_v19, %v561_v61  ;;  %v17107_v44 = vsel %vm17071_vm13, 1.0, %v20538_v47 }
 0x40a   : > { %v17101_v15 = vmul.u32.u64.low 2863311531, %v17069_v30  ;;  %v17102_v48 = vmul.u32.u64.high 2863311531, %v17069_v30, %v17101_v15  ;;  %20859 = vst [vmem:[#allocation31_spill] sm:$0xff] %v17107_v44  ;;  %v539_v31 = vmul.u32 24, %v538_v58  ;;  %v571_v2 = vshrl.u32 %v17024_v40, 4 }
 0x40b   : > { %v549_v54 = vshrl.u32 %v17028_v60, 4  ;;  %vm17115_vm3 = vcmp.lt.s32.totalorder %v1005_v18, 16  ;;  %vm17119_vm4 = vcmp.lt.s32.totalorder %v1010_v46, 16  ;;  %v604_v55 = vshrl.u32 %v17039_v24, 4 }
 0x40c   : > { %v17125_v56 = vadd.s32 272, %v16480_v27  ;;  %vm819_vm5 = vcmp.ne.s32.totalorder %v17078_v23, 0  ;;  %vm867_vm6 = vcmp.lt.s32.totalorder %v17078_v23, 0  ;;  %v963_v57 = vadd.s32 24, %v17078_v23 }
 0x40d   : > { %v17131_v32 = vadd.s32 256, %v16480_v27  ;;  %v1008_v7 = vsel %vm17109_vm2, %v960_v45, %v17035_v8  ;;  %vm817_vm7 = vcmp.ne.s32.totalorder %v17095_v50, 0  ;;  %vm865_vm8 = vcmp.lt.s32.totalorder %v17095_v50, 0  ;;  %vm17143_vm11 = vmand %vm867_vm6, %vm819_vm5 }
 0x40e   : > { %vm822_vm10 = vcmp.ne.s32.totalorder %v17098_v22, 0  ;;  %vm870_vm12 = vcmp.lt.s32.totalorder %v17098_v22, 0  ;;  %v17141_v40 = vsub.s32 %v16957_v13, %v539_v31  ;;  %v572_v37 = vmul.u32 24, %v571_v2  ;;  %vm17179_vm13 = vmand %vm865_vm8, %vm817_vm7 }
 0x40f   : > { %v550_v60 = vmul.u32 24, %v549_v54  ;;  %v605_v59 = vmul.u32 24, %v604_v55  ;;  %v582_v8 = vshrl.u32 %v17085_v26, 4  ;;  %v615_v51 = vshrl.u32 %v17092_v3, 4  ;;  %vm17191_vm14 = vmand %vm870_vm12, %vm822_vm10 }
 0x410   : > { %v17149_v24 = vmul.u32.u64.low 2863311531, %v17125_v56  ;;  %v17150_v12 = vmul.u32.u64.high 2863311531, %v17125_v56, %v17149_v24  ;;  %v17154_v49 = vmul.u32.u64.low 2863311531, %v17131_v32  ;;  %v17155_v61 = vmul.u32.u64.high 2863311531, %v17131_v32, %v17154_v49 }
 0x411   : > { %v17158_v13 = vadd.s32 280, %v16480_v27  ;;  %v17163_v33 = vsel %vm17115_vm3, 1.0, %v20538_v47  ;;  %v17168_v18 = vsel %vm17119_vm4, 1.0, %v20538_v47  ;;  %v961_v58 = vadd.s32 24, %v17095_v50 }
 0x412   : > { %20868 = vst [vmem:[#allocation32_spill] sm:$0xff] %v17163_v33  ;;  %20869 = vst [vmem:[#allocation33_spill] sm:$0xff] %v17168_v18  ;;  %v593_v14 = vshrl.u32 %v17102_v48, 4  ;;  %vm1056_vm9 = vcmp.lt.s32.totalorder %v1008_v7, 16  ;;  %v1011_v26 = vsel %vm17143_vm11, %v963_v57, %v17078_v23  ;;  %v966_v45 = vadd.s32 24, %v17098_v22 }
 0x413   : > { %v17185_v6 = vsub.s32 %v17005_v9, %v572_v37  ;;  %vm820_vm15 = vcmp.ne.s32.totalorder %v17141_v40, 0  ;;  %vm868_vm2 = vcmp.lt.s32.totalorder %v17141_v40, 0  ;;  %v17198_v23 = vsub.s32 %v17008_v20, %v550_v60 }
 0x414   : > { %v583_v15 = vmul.u32 24, %v582_v8  ;;  %v17201_v48 = vsub.s32 %v17018_v36, %v605_v59  ;;  %v616_v9 = vmul.u32 24, %v615_v51  ;;  %v17208_v2 = vsel %vm1056_vm9, 1.0, %v20538_v47  ;;  %vm17227_vm6 = vmand %vm868_vm2, %vm820_vm15 }
 0x415   : > { %v17204_v41 = vmul.u32.u64.low 2863311531, %v17158_v13  ;;  %v17205_v31 = vmul.u32.u64.high 2863311531, %v17158_v13, %v17204_v41  ;;  %20874 = vst [vmem:[#allocation34_spill] sm:$0xff] %v17208_v2  ;;  %vm17210_vm3 = vcmp.lt.s32.totalorder %v1011_v26, 16  ;;  %v1009_v20 = vsel %vm17179_vm13, %v961_v58, %v17095_v50 }
 0x416   : > { %v594_v19 = vmul.u32 24, %v593_v14  ;;  %v1014_v36 = vsel %vm17191_vm14, %v966_v45, %v17098_v22  ;;  %v964_v53 = vadd.s32 24, %v17141_v40  ;;  %vm823_vm4 = vcmp.ne.s32.totalorder %v17185_v6, 0 }
 0x417   : > { %vm871_vm5 = vcmp.lt.s32.totalorder %v17185_v6, 0  ;;  %vm821_vm7 = vcmp.ne.s32.totalorder %v17198_v23, 0  ;;  %vm869_vm8 = vcmp.lt.s32.totalorder %v17198_v23, 0  ;;  %v584_v50 = vsub.s32 %v17042_v63, %v583_v15 }
 0x418   : > { %v648_v22 = vshrl.u32 %v17150_v12, 4  ;;  %vm826_vm10 = vcmp.ne.s32.totalorder %v17201_v48, 0  ;;  %vm874_vm12 = vcmp.lt.s32.totalorder %v17201_v48, 0  ;;  %v17238_v57 = vsub.s32 %v17055_v11, %v616_v9  ;;  %vm17250_vm9 = vmand %vm871_vm5, %vm823_vm4 }
 0x419   : > { %v626_v7 = vshrl.u32 %v17155_v61, 4  ;;  %v17244_v37 = vsel %vm17210_vm3, 1.0, %v20538_v47  ;;  %vm17246_vm11 = vcmp.lt.s32.totalorder %v1009_v20, 16  ;;  %v967_v29 = vadd.s32 24, %v17185_v6  ;;  %vm17267_vm14 = vmand %vm869_vm8, %vm821_vm7 }
 0x41a   : > { %20879 = vst [vmem:[#allocation35_spill] sm:$0xff] %v17244_v37  ;;  %v595_v11 = vsub.s32 %v17069_v30, %v594_v19  ;;  %vm17256_vm13 = vcmp.lt.s32.totalorder %v1014_v36, 16  ;;  %v1012_v8 = vsel %vm17227_vm6, %v964_v53, %v17141_v40  ;;  %v965_v12 = vadd.s32 24, %v17198_v23  ;;  %vm17275_vm15 = vmand %vm874_vm12, %vm826_vm10 }
 0x41b   : > { %v970_v30 = vadd.s32 24, %v17201_v48  ;;  %vm824_vm2 = vcmp.ne.s32.totalorder %v584_v50, 0  ;;  %vm872_vm3 = vcmp.lt.s32.totalorder %v584_v50, 0  ;;  %v649_v40 = vmul.u32 24, %v648_v22 }
 0x41c   : > { %v17280_v49 = vadd.s32 264, %v16480_v27  ;;  %vm827_vm4 = vcmp.ne.s32.totalorder %v17238_v57, 0  ;;  %vm875_vm5 = vcmp.lt.s32.totalorder %v17238_v57, 0  ;;  %v627_v61 = vmul.u32 24, %v626_v7  ;;  %vm17297_vm8 = vmand %vm872_vm3, %vm824_vm2 }
 0x41d   : > { %v659_v58 = vshrl.u32 %v17205_v31, 4  ;;  %v1015_v14 = vsel %vm17250_vm9, %v967_v29, %v17185_v6  ;;  %vm825_vm6 = vcmp.ne.s32.totalorder %v595_v11, 0  ;;  %vm873_vm7 = vcmp.lt.s32.totalorder %v595_v11, 0  ;;  %vm17302_vm10 = vmand %vm875_vm5, %vm827_vm4 }
 0x41e   : > { %v17289_v26 = vadd.s32 304, %v16480_v27  ;;  %v1013_v46 = vsel %vm17267_vm14, %v965_v12, %v17198_v23  ;;  %v1018_v45 = vsel %vm17275_vm15, %v970_v30, %v17201_v48  ;;  %v968_v15 = vadd.s32 24, %v584_v50  ;;  %vm17321_vm12 = vmand %vm873_vm7, %vm825_vm6 }
 0x41f   : > { %v971_v6 = vadd.s32 24, %v17238_v57  ;;  %v969_v41 = vadd.s32 24, %v595_v11  ;;  %v650_v31 = vsub.s32 %v17125_v56, %v649_v40  ;;  %v17314_v48 = vsel %vm17246_vm11, 1.0, %v20538_v47 }
 0x420   : > { %v17308_v23 = vmul.u32.u64.low 2863311531, %v17280_v49  ;;  %v17309_v54 = vmul.u32.u64.high 2863311531, %v17280_v49, %v17308_v23  ;;  %20894 = vst [vmem:[#allocation36_spill] sm:$0xff] %v17314_v48  ;;  %v17319_v20 = vsel %vm17256_vm13, 1.0, %v20538_v47  ;;  %v628_v56 = vsub.s32 %v17131_v32, %v627_v61 }
 0x421   : > { %20895 = vst [vmem:[#allocation37_spill] sm:$0xff] %v17319_v20  ;;  %v660_v36 = vmul.u32 24, %v659_v58  ;;  %vm1060_vm9 = vcmp.lt.s32.totalorder %v1012_v8, 16  ;;  %vm1063_vm14 = vcmp.lt.s32.totalorder %v1015_v14, 16  ;;  %vm1061_vm11 = vcmp.lt.s32.totalorder %v1013_v46, 16 }
 0x422   : > { %v17327_v53 = vmul.u32.u64.low 2863311531, %v17289_v26  ;;  %v17328_v55 = vmul.u32.u64.high 2863311531, %v17289_v26, %v17327_v53  ;;  %vm17330_vm15 = vcmp.lt.s32.totalorder %v1018_v45, 16  ;;  %v1016_v7 = vsel %vm17297_vm8, %v968_v15, %v584_v50 }
 0x423   : > { %v1019_v60 = vsel %vm17302_vm10, %v971_v6, %v17238_v57  ;;  %v1017_v32 = vsel %vm17321_vm12, %v969_v41, %v595_v11  ;;  %vm830_vm13 = vcmp.ne.s32.totalorder %v650_v31, 0  ;;  %vm878_vm2 = vcmp.lt.s32.totalorder %v650_v31, 0 }
 0x424   : > { %v17342_v63 = vadd.s32 288, %v16480_v27  ;;  %v17345_v29 = vsel %vm1060_vm9, 1.0, %v20538_v47  ;;  %vm828_vm3 = vcmp.ne.s32.totalorder %v628_v56, 0  ;;  %vm876_vm4 = vcmp.lt.s32.totalorder %v628_v56, 0  ;;  %vm17369_vm8 = vmand %vm878_vm2, %vm830_vm13 }
 0x425   : > { %20900 = vst [vmem:[#allocation38_spill] sm:$0xff] %v17345_v29  ;;  %v17348_v59 = vsub.s32 %v17158_v13, %v660_v36  ;;  %v17351_v50 = vsel %vm1063_vm14, 1.0, %v20538_v47  ;;  %v17354_v57 = vsel %vm1061_vm11, 1.0, %v20538_v47  ;;  %vm17356_vm5 = vcmp.lt.s32.totalorder %v1016_v7, 16  ;;  %vm17376_vm10 = vmand %vm876_vm4, %vm828_vm3 }
 0x426   : > { %20901 = vst [vmem:[#allocation39_spill] sm:$0xff] %v17351_v50  ;;  %20902 = vst [vmem:[#allocation40_spill] sm:$0xff] %v17354_v57  ;;  %v974_v8 = vadd.s32 24, %v650_v31  ;;  %v17365_v12 = vsel %vm17330_vm15, 1.0, %v20538_v47  ;;  %vm1067_vm6 = vcmp.lt.s32.totalorder %v1019_v60, 16  ;;  %vm1065_vm7 = vcmp.lt.s32.totalorder %v1017_v32, 16 }
 0x427   : > { %20905 = vst [vmem:[#allocation41_spill] sm:$0xff] %v17365_v12  ;;  %v972_v30 = vadd.s32 24, %v628_v56  ;;  %v637_v61 = vshrl.u32 %v17309_v54, 4  ;;  %v17382_v58 = vmul.u32.u64.low 2863311531, %v17342_v63  ;;  %v17383_v14 = vmul.u32.u64.high 2863311531, %v17342_v63, %v17382_v58 }
 0x428   : > { %v17386_v46 = vadd.s32 312, %v16480_v27  ;;  %v17395_v15 = vsel %vm17356_vm5, 1.0, %v20538_v47  ;;  %vm831_vm12 = vcmp.ne.s32.totalorder %v17348_v59, 0  ;;  %vm879_vm9 = vcmp.lt.s32.totalorder %v17348_v59, 0 }
 0x429   : > { %20910 = vst [vmem:[#allocation42_spill] sm:$0xff] %v17395_v15  ;;  %v17402_v9 = vsel %vm1067_vm6, 1.0, %v20538_v47  ;;  %v17405_v41 = vsel %vm1065_vm7, 1.0, %v20538_v47  ;;  %v1022_v23 = vsel %vm17369_vm8, %v974_v8, %v650_v31  ;;  %v692_v54 = vshrl.u32 %v17328_v55, 4  ;;  %vm17417_vm14 = vmand %vm879_vm9, %vm831_vm12 }
 0x42a   : > { %20911 = vst [vmem:[#allocation43_spill] sm:$0xff] %v17402_v9  ;;  %20912 = vst [vmem:[#allocation44_spill] sm:$0xff] %v17405_v41  ;;  %v1020_v53 = vsel %vm17376_vm10, %v972_v30, %v628_v56  ;;  %v975_v22 = vadd.s32 24, %v17348_v59  ;;  %v638_v60 = vmul.u32 24, %v637_v61  ;;  %v17426_v55 = vadd.s32 296, %v16480_v27 }
 0x42b   : > { %v17422_v31 = vmul.u32.u64.low 2863311531, %v17386_v46  ;;  %v17423_v32 = vmul.u32.u64.high 2863311531, %v17386_v46, %v17422_v31  ;;  %vm17430_vm11 = vcmp.lt.s32.totalorder %v1022_v23, 16  ;;  %vm17434_vm15 = vcmp.lt.s32.totalorder %v1020_v53, 16 }
 0x42c   : > { %v693_v61 = vmul.u32 24, %v692_v54  ;;  %v17439_v58 = vadd.s32 336, %v16480_v27  ;;  %v670_v53 = vshrl.u32 %v17383_v14, 4 }
 0x42e   : > { %v17468_v14 = vmul.u32.u64.low 2863311531, %v17439_v58  ;;  %v17469_v7 = vmul.u32.u64.high 2863311531, %v17439_v58, %v17468_v14 }
 0x42f   : > { %v20919_v14 = vmov 0.0  }
 0x461   : > { %v17360_v24 = vpop.f32.mrb[0].mxu0 }
 0x462   : > { %v17373_v51 = vpop.f32.mrb[1].mxu0  ;;  %v5896_v19 = vmul.f32 %v17360_v24, %v16629_v62 }
 0x463   : > { %v5894_v45 = vmul.f32 %v16634_v17, %v17373_v51  ;;  %v17390_v3 = vpop.f32.mrb[2].mxu0 }
 0x464   : > { %v17399_v6 = vpop.f32.mrb[3].mxu0  ;;  %v5897_v8 = vmul.f32 %v17390_v3, %v16639_v21  ;;  %v5998_v31 = vmul.f32 %v5896_v19, %v5896_v19  ;;  %v17453_v54 = vmul.u32.u64.low 2863311531, %v17426_v55  ;;  %v17454_v21 = vmul.u32.u64.high 2863311531, %v17426_v55, %v17453_v54 }
 0x465   : > { %v5895_v36 = vmul.f32 %v16719_v28, %v17399_v6  ;;  %v5996_v11 = vmul.f32 %v5894_v45, %v5894_v45  ;;  %v703_v54 = vshrl.u32 %v17423_v32, 4 }
 0x466   : > { %v5999_v17 = vmul.f32 %v5897_v8, %v5897_v8 }
 0x467   : > { %v5942_v13 = vadd.f32 %v5895_v36, %v5894_v45  ;;  %v5997_v56 = vmul.f32 %v5895_v36, %v5895_v36  ;;  %v1023_v45 = vsel %vm17417_vm14, %v975_v22, %v17348_v59  ;;  %v17449_v36 = vsub.s32 %v17280_v49, %v638_v60 }
 0x468   : > { %v17465_v49 = vsub.s32 %v17289_v26, %v693_v61  ;;  %vm1071_vm5 = vcmp.lt.s32.totalorder %v1023_v45, 16  ;;  %v704_v45 = vmul.u32 24, %v703_v54 }
 0x469   : > { %v5943_v47 = vadd.f32 %v5942_v13, %v5896_v19  ;;  %v6044_v62 = vadd.f32 %v5997_v56, %v5996_v11  ;;  %v17441_v28 = vpop.f32.mrb[4].mxu0  ;;  %vm829_vm13 = vcmp.ne.s32.totalorder %v17449_v36, 0  ;;  %vm877_vm2 = vcmp.lt.s32.totalorder %v17449_v36, 0 }
 0x46a   : > { %v17446_v23 = vpop.f32.mrb[5].mxu0  ;;  %v5900_v59 = vmul.f32 %v17441_v28, %v16733_v25  ;;  %vm834_vm3 = vcmp.ne.s32.totalorder %v17465_v49, 0  ;;  %vm882_vm4 = vcmp.lt.s32.totalorder %v17465_v49, 0  ;;  %vm17492_vm6 = vmand %vm877_vm2, %vm829_vm13  ;;  %v17524_v54 = vsel %vm1071_vm5, 1.0, %v20919_v14 }
 0x46b   : > { %v6045_v19 = vadd.f32 %v6044_v62, %v5998_v31  ;;  %v5898_v11 = vmul.f32 %v16817_v38, %v17446_v23  ;;  %v5944_v13 = vadd.f32 %v5943_v47, %v5897_v8  ;;  %v17458_v56 = vpop.f32.mrb[6].mxu0  ;;  %v671_v8 = vmul.u32 24, %v670_v53  ;;  %vm17515_vm7 = vmand %vm882_vm4, %vm834_vm3  ;;  %20930 = vst [vmem:[#allocation51_spill] sm:$0xff] %v17524_v54 }
 0x46c   : > { %v17462_v22 = vpop.f32.mrb[7].mxu0  ;;  %v5901_v26 = vmul.f32 %v17458_v56, %v16822_v42  ;;  %v6002_v53 = vmul.f32 %v5900_v59, %v5900_v59  ;;  %v17538_v30 = vsub.s32 %v17386_v46, %v704_v45  ;;  %v15293_v46 = vld [vmem:[#allocation8 + $0x88] sm:$0xff]  }
 0x46d   : > { %v5945_v60 = vadd.f32 %v5944_v13, %v5898_v11  ;;  %v6000_v62 = vmul.f32 %v5898_v11, %v5898_v11  ;;  %v6046_v31 = vadd.f32 %v6045_v19, %v5999_v17  ;;  %v5899_v47 = vmul.f32 %v16837_v16, %v17462_v22 }
 0x46e   : > { %v17481_v17 = vsel %vm17430_vm11, 1.0, %v20919_v14  ;;  %v973_v19 = vadd.s32 24, %v17449_v36  ;;  %vm835_vm11 = vcmp.ne.s32.totalorder %v17538_v30, 0 }
 0x46f   : > { %v6047_v25 = vadd.f32 %v6046_v31, %v6000_v62  ;;  %v5946_v61 = vadd.f32 %v5945_v60, %v5899_v47  ;;  %v6001_v38 = vmul.f32 %v5899_v47, %v5899_v47  ;;  %20920 = vst [vmem:[#allocation45_spill] sm:$0xff] %v17481_v17  ;;  %v17501_v62 = vsel %vm17434_vm15, 1.0, %v20919_v14 }
 0x470   : > { %20925 = vst [vmem:[#allocation48_spill] sm:$0xff] %v17501_v62  ;;  %vm883_vm15 = vcmp.lt.s32.totalorder %v17538_v30, 0 }
 0x471   : > { %v5947_v11 = vadd.f32 %v5946_v61, %v5900_v59  ;;  %v6048_v32 = vadd.f32 %v6047_v25, %v6001_v38  ;;  %v17486_v13 = vpop.f32.mrb[8].mxu0  ;;  %v978_v25 = vadd.s32 24, %v17465_v49  ;;  %v17505_v38 = vsub.s32 %v17342_v63, %v671_v8  ;;  %vm17595_vm13 = vmand %vm883_vm15, %vm835_vm11 }
 0x472   : > { %20921 = vst [vmem:[#allocation46_spill] sm:$0xff] %v17486_v13  ;;  %v17496_v60 = vpop.f32.mrb[9].mxu0  ;;  %v6003_v59 = vmul.f32 %v5901_v26, %v5901_v26  ;;  %v5904_v63 = vmul.f32 %v17486_v13, %v16842_v4 }
 0x473   : > { %20924 = vst [vmem:[#allocation47_spill] sm:$0xff] %v17496_v60  ;;  %v6049_v31 = vadd.f32 %v6048_v32, %v6002_v53  ;;  %v5902_v47 = vmul.f32 %v16858_v1, %v17496_v60  ;;  %v5948_v61 = vadd.f32 %v5947_v11, %v5901_v26  ;;  %v17509_v42 = vpop.f32.mrb[10].mxu0  ;;  %v1021_v26 = vsel %vm17492_vm6, %v973_v19, %v17449_v36  ;;  %v15292_v11 = vld [vmem:[#allocation8 + $0x80] sm:$0xff]  }
 0x474   : > { %20926 = vst [vmem:[#allocation49_spill] sm:$0xff] %v17509_v42  ;;  %v17521_v8 = vpop.f32.mrb[11].mxu0  ;;  %v681_v53 = vshrl.u32 %v17454_v21, 4  ;;  %v1026_v4 = vsel %vm17515_vm7, %v978_v25, %v17465_v49  ;;  %vm832_vm8 = vcmp.ne.s32.totalorder %v17505_v38, 0  ;;  %vm880_vm10 = vcmp.lt.s32.totalorder %v17505_v38, 0  ;;  %13576 = vmatprep.subr.bf16.mxu1 %v15292_v11 }
 0x475   : > { %20929 = vst [vmem:[#allocation50_spill] sm:$0xff] %v17521_v8  ;;  %v5949_v32 = vadd.f32 %v5948_v61, %v5902_v47  ;;  %v6004_v1 = vmul.f32 %v5902_v47, %v5902_v47  ;;  %v6050_v16 = vadd.f32 %v6049_v31, %v6003_v59  ;;  %v5903_v60 = vmul.f32 %v16962_v0, %v17521_v8  ;;  %vm17560_vm9 = vmand %vm880_vm10, %vm832_vm8 }
 0x476   : > { %v5905_v36 = vmul.f32 %v17509_v42, %v16903_v5  ;;  %13577 = vmatpush3.bf16.msra.mxu1 %v15292_v11  ;;  %v976_v31 = vadd.s32 24, %v17505_v38  ;;  %v736_v47 = vshrl.u32 %v17469_v7, 4  ;;  %v17545_v49 = vadd.s32 320, %v16480_v27 }
 0x477   : > { %v6051_v21 = vadd.f32 %v6050_v16, %v6004_v1  ;;  %v5950_v19 = vadd.f32 %v5949_v32, %v5903_v60  ;;  %v6005_v59 = vmul.f32 %v5903_v60, %v5903_v60  ;;  %v17548_v25 = vadd.s32 344, %v16480_v27  ;;  %13578 = vmatprep.subr.bf16.mxu1 %v15293_v46 }
 0x478   : > { %v6006_v45 = vmul.f32 %v5904_v63, %v5904_v63  ;;  %vm17552_vm12 = vcmp.lt.s32.totalorder %v1021_v26, 16  ;;  %vm17566_vm14 = vcmp.lt.s32.totalorder %v1026_v4, 16  ;;  %v6007_v26 = vmul.f32 %v5905_v36, %v5905_v36 }
 0x479   : > { %v5951_v61 = vadd.f32 %v5950_v19, %v5904_v63  ;;  %v6052_v16 = vadd.f32 %v6051_v21, %v6005_v59  ;;  %v17550_v1 = vpop.f32.mrb[12].mxu0  ;;  %v682_v63 = vmul.u32 24, %v681_v53  ;;  %v1024_v0 = vsel %vm17560_vm9, %v976_v31, %v17505_v38 }
 0x47a   : > { %20931 = vst [vmem:[#allocation52_spill] sm:$0xff] %v17550_v1  ;;  %v17564_v60 = vpop.f32.mrb[13].mxu0  ;;  %13579 = vmatpush3.bf16.msra.mxu1 %v15293_v46  ;;  %v5908_v4 = vmul.f32 %v17550_v1, %v16967_v39  ;;  %v979_v53 = vadd.s32 24, %v17538_v30  ;;  %v737_v42 = vmul.u32 24, %v736_v47  ;;  %v17589_v46 = vsel %vm17552_vm12, 1.0, %v20919_v14  ;;  %v15298_v1 = vld [vmem:[#allocation8 + $0xb0] sm:$0xff]  }
 0x47b   : > { %20936 = vst [vmem:[#allocation53_spill] sm:$0xff] %v17564_v60  ;;  %v6053_v32 = vadd.f32 %v6052_v16, %v6006_v45  ;;  %v5906_v21 = vmul.f32 %v16974_v35, %v17564_v60  ;;  %v5952_v19 = vadd.f32 %v5951_v61, %v5905_v36  ;;  %v17574_v59 = vpop.f32.mrb[14].mxu0  ;;  %v15294_v45 = vld [vmem:[#allocation8 + $0x90] sm:$0xff]   ;;  %20941 = vst [vmem:[#allocation56_spill] sm:$0xff] %v17589_v46  ;;  %vm17613_vm2 = vcmp.lt.s32.totalorder %v1024_v0, 16 }
 0x47c   : > { %20939 = vst [vmem:[#allocation54_spill] sm:$0xff] %v17574_v59  ;;  %v17578_v5 = vpop.f32.mrb[15].mxu0  ;;  %v17600_v31 = vsub.s32 %v17426_v55, %v682_v63  ;;  %v17603_v47 = vmul.u32.u64.low 2863311531, %v17545_v49  ;;  %v17604_v61 = vmul.u32.u64.high 2863311531, %v17545_v49, %v17603_v47  ;;  %13580 = vmatprep.subr.bf16.mxu1 %v15294_v45  ;;  %v5909_v40 = vmul.f32 %v17574_v59, %v16989_v52 }
 0x47d   : > { %20940 = vst [vmem:[#allocation55_spill] sm:$0xff] %v17578_v5  ;;  %v5953_v16 = vadd.f32 %v5952_v19, %v5906_v21  ;;  %v6008_v13 = vmul.f32 %v5906_v21, %v5906_v21  ;;  %v6054_v35 = vadd.f32 %v6053_v32, %v6007_v26  ;;  %v5907_v36 = vmul.f32 %v17047_v34, %v17578_v5 }
 0x47e   : > { %13581 = vmatpush3.bf16.msra.mxu1 %v15294_v45  ;;  %v17611_v21 = vsel %vm17566_vm14, 1.0, %v20919_v14  ;;  %v17618_v63 = vsub.s32 %v17439_v58, %v737_v42  ;;  %v6010_v19 = vmul.f32 %v5908_v4, %v5908_v4  ;;  %v1027_v11 = vsel %vm17595_vm13, %v979_v53, %v17538_v30 }
 0x47f   : > { %v6055_v7 = vadd.f32 %v6054_v35, %v6008_v13  ;;  %v5954_v26 = vadd.f32 %v5953_v16, %v5907_v36  ;;  %v6009_v32 = vmul.f32 %v5907_v36, %v5907_v36  ;;  %20944 = vst [vmem:[#allocation57_spill] sm:$0xff] %v17611_v21  ;;  %v17621_v35 = vadd.s32 328, %v16480_v27  ;;  %v15295_v13 = vld [vmem:[#allocation8 + $0x98] sm:$0xff]  }
 0x480   : > { %vm833_vm3 = vcmp.ne.s32.totalorder %v17600_v31, 0  ;;  %vm881_vm4 = vcmp.lt.s32.totalorder %v17600_v31, 0  ;;  %v17633_v42 = vmul.u32.u64.low 2863311531, %v17548_v25  ;;  %v17634_v58 = vmul.u32.u64.high 2863311531, %v17548_v25, %v17633_v42  ;;  %13582 = vmatprep.subr.bf16.mxu1 %v15295_v13 }
 0x481   : > { %v5955_v16 = vadd.f32 %v5954_v26, %v5908_v4  ;;  %v6056_v36 = vadd.f32 %v6055_v7, %v6009_v32  ;;  %v17623_v45 = vpop.f32.mrb[16].mxu0  ;;  %v6011_v47 = vmul.f32 %v5909_v40, %v5909_v40  ;;  %vm838_vm5 = vcmp.ne.s32.totalorder %v17618_v63, 0  ;;  %vm17659_vm8 = vmand %vm881_vm4, %vm833_vm3 }
 0x482   : > { %20947 = vst [vmem:[#allocation58_spill] sm:$0xff] %v17623_v45  ;;  %v17628_v0 = vpop.f32.mrb[17].mxu0  ;;  %13583 = vmatpush3.bf16.msra.mxu1 %v15295_v13  ;;  %v5912_v30 = vmul.f32 %v17623_v45, %v17052_v43  ;;  %vm886_vm6 = vcmp.lt.s32.totalorder %v17618_v63, 0  ;;  %v17647_v38 = vadd.s32 368, %v16480_v27  ;;  %vm17651_vm7 = vcmp.lt.s32.totalorder %v1027_v11, 16 }
 0x483   : > { %20948 = vst [vmem:[#allocation59_spill] sm:$0xff] %v17628_v0  ;;  %v6057_v4 = vadd.f32 %v6056_v36, %v6010_v19  ;;  %v5910_v7 = vmul.f32 %v17060_v10, %v17628_v0  ;;  %v5956_v26 = vadd.f32 %v5955_v16, %v5909_v40  ;;  %v17638_v32 = vpop.f32.mrb[18].mxu0  ;;  %v15296_v19 = vld [vmem:[#allocation8 + $0xa0] sm:$0xff]   ;;  %v17664_v43 = vadd.s32 24, %v17600_v31  ;;  %vm17675_vm10 = vmand %vm886_vm6, %vm838_vm5 }
 0x484   : > { %20949 = vst [vmem:[#allocation60_spill] sm:$0xff] %v17638_v32  ;;  %v17642_v53 = vpop.f32.mrb[19].mxu0  ;;  %13584 = vmatprep.subr.bf16.mxu1 %v15296_v19  ;;  %v5913_v11 = vmul.f32 %v17638_v32, %v17107_v44  ;;  %v20584_v52 = vmov 0   ;;  %v6014_v44 = vmul.f32 %v5912_v30, %v5912_v30  ;;  %vm6423_vm12 = vsmask.f32 3328 }
 0x485   : > { %20950 = vst [vmem:[#allocation61_spill] sm:$0xff] %v17642_v53  ;;  %v5957_v36 = vadd.f32 %v5956_v26, %v5910_v7  ;;  %v6012_v42 = vmul.f32 %v5910_v7, %v5910_v7  ;;  %v6058_v10 = vadd.f32 %v6057_v4, %v6011_v47  ;;  %v5911_v40 = vmul.f32 %v17163_v33, %v17642_v53 }
 0x486   : > { %v17667_v47 = vadd.s32 24, %v17618_v63  ;;  %13585 = vmatpush3.bf16.msra.mxu1 %v15296_v19  ;;  %6294 = vst [vmem:[#allocation2] sm:$0xff] %v20584_v52  ;;  %6295 = vst [vmem:[#allocation2 + $0x8] sm:$0xff] %v20584_v52  ;;  %v15297_v19 = vld [vmem:[#allocation8 + $0xa8] sm:$0xff]   ;;  %v6015_v13 = vmul.f32 %v5913_v11, %v5913_v11 }
 0x487   : > { %v6059_v4 = vadd.f32 %v6058_v10, %v6012_v42  ;;  %v5958_v7 = vadd.f32 %v5957_v36, %v5911_v40  ;;  %v6013_v26 = vmul.f32 %v5911_v40, %v5911_v40  ;;  %6296 = vst [vmem:[#allocation2 + $0xd0] sm:$0xff] %v20584_v52  ;;  %6297 = vst [vmem:[#allocation2 + $0xd8] sm:$0xff] %v20584_v52  ;;  %v17686_v10 = vsel %vm17613_vm2, 1.0, %v20919_v14 }
 0x488   : > { %20957 = vst [vmem:[#allocation62_spill] sm:$0xff] %v17686_v10  ;;  %v714_v36 = vshrl.u32 %v17604_v61, 4  ;;  %v17690_v42 = vmul.u32.u64.low 2863311531, %v17621_v35  ;;  %v17691_v40 = vmul.u32.u64.high 2863311531, %v17621_v35, %v17690_v42  ;;  %v17698_v52 = vsel %vm17651_vm7, 1.0, %v20919_v14  ;;  %13586 = vmatprep.subr.bf16.mxu1 %v15297_v19 }
 0x489   : > { %v5959_v39 = vadd.f32 %v5958_v7, %v5912_v30  ;;  %v6060_v34 = vadd.f32 %v6059_v4, %v6013_v26  ;;  %v17693_v32 = vpop.f32.mrb[20].mxu0  ;;  %20959 = vst [vmem:[#allocation64_spill] sm:$0xff] %v17698_v52  ;;  %v747_v4 = vshrl.u32 %v17634_v58, 4  ;;  %v17712_v7 = vadd.s32 352, %v16480_v27 }
 0x48a   : > { %20958 = vst [vmem:[#allocation63_spill] sm:$0xff] %v17693_v32  ;;  %v17700_v55 = vpop.f32.mrb[21].mxu0  ;;  %13587 = vmatpush3.bf16.msra.mxu1 %v15297_v19  ;;  %v5916_v61 = vmul.f32 %v17693_v32, %v17168_v18  ;;  %v715_v30 = vmul.u32 24, %v714_v36  ;;  %v17723_v58 = vmul.u32.u64.low 2863311531, %v17647_v38  ;;  %v17724_v59 = vmul.u32.u64.high 2863311531, %v17647_v38, %v17723_v58 }
 0x48b   : > { %20960 = vst [vmem:[#allocation65_spill] sm:$0xff] %v17700_v55  ;;  %v6061_v26 = vadd.f32 %v6060_v34, %v6014_v44  ;;  %v5914_v42 = vmul.f32 %v17208_v2, %v17700_v55  ;;  %v5960_v45 = vadd.f32 %v5959_v39, %v5913_v11  ;;  %v17716_v53 = vpop.f32.mrb[22].mxu0  ;;  %v17731_v19 = vadd.s32 376, %v16480_v27  ;;  %13588 = vmatprep.subr.bf16.mxu1 %v15298_v1  ;;  %v15299_v58 = vld [vmem:[#allocation8 + $0xb8] sm:$0xff]  }
 0x48c   : > { %20961 = vst [vmem:[#allocation66_spill] sm:$0xff] %v17716_v53  ;;  %v17720_v0 = vpop.f32.mrb[23].mxu0  ;;  %v5917_v11 = vmul.f32 %v17716_v53, %v17244_v37  ;;  %v748_v55 = vmul.u32 24, %v747_v4  ;;  %v17740_v8 = vsub.s32 %v17545_v49, %v715_v30  ;;  %v725_v30 = vshrl.u32 %v17691_v40, 4 }
 0x48d   : > { %20962 = vst [vmem:[#allocation67_spill] sm:$0xff] %v17720_v0  ;;  %v5961_v5 = vadd.f32 %v5960_v45, %v5914_v42  ;;  %v6016_v34 = vmul.f32 %v5914_v42, %v5914_v42  ;;  %v6062_v44 = vadd.f32 %v6061_v26, %v6015_v13  ;;  %v5915_v39 = vmul.f32 %v17314_v48, %v17720_v0  ;;  %v6387_v18 = vld [vmem:[#allocation2] sm:$0xf0] }
 0x48e   : > { %13589 = vmatpush3.bf16.msra.mxu1 %v15298_v1  ;;  %v6425_v45 = vshrl.u32 %v6387_v18, 16  ;;  %v6428_v42 = vshll.u32 %v6387_v18, 16  ;;  %v20963_v13 = vmov 0   ;;  %v6018_v0 = vmul.f32 %v5916_v61, %v5916_v61 }
 0x48f   : > { %v6063_v36 = vadd.f32 %v6062_v44, %v6016_v34  ;;  %v5962_v2 = vadd.f32 %v5961_v5, %v5915_v39  ;;  %v6017_v32 = vmul.f32 %v5915_v39, %v5915_v39  ;;  %v17734_v26 = vrot.slane %v20963_v13, 4  ;;  %13590 = vmatprep.subr.bf16.mxu1 %v15299_v58 }
 0x490   : > { %v6438_v48 = vrot.slane %v20963_v13, 5  ;;  %v6019_v5 = vmul.f32 %v5917_v11, %v5917_v11  ;;  %v6427_v1 = vrot.slane %v6425_v45, 4  ;;  %v6430_v34 = vrot.slane %v6428_v42, 5 }
 0x491   : > { %v5963_v37 = vadd.f32 %v5962_v2, %v5916_v61  ;;  %v6064_v53 = vadd.f32 %v6063_v36, %v6017_v32  ;;  %v17737_v60 = vpop.f32.mrb[24].mxu0  ;;  %v17757_v36 = vadd.s32 360, %v16480_v27  ;;  %vm836_vm14 = vcmp.ne.s32.totalorder %v17740_v8, 0 }
 0x492   : > { %v17742_v4 = vpop.f32.mrb[25].mxu0  ;;  %v17745_v18 = vor.u32 %v6438_v48, %v17734_v26  ;;  %13591 = vmatpush3.bf16.msra.mxu1 %v15299_v58  ;;  %v5920_v49 = vmul.f32 %v17737_v60, %v17319_v20  ;;  %v6431_v48 = vor.u32 %v6430_v34, %v6427_v1  ;;  %vm884_vm11 = vcmp.lt.s32.totalorder %v17740_v8, 0 }
 0x493   : > { %v6065_v44 = vadd.f32 %v6064_v53, %v6018_v0  ;;  %v5918_v39 = vmul.f32 %v17345_v29, %v17742_v4  ;;  %v5964_v2 = vadd.f32 %v5963_v37, %v5917_v11  ;;  %v17749_v32 = vpop.f32.mrb[26].mxu0  ;;  %v17761_v11 = vld [vmem:[#allocation8] sm:$0xff]   ;;  %vm17807_vm15 = vmand %vm884_vm11, %vm836_vm14 }
 0x494   : > { %20964 = vst [vmem:[#allocation68_spill] sm:$0xff] %v17745_v18  ;;  %v17753_v61 = vpop.f32.mrb[27].mxu0  ;;  %20965 = vst [vmem:[#allocation69_spill] sm:$0xff] %v17761_v11  ;;  %v5921_v58 = vmul.f32 %v17749_v32, %v17351_v50  ;;  %v17766_v42 = vmul.u32.u64.low 2863311531, %v17712_v7  ;;  %v17767_v20 = vmul.u32.u64.high 2863311531, %v17712_v7, %v17766_v42  ;;  %v6440_v27 = vsel %vm6423_vm12, %v6431_v48, %v17745_v18  ;;  %13640 = vmatprep.subr.bf16.mxu1 %v17761_v11 }
 0x495   : > { %v5965_v0 = vadd.f32 %v5964_v2, %v5918_v39  ;;  %v6020_v53 = vmul.f32 %v5918_v39, %v5918_v39  ;;  %v6066_v45 = vadd.f32 %v6065_v44, %v6019_v5  ;;  %v5919_v37 = vmul.f32 %v17354_v57, %v17753_v61  ;;  %13592 = vmatprep.mubr.bf16.mxu1 %v6440_v27 }
 0x496   : > { %v20966_v5 = vsel %vm17659_vm8, %v17664_v43, %v17600_v31  ;;  %v17784_v39 = vmul.u32.u64.low 2863311531, %v17757_v36  ;;  %v17785_v2 = vmul.u32.u64.high 2863311531, %v17757_v36, %v17784_v39  ;;  %v6022_v48 = vmul.f32 %v5920_v49, %v5920_v49 }
 0x497   : > { %v6067_v40 = vadd.f32 %v6066_v45, %v6020_v53  ;;  %v5966_v1 = vadd.f32 %v5965_v0, %v5919_v37  ;;  %v6021_v34 = vmul.f32 %v5919_v37, %v5919_v37  ;;  %vm17776_vm9 = vcmp.lt.s32.totalorder %v20966_v5, 16 }
 0x498   : > { %v17790_v43 = vsub.s32 %v17548_v25, %v748_v55  ;;  %v980_v45 = vadd.s32 24, %v17740_v8  ;;  %v726_v37 = vmul.u32 24, %v725_v30  ;;  %v6023_v5 = vmul.f32 %v5921_v58, %v5921_v58 }
 0x499   : > { %v5967_v16 = vadd.f32 %v5966_v1, %v5920_v49  ;;  %v6068_v0 = vadd.f32 %v6067_v40, %v6021_v34  ;;  %v17787_v53 = vpop.f32.mrb[28].mxu0  ;;  %v17796_v42 = vmul.u32.u64.low 2863311531, %v17731_v19  ;;  %v17797_v27 = vmul.u32.u64.high 2863311531, %v17731_v19, %v17796_v42 }
 0x49a   : > { %v17792_v31 = vpop.f32.mrb[29].mxu0  ;;  %v5924_v55 = vmul.f32 %v17787_v53, %v17365_v12  ;;  %v17818_v34 = vsel %vm17776_vm9, 1.0, %v20919_v14  ;;  %v1028_v44 = vsel %vm17807_vm15, %v980_v45, %v17740_v8  ;;  %vm839_vm2 = vcmp.ne.s32.totalorder %v17790_v43, 0 }
 0x49b   : > { %v6069_v11 = vadd.f32 %v6068_v0, %v6022_v48  ;;  %v5922_v49 = vmul.f32 %v17395_v15, %v17792_v31  ;;  %v5968_v40 = vadd.f32 %v5967_v16, %v5921_v58  ;;  %v17801_v1 = vpop.f32.mrb[30].mxu0  ;;  %20971 = vst [vmem:[#allocation70_spill] sm:$0xff] %v17818_v34  ;;  %v20972_v58 = vsel %vm17675_vm10, %v17667_v47, %v17618_v63 }
 0x49c   : > { %v17813_v30 = vpop.f32.mrb[31].mxu0  ;;  %vm17825_vm13 = vcmp.lt.s32.totalorder %v20972_v58, 16  ;;  %v780_v48 = vshrl.u32 %v17724_v59, 4  ;;  %v17837_v33 = vsub.s32 %v17621_v35, %v726_v37  ;;  %v758_v63 = vshrl.u32 %v17767_v20, 4 }
 0x49d   : > { %v5969_v16 = vadd.f32 %v5968_v40, %v5922_v49  ;;  %v6024_v0 = vmul.f32 %v5922_v49, %v5922_v49  ;;  %v6070_v42 = vadd.f32 %v6069_v11, %v6023_v5  ;;  %v5923_v18 = vmul.f32 %v17405_v41, %v17813_v30 }
 0x49e   : > { %v5925_v59 = vmul.f32 %v17801_v1, %v17402_v9  ;;  %vm887_vm3 = vcmp.lt.s32.totalorder %v17790_v43, 0  ;;  %v983_v5 = vadd.s32 24, %v17790_v43  ;;  %v781_v40 = vmul.u32 24, %v780_v48 }
 0x49f   : > { %v6071_v47 = vadd.f32 %v6070_v42, %v6024_v0  ;;  %v5970_v49 = vadd.f32 %v5969_v16, %v5923_v18  ;;  %v6025_v11 = vmul.f32 %v5923_v18, %v5923_v18  ;;  %v769_v8 = vshrl.u32 %v17785_v2, 4  ;;  %vm17864_vm7 = vmand %vm887_vm3, %vm839_vm2 }
 0x4a0   : > { %v6026_v45 = vmul.f32 %v5924_v55, %v5924_v55  ;;  %vm17847_vm4 = vcmp.lt.s32.totalorder %v1028_v44, 16  ;;  %vm837_vm5 = vcmp.ne.s32.totalorder %v17837_v33, 0  ;;  %vm885_vm6 = vcmp.lt.s32.totalorder %v17837_v33, 0 }
 0x4a1   : > { %v5971_v25 = vadd.f32 %v5970_v49, %v5924_v55  ;;  %v6072_v58 = vadd.f32 %v6071_v47, %v6025_v11  ;;  %v17845_v35 = vpop.f32.mrb[32].mxu0  ;;  %v759_v18 = vmul.u32 24, %v758_v63  ;;  %v791_v48 = vshrl.u32 %v17797_v27, 4  ;;  %vm17882_vm8 = vmand %vm885_vm6, %vm837_vm5 }
 0x4a2   : > { %v17851_v37 = vpop.f32.mrb[33].mxu0  ;;  %v6027_v16 = vmul.f32 %v5925_v59, %v5925_v59  ;;  %v5928_v63 = vmul.f32 %v17845_v35, %v17481_v17  ;;  %v981_v47 = vadd.s32 24, %v17837_v33  ;;  %v17874_v49 = vsub.s32 %v17647_v38, %v781_v40 }
 0x4a3   : > { %v6073_v2 = vadd.f32 %v6072_v58, %v6026_v45  ;;  %v5926_v55 = vmul.f32 %v17501_v62, %v17851_v37  ;;  %v5972_v0 = vadd.f32 %v5971_v25, %v5925_v59  ;;  %v17858_v42 = vpop.f32.mrb[34].mxu0  ;;  %v770_v59 = vmul.u32 24, %v769_v8 }
 0x4a4   : > { %v17870_v27 = vpop.f32.mrb[35].mxu0  ;;  %v17889_v38 = vsel %vm17825_vm13, 1.0, %v20919_v14  ;;  %v1031_v40 = vsel %vm17864_vm7, %v983_v5, %v17790_v43  ;;  %v17895_v8 = vsub.s32 %v17712_v7, %v759_v18  ;;  %v17902_v39 = vsel %vm17847_vm4, 1.0, %v20919_v14 }
 0x4a5   : > { %v5973_v11 = vadd.f32 %v5972_v0, %v5926_v55  ;;  %v6028_v45 = vmul.f32 %v5926_v55, %v5926_v55  ;;  %v6074_v25 = vadd.f32 %v6073_v2, %v6027_v16  ;;  %v5927_v58 = vmul.f32 %v17589_v46, %v17870_v27  ;;  %20981 = vst [vmem:[#allocation71_spill] sm:$0xff] %v17889_v38 }
 0x4a6   : > { %v792_v16 = vmul.u32 24, %v791_v48  ;;  %v5929_v55 = vmul.f32 %v17858_v42, %v17524_v54  ;;  %20982 = vst [vmem:[#allocation72_spill] sm:$0xff] %v17902_v39  ;;  %v1029_v44 = vsel %vm17882_vm8, %v981_v47, %v17837_v33  ;;  %vm842_vm10 = vcmp.ne.s32.totalorder %v17874_v49, 0 }
 0x4a7   : > { %v6075_v2 = vadd.f32 %v6074_v25, %v6028_v45  ;;  %v5974_v0 = vadd.f32 %v5973_v11, %v5927_v58  ;;  %v6029_v46 = vmul.f32 %v5927_v58, %v5927_v58  ;;  %v17909_v7 = vsub.s32 %v17757_v36, %v770_v59 }
 0x4a8   : > { %v6030_v43 = vmul.f32 %v5928_v63, %v5928_v63  ;;  %vm17913_vm9 = vcmp.lt.s32.totalorder %v1031_v40, 16  ;;  %vm890_vm14 = vcmp.lt.s32.totalorder %v17874_v49, 0  ;;  %v986_v17 = vadd.s32 24, %v17874_v49 }
 0x4a9   : > { %v5975_v5 = vadd.f32 %v5974_v0, %v5928_v63  ;;  %v6076_v18 = vadd.f32 %v6075_v2, %v6029_v46  ;;  %v17911_v48 = vpop.f32.mrb[36].mxu0  ;;  %vm840_vm11 = vcmp.ne.s32.totalorder %v17895_v8, 0  ;;  %vm888_vm15 = vcmp.lt.s32.totalorder %v17895_v8, 0  ;;  %vm17943_vm3 = vmand %vm890_vm14, %vm842_vm10 }
 0x4aa   : > { %v17918_v20 = vpop.f32.mrb[37].mxu0  ;;  %v17924_v36 = vsub.s32 %v17731_v19, %v792_v16  ;;  %v6031_v46 = vmul.f32 %v5929_v55, %v5929_v55  ;;  %v5932_v45 = vmul.f32 %v17911_v48, %v17611_v21  ;;  %v984_v58 = vadd.s32 24, %v17895_v8  ;;  %vm17955_vm5 = vmand %vm888_vm15, %vm840_vm11 }
 0x4ab   : > { %v6077_v33 = vadd.f32 %v6076_v18, %v6030_v43  ;;  %v5930_v63 = vmul.f32 %v17686_v10, %v17918_v20  ;;  %v5976_v47 = vadd.f32 %v5975_v5, %v5929_v55  ;;  %v17928_v59 = vpop.f32.mrb[38].mxu0  ;;  %vm841_vm13 = vcmp.ne.s32.totalorder %v17909_v7, 0 }
 0x4ac   : > { %v17932_v25 = vpop.f32.mrb[39].mxu0  ;;  %vm889_vm2 = vcmp.lt.s32.totalorder %v17909_v7, 0  ;;  %vm17947_vm4 = vcmp.lt.s32.totalorder %v1029_v44, 16  ;;  %v985_v5 = vadd.s32 24, %v17909_v7  ;;  %v6954_v18 = vrot.slane %v20963_v13, 3 }
 0x4ad   : > { %v5977_v19 = vadd.f32 %v5976_v47, %v5930_v63  ;;  %v6032_v40 = vmul.f32 %v5930_v63, %v5930_v63  ;;  %v6078_v16 = vadd.f32 %v6077_v33, %v6031_v46  ;;  %v5931_v2 = vmul.f32 %v17818_v34, %v17932_v25  ;;  %vm17965_vm6 = vmand %vm889_vm2, %vm841_vm13 }
 0x4ae   : > { %v5933_v33 = vmul.f32 %v17928_v59, %v17698_v52  ;;  %v1034_v21 = vsel %vm17943_vm3, %v986_v17, %v17874_v49  ;;  %vm843_vm7 = vcmp.ne.s32.totalorder %v17924_v36, 0  ;;  %vm891_vm8 = vcmp.lt.s32.totalorder %v17924_v36, 0 }
 0x4af   : > { %v6079_v46 = vadd.f32 %v6078_v16, %v6032_v40  ;;  %v5978_v44 = vadd.f32 %v5977_v19, %v5931_v2  ;;  %v6033_v63 = vmul.f32 %v5931_v2, %v5931_v2  ;;  %v17975_v13 = vor.u32 %v6954_v18, %v17734_v26  ;;  %vm18001_vm10 = vmand %vm891_vm8, %vm843_vm7 }
 0x4b0   : > { %v6034_v40 = vmul.f32 %v5932_v45, %v5932_v45  ;;  %v1032_v52 = vsel %vm17955_vm5, %v984_v58, %v17895_v8  ;;  %v17987_v49 = vsel %vm17947_vm4, 1.0, %v20919_v14  ;;  %v987_v17 = vadd.s32 24, %v17924_v36 }
 0x4b1   : > { %20993 = vst [vmem:[#allocation73_spill] sm:$0xff] %v17975_v13  ;;  %v5979_v19 = vadd.f32 %v5978_v44, %v5932_v45  ;;  %v6080_v16 = vadd.f32 %v6079_v46, %v6033_v63  ;;  %v17977_v2 = vpop.f32.mrb[40].mxu0  ;;  %20994 = vst [vmem:[#allocation74_spill] sm:$0xff] %v17987_v49  ;;  %v1033_v26 = vsel %vm17965_vm6, %v985_v5, %v17909_v7  ;;  %v18010_v7 = vsel %vm17913_vm9, 1.0, %v20919_v14 }
 0x4b2   : > { %v17982_v34 = vpop.f32.mrb[41].mxu0  ;;  %v6035_v45 = vmul.f32 %v5933_v33, %v5933_v33  ;;  %v5936_v0 = vmul.f32 %v17977_v2, %v17889_v38  ;;  %20997 = vst [vmem:[#allocation75_spill] sm:$0xff] %v18010_v7  ;;  %vm1082_vm14 = vcmp.lt.s32.totalorder %v1034_v21, 16  ;;  %vm1080_vm11 = vcmp.lt.s32.totalorder %v1032_v52, 16 }
 0x4b3   : > { %v6081_v55 = vadd.f32 %v6080_v16, %v6034_v40  ;;  %v5934_v18 = vmul.f32 %v17902_v39, %v17982_v34  ;;  %v5980_v43 = vadd.f32 %v5979_v19, %v5933_v33  ;;  %v17995_v8 = vpop.f32.mrb[42].mxu0  ;;  %v1035_v47 = vsel %vm18001_vm10, %v987_v17, %v17924_v36 }
 0x4b4   : > { %v18012_v5 = vpop.f32.mrb[43].mxu0  ;;  %vm1081_vm15 = vcmp.lt.s32.totalorder %v1033_v26, 16  ;;  %v5937_v11 = vmul.f32 %v17995_v8, %v18010_v7  ;;  %v18022_v21 = vsel %vm1082_vm14, 1.0, %v20919_v14  ;;  %v18025_v52 = vsel %vm1080_vm11, 1.0, %v20919_v14 }
 0x4b5   : > { %v5981_v46 = vadd.f32 %v5980_v43, %v5934_v18  ;;  %v6036_v33 = vmul.f32 %v5934_v18, %v5934_v18  ;;  %v6082_v44 = vadd.f32 %v6081_v55, %v6035_v45  ;;  %v5935_v63 = vmul.f32 %v17987_v49, %v18012_v5  ;;  %20998 = vst [vmem:[#allocation76_spill] sm:$0xff] %v18022_v21 }
 0x4b6   : > { %20999 = vst [vmem:[#allocation77_spill] sm:$0xff] %v18025_v52  ;;  %v6038_v45 = vmul.f32 %v5936_v0, %v5936_v0  ;;  %vm1083_vm9 = vcmp.lt.s32.totalorder %v1035_v47, 16  ;;  %v18032_v17 = vsel %vm1081_vm15, 1.0, %v20919_v14  ;;  %v6039_v26 = vmul.f32 %v5937_v11, %v5937_v11 }
 0x4b7   : > { %v6083_v40 = vadd.f32 %v6082_v44, %v6036_v33  ;;  %v5982_v19 = vadd.f32 %v5981_v46, %v5935_v63  ;;  %v6037_v16 = vmul.f32 %v5935_v63, %v5935_v63  ;;  %21000 = vst [vmem:[#allocation78_spill] sm:$0xff] %v18032_v17  ;;  %v18041_v63 = vsel %vm1083_vm9, 1.0, %v20919_v14 }
 0x4b8   : > { %21001 = vst [vmem:[#allocation79_spill] sm:$0xff] %v18041_v63  ;;  %vm6945_vm13 = vsmask.f32 4352  ;;  %vm7394_vm2 = vsmask.f32 256  ;;  %vm7913_vm3 = vcmask 1043456  }
 0x4b9   : > { %v5983_v55 = vadd.f32 %v5982_v19, %v5936_v0  ;;  %v6084_v18 = vadd.f32 %v6083_v40, %v6037_v16  ;;  %v18027_v43 = vpop.f32.mrb[44].mxu0 }
 0x4ba   : > { %v18029_v36 = vpop.f32.mrb[45].mxu0  ;;  %v5940_v0 = vmul.f32 %v18027_v43, %v18022_v21 }
 0x4bb   : > { %v6085_v58 = vadd.f32 %v6084_v18, %v6038_v45  ;;  %v5938_v46 = vmul.f32 %v18025_v52, %v18029_v36  ;;  %v5984_v33 = vadd.f32 %v5983_v55, %v5937_v11  ;;  %v18036_v44 = vpop.f32.mrb[46].mxu0 }
 0x4bc   : > { %v18043_v47 = vpop.f32.mrb[47].mxu0  ;;  %v5941_v11 = vmul.f32 %v18036_v44, %v18041_v63  ;;  %v6042_v7 = vmul.f32 %v5940_v0, %v5940_v0 }
 0x4bd   : > { %v5985_v40 = vadd.f32 %v5984_v33, %v5938_v46  ;;  %v6040_v19 = vmul.f32 %v5938_v46, %v5938_v46  ;;  %v6086_v16 = vadd.f32 %v6085_v58, %v6039_v26  ;;  %v5939_v45 = vmul.f32 %v18032_v17, %v18043_v47 }
 0x4be   : > { %v6043_v49 = vmul.f32 %v5941_v11, %v5941_v11 }
 0x4bf   : > { %v6087_v18 = vadd.f32 %v6086_v16, %v6040_v19  ;;  %v5986_v55 = vadd.f32 %v5985_v40, %v5939_v45  ;;  %v6041_v13 = vmul.f32 %v5939_v45, %v5939_v45 }
 0x4c1   : > { %v5987_v38 = vadd.f32 %v5986_v55, %v5940_v0  ;;  %v6088_v21 = vadd.f32 %v6087_v18, %v6041_v13 }
 0x4c3   : > { %v5988_v14 = vadd.f32 %v5987_v38, %v5941_v11  ;;  %v6089_v39 = vadd.f32 %v6088_v21, %v6042_v7 }
 0x4c5   : > { %v5989_v10 = vrot.slane %v5988_v14, 4  ;;  %v6090_v54 = vadd.f32 %v6089_v39, %v6043_v49 }
 0x4c7   : > { %v5990_v33 = vadd.f32 %v5989_v10, %v5988_v14  ;;  %v6091_v46 = vrot.slane %v6090_v54, 4 }
 0x4c9   : > { %v5991_v26 = vrot.slane %v5990_v33, 2  ;;  %v6092_v58 = vadd.f32 %v6091_v46, %v6090_v54  ;;  %v21009_v46 = vld [vmem:[#allocation54_spill] sm:$0xff] }
 0x4cb   : > { %v5992_v62 = vadd.f32 %v5991_v26, %v5990_v33  ;;  %v6093_v9 = vrot.slane %v6092_v58, 2 }
 0x4cd   : > { %v5993_v19 = vrot.slane %v5992_v62, 1  ;;  %v6094_v16 = vadd.f32 %v6093_v9, %v6092_v58  ;;  %v21010_v58 = vld [vmem:[#allocation59_spill] sm:$0xff] }
 0x4cf   : > { %v5994_v12 = vadd.f32 %v5993_v19, %v5992_v62  ;;  %v6095_v63 = vrot.slane %v6094_v16, 1 }
 0x4d1   : > { %v18049_v40 = vmul.f32 0.00390625, %v5994_v12  ;;  %v6096_v45 = vadd.f32 %v6095_v63, %v6094_v16  ;;  %v21011_v16 = vld [vmem:[#allocation61_spill] sm:$0xff] }
 0x4d3   : > { %v6097_v0 = vmul.f32 0.00390625, %v6096_v45  ;;  %v6098_v38 = vmul.f32 %v18049_v40, %v18049_v40  ;;  %v6144_v39 = vsub.f32 %v18029_v36, %v18049_v40  ;;  %v6145_v10 = vsub.f32 %v18043_v47, %v18049_v40 }
 0x4d4   : > { %v6100_v54 = vsub.f32 %v17373_v51, %v18049_v40  ;;  %v6101_v9 = vsub.f32 %v17399_v6, %v18049_v40  ;;  %v6102_v12 = vsub.f32 %v17360_v24, %v18049_v40  ;;  %v6103_v62 = vsub.f32 %v17390_v3, %v18049_v40  ;;  %v21002_v6 = vld [vmem:[#allocation47_spill] sm:$0xff]  ;;  %v21003_v24 = vld [vmem:[#allocation50_spill] sm:$0xff] }
 0x4d5   : > { %v6099_v13 = vsub.f32 %v6097_v0, %v6098_v38  ;;  %v6104_v49 = vsub.f32 %v17446_v23, %v18049_v40  ;;  %v6105_v7 = vsub.f32 %v17462_v22, %v18049_v40  ;;  %v6106_v21 = vsub.f32 %v17441_v28, %v18049_v40  ;;  %v21004_v3 = vld [vmem:[#allocation46_spill] sm:$0xff]  ;;  %v21005_v23 = vld [vmem:[#allocation49_spill] sm:$0xff]  ;;  %v21007_v28 = vld [vmem:[#allocation55_spill] sm:$0xff] }
 0x4d6   : > { %v6107_v51 = vsub.f32 %v17458_v56, %v18049_v40  ;;  %v6108_v36 = vsub.f32 %v21002_v6, %v18049_v40  ;;  %v6109_v63 = vsub.f32 %v21003_v24, %v18049_v40  ;;  %v6110_v47 = vsub.f32 %v21004_v3, %v18049_v40  ;;  %v21006_v22 = vld [vmem:[#allocation53_spill] sm:$0xff]  ;;  %v21008_v56 = vld [vmem:[#allocation52_spill] sm:$0xff]  ;;  %v21012_v0 = vld [vmem:[#allocation58_spill] sm:$0xff] }
 0x4d7   : > { %v6148_v18 = vadd.f32 1e-05, %v6099_v13  ;;  %v6111_v11 = vsub.f32 %v21005_v23, %v18049_v40  ;;  %v6112_v55 = vsub.f32 %v21006_v22, %v18049_v40  ;;  %v6113_v14 = vsub.f32 %v21007_v28, %v18049_v40  ;;  %v21013_v13 = vld [vmem:[#allocation60_spill] sm:$0xff]  ;;  %v21014_v24 = vld [vmem:[#allocation65_spill] sm:$0xff]  ;;  %v21015_v23 = vld [vmem:[#allocation67_spill] sm:$0xff] }
 0x4d8   : > { %v6114_v33 = vsub.f32 %v21008_v56, %v18049_v40  ;;  %v6115_v26 = vsub.f32 %v21009_v46, %v18049_v40  ;;  %v6116_v19 = vsub.f32 %v21010_v58, %v18049_v40  ;;  %v6117_v45 = vsub.f32 %v21011_v16, %v18049_v40  ;;  %v21016_v28 = vld [vmem:[#allocation63_spill] sm:$0xff]  ;;  %v21017_v46 = vld [vmem:[#allocation66_spill] sm:$0xff] }
 0x4d9   : > { %15364 = vrsqrt.f32 %v6148_v18  ;;  %v6118_v38 = vsub.f32 %v21012_v0, %v18049_v40  ;;  %v6119_v6 = vsub.f32 %v21013_v13, %v18049_v40  ;;  %v6120_v3 = vsub.f32 %v21014_v24, %v18049_v40 }
 0x4da   : > { %v6121_v22 = vsub.f32 %v21015_v23, %v18049_v40  ;;  %v6122_v56 = vsub.f32 %v21016_v28, %v18049_v40  ;;  %v6123_v58 = vsub.f32 %v21017_v46, %v18049_v40  ;;  %v6124_v18 = vsub.f32 %v17742_v4, %v18049_v40 }
 0x4db   : > { %v6125_v16 = vsub.f32 %v17753_v61, %v18049_v40  ;;  %v6126_v0 = vsub.f32 %v17737_v60, %v18049_v40  ;;  %v6127_v13 = vsub.f32 %v17749_v32, %v18049_v40  ;;  %v6128_v24 = vsub.f32 %v17792_v31, %v18049_v40 }
 0x4dc   : > { %v6129_v23 = vsub.f32 %v17813_v30, %v18049_v40  ;;  %v6130_v28 = vsub.f32 %v17787_v53, %v18049_v40  ;;  %v6131_v4 = vsub.f32 %v17801_v1, %v18049_v40  ;;  %v6132_v61 = vsub.f32 %v17851_v37, %v18049_v40 }
 0x4dd   : > { %v6133_v60 = vsub.f32 %v17870_v27, %v18049_v40  ;;  %v6134_v32 = vsub.f32 %v17845_v35, %v18049_v40  ;;  %v6135_v31 = vsub.f32 %v17858_v42, %v18049_v40  ;;  %v6136_v30 = vsub.f32 %v17918_v20, %v18049_v40 }
 0x4de   : > { %v6137_v53 = vsub.f32 %v17932_v25, %v18049_v40  ;;  %v6138_v1 = vsub.f32 %v17911_v48, %v18049_v40  ;;  %v6139_v37 = vsub.f32 %v17928_v59, %v18049_v40  ;;  %v6140_v27 = vsub.f32 %v17982_v34, %v18049_v40 }
 0x4df   : > { %v6141_v35 = vsub.f32 %v18012_v5, %v18049_v40  ;;  %v6142_v42 = vsub.f32 %v17977_v2, %v18049_v40  ;;  %v6143_v20 = vsub.f32 %v17995_v8, %v18049_v40  ;;  %v6146_v25 = vsub.f32 %v18027_v43, %v18049_v40 }
 0x4e0   : > { %v6147_v48 = vsub.f32 %v18036_v44, %v18049_v40 }
 0x4e3   : > { %v15365_v46 = vpop.eup %15364 }
 0x4e4   : > { %v6194_v59 = vmul.f32 %v15365_v46, %v6144_v39  ;;  %v6195_v41 = vmul.f32 %v15365_v46, %v6145_v10  ;;  %v18149_v15 = vmul.f32 %v15365_v46, %v6100_v54  ;;  %v18151_v34 = vmul.f32 %v15365_v46, %v6101_v9 }
 0x4e5   : > { %v18153_v5 = vmul.f32 %v15365_v46, %v6102_v12  ;;  %v18155_v50 = vmul.f32 %v15365_v46, %v6103_v62  ;;  %v18157_v2 = vmul.f32 %v15365_v46, %v6104_v49  ;;  %v18159_v8 = vmul.f32 %v15365_v46, %v6105_v7 }
 0x4e6   : > { %v6242_v57 = vmax.f32 %v6194_v59, 0.0  ;;  %v6243_v43 = vmax.f32 %v6195_v41, 0.0  ;;  %v18161_v29 = vmul.f32 %v15365_v46, %v6106_v21  ;;  %v18163_v44 = vmul.f32 %v15365_v46, %v6107_v51 }
 0x4e7   : > { %v18165_v40 = vmul.f32 %v15365_v46, %v6108_v36  ;;  %v18167_v39 = vmul.f32 %v15365_v46, %v6109_v63  ;;  %v18169_v10 = vmul.f32 %v15365_v46, %v6110_v47  ;;  %v18171_v54 = vmul.f32 %v15365_v46, %v6111_v11 }
 0x4e8   : > { %v6290_v9 = vmul.f32 %v18025_v52, %v6242_v57  ;;  %v6291_v12 = vmul.f32 %v18032_v17, %v6243_v43  ;;  %v18175_v62 = vmul.f32 %v15365_v46, %v6112_v55  ;;  %v18177_v49 = vmul.f32 %v15365_v46, %v6113_v14  ;;  %v21024_v17 = vld [vmem:[#allocation17_spill] sm:$0xff]  ;;  %v21025_v52 = vld [vmem:[#allocation19_spill] sm:$0xff] }
 0x4e9   : > { %v18179_v41 = vmul.f32 %v15365_v46, %v6114_v33  ;;  %v18181_v7 = vmul.f32 %v15365_v46, %v6115_v26  ;;  %v18183_v21 = vmul.f32 %v15365_v46, %v6116_v19  ;;  %v18185_v51 = vmul.f32 %v15365_v46, %v6117_v45 }
 0x4ea   : > { %v6320_v36 = vpack.c.bf16 %v6291_v12, %v6290_v9  ;;  %v18187_v63 = vmul.f32 %v15365_v46, %v6118_v38  ;;  %v18189_v47 = vmul.f32 %v15365_v46, %v6119_v6  ;;  %v18191_v57 = vmul.f32 %v15365_v46, %v6120_v3 }
 0x4eb   : > { %v18193_v11 = vmul.f32 %v15365_v46, %v6121_v22  ;;  %v18195_v55 = vmul.f32 %v15365_v46, %v6122_v56  ;;  %v18197_v14 = vmul.f32 %v15365_v46, %v6123_v58  ;;  %v18199_v33 = vmul.f32 %v15365_v46, %v6124_v18 }
 0x4ec   : > { %6344 = vst [vmem:[#allocation2 + $0xc0] sm:$0xff] %v6320_v36  ;;  %v18201_v26 = vmul.f32 %v15365_v46, %v6125_v16  ;;  %v18203_v19 = vmul.f32 %v15365_v46, %v6126_v0  ;;  %v18205_v45 = vmul.f32 %v15365_v46, %v6127_v13  ;;  %v18207_v38 = vmul.f32 %v15365_v46, %v6128_v24 }
 0x4ed   : > { %v18209_v6 = vmul.f32 %v15365_v46, %v6129_v23  ;;  %v18211_v3 = vmul.f32 %v15365_v46, %v6130_v28  ;;  %v18213_v22 = vmul.f32 %v15365_v46, %v6131_v4  ;;  %v18215_v56 = vmul.f32 %v15365_v46, %v6132_v61 }
 0x4ee   : > { %v18217_v58 = vmul.f32 %v15365_v46, %v6133_v60  ;;  %v18219_v18 = vmul.f32 %v15365_v46, %v6134_v32  ;;  %v18221_v16 = vmul.f32 %v15365_v46, %v6135_v31  ;;  %v18223_v0 = vmul.f32 %v15365_v46, %v6136_v30 }
 0x4ef   : > { %v18225_v13 = vmul.f32 %v15365_v46, %v6137_v53  ;;  %v18227_v24 = vmul.f32 %v15365_v46, %v6138_v1  ;;  %v18229_v23 = vmul.f32 %v15365_v46, %v6139_v37  ;;  %v18231_v28 = vmul.f32 %v15365_v46, %v6140_v27 }
 0x4f0   : > { %v18233_v4 = vmul.f32 %v15365_v46, %v6141_v35  ;;  %v18235_v61 = vmul.f32 %v15365_v46, %v6142_v42  ;;  %v18237_v60 = vmul.f32 %v15365_v46, %v6143_v20  ;;  %v18239_v32 = vmul.f32 %v15365_v46, %v6146_v25 }
 0x4f1   : > { %v18241_v31 = vmul.f32 %v15365_v46, %v6147_v48  ;;  %v6198_v30 = vmax.f32 %v18149_v15, 0.0  ;;  %v6199_v53 = vmax.f32 %v18151_v34, 0.0  ;;  %v6200_v1 = vmax.f32 %v18153_v5, 0.0 }
 0x4f2   : > { %v6201_v37 = vmax.f32 %v18155_v50, 0.0  ;;  %v6202_v27 = vmax.f32 %v18157_v2, 0.0  ;;  %v6203_v35 = vmax.f32 %v18159_v8, 0.0  ;;  %v6204_v42 = vmax.f32 %v18161_v29, 0.0 }
 0x4f3   : > { %v6205_v20 = vmax.f32 %v18163_v44, 0.0  ;;  %v6206_v25 = vmax.f32 %v18165_v40, 0.0  ;;  %v6207_v48 = vmax.f32 %v18167_v39, 0.0  ;;  %v6208_v15 = vmax.f32 %v18169_v10, 0.0 }
 0x4f4   : > { %v6209_v46 = vmax.f32 %v18171_v54, 0.0  ;;  %v6210_v59 = vmax.f32 %v18175_v62, 0.0  ;;  %v6211_v50 = vmax.f32 %v18177_v49, 0.0  ;;  %v6212_v34 = vmax.f32 %v18179_v41, 0.0 }
 0x4f5   : > { %v6213_v5 = vmax.f32 %v18181_v7, 0.0  ;;  %v6214_v29 = vmax.f32 %v18183_v21, 0.0  ;;  %v6215_v2 = vmax.f32 %v18185_v51, 0.0  ;;  %v6216_v8 = vmax.f32 %v18187_v63, 0.0 }
 0x4f6   : > { %v6217_v43 = vmax.f32 %v18189_v47, 0.0  ;;  %v6218_v44 = vmax.f32 %v18191_v57, 0.0  ;;  %v6219_v40 = vmax.f32 %v18193_v11, 0.0  ;;  %v6220_v39 = vmax.f32 %v18195_v55, 0.0 }
 0x4f7   : > { %v6221_v10 = vmax.f32 %v18197_v14, 0.0  ;;  %v6222_v54 = vmax.f32 %v18199_v33, 0.0  ;;  %v6223_v9 = vmax.f32 %v18201_v26, 0.0  ;;  %v6224_v12 = vmax.f32 %v18203_v19, 0.0 }
 0x4f8   : > { %v6225_v62 = vmax.f32 %v18205_v45, 0.0  ;;  %v6226_v49 = vmax.f32 %v18207_v38, 0.0  ;;  %v6227_v41 = vmax.f32 %v18209_v6, 0.0  ;;  %v6228_v7 = vmax.f32 %v18211_v3, 0.0  ;;  %v21018_v3 = vld [vmem:[#allocation14_spill] sm:$0xff] }
 0x4f9   : > { %v6229_v21 = vmax.f32 %v18213_v22, 0.0  ;;  %v6230_v51 = vmax.f32 %v18215_v56, 0.0  ;;  %v6231_v36 = vmax.f32 %v18217_v58, 0.0  ;;  %v6232_v63 = vmax.f32 %v18219_v18, 0.0  ;;  %v21019_v56 = vld [vmem:[#allocation16_spill] sm:$0xff]  ;;  %v21020_v18 = vld [vmem:[#allocation13_spill] sm:$0xff] }
 0x4fa   : > { %v6233_v47 = vmax.f32 %v18221_v16, 0.0  ;;  %v6234_v57 = vmax.f32 %v18223_v0, 0.0  ;;  %v6235_v11 = vmax.f32 %v18225_v13, 0.0  ;;  %v6236_v55 = vmax.f32 %v18227_v24, 0.0  ;;  %v21021_v0 = vld [vmem:[#allocation15_spill] sm:$0xff]  ;;  %v21022_v24 = vld [vmem:[#allocation18_spill] sm:$0xff] }
 0x4fb   : > { %v6237_v14 = vmax.f32 %v18229_v23, 0.0  ;;  %v6238_v33 = vmax.f32 %v18231_v28, 0.0  ;;  %v6239_v26 = vmax.f32 %v18233_v4, 0.0  ;;  %v6240_v19 = vmax.f32 %v18235_v61, 0.0  ;;  %v21023_v28 = vld [vmem:[#allocation20_spill] sm:$0xff] }
 0x4fc   : > { %v6241_v45 = vmax.f32 %v18237_v60, 0.0  ;;  %v6244_v38 = vmax.f32 %v18239_v32, 0.0  ;;  %v6245_v6 = vmax.f32 %v18241_v31, 0.0  ;;  %v6246_v22 = vmul.f32 %v21018_v3, %v6198_v30  ;;  %v21026_v32 = vld [vmem:[#allocation22_spill] sm:$0xff]  ;;  %v21027_v3 = vld [vmem:[#allocation24_spill] sm:$0xff] }
 0x4fd   : > { %v6247_v58 = vmul.f32 %v21019_v56, %v6199_v53  ;;  %v6248_v16 = vmul.f32 %v21020_v18, %v6200_v1  ;;  %v6249_v13 = vmul.f32 %v21021_v0, %v6201_v37  ;;  %v6250_v23 = vmul.f32 %v21022_v24, %v6202_v27  ;;  %v21028_v53 = vld [vmem:[#allocation21_spill] sm:$0xff]  ;;  %v21029_v1 = vld [vmem:[#allocation23_spill] sm:$0xff]  ;;  %v21030_v0 = vld [vmem:[#allocation26_spill] sm:$0xff] }
 0x4fe   : > { %v6251_v4 = vmul.f32 %v21023_v28, %v6203_v35  ;;  %v6252_v61 = vmul.f32 %v21024_v17, %v6204_v42  ;;  %v6253_v60 = vmul.f32 %v21025_v52, %v6205_v20  ;;  %v6254_v31 = vmul.f32 %v21026_v32, %v6206_v25  ;;  %v21031_v24 = vld [vmem:[#allocation28_spill] sm:$0xff]  ;;  %v21032_v28 = vld [vmem:[#allocation25_spill] sm:$0xff]  ;;  %v21033_v17 = vld [vmem:[#allocation27_spill] sm:$0xff] }
 0x4ff   : > { %v6255_v30 = vmul.f32 %v21027_v3, %v6207_v48  ;;  %v6256_v56 = vmul.f32 %v21028_v53, %v6208_v15  ;;  %v6257_v18 = vmul.f32 %v21029_v1, %v6209_v46  ;;  %v6258_v37 = vmul.f32 %v21030_v0, %v6210_v59  ;;  %v21034_v20 = vld [vmem:[#allocation30_spill] sm:$0xff]  ;;  %v21035_v25 = vld [vmem:[#allocation32_spill] sm:$0xff]  ;;  %v21036_v3 = vld [vmem:[#allocation29_spill] sm:$0xff] }
 0x500   : > { %v6259_v27 = vmul.f32 %v21031_v24, %v6211_v50  ;;  %v6260_v35 = vmul.f32 %v21032_v28, %v6212_v34  ;;  %v6261_v42 = vmul.f32 %v21033_v17, %v6213_v5  ;;  %v6262_v52 = vmul.f32 %v21034_v20, %v6214_v29  ;;  %v21037_v15 = vld [vmem:[#allocation31_spill] sm:$0xff]  ;;  %v21038_v1 = vld [vmem:[#allocation34_spill] sm:$0xff]  ;;  %v21039_v0 = vld [vmem:[#allocation36_spill] sm:$0xff] }
 0x501   : > { %v6263_v32 = vmul.f32 %v21035_v25, %v6215_v2  ;;  %v6264_v48 = vmul.f32 %v21036_v3, %v6216_v8  ;;  %v6265_v53 = vmul.f32 %v21037_v15, %v6217_v43  ;;  %v6266_v46 = vmul.f32 %v21038_v1, %v6218_v44  ;;  %v21040_v24 = vld [vmem:[#allocation33_spill] sm:$0xff]  ;;  %v21041_v28 = vld [vmem:[#allocation35_spill] sm:$0xff]  ;;  %v21042_v5 = vld [vmem:[#allocation38_spill] sm:$0xff] }
 0x502   : > { %v6267_v59 = vmul.f32 %v21039_v0, %v6219_v40  ;;  %v6268_v50 = vmul.f32 %v21040_v24, %v6220_v39  ;;  %v6269_v34 = vmul.f32 %v21041_v28, %v6221_v10  ;;  %v6270_v17 = vmul.f32 %v21042_v5, %v6222_v54  ;;  %v21043_v20 = vld [vmem:[#allocation40_spill] sm:$0xff]  ;;  %v21044_v2 = vld [vmem:[#allocation37_spill] sm:$0xff]  ;;  %v21045_v3 = vld [vmem:[#allocation39_spill] sm:$0xff] }
 0x503   : > { %v6271_v29 = vmul.f32 %v21043_v20, %v6223_v9  ;;  %v6272_v25 = vmul.f32 %v21044_v2, %v6224_v12  ;;  %v6273_v8 = vmul.f32 %v21045_v3, %v6225_v62  ;;  %v21046_v15 = vld [vmem:[#allocation42_spill] sm:$0xff]  ;;  %v21047_v1 = vld [vmem:[#allocation44_spill] sm:$0xff]  ;;  %v21048_v0 = vld [vmem:[#allocation41_spill] sm:$0xff] }
 0x504   : > { %v6274_v43 = vmul.f32 %v21046_v15, %v6226_v49  ;;  %v6275_v44 = vmul.f32 %v21047_v1, %v6227_v41  ;;  %v6276_v40 = vmul.f32 %v21048_v0, %v6228_v7  ;;  %v21049_v24 = vld [vmem:[#allocation43_spill] sm:$0xff]  ;;  %v21050_v10 = vld [vmem:[#allocation48_spill] sm:$0xff]  ;;  %v21052_v9 = vld [vmem:[#allocation45_spill] sm:$0xff] }
 0x505   : > { %v6277_v39 = vmul.f32 %v21049_v24, %v6229_v21  ;;  %v6278_v28 = vmul.f32 %v21050_v10, %v6230_v51  ;;  %v21051_v5 = vld [vmem:[#allocation56_spill] sm:$0xff]  ;;  %v6280_v20 = vmul.f32 %v21052_v9, %v6232_v63  ;;  %v21053_v2 = vld [vmem:[#allocation51_spill] sm:$0xff]  ;;  %v21054_v3 = vld [vmem:[#allocation62_spill] sm:$0xff] }
 0x506   : > { %v6279_v54 = vmul.f32 %v21051_v5, %v6231_v36  ;;  %v6281_v12 = vmul.f32 %v21053_v2, %v6233_v47  ;;  %v6282_v62 = vmul.f32 %v21054_v3, %v6234_v57  ;;  %v21055_v15 = vld [vmem:[#allocation70_spill] sm:$0xff]  ;;  %v21056_v1 = vld [vmem:[#allocation57_spill] sm:$0xff]  ;;  %v21057_v0 = vld [vmem:[#allocation64_spill] sm:$0xff] }
 0x507   : > { %v6283_v49 = vmul.f32 %v21055_v15, %v6235_v11  ;;  %v6284_v41 = vmul.f32 %v21056_v1, %v6236_v55  ;;  %v6285_v7 = vmul.f32 %v21057_v0, %v6237_v14  ;;  %v21058_v21 = vld [vmem:[#allocation72_spill] sm:$0xff]  ;;  %v21059_v10 = vld [vmem:[#allocation74_spill] sm:$0xff]  ;;  %v21060_v5 = vld [vmem:[#allocation71_spill] sm:$0xff]  ;;  %v6298_v11 = vpack.c.bf16 %v6247_v58, %v6246_v22 }
 0x508   : > { %v6286_v24 = vmul.f32 %v21058_v21, %v6238_v33  ;;  %v6287_v51 = vmul.f32 %v21059_v10, %v6239_v26  ;;  %v6288_v36 = vmul.f32 %v21060_v5, %v6240_v19  ;;  %v21061_v9 = vld [vmem:[#allocation75_spill] sm:$0xff]  ;;  %v21062_v2 = vld [vmem:[#allocation76_spill] sm:$0xff]  ;;  %v6299_v15 = vpack.c.bf16 %v6249_v13, %v6248_v16 }
 0x509   : > { %v6289_v63 = vmul.f32 %v21061_v9, %v6241_v45  ;;  %v6292_v47 = vmul.f32 %v21062_v2, %v6244_v38  ;;  %v21063_v3 = vld [vmem:[#allocation79_spill] sm:$0xff]  ;;  %v6300_v1 = vpack.c.bf16 %v6251_v4, %v6250_v23  ;;  %v6301_v55 = vpack.c.bf16 %v6253_v60, %v6252_v61  ;;  %6322 = vst [vmem:[#allocation2 + $0x10] sm:$0xff] %v6298_v11 }
 0x50a   : > { %v6293_v57 = vmul.f32 %v21063_v3, %v6245_v6  ;;  %v6302_v0 = vpack.c.bf16 %v6255_v30, %v6254_v31  ;;  %v18335_v14 = vpack.c.bf16 %v6257_v18, %v6256_v56  ;;  %v18337_v21 = vpack.c.bf16 %v6259_v27, %v6258_v37  ;;  %6323 = vst [vmem:[#allocation2 + $0x18] sm:$0xff] %v6299_v15 }
 0x50b   : > { %v18339_v33 = vpack.c.bf16 %v6261_v42, %v6260_v35  ;;  %v18341_v26 = vpack.c.bf16 %v6263_v32, %v6262_v52  ;;  %v18343_v19 = vpack.c.bf16 %v6265_v53, %v6264_v48  ;;  %v18345_v45 = vpack.c.bf16 %v6267_v59, %v6266_v46  ;;  %6324 = vst [vmem:[#allocation2 + $0x20] sm:$0xff] %v6300_v1  ;;  %v21064_v46 = vld [vmem:[#allocation68_spill] sm:$0xff] }
 0x50c   : > { %v18347_v38 = vpack.c.bf16 %v6269_v34, %v6268_v50  ;;  %v18349_v6 = vpack.c.bf16 %v6271_v29, %v6270_v17  ;;  %v18351_v22 = vpack.c.bf16 %v6273_v8, %v6272_v25  ;;  %v18353_v56 = vpack.c.bf16 %v6275_v44, %v6274_v43  ;;  %6325 = vst [vmem:[#allocation2 + $0x28] sm:$0xff] %v6301_v55  ;;  %v21066_v44 = vld [vmem:[#allocation69_spill] sm:$0xff] }
 0x50d   : > { %6326 = vst [vmem:[#allocation2 + $0x30] sm:$0xff] %v6302_v0  ;;  %6327 = vst [vmem:[#allocation2 + $0x38] sm:$0xff] %v18335_v14  ;;  %v18357_v52 = vpack.c.bf16 %v6277_v39, %v6276_v40  ;;  %v18359_v58 = vpack.c.bf16 %v6279_v54, %v6278_v28  ;;  %v18361_v18 = vpack.c.bf16 %v6281_v12, %v6280_v20  ;;  %v18385_v4 = vshll.u32 %v6298_v11, 16  ;;  %v15302_v54 = vld [vmem:[#allocation8 + $0x10] sm:$0xff]  }
 0x50e   : > { %6328 = vst [vmem:[#allocation2 + $0x40] sm:$0xff] %v18337_v21  ;;  %v18363_v16 = vpack.c.bf16 %v6283_v49, %v6282_v62  ;;  %6329 = vst [vmem:[#allocation2 + $0x48] sm:$0xff] %v18339_v33  ;;  %v18369_v17 = vpack.c.bf16 %v6285_v7, %v6284_v41  ;;  %v18371_v13 = vpack.c.bf16 %v6287_v51, %v6286_v24  ;;  %v18383_v24 = vshrl.u32 %v6298_v11, 16  ;;  %v15303_v51 = vld [vmem:[#allocation8 + $0x18] sm:$0xff]  }
 0x50f   : > { %6330 = vst [vmem:[#allocation2 + $0x50] sm:$0xff] %v18341_v26  ;;  %6331 = vst [vmem:[#allocation2 + $0x58] sm:$0xff] %v18343_v19  ;;  %v18373_v23 = vpack.c.bf16 %v6289_v63, %v6288_v36  ;;  %v6321_v28 = vpack.c.bf16 %v6293_v57, %v6292_v47  ;;  %v18387_v61 = vshrl.u32 %v6299_v15, 16  ;;  %v18389_v60 = vshll.u32 %v6299_v15, 16 }
 0x510   : > { %6332 = vst [vmem:[#allocation2 + $0x60] sm:$0xff] %v18345_v45  ;;  %6333 = vst [vmem:[#allocation2 + $0x68] sm:$0xff] %v18347_v38  ;;  %v18394_v32 = vshrl.u32 %v6300_v1, 16  ;;  %v18396_v31 = vshll.u32 %v6300_v1, 16  ;;  %v6444_v30 = vrot.slane %v18383_v24, 4  ;;  %v6447_v53 = vrot.slane %v18385_v4, 5 }
 0x511   : > { %6334 = vst [vmem:[#allocation2 + $0x70] sm:$0xff] %v18349_v6  ;;  %6335 = vst [vmem:[#allocation2 + $0x78] sm:$0xff] %v18351_v22  ;;  %v6453_v37 = vrot.slane %v18387_v61, 4  ;;  %v6456_v27 = vrot.slane %v18389_v60, 5  ;;  %v18402_v35 = vshrl.u32 %v6301_v55, 16  ;;  %v18404_v42 = vshll.u32 %v6301_v55, 16 }
 0x512   : > { %6336 = vst [vmem:[#allocation2 + $0x80] sm:$0xff] %v18353_v56  ;;  %6337 = vst [vmem:[#allocation2 + $0x88] sm:$0xff] %v18357_v52  ;;  %v6448_v20 = vor.u32 %v6447_v53, %v6444_v30  ;;  %v6462_v48 = vrot.slane %v18394_v32, 4  ;;  %v6465_v15 = vrot.slane %v18396_v31, 5  ;;  %v15301_v1 = vld [vmem:[#allocation8 + $0x8] sm:$0xff]   ;;  %v18411_v34 = vshrl.u32 %v6302_v0, 16 }
 0x513   : > { %6338 = vst [vmem:[#allocation2 + $0x90] sm:$0xff] %v18359_v58  ;;  %6339 = vst [vmem:[#allocation2 + $0x98] sm:$0xff] %v18361_v18  ;;  %v6457_v25 = vor.u32 %v6456_v27, %v6453_v37  ;;  %v18413_v29 = vshll.u32 %v6302_v0, 16  ;;  %v6471_v8 = vrot.slane %v18402_v35, 4  ;;  %v6474_v43 = vrot.slane %v18404_v42, 5  ;;  %v15304_v37 = vld [vmem:[#allocation8 + $0x20] sm:$0xff]  }
 0x514   : > { %6340 = vst [vmem:[#allocation2 + $0xa0] sm:$0xff] %v18363_v16  ;;  %6341 = vst [vmem:[#allocation2 + $0xa8] sm:$0xff] %v18369_v17  ;;  %v6449_v59 = vsel %vm6423_vm12, %v21064_v46, %v6448_v20  ;;  %v20672_v40 = vshrl.u32 %v18335_v14, 16  ;;  %v20668_v39 = vshll.u32 %v18335_v14, 16  ;;  %v6466_v12 = vor.u32 %v6465_v15, %v6462_v48 }
 0x515   : > { %6342 = vst [vmem:[#allocation2 + $0xb0] sm:$0xff] %v18371_v13  ;;  %6343 = vst [vmem:[#allocation2 + $0xb8] sm:$0xff] %v18373_v23  ;;  %v6458_v50 = vsel %vm6423_vm12, %v6448_v20, %v6457_v25  ;;  %13593 = vmatmul.mubr.bf16.vlgmr.msra.gmra.mrb[0].mxu1 %v6449_v59  ;;  %v6480_v62 = vrot.slane %v18411_v34, 4  ;;  %v6483_v0 = vrot.slane %v18413_v29, 5  ;;  %v6475_v49 = vor.u32 %v6474_v43, %v6471_v8 }
 0x516   : > { %6345 = vst [vmem:[#allocation2 + $0xc8] sm:$0xff] %v6321_v28  ;;  %21065 = vst [vmem:[#allocation47_spill] sm:$0xff] %v18411_v34  ;;  %13596 = vmatprep.mubr.bf16.mxu1 %v6458_v50  ;;  %13641 = vmatpush3.bf16.msra.mxu1 %v21066_v44  ;;  %v6489_v41 = vrot.slane %v20672_v40, 4  ;;  %v6492_v7 = vrot.slane %v20668_v39, 5  ;;  %v6467_v36 = vsel %vm6423_vm12, %v6457_v25, %v6466_v12  ;;  %v20666_v57 = vshrl.u32 %v18337_v21, 16  ;;  %v15307_v40 = vld [vmem:[#allocation8 + $0x38] sm:$0xff]  }
 0x517   : > { %13642 = vmatprep.subr.bf16.mxu1 %v15301_v1  ;;  %v6484_v63 = vor.u32 %v6483_v0, %v6480_v62  ;;  %v6476_v47 = vsel %vm6423_vm12, %v6466_v12, %v6475_v49  ;;  %v20664_v11 = vshll.u32 %v18337_v21, 16  ;;  %v20656_v28 = vshrl.u32 %v18339_v33, 16 }
 0x518   : > { %v6493_v55 = vor.u32 %v6492_v7, %v6489_v41  ;;  %v20655_v30 = vshll.u32 %v18339_v33, 16  ;;  %v20657_v53 = vshrl.u32 %v18341_v26, 16  ;;  %v20658_v20 = vshll.u32 %v18341_v26, 16 }
 0x519   : > { %v6485_v27 = vsel %vm6423_vm12, %v6475_v49, %v6484_v63  ;;  %v20659_v25 = vshrl.u32 %v18343_v19, 16  ;;  %v20663_v48 = vshll.u32 %v18343_v19, 16  ;;  %v6498_v15 = vrot.slane %v20666_v57, 4  ;;  %v15305_v49 = vld [vmem:[#allocation8 + $0x28] sm:$0xff]  }
 0x51a   : > { %13643 = vmatpush3.bf16.msra.mxu1 %v15301_v1  ;;  %v6501_v1 = vrot.slane %v20664_v11, 5  ;;  %v20661_v46 = vshrl.u32 %v18345_v45, 16  ;;  %v20660_v59 = vshll.u32 %v18345_v45, 16  ;;  %v20662_v50 = vshrl.u32 %v18347_v38, 16 }
 0x51b   : > { %13644 = vmatprep.subr.bf16.mxu1 %v15302_v54  ;;  %v20665_v8 = vshll.u32 %v18347_v38, 16  ;;  %v20667_v43 = vshrl.u32 %v18349_v6, 16  ;;  %v20669_v44 = vshll.u32 %v18349_v6, 16  ;;  %v6510_v12 = vrot.slane %v20655_v30, 5 }
 0x51c   : > { %v20670_v62 = vshrl.u32 %v18351_v22, 16  ;;  %v20671_v0 = vshll.u32 %v18351_v22, 16  ;;  %v6516_v41 = vrot.slane %v20657_v53, 4  ;;  %v6519_v7 = vrot.slane %v20658_v20, 5 }
 0x51d   : > { %13597 = vmatmul.mubr.bf16.gmra.mrb[4].mxu1 %v6467_v36  ;;  %v6528_v36 = vrot.slane %v20663_v48, 5  ;;  %v6534_v30 = vrot.slane %v20661_v46, 4  ;;  %v6543_v53 = vrot.slane %v20662_v50, 4  ;;  %v6546_v20 = vrot.slane %v20665_v8, 5 }
 0x51e   : > { %13600 = vmatprep.mubr.bf16.mxu1 %v6476_v47  ;;  %13645 = vmatpush3.bf16.msra.mxu1 %v15302_v54  ;;  %v6507_v54 = vrot.slane %v20656_v28, 4  ;;  %v6494_v47 = vsel %vm6423_vm12, %v6484_v63, %v6493_v55  ;;  %v6537_v28 = vrot.slane %v20660_v59, 5  ;;  %v6561_v63 = vrot.slane %v20670_v62, 4 }
 0x51f   : > { %13646 = vmatprep.subr.bf16.mxu1 %v15303_v51  ;;  %v6564_v59 = vrot.slane %v20671_v0, 5  ;;  %v6502_v46 = vor.u32 %v6501_v1, %v6498_v15  ;;  %v6520_v48 = vor.u32 %v6519_v7, %v6516_v41  ;;  %v20676_v57 = vshrl.u32 %v18353_v56, 16 }
 0x520   : > { %v6511_v50 = vor.u32 %v6510_v12, %v6507_v54  ;;  %v6538_v8 = vor.u32 %v6537_v28, %v6534_v30  ;;  %v20673_v0 = vshll.u32 %v18357_v52, 16  ;;  %v6959_v54 = vrot.slane %v18385_v4, 4  ;;  %v18521_v12 = vld [vmem:[#allocation8 + $0xc0] sm:$0xff]  }
 0x521   : > { %v18481_v62 = vor.u32 %v6564_v59, %v6561_v63  ;;  %v6503_v15 = vsel %vm6423_vm12, %v6493_v55, %v6502_v46  ;;  %v6962_v63 = vrot.slane %v18387_v61, 3  ;;  %v6967_v41 = vrot.slane %v18396_v31, 4 }
 0x522   : > { %13647 = vmatpush3.bf16.msra.mxu1 %v15303_v51  ;;  %v6525_v51 = vrot.slane %v20659_v25, 4  ;;  %v6552_v25 = vrot.slane %v20667_v43, 4  ;;  %v6547_v43 = vor.u32 %v6546_v20, %v6543_v53  ;;  %v6512_v28 = vsel %vm6423_vm12, %v6502_v46, %v6511_v50 }
 0x523   : > { %13648 = vmatprep.subr.bf16.mxu1 %v15304_v37  ;;  %v6521_v30 = vsel %vm6423_vm12, %v6511_v50, %v6520_v48  ;;  %v6975_v1 = vrot.slane %v18413_v29, 4  ;;  %v21075_v3 = vshll.u32 %v18341_v26, 16 }
 0x524   : > { %v6529_v11 = vor.u32 %v6528_v36, %v6525_v51  ;;  %v18498_v55 = vsel %vm6423_vm12, %v6538_v8, %v6547_v43  ;;  %v6974_v51 = vrot.slane %v18411_v34, 3 }
 0x525   : > { %13601 = vmatmul.mubr.bf16.gmra.mrb[8].mxu1 %v6485_v27  ;;  %v6555_v27 = vrot.slane %v20669_v44, 5  ;;  %v20675_v44 = vshll.u32 %v18353_v56, 16 }
 0x526   : > { %13604 = vmatprep.mubr.bf16.mxu1 %v6494_v47  ;;  %13649 = vmatpush3.bf16.msra.mxu1 %v15304_v37  ;;  %v15306_v47 = vld [vmem:[#allocation8 + $0x30] sm:$0xff]   ;;  %v20674_v37 = vshrl.u32 %v18357_v52, 16  ;;  %v6530_v53 = vsel %vm6423_vm12, %v6520_v48, %v6529_v11  ;;  %v18489_v20 = vsel %vm6423_vm12, %v6529_v11, %v6538_v8  ;;  %v18517_v8 = vrot.slane %v20673_v0, 5 }
 0x527   : > { %13650 = vmatprep.subr.bf16.mxu1 %v15305_v49  ;;  %v6556_v39 = vor.u32 %v6555_v27, %v6552_v25  ;;  %v18493_v25 = vrot.slane %v20676_v57, 4  ;;  %v18505_v48 = vrot.slane %v20675_v44, 5  ;;  %v21068_v0 = vshrl.u32 %v18335_v14, 16 }
 0x528   : > { %v18509_v11 = vrot.slane %v20674_v37, 4 }
 0x529   : > { %v18501_v46 = vsel %vm6423_vm12, %v6547_v43, %v6556_v39  ;;  %v18513_v50 = vsel %vm6423_vm12, %v6556_v39, %v18481_v62  ;;  %v6958_v43 = vrot.slane %v18383_v24, 3  ;;  %v6978_v37 = vrot.slane %v21068_v0, 3 }
 0x52a   : > { %13651 = vmatpush3.bf16.msra.mxu1 %v15305_v49  ;;  %v21067_v49 = vld [vmem:[#allocation73_spill] sm:$0xff] }
 0x52b   : > { %13652 = vmatprep.subr.bf16.mxu1 %v15306_v47  ;;  %v6960_v27 = vor.u32 %v6959_v54, %v6958_v43  ;;  %v6970_v43 = vrot.slane %v18402_v35, 3  ;;  %v6971_v54 = vrot.slane %v18404_v42, 4 }
 0x52d   : > { %13605 = vmatmul.mubr.bf16.gmra.mrb[12].mxu1 %v6503_v15  ;;  %v6963_v15 = vrot.slane %v18389_v60, 4  ;;  %v18537_v39 = vsel %vm6945_vm13, %v21067_v49, %v6960_v27  ;;  %v6972_v7 = vor.u32 %v6971_v54, %v6970_v43  ;;  %v6976_v43 = vor.u32 %v6975_v1, %v6974_v51 }
 0x52e   : > { %13608 = vmatprep.mubr.bf16.mxu1 %v6512_v28  ;;  %13653 = vmatpush3.bf16.msra.mxu1 %v15306_v47  ;;  %v6966_v28 = vrot.slane %v18394_v32, 3  ;;  %v21071_v54 = vshll.u32 %v18337_v21, 16 }
 0x52f   : > { %13654 = vmatprep.subr.bf16.mxu1 %v15307_v40  ;;  %v6964_v47 = vor.u32 %v6963_v15, %v6962_v63 }
 0x530   : > { %v6968_v36 = vor.u32 %v6967_v41, %v6966_v28  ;;  %v21069_v41 = vshll.u32 %v18335_v14, 16  ;;  %v6983_v0 = vrot.slane %v21071_v54, 4  ;;  %v21074_v14 = vshrl.u32 %v18341_v26, 16 }
 0x531   : > { %v18549_v44 = vsel %vm6945_vm13, %v6960_v27, %v6964_v47  ;;  %v21077_v54 = vshll.u32 %v18343_v19, 16 }
 0x532   : > { %13655 = vmatpush3.bf16.msra.mxu1 %v15307_v40  ;;  %v18552_v57 = vsel %vm6945_vm13, %v6964_v47, %v6968_v36  ;;  %v6979_v63 = vrot.slane %v21069_v41, 4  ;;  %v18559_v28 = vsel %vm6945_vm13, %v6968_v36, %v6972_v7  ;;  %v21073_v47 = vshll.u32 %v18339_v33, 16 }
 0x533   : > { %13704 = vmatprep.subr.bf16.mxu1 %v18521_v12  ;;  %v6990_v41 = vrot.slane %v21074_v14, 3  ;;  %v18572_v36 = vsel %vm6945_vm13, %v6972_v7, %v6976_v43  ;;  %v21079_v7 = vshll.u32 %v18345_v45, 16 }
 0x534   : > { %v6980_v59 = vor.u32 %v6979_v63, %v6978_v37  ;;  %v6987_v40 = vrot.slane %v21073_v47, 4  ;;  %v21078_v47 = vshrl.u32 %v18345_v45, 16 }
 0x535   : > { %13609 = vmatmul.mubr.bf16.gmra.mrb[16].mxu1 %v6521_v30  ;;  %v21070_v30 = vshrl.u32 %v18337_v21, 16  ;;  %v21076_v21 = vshrl.u32 %v18343_v19, 16 }
 0x536   : > { %13612 = vmatprep.mubr.bf16.mxu1 %v6530_v53  ;;  %v21072_v53 = vshrl.u32 %v18339_v33, 16  ;;  %v18579_v37 = vsel %vm6945_vm13, %v6976_v43, %v6980_v59  ;;  %v6998_v14 = vrot.slane %v21078_v47, 3 }
 0x537   : > { %v6982_v15 = vrot.slane %v21070_v30, 3  ;;  %v6991_v30 = vrot.slane %v21075_v3, 4  ;;  %v6994_v51 = vrot.slane %v21076_v21, 3 }
 0x538   : > { %v6986_v27 = vrot.slane %v21072_v53, 3  ;;  %v6995_v53 = vrot.slane %v21077_v54, 4 }
 0x539   : > { %v6984_v1 = vor.u32 %v6983_v0, %v6982_v15  ;;  %v6992_v63 = vor.u32 %v6991_v30, %v6990_v41  ;;  %v6999_v15 = vrot.slane %v21079_v7, 4  ;;  %v21080_v0 = vshrl.u32 %v18347_v38, 16 }
 0x53a   : > { %v6988_v33 = vor.u32 %v6987_v40, %v6986_v27  ;;  %v6996_v26 = vor.u32 %v6995_v53, %v6994_v51  ;;  %v21081_v40 = vshll.u32 %v18347_v38, 16  ;;  %v21082_v41 = vshrl.u32 %v18349_v6, 16 }
 0x53b   : > { %v18584_v3 = vsel %vm6945_vm13, %v6980_v59, %v6984_v1  ;;  %v7002_v21 = vrot.slane %v21080_v0, 3  ;;  %v7000_v30 = vor.u32 %v6999_v15, %v6998_v14  ;;  %v21083_v51 = vshll.u32 %v18349_v6, 16 }
 0x53c   : > { %v18591_v19 = vsel %vm6945_vm13, %v6984_v1, %v6988_v33  ;;  %v18594_v43 = vsel %vm6945_vm13, %v6988_v33, %v6992_v63  ;;  %v7003_v27 = vrot.slane %v21081_v40, 4  ;;  %v7006_v59 = vrot.slane %v21082_v41, 3 }
 0x53d   : > { %13613 = vmatmul.mubr.bf16.gmra.mrb[20].mxu1 %v18489_v20  ;;  %v18602_v45 = vsel %vm6945_vm13, %v6992_v63, %v6996_v26  ;;  %v7007_v54 = vrot.slane %v21083_v51, 4  ;;  %v21084_v1 = vshrl.u32 %v18351_v22, 16  ;;  %v21085_v38 = vshll.u32 %v18351_v22, 16 }
 0x53e   : > { %13616 = vmatprep.mubr.bf16.mxu1 %v18498_v55  ;;  %v7004_v33 = vor.u32 %v7003_v27, %v7002_v21  ;;  %v21086_v7 = vshrl.u32 %v18353_v56, 16  ;;  %v21087_v20 = vshll.u32 %v18353_v56, 16  ;;  %v18616_v14 = vsel %vm6945_vm13, %v6996_v26, %v7000_v30 }
 0x53f   : > { %v7010_v53 = vrot.slane %v21084_v1, 3  ;;  %v7011_v47 = vrot.slane %v21085_v38, 4  ;;  %v7008_v6 = vor.u32 %v7007_v54, %v7006_v59  ;;  %v21088_v15 = vshrl.u32 %v18357_v52, 16 }
 0x540   : > { %v7014_v0 = vrot.slane %v21086_v7, 3  ;;  %v7015_v63 = vrot.slane %v21087_v20, 4  ;;  %v21089_v41 = vshll.u32 %v18357_v52, 16  ;;  %v18623_v21 = vsel %vm6945_vm13, %v7000_v30, %v7004_v33 }
 0x541   : > { %v7018_v40 = vrot.slane %v21088_v15, 3  ;;  %v7012_v22 = vor.u32 %v7011_v47, %v7010_v53  ;;  %v21090_v51 = vshrl.u32 %v18359_v58, 16  ;;  %v18628_v56 = vsel %vm6945_vm13, %v7004_v33, %v7008_v6 }
 0x542   : > { %v7019_v55 = vrot.slane %v21089_v41, 4  ;;  %v7016_v27 = vor.u32 %v7015_v63, %v7014_v0  ;;  %v21091_v59 = vshll.u32 %v18359_v58, 16  ;;  %v21092_v38 = vshrl.u32 %v18361_v18, 16 }
 0x543   : > { %v7022_v1 = vrot.slane %v21090_v51, 3  ;;  %v18635_v52 = vsel %vm6945_vm13, %v7008_v6, %v7012_v22  ;;  %v21093_v53 = vshll.u32 %v18361_v18, 16  ;;  %v21094_v0 = vshrl.u32 %v18363_v16, 16 }
 0x544   : > { %v7020_v26 = vor.u32 %v7019_v55, %v7018_v40  ;;  %v7023_v54 = vrot.slane %v21091_v59, 4  ;;  %v7026_v7 = vrot.slane %v21092_v38, 3  ;;  %v18638_v30 = vsel %vm6945_vm13, %v7012_v22, %v7016_v27 }
 0x545   : > { %v7027_v47 = vrot.slane %v21093_v53, 4  ;;  %v7030_v33 = vrot.slane %v21094_v0, 3  ;;  %v21095_v15 = vshll.u32 %v18363_v16, 16  ;;  %v21096_v41 = vshrl.u32 %v18369_v17, 16  ;;  %13617 = vmatmul.mubr.bf16.gmra.mrb[24].mxu1 %v18501_v46 }
 0x546   : > { %v18645_v20 = vsel %vm6945_vm13, %v7016_v27, %v7020_v26  ;;  %v7024_v63 = vor.u32 %v7023_v54, %v7022_v1  ;;  %v21097_v22 = vshll.u32 %v18369_v17, 16  ;;  %v21098_v59 = vshrl.u32 %v18371_v13, 16  ;;  %13620 = vmatprep.mubr.bf16.mxu1 %v18513_v50 }
 0x547   : > { %v7031_v40 = vrot.slane %v21095_v15, 4  ;;  %v7034_v6 = vrot.slane %v21096_v41, 3  ;;  %v7028_v55 = vor.u32 %v7027_v47, %v7026_v7  ;;  %v21099_v53 = vshll.u32 %v18371_v13, 16 }
 0x548   : > { %v7035_v51 = vrot.slane %v21097_v22, 4  ;;  %v7038_v38 = vrot.slane %v21098_v59, 3  ;;  %v18659_v27 = vsel %vm6945_vm13, %v7020_v26, %v7024_v63  ;;  %v21100_v54 = vshrl.u32 %v18373_v23, 16 }
 0x549   : > { %v7039_v0 = vrot.slane %v21099_v53, 4  ;;  %v7032_v1 = vor.u32 %v7031_v40, %v7030_v33  ;;  %v21101_v7 = vshll.u32 %v18373_v23, 16  ;;  %v18667_v41 = vsel %vm6945_vm13, %v7024_v63, %v7028_v55 }
 0x54a   : > { %v7042_v15 = vrot.slane %v21100_v54, 3  ;;  %v7036_v22 = vor.u32 %v7035_v51, %v7034_v6  ;;  %v7402_v26 = vrot.slane %v18383_v24, 7  ;;  %v6574_v33 = vor.u32 %v18505_v48, %v18493_v25 }
 0x54b   : > { %v7043_v47 = vrot.slane %v21101_v7, 4  ;;  %v7040_v59 = vor.u32 %v7039_v0, %v7038_v38  ;;  %v18670_v53 = vsel %vm6945_vm13, %v7028_v55, %v7032_v1  ;;  %v7410_v63 = vrot.slane %v18387_v61, 7 }
 0x54c   : > { %v18678_v40 = vsel %vm6945_vm13, %v7032_v1, %v7036_v22  ;;  %v6583_v6 = vor.u32 %v18517_v8, %v18509_v11  ;;  %v18691_v24 = vor.u32 %v7402_v26, %v18385_v4  ;;  %v7418_v25 = vrot.slane %v18394_v32, 7 }
 0x54d   : > { %v18672_v46 = vor.u32 %v7043_v47, %v7042_v15  ;;  %v18681_v50 = vsel %vm6945_vm13, %v7036_v22, %v7040_v59  ;;  %v7413_v48 = vor.u32 %v7410_v63, %v18389_v60  ;;  %v7426_v51 = vrot.slane %v18402_v35, 7 }
 0x54e   : > { %v20677_v38 = vrot.slane %v18411_v34, 7  ;;  %v21102_v61 = vshrl.u32 %v18359_v58, 16  ;;  %v21103_v11 = vshll.u32 %v18359_v58, 16  ;;  %v7421_v1 = vor.u32 %v7418_v25, %v18396_v31 }
 0x54f   : > { %v18688_v55 = vsel %vm6945_vm13, %v7040_v59, %v18672_v46  ;;  %v6575_v4 = vsel %vm6423_vm12, %v18481_v62, %v6574_v33  ;;  %v18705_v54 = vsel %vm7394_vm2, %v7402_v26, %v7413_v48  ;;  %v7429_v60 = vor.u32 %v7426_v51, %v18404_v42 }
 0x550   : > { %v6588_v0 = vrot.slane %v21102_v61, 4  ;;  %v6591_v8 = vrot.slane %v21103_v11, 5  ;;  %v7437_v32 = vor.u32 %v20677_v38, %v18413_v29  ;;  %13621 = vmatmul.mubr.bf16.gmra.mrb[28].mxu1 %v6575_v4  ;;  %v6584_v35 = vsel %vm6423_vm12, %v6574_v33, %v6583_v6  ;;  %v18792_v38 = vld [vmem:[#allocation2 + $0xa0] sm:$0xff] }
 0x551   : > { %v21104_v58 = vshrl.u32 %v18361_v18, 16  ;;  %v21105_v31 = vshll.u32 %v18361_v18, 16  ;;  %v18717_v62 = vsel %vm7394_vm2, %v7410_v63, %v7421_v1  ;;  %13624 = vmatprep.mubr.bf16.mxu1 %v6584_v35  ;;  %v18720_v47 = vsel %vm7394_vm2, %v7418_v25, %v7429_v60  ;;  %v6346_v35 = vld [vmem:[#allocation2] sm:$0xf8] }
 0x552   : > { %21106 = vst [vmem:[#allocation50_spill] sm:$0xff] %v18717_v62  ;;  %21107 = vst [vmem:[#allocation46_spill] sm:$0xff] %v18720_v47  ;;  %v18723_v42 = vsel %vm7394_vm2, %v7426_v51, %v7437_v32  ;;  %v6592_v29 = vor.u32 %v6591_v8, %v6588_v0  ;;  %v21109_v26 = vshrl.u32 %v18363_v16, 16  ;;  %v21110_v18 = vshll.u32 %v18363_v16, 16  ;;  %v6405_v32 = vld [vmem:[#allocation2 + $0xc0] sm:$0x1f] }
 0x553   : > { %v6597_v15 = vrot.slane %v21104_v58, 4  ;;  %v6600_v7 = vrot.slane %v21105_v31, 5  ;;  %21108 = vst [vmem:[#allocation49_spill] sm:$0xff] %v18723_v42  ;;  %v21111_v61 = vshrl.u32 %v18369_v17, 16  ;;  %v21112_v11 = vshll.u32 %v18369_v17, 16 }
 0x554   : > { %v6593_v59 = vsel %vm6423_vm12, %v6583_v6, %v6592_v29  ;;  %v6606_v33 = vrot.slane %v21109_v26, 4  ;;  %v6609_v48 = vrot.slane %v21110_v18, 5  ;;  %v21113_v1 = vshrl.u32 %v18371_v13, 16 }
 0x555   : > { %v6601_v22 = vor.u32 %v6600_v7, %v6597_v15  ;;  %v6615_v25 = vrot.slane %v21111_v61, 4  ;;  %v6618_v51 = vrot.slane %v21112_v11, 5  ;;  %v21114_v16 = vshll.u32 %v18371_v13, 16 }
 0x556   : > { %v6610_v0 = vor.u32 %v6609_v48, %v6606_v33  ;;  %v6624_v4 = vrot.slane %v21113_v1, 4  ;;  %v21115_v15 = vshrl.u32 %v18373_v23, 16  ;;  %v21116_v31 = vshll.u32 %v18373_v23, 16  ;;  %v18751_v1 = vld [vmem:[#allocation2 + $0x48] sm:$0xff] }
 0x557   : > { %v6602_v63 = vsel %vm6423_vm12, %v6592_v29, %v6601_v22  ;;  %v6619_v8 = vor.u32 %v6618_v51, %v6615_v25  ;;  %v6627_v60 = vrot.slane %v21114_v16, 5  ;;  %v6640_v29 = vshrl.u32 %v6405_v32, 16  ;;  %21119 = vst [vmem:[#allocation52_spill] sm:$0xff] %v18751_v1 }
 0x558   : > { %13625 = vmatmul.mubr.bf16.gmra.mrb[32].mxu1 %v6593_v59  ;;  %v6611_v6 = vsel %vm6423_vm12, %v6601_v22, %v6610_v0  ;;  %v6633_v17 = vrot.slane %v21115_v15, 4  ;;  %v6636_v7 = vrot.slane %v21116_v31, 5  ;;  %v6643_v22 = vshll.u32 %v6405_v32, 16  ;;  %v18760_v32 = vld [vmem:[#allocation2 + $0x60] sm:$0xff]  ;;  %v18766_v31 = vld [vmem:[#allocation2 + $0x68] sm:$0xff]  ;;  %v18806_v15 = vld [vmem:[#allocation2 + $0xb8] sm:$0xff] }
 0x559   : > { %13628 = vmatprep.mubr.bf16.mxu1 %v6602_v63  ;;  %v6620_v58 = vsel %vm6423_vm12, %v6610_v0, %v6619_v8  ;;  %v6947_v59 = vshrl.u32 %v6346_v35, 16  ;;  %v6950_v26 = vshll.u32 %v6346_v35, 16  ;;  %v6628_v33 = vor.u32 %v6627_v60, %v6624_v4  ;;  %v18747_v0 = vld [vmem:[#allocation2 + $0x38] sm:$0xff]  ;;  %v18753_v4 = vld [vmem:[#allocation2 + $0x50] sm:$0xff]  ;;  %21122 = vst [vmem:[#allocation61_spill] sm:$0xff] %v18760_v32  ;;  %21123 = vst [vmem:[#allocation58_spill] sm:$0xff] %v18806_v15 }
 0x55a   : > { %v6637_v18 = vor.u32 %v6636_v7, %v6633_v17  ;;  %v6642_v13 = vrot.slane %v6640_v29, 4  ;;  %v6645_v48 = vrot.slane %v6643_v22, 5  ;;  %21117 = vst [vmem:[#allocation53_spill] sm:$0xff] %v18747_v0  ;;  %21120 = vst [vmem:[#allocation54_spill] sm:$0xff] %v18753_v4  ;;  %v18768_v7 = vld [vmem:[#allocation2 + $0x70] sm:$0xff]  ;;  %v18798_v22 = vld [vmem:[#allocation2 + $0xa8] sm:$0xff] }
 0x55b   : > { %v6949_v63 = vrot.slane %v6947_v59, 3  ;;  %v6952_v61 = vrot.slane %v6950_v26, 4  ;;  %v6629_v25 = vsel %vm6423_vm12, %v6619_v8, %v6628_v33  ;;  %v18758_v8 = vld [vmem:[#allocation2 + $0x58] sm:$0xff]  ;;  %v18817_v29 = vld [vmem:[#allocation2 + $0xc8] sm:$0xff]  ;;  %v18819_v35 = vld [vmem:[#allocation2 + $0x20] sm:$0xff]  ;;  %v21132_v2 = vshll.u32 %v18753_v4, 16 }
 0x55c   : > { %v6638_v11 = vsel %vm6423_vm12, %v6628_v33, %v6637_v18  ;;  %v6646_v51 = vor.u32 %v6645_v48, %v6642_v13  ;;  %21121 = vst [vmem:[#allocation59_spill] sm:$0xff] %v18758_v8  ;;  %v18774_v26 = vld [vmem:[#allocation2 + $0x78] sm:$0xff]  ;;  %v18776_v33 = vld [vmem:[#allocation2 + $0x80] sm:$0xff]  ;;  %v15309_v48 = vld [vmem:[#allocation8 + $0xc8] sm:$0xff]   ;;  %v21130_v13 = vshll.u32 %v18751_v1, 16  ;;  %v21139_v34 = vshrl.u32 %v18753_v4, 16 }
 0x55d   : > { %v6953_v23 = vor.u32 %v6952_v61, %v6949_v63  ;;  %v18782_v61 = vld [vmem:[#allocation2 + $0x88] sm:$0xff]  ;;  %21125 = vst [vmem:[#allocation65_spill] sm:$0xff] %v18817_v29  ;;  %21126 = vst [vmem:[#allocation67_spill] sm:$0xff] %v18819_v35  ;;  %v8706_v10 = vrot.slane %v21132_v2, 1  ;;  %v21140_v47 = vshll.u32 %v18758_v8, 16 }
 0x55e   : > { %v6647_v16 = vsel %vm6423_vm12, %v6637_v18, %v6646_v51  ;;  %v18828_v17 = vld [vmem:[#allocation2 + $0x28] sm:$0xff]  ;;  %v8698_v59 = vrot.slane %v21130_v13, 1  ;;  %v18847_v51 = vld [vmem:[#allocation2 + $0x30] sm:$0xff]  ;;  %v18852_v13 = vshrl.u32 %v18819_v35, 16 }
 0x55f   : > { %v6957_v60 = vsel %vm6945_vm13, %v6953_v23, %v21067_v49  ;;  %v18812_v49 = vld [vmem:[#allocation2 + $0xc0] sm:$0xff]  ;;  %v18863_v5 = vshrl.u32 %v18828_v17, 16  ;;  %v8710_v42 = vor.u32 %v8706_v10, %v21139_v34  ;;  %v18872_v62 = vshll.u32 %v18847_v51, 16 }
 0x560   : > { %13629 = vmatmul.mubr.bf16.gmra.mrb[36].mxu1 %v6611_v6  ;;  %v18749_v6 = vld [vmem:[#allocation2 + $0x40] sm:$0xff]  ;;  %21124 = vst [vmem:[#allocation60_spill] sm:$0xff] %v18812_v49  ;;  %21133 = vst [vmem:[#allocation68_spill] sm:$0xff] %v18852_v13 }
 0x561   : > { %13632 = vmatprep.mubr.bf16.mxu1 %v6620_v58  ;;  %21118 = vst [vmem:[#allocation55_spill] sm:$0xff] %v18749_v6  ;;  %v20678_v58 = vshll.u32 %v18747_v0, 16  ;;  %v21128_v23 = vshll.u32 %v18749_v6, 16  ;;  %v21136_v63 = vshrl.u32 %v18749_v6, 16  ;;  %21137 = vst [vmem:[#allocation80_spill] sm:$0xff] %v18863_v5 }
 0x563   : > { %v18823_v18 = vrot.slane %v20678_v58, 1  ;;  %v21129_v58 = vshrl.u32 %v18747_v0, 16  ;;  %v8714_v0 = vrot.slane %v21140_v47, 1  ;;  %v21146_v47 = vshrl.u32 %v18758_v8, 16 }
 0x565   : > { %21127 = vst [vmem:[#allocation63_spill] sm:$0xff] %v18823_v18  ;;  %v8686_v9 = vor.u32 %v18823_v18, %v21129_v58  ;;  %v15310_v58 = vld [vmem:[#allocation8 + $0xd0] sm:$0xff]   ;;  %v21138_v18 = vshrl.u32 %v18751_v1, 16  ;;  %v18885_v34 = vsel %vm2532_vm1, %v8710_v42, %v8714_v0  ;;  %v8718_v4 = vor.u32 %v8714_v0, %v21146_v47 }
 0x566   : > { %21145 = vst [vmem:[#allocation83_spill] sm:$0xff] %v18885_v34  ;;  %v21147_v1 = vshll.u32 %v18768_v7, 16  ;;  %v21151_v42 = vshll.u32 %v18776_v33, 16  ;;  %v21153_v0 = vshrl.u32 %v18768_v7, 16  ;;  %v21154_v47 = vshll.u32 %v18782_v61, 16 }
 0x567   : > { %v8702_v2 = vor.u32 %v8698_v59, %v21138_v18 }
 0x568   : > { %13633 = vmatmul.mubr.bf16.gmra.mrb[40].mxu1 %v6629_v25  ;;  %v18784_v25 = vld [vmem:[#allocation2 + $0x90] sm:$0xff]  ;;  %v8754_v34 = vrot.slane %v21151_v42, 1  ;;  %v8762_v8 = vrot.slane %v21154_v47, 1  ;;  %v21159_v42 = vshrl.u32 %v18776_v33, 16 }
 0x569   : > { %13636 = vmatprep.mubr.bf16.mxu1 %v6638_v11  ;;  %v18800_v11 = vld [vmem:[#allocation2 + $0xb0] sm:$0xff]  ;;  %v18882_v18 = vsel %vm2532_vm1, %v8702_v2, %v8706_v10  ;;  %v21150_v10 = vshll.u32 %v18774_v26, 16 }
 0x56a   : > { %21144 = vst [vmem:[#allocation82_spill] sm:$0xff] %v18882_v18 }
 0x56b   : > { %v8746_v2 = vrot.slane %v21150_v10, 1 }
 0x570   : > { %13637 = vmatmul.mubr.bf16.gmra.mrb[44].mxu1 %v6647_v16  ;;  %v8690_v16 = vrot.slane %v21128_v23, 1 }
 0x571   : > { %13656 = vmatprep.mubr.bf16.mxu1 %v6957_v60  ;;  %v18790_v60 = vld [vmem:[#allocation2 + $0x98] sm:$0xff] }
 0x572   : > { %v8694_v23 = vor.u32 %v8690_v16, %v21136_v63  ;;  %v21142_v63 = vshll.u32 %v18760_v32, 16 }
 0x578   : > { %13657 = vmatmul.mubr.bf16.vlgmr.msra.gmra.mrb[0].mxu1 %v18537_v39  ;;  %v18845_v39 = vshll.u32 %v18819_v35, 16 }
 0x579   : > { %13660 = vmatprep.mubr.bf16.mxu1 %v18549_v44  ;;  %13705 = vmatpush3.bf16.msra.mxu1 %v18521_v12  ;;  %v18855_v44 = vshll.u32 %v18828_v17, 16  ;;  %v18858_v12 = vsel %vm2532_vm1, %v8686_v9, %v8690_v16  ;;  %v18875_v9 = vsel %vm2532_vm1, %v8694_v23, %v8698_v59  ;;  %v8722_v16 = vrot.slane %v21142_v63, 1  ;;  %v15311_v23 = vld [vmem:[#allocation8 + $0xd8] sm:$0xff]  }
 0x57a   : > { %21131 = vst [vmem:[#allocation66_spill] sm:$0xff] %v18845_v39  ;;  %13706 = vmatprep.subr.bf16.mxu1 %v15309_v48  ;;  %21135 = vst [vmem:[#allocation73_spill] sm:$0xff] %v18858_v12  ;;  %v21143_v12 = vshll.u32 %v18766_v31, 16  ;;  %v8738_v59 = vrot.slane %v21147_v1, 1  ;;  %v21148_v63 = vshrl.u32 %v18760_v32, 16 }
 0x57b   : > { %21134 = vst [vmem:[#allocation69_spill] sm:$0xff] %v18855_v44  ;;  %21141 = vst [vmem:[#allocation81_spill] sm:$0xff] %v18875_v9  ;;  %v18900_v18 = vsel %vm2532_vm1, %v8718_v4, %v8722_v16  ;;  %v21158_v4 = vshrl.u32 %v18774_v26, 16 }
 0x57c   : > { %v8730_v6 = vrot.slane %v21143_v12, 1  ;;  %v8726_v9 = vor.u32 %v8722_v16, %v21148_v63  ;;  %v21149_v12 = vshrl.u32 %v18766_v31, 16  ;;  %21152 = vst [vmem:[#allocation84_spill] sm:$0xff] %v18900_v18  ;;  %v8742_v1 = vor.u32 %v8738_v59, %v21153_v0  ;;  %v19084_v18 = vld [vmem:[#allocation2 + $0xb0] sm:$0xff] }
 0x57d   : > { %13707 = vmatpush3.bf16.msra.mxu1 %v15309_v48  ;;  %v21155_v63 = vshll.u32 %v18784_v25, 16  ;;  %v8750_v16 = vor.u32 %v8746_v2, %v21158_v4  ;;  %v8758_v0 = vor.u32 %v8754_v34, %v21159_v42  ;;  %v15312_v4 = vld [vmem:[#allocation8 + $0xe0] sm:$0xff]  }
 0x57e   : > { %13708 = vmatprep.subr.bf16.mxu1 %v15310_v58  ;;  %v8734_v48 = vor.u32 %v8730_v6, %v21149_v12  ;;  %v18910_v12 = vsel %vm2532_vm1, %v8726_v9, %v8730_v6  ;;  %v18921_v47 = vsel %vm2532_vm1, %v8742_v1, %v8746_v2  ;;  %v21162_v6 = vshrl.u32 %v18784_v25, 16 }
 0x57f   : > { %v8770_v32 = vrot.slane %v21155_v63, 1  ;;  %21156 = vst [vmem:[#allocation85_spill] sm:$0xff] %v18910_v12  ;;  %21160 = vst [vmem:[#allocation87_spill] sm:$0xff] %v18921_v47  ;;  %v21167_v1 = vshll.u32 %v18798_v22, 16  ;;  %v19078_v12 = vld [vmem:[#allocation2 + $0xa8] sm:$0xff] }
 0x580   : > { %13661 = vmatmul.mubr.bf16.gmra.mrb[4].mxu1 %v18552_v57  ;;  %v18913_v10 = vsel %vm2532_vm1, %v8734_v48, %v8738_v59  ;;  %v21161_v57 = vshrl.u32 %v18782_v61, 16  ;;  %v21163_v59 = vshll.u32 %v18790_v60, 16 }
 0x581   : > { %21157 = vst [vmem:[#allocation86_spill] sm:$0xff] %v18913_v10  ;;  %13664 = vmatprep.mubr.bf16.mxu1 %v18559_v28  ;;  %13709 = vmatpush3.bf16.msra.mxu1 %v15310_v58  ;;  %v8774_v9 = vor.u32 %v8770_v32, %v21162_v6  ;;  %v18930_v10 = vsel %vm2532_vm1, %v8750_v16, %v8754_v34  ;;  %v21166_v58 = vshll.u32 %v18792_v38, 16  ;;  %v8794_v42 = vrot.slane %v21167_v1, 1 }
 0x582   : > { %v8766_v63 = vor.u32 %v8762_v8, %v21161_v57  ;;  %v8778_v48 = vrot.slane %v21163_v59, 1  ;;  %13710 = vmatprep.subr.bf16.mxu1 %v15311_v23  ;;  %21164 = vst [vmem:[#allocation88_spill] sm:$0xff] %v18930_v10  ;;  %v18933_v28 = vsel %vm2532_vm1, %v8758_v0, %v8762_v8  ;;  %v21170_v59 = vshrl.u32 %v18790_v60, 16 }
 0x583   : > { %21165 = vst [vmem:[#allocation89_spill] sm:$0xff] %v18933_v28  ;;  %v8786_v2 = vrot.slane %v21166_v58, 1  ;;  %v21171_v34 = vshll.u32 %v18800_v11, 16  ;;  %v21172_v8 = vshrl.u32 %v18792_v38, 16  ;;  %v21173_v58 = vshrl.u32 %v18798_v22, 16 }
 0x584   : > { %v18940_v57 = vsel %vm2532_vm1, %v8766_v63, %v8770_v32  ;;  %v18943_v6 = vsel %vm2532_vm1, %v8774_v9, %v8778_v48  ;;  %v8782_v47 = vor.u32 %v8778_v48, %v21170_v59  ;;  %v21174_v1 = vshll.u32 %v18806_v15, 16 }
 0x585   : > { %21168 = vst [vmem:[#allocation90_spill] sm:$0xff] %v18940_v57  ;;  %21169 = vst [vmem:[#allocation91_spill] sm:$0xff] %v18943_v6  ;;  %v8802_v16 = vrot.slane %v21171_v34, 1  ;;  %v8790_v0 = vor.u32 %v8786_v2, %v21172_v8  ;;  %v8798_v28 = vor.u32 %v8794_v42, %v21173_v58  ;;  %v21175_v32 = vshll.u32 %v18812_v49, 16  ;;  %13711 = vmatpush3.bf16.msra.mxu1 %v15311_v23  ;;  %v15313_v58 = vld [vmem:[#allocation8 + $0xe8] sm:$0xff]  }
 0x586   : > { %v8810_v10 = vrot.slane %v21174_v1, 1  ;;  %v18958_v9 = vshrl.u32 %v18847_v51, 16  ;;  %v18961_v48 = vsel %vm2532_vm1, %v8782_v47, %v8786_v2  ;;  %v21178_v59 = vshrl.u32 %v18800_v11, 16  ;;  %13712 = vmatprep.subr.bf16.mxu1 %v15312_v4 }
 0x587   : > { %v8818_v63 = vrot.slane %v21175_v32, 1  ;;  %21177 = vst [vmem:[#allocation93_spill] sm:$0xff] %v18961_v48  ;;  %v21179_v8 = vshll.u32 %v18817_v29, 16  ;;  %v18968_v1 = vsel %vm2532_vm1, %v8790_v0, %v8794_v42  ;;  %v18971_v32 = vsel %vm2532_vm1, %v8798_v28, %v8802_v16 }
 0x588   : > { %21176 = vst [vmem:[#allocation92_spill] sm:$0xff] %v18958_v9  ;;  %v8806_v34 = vor.u32 %v8802_v16, %v21178_v59  ;;  %21180 = vst [vmem:[#allocation94_spill] sm:$0xff] %v18968_v1  ;;  %v21182_v23 = vshrl.u32 %v18806_v15, 16  ;;  %v21183_v47 = vshrl.u32 %v18812_v49, 16  ;;  %v21185_v59 = vshrl.u32 %v18817_v29, 16  ;;  %13665 = vmatmul.mubr.bf16.gmra.mrb[8].mxu1 %v18572_v36  ;;  %v19076_v1 = vld [vmem:[#allocation2 + $0xa0] sm:$0xff] }
 0x589   : > { %v8826_v6 = vrot.slane %v21179_v8, 1  ;;  %21181 = vst [vmem:[#allocation95_spill] sm:$0xff] %v18971_v32  ;;  %v9234_v16 = vrot.slane %v18852_v13, 3  ;;  %13668 = vmatprep.mubr.bf16.mxu1 %v18579_v37  ;;  %13713 = vmatpush3.bf16.msra.mxu1 %v15312_v4  ;;  %v9243_v0 = vrot.slane %v18863_v5, 3  ;;  %v9252_v36 = vrot.slane %v18958_v9, 3  ;;  %v15315_v37 = vld [vmem:[#allocation8 + $0xf8] sm:$0xff]  }
 0x58a   : > { %v8814_v57 = vor.u32 %v8810_v10, %v21182_v23  ;;  %v8822_v2 = vor.u32 %v8818_v63, %v21183_v47  ;;  %v18978_v48 = vsel %vm2532_vm1, %v8806_v34, %v8810_v10  ;;  %v9237_v10 = vrot.slane %v18845_v39, 4  ;;  %13714 = vmatprep.subr.bf16.mxu1 %v15313_v58  ;;  %v15314_v34 = vld [vmem:[#allocation8 + $0xf0] sm:$0xff]   ;;  %v19070_v32 = vld [vmem:[#allocation2 + $0x98] sm:$0xff]  ;;  %v19119_v29 = vld [vmem:[#allocation2 + $0xc8] sm:$0xff] }
 0x58b   : > { %21184 = vst [vmem:[#allocation96_spill] sm:$0xff] %v18978_v48  ;;  %v18982_v8 = vor.u32 %v8826_v6, %v21185_v59  ;;  %v9246_v23 = vrot.slane %v18855_v44, 4  ;;  %v19012_v59 = vld [vmem:[#allocation8 + $0x40] sm:$0xff]   ;;  %v21195_v48 = vrot.slane %v18819_v35, 4 }
 0x58c   : > { %v18986_v42 = vsel %vm2532_vm1, %v8814_v57, %v8818_v63  ;;  %v18989_v28 = vsel %vm2532_vm1, %v8822_v2, %v8826_v6  ;;  %v9255_v57 = vrot.slane %v18872_v62, 4  ;;  %v18998_v63 = vor.u32 %v9237_v10, %v9234_v16 }
 0x58d   : > { %21186 = vst [vmem:[#allocation97_spill] sm:$0xff] %v18982_v8  ;;  %21187 = vst [vmem:[#allocation98_spill] sm:$0xff] %v18986_v42  ;;  %v9247_v6 = vor.u32 %v9246_v23, %v9243_v0  ;;  %13715 = vmatpush3.bf16.msra.mxu1 %v15313_v58  ;;  %v19015_v58 = vld [vmem:[#allocation2 + $0xc0] sm:$0xf]  ;;  %v19025_v23 = vld [vmem:[#allocation2 + $0x38] sm:$0xff] }
 0x58e   : > { %21188 = vst [vmem:[#allocation99_spill] sm:$0xff] %v18989_v28  ;;  %21189 = vst [vmem:[#allocation100_spill] sm:$0xff] %v18998_v63  ;;  %v19000_v47 = vor.u32 %v9255_v57, %v9252_v36  ;;  %13716 = vmatprep.subr.bf16.mxu1 %v15314_v34  ;;  %v7047_v16 = vshrl.u32 %v19015_v58, 16  ;;  %v7050_v10 = vshll.u32 %v19015_v58, 16  ;;  %v19027_v36 = vld [vmem:[#allocation2 + $0x40] sm:$0xff]  ;;  %v19030_v57 = vld [vmem:[#allocation2 + $0x48] sm:$0xff] }
 0x58f   : > { %v19004_v4 = vsel %vm6945_vm13, %v18998_v63, %v9247_v6  ;;  %21193 = vst [vmem:[#allocation104_spill] sm:$0xff] %v19015_v58  ;;  %21194 = vst [vmem:[#allocation105_spill] sm:$0xff] %v19025_v23  ;;  %v19056_v8 = vld [vmem:[#allocation2 + $0x80] sm:$0xff]  ;;  %v19062_v42 = vld [vmem:[#allocation2 + $0x88] sm:$0xff]  ;;  %v9840_v63 = vrot.slane %v18847_v51, 4 }
 0x590   : > { %21190 = vst [vmem:[#allocation101_spill] sm:$0xff] %v19000_v47  ;;  %21191 = vst [vmem:[#allocation102_spill] sm:$0xff] %v19004_v4  ;;  %v19008_v2 = vsel %vm6945_vm13, %v9247_v6, %v19000_v47  ;;  %13669 = vmatmul.mubr.bf16.gmra.mrb[12].mxu1 %v18584_v3  ;;  %v7352_v3 = vld [vmem:[#allocation2 + $0x8] sm:$0x80]  ;;  %v19037_v6 = vld [vmem:[#allocation2 + $0x58] sm:$0xff] }
 0x591   : > { %21192 = vst [vmem:[#allocation103_spill] sm:$0xff] %v19008_v2  ;;  %13672 = vmatprep.mubr.bf16.mxu1 %v18591_v19  ;;  %13717 = vmatpush3.bf16.msra.mxu1 %v15314_v34  ;;  %v7396_v0 = vshrl.u32 %v7352_v3, 16  ;;  %v19021_v19 = vrot.slane %v7047_v16, 3  ;;  %v19023_v34 = vrot.slane %v7050_v10, 4  ;;  %v19046_v47 = vld [vmem:[#allocation2 + $0x68] sm:$0xff]  ;;  %v19048_v2 = vld [vmem:[#allocation2 + $0x70] sm:$0xff] }
 0x592   : > { %13718 = vmatprep.subr.bf16.mxu1 %v15315_v37  ;;  %v19054_v16 = vld [vmem:[#allocation2 + $0x78] sm:$0xff]  ;;  %v19101_v58 = vld [vmem:[#allocation2 + $0xc0] sm:$0xff]  ;;  %v9846_v10 = vrot.slane %v19030_v57, 4  ;;  %v9850_v35 = vrot.slane %v19037_v6, 4 }
 0x593   : > { %v19090_v3 = vld [vmem:[#allocation2 + $0xb8] sm:$0xff] }
 0x595   : > { %13719 = vmatpush3.bf16.msra.mxu1 %v15315_v37  ;;  %v19039_v37 = vld [vmem:[#allocation2 + $0x60] sm:$0xff] }
 0x596   : > { %13768 = vmatprep.subr.bf16.mxu1 %v19012_v59 }
 0x598   : > { %13673 = vmatmul.mubr.bf16.gmra.mrb[16].mxu1 %v18594_v43  ;;  %v19032_v43 = vld [vmem:[#allocation2 + $0x50] sm:$0xff] }
 0x599   : > { %13676 = vmatprep.mubr.bf16.mxu1 %v18602_v45  ;;  %v19035_v45 = vrot.slane %v7396_v0, 7  ;;  %v9842_v0 = vrot.slane %v19025_v23, 4  ;;  %v9848_v51 = vrot.slane %v19032_v43, 4 }
 0x59b   : > { %v19137_v49 = vsel %vm7913_vm3, %v9848_v51, %v9850_v35 }
 0x59c   : > { %21202 = vst [vmem:[#allocation112_spill] sm:$0xff] %v19137_v49 }
 0x5a0   : > { %13677 = vmatmul.mubr.bf16.gmra.mrb[20].mxu1 %v18616_v14 }
 0x5a1   : > { %13680 = vmatprep.mubr.bf16.mxu1 %v18623_v21  ;;  %v19064_v21 = vld [vmem:[#allocation2 + $0x90] sm:$0xff] }
 0x5a8   : > { %13681 = vmatmul.mubr.bf16.gmra.mrb[24].mxu1 %v18628_v56  ;;  %v9838_v56 = vrot.slane %v18828_v17, 4  ;;  %v9844_v17 = vrot.slane %v19027_v36, 4 }
 0x5a9   : > { %13684 = vmatprep.mubr.bf16.mxu1 %v18635_v52  ;;  %v9852_v52 = vrot.slane %v19039_v37, 4 }
 0x5aa   : > { %v19108_v4 = vsel %vm7913_vm3, %v21195_v48, %v9838_v56  ;;  %v19114_v14 = vsel %vm7913_vm3, %v9838_v56, %v9840_v63  ;;  %v19122_v48 = vsel %vm7913_vm3, %v9840_v63, %v9842_v0  ;;  %v19130_v56 = vsel %vm7913_vm3, %v9844_v17, %v9846_v10 }
 0x5ab   : > { %21196 = vst [vmem:[#allocation106_spill] sm:$0xff] %v19108_v4  ;;  %21197 = vst [vmem:[#allocation107_spill] sm:$0xff] %v19114_v14  ;;  %v19125_v4 = vsel %vm7913_vm3, %v9842_v0, %v9844_v17  ;;  %v19133_v14 = vsel %vm7913_vm3, %v9846_v10, %v9848_v51  ;;  %v9854_v63 = vrot.slane %v19046_v47, 4  ;;  %v9856_v0 = vrot.slane %v19048_v2, 4 }
 0x5ac   : > { %21198 = vst [vmem:[#allocation108_spill] sm:$0xff] %v19122_v48  ;;  %21199 = vst [vmem:[#allocation109_spill] sm:$0xff] %v19125_v4  ;;  %v9858_v4 = vrot.slane %v19054_v16, 4  ;;  %v19145_v17 = vsel %vm7913_vm3, %v9850_v35, %v9852_v52  ;;  %v9860_v10 = vrot.slane %v19056_v8, 4 }
 0x5ad   : > { %21200 = vst [vmem:[#allocation110_spill] sm:$0xff] %v19130_v56  ;;  %21201 = vst [vmem:[#allocation111_spill] sm:$0xff] %v19133_v14  ;;  %v9862_v14 = vrot.slane %v19062_v42, 4  ;;  %v19151_v51 = vsel %vm7913_vm3, %v9852_v52, %v9854_v63  ;;  %v19154_v49 = vsel %vm7913_vm3, %v9854_v63, %v9856_v0  ;;  %v9792_v52 = vld [vmem:[#allocation2 + $0x18] sm:$0xf0]  ;;  %v9868_v63 = vrot.slane %v19076_v1, 4 }
 0x5ae   : > { %21203 = vst [vmem:[#allocation113_spill] sm:$0xff] %v19145_v17  ;;  %21204 = vst [vmem:[#allocation114_spill] sm:$0xff] %v19151_v51  ;;  %v19157_v56 = vsel %vm7913_vm3, %v9856_v0, %v9858_v4  ;;  %v19162_v28 = vsel %vm7913_vm3, %v9858_v4, %v9860_v10  ;;  %v9870_v0 = vrot.slane %v19078_v12, 4  ;;  %v9874_v4 = vrot.slane %v19090_v3, 4 }
 0x5af   : > { %21205 = vst [vmem:[#allocation115_spill] sm:$0xff] %v19154_v49  ;;  %21206 = vst [vmem:[#allocation116_spill] sm:$0xff] %v19157_v56  ;;  %v19165_v17 = vsel %vm7913_vm3, %v9860_v10, %v9862_v14  ;;  %v9872_v56 = vrot.slane %v19084_v18, 4  ;;  %v9876_v10 = vrot.slane %v19101_v58, 4 }
 0x5b0   : > { %13685 = vmatmul.mubr.bf16.gmra.mrb[28].mxu1 %v18638_v30  ;;  %v9864_v30 = vrot.slane %v19064_v21, 4  ;;  %21207 = vst [vmem:[#allocation117_spill] sm:$0xff] %v19162_v28  ;;  %21208 = vst [vmem:[#allocation118_spill] sm:$0xff] %v19165_v17  ;;  %v20703_v17 = vrot.slane %v19119_v29, 4  ;;  %v19180_v28 = vld [vmem:[#allocation2] sm:$0xff]  ;;  %v19187_v49 = vsel %vm7913_vm3, %v9868_v63, %v9870_v0 }
 0x5b1   : > { %13688 = vmatprep.mubr.bf16.mxu1 %v18645_v20  ;;  %v9866_v20 = vrot.slane %v19070_v32, 4  ;;  %21212 = vst [vmem:[#allocation122_spill] sm:$0xff] %v19187_v49  ;;  %v19190_v48 = vsel %vm7913_vm3, %v9870_v0, %v9872_v56  ;;  %v10256_v0 = vrot.slane %v18845_v39, 5  ;;  %v21218_v49 = vshll.u32 %v19025_v23, 16 }
 0x5b2   : > { %v19169_v51 = vsel %vm7913_vm3, %v9862_v14, %v9864_v30  ;;  %21213 = vst [vmem:[#allocation123_spill] sm:$0xff] %v19190_v48  ;;  %v19201_v15 = vsel %vm7913_vm3, %v9876_v10, %v20703_v17  ;;  %v10248_v14 = vshrl.u32 %v9792_v52, 16 }
 0x5b3   : > { %21209 = vst [vmem:[#allocation119_spill] sm:$0xff] %v19169_v51  ;;  %v19175_v35 = vsel %vm7913_vm3, %v9864_v30, %v9866_v20  ;;  %v19184_v51 = vsel %vm7913_vm3, %v9866_v20, %v9868_v63  ;;  %v19193_v30 = vsel %vm7913_vm3, %v9872_v56, %v9874_v4  ;;  %21216 = vst [vmem:[#allocation126_spill] sm:$0xff] %v19201_v15  ;;  %v10255_v63 = vrot.slane %v18852_v13, 4 }
 0x5b4   : > { %21210 = vst [vmem:[#allocation120_spill] sm:$0xff] %v19175_v35  ;;  %21211 = vst [vmem:[#allocation121_spill] sm:$0xff] %v19184_v51  ;;  %v19196_v35 = vsel %vm7913_vm3, %v9874_v4, %v9876_v10  ;;  %v10251_v51 = vshll.u32 %v9792_v52, 16  ;;  %v10250_v56 = vrot.slane %v10248_v14, 4  ;;  %v10260_v4 = vrot.slane %v18855_v44, 5 }
 0x5b5   : > { %21214 = vst [vmem:[#allocation124_spill] sm:$0xff] %v19193_v30  ;;  %21215 = vst [vmem:[#allocation125_spill] sm:$0xff] %v19196_v35  ;;  %v10259_v30 = vrot.slane %v18863_v5, 4  ;;  %v10263_v35 = vrot.slane %v18958_v9, 4  ;;  %v10257_v17 = vor.u32 %v10256_v0, %v10255_v63  ;;  %v10264_v20 = vrot.slane %v18872_v62, 5 }
 0x5b6   : > { %v10253_v10 = vrot.slane %v10251_v51, 5  ;;  %v21217_v52 = vshrl.u32 %v19025_v23, 16  ;;  %v21219_v14 = vshrl.u32 %v19027_v36, 16  ;;  %v21220_v44 = vshll.u32 %v19027_v36, 16 }
 0x5b7   : > { %v10261_v48 = vor.u32 %v10260_v4, %v10259_v30  ;;  %v10265_v39 = vor.u32 %v10264_v20, %v10263_v35  ;;  %v21222_v63 = vshll.u32 %v19030_v57, 16  ;;  %v21224_v20 = vshll.u32 %v19032_v43, 16 }
 0x5b8   : > { %13689 = vmatmul.mubr.bf16.gmra.mrb[32].mxu1 %v18659_v27  ;;  %v10267_v15 = vrot.slane %v21217_v52, 4  ;;  %v10268_v27 = vrot.slane %v21218_v49, 5  ;;  %v10271_v5 = vrot.slane %v21219_v14, 4  ;;  %v10272_v13 = vrot.slane %v21220_v44, 5 }
 0x5b9   : > { %13692 = vmatprep.mubr.bf16.mxu1 %v18667_v41  ;;  %v10254_v9 = vor.u32 %v10253_v10, %v10250_v56  ;;  %v21221_v41 = vshrl.u32 %v19030_v57, 16  ;;  %v10276_v0 = vrot.slane %v21222_v63, 5  ;;  %v19225_v52 = vsel %vm6423_vm12, %v10257_v17, %v10261_v48 }
 0x5ba   : > { %v10269_v30 = vor.u32 %v10268_v27, %v10267_v15  ;;  %v10273_v4 = vor.u32 %v10272_v13, %v10271_v5  ;;  %v21223_v49 = vshrl.u32 %v19032_v43, 16  ;;  %v19233_v44 = vsel %vm6423_vm12, %v10261_v48, %v10265_v39 }
 0x5bb   : > { %v10275_v51 = vrot.slane %v21221_v41, 4  ;;  %v19230_v14 = vsel %vm6423_vm12, %v10254_v9, %v10257_v17  ;;  %v10280_v56 = vrot.slane %v21224_v20, 5  ;;  %v21225_v5 = vshrl.u32 %v19037_v6, 16 }
 0x5bc   : > { %v10279_v23 = vrot.slane %v21223_v49, 4  ;;  %v19238_v10 = vsel %vm6423_vm12, %v10265_v39, %v10269_v30  ;;  %v19241_v41 = vsel %vm6423_vm12, %v10269_v30, %v10273_v4  ;;  %v21226_v13 = vshll.u32 %v19037_v6, 16 }
 0x5bd   : > { %v10277_v35 = vor.u32 %v10276_v0, %v10275_v51  ;;  %v10283_v15 = vrot.slane %v21225_v5, 4  ;;  %v21228_v27 = vshrl.u32 %v19039_v37, 16  ;;  %v21229_v63 = vshll.u32 %v19039_v37, 16 }
 0x5be   : > { %v10284_v9 = vrot.slane %v21226_v13, 5  ;;  %v10281_v48 = vor.u32 %v10280_v56, %v10279_v23  ;;  %v21230_v30 = vshrl.u32 %v19046_v47, 16  ;;  %v21231_v20 = vshll.u32 %v19046_v47, 16 }
 0x5bf   : > { %v19248_v17 = vsel %vm6423_vm12, %v10273_v4, %v10277_v35  ;;  %v10287_v51 = vrot.slane %v21228_v27, 4  ;;  %v10288_v39 = vrot.slane %v21229_v63, 5  ;;  %v21232_v13 = vshrl.u32 %v19048_v2, 16 }
 0x5c0   : > { %21227 = vst [vmem:[#allocation127_spill] sm:$0xff] %v19248_v17  ;;  %13693 = vmatmul.mubr.bf16.gmra.mrb[36].mxu1 %v18670_v53  ;;  %v10285_v0 = vor.u32 %v10284_v9, %v10283_v15  ;;  %v10291_v49 = vrot.slane %v21230_v30, 4  ;;  %v10292_v5 = vrot.slane %v21231_v20, 5  ;;  %v19263_v23 = vsel %vm6423_vm12, %v10277_v35, %v10281_v48 }
 0x5c1   : > { %v10295_v4 = vrot.slane %v21232_v13, 4  ;;  %13696 = vmatprep.mubr.bf16.mxu1 %v18678_v40  ;;  %21233 = vst [vmem:[#allocation128_spill] sm:$0xff] %v19263_v23  ;;  %v10289_v56 = vor.u32 %v10288_v39, %v10287_v51  ;;  %v21234_v27 = vshll.u32 %v19048_v2, 16  ;;  %v21235_v53 = vshrl.u32 %v19054_v16, 16 }
 0x5c2   : > { %v19270_v9 = vsel %vm6423_vm12, %v10281_v48, %v10285_v0  ;;  %v10293_v30 = vor.u32 %v10292_v5, %v10291_v49  ;;  %v21237_v20 = vshll.u32 %v19054_v16, 16  ;;  %v21238_v13 = vshrl.u32 %v19056_v8, 16 }
 0x5c3   : > { %v10296_v63 = vrot.slane %v21234_v27, 5  ;;  %v10299_v15 = vrot.slane %v21235_v53, 4  ;;  %21236 = vst [vmem:[#allocation129_spill] sm:$0xff] %v19270_v9  ;;  %v19277_v35 = vsel %vm6423_vm12, %v10285_v0, %v10289_v56  ;;  %v21240_v39 = vshll.u32 %v19056_v8, 16 }
 0x5c4   : > { %v10300_v17 = vrot.slane %v21237_v20, 5  ;;  %v10303_v40 = vrot.slane %v21238_v13, 4  ;;  %21239 = vst [vmem:[#allocation130_spill] sm:$0xff] %v19277_v35  ;;  %v21241_v23 = vshrl.u32 %v19062_v42, 16  ;;  %v19284_v48 = vsel %vm6423_vm12, %v10289_v56, %v10293_v30 }
 0x5c5   : > { %v10297_v51 = vor.u32 %v10296_v63, %v10295_v4  ;;  %v10304_v27 = vrot.slane %v21240_v39, 5  ;;  %21242 = vst [vmem:[#allocation131_spill] sm:$0xff] %v19284_v48  ;;  %v21243_v5 = vshll.u32 %v19062_v42, 16  ;;  %v21244_v9 = vshrl.u32 %v19064_v21, 16 }
 0x5c6   : > { %v10307_v53 = vrot.slane %v21241_v23, 4  ;;  %v10301_v49 = vor.u32 %v10300_v17, %v10299_v15  ;;  %v21246_v63 = vshll.u32 %v19064_v21, 16  ;;  %v21247_v35 = vshrl.u32 %v19070_v32, 16 }
 0x5c7   : > { %v10308_v20 = vrot.slane %v21243_v5, 5  ;;  %v10311_v13 = vrot.slane %v21244_v9, 4  ;;  %v19291_v0 = vsel %vm6423_vm12, %v10293_v30, %v10297_v51  ;;  %v10305_v4 = vor.u32 %v10304_v27, %v10303_v40 }
 0x5c8   : > { %21245 = vst [vmem:[#allocation132_spill] sm:$0xff] %v19291_v0  ;;  %v10312_v39 = vrot.slane %v21246_v63, 5  ;;  %v10315_v23 = vrot.slane %v21247_v35, 4  ;;  %v19298_v56 = vsel %vm6423_vm12, %v10297_v51, %v10301_v49  ;;  %v21248_v15 = vshll.u32 %v19070_v32, 16  ;;  %13697 = vmatmul.mubr.bf16.gmra.mrb[40].mxu1 %v18681_v50 }
 0x5c9   : > { %v10309_v17 = vor.u32 %v10308_v20, %v10307_v53  ;;  %v21249_v48 = vshrl.u32 %v19076_v1, 16  ;;  %v19305_v30 = vsel %vm6423_vm12, %v10301_v49, %v10305_v4  ;;  %v21250_v27 = vshll.u32 %v19076_v1, 16  ;;  %13700 = vmatprep.mubr.bf16.mxu1 %v18688_v55 }
 0x5ca   : > { %v10316_v5 = vrot.slane %v21248_v15, 5  ;;  %v10313_v40 = vor.u32 %v10312_v39, %v10311_v13  ;;  %v21251_v0 = vshrl.u32 %v19078_v12, 16  ;;  %v21253_v20 = vshll.u32 %v19078_v12, 16 }
 0x5cb   : > { %v10319_v9 = vrot.slane %v21249_v48, 4  ;;  %v10320_v63 = vrot.slane %v21250_v27, 5  ;;  %v19313_v51 = vsel %vm6423_vm12, %v10305_v4, %v10309_v17  ;;  %v21254_v48 = vshrl.u32 %v19084_v18, 16 }
 0x5cc   : > { %v10323_v35 = vrot.slane %v21251_v0, 4  ;;  %21252 = vst [vmem:[#allocation133_spill] sm:$0xff] %v19313_v51  ;;  %v10317_v53 = vor.u32 %v10316_v5, %v10315_v23  ;;  %v10324_v15 = vrot.slane %v21253_v20, 5  ;;  %v19321_v13 = vsel %vm6423_vm12, %v10309_v17, %v10313_v40 }
 0x5cd   : > { %v10327_v49 = vrot.slane %v21254_v48, 4  ;;  %21255 = vst [vmem:[#allocation134_spill] sm:$0xff] %v19321_v13  ;;  %v10321_v39 = vor.u32 %v10320_v63, %v10319_v9  ;;  %v21256_v0 = vshll.u32 %v19084_v18, 16  ;;  %v21257_v50 = vshrl.u32 %v19090_v3, 16 }
 0x5ce   : > { %v19328_v23 = vsel %vm6423_vm12, %v10313_v40, %v10317_v53  ;;  %v10325_v5 = vor.u32 %v10324_v15, %v10323_v35  ;;  %v21259_v20 = vshll.u32 %v19090_v3, 16  ;;  %v21260_v48 = vshrl.u32 %v19101_v58, 16 }
 0x5cf   : > { %v10328_v27 = vrot.slane %v21256_v0, 5  ;;  %v10331_v4 = vrot.slane %v21257_v50, 4  ;;  %21258 = vst [vmem:[#allocation135_spill] sm:$0xff] %v19328_v23  ;;  %v19335_v17 = vsel %vm6423_vm12, %v10317_v53, %v10321_v39  ;;  %v21262_v63 = vshll.u32 %v19101_v58, 16 }
 0x5d0   : > { %v10332_v51 = vrot.slane %v21259_v20, 5  ;;  %v10335_v55 = vrot.slane %v21260_v48, 4  ;;  %21261 = vst [vmem:[#allocation136_spill] sm:$0xff] %v19335_v17  ;;  %v21263_v13 = vshrl.u32 %v19119_v29, 16  ;;  %v19342_v40 = vsel %vm6423_vm12, %v10321_v39, %v10325_v5 }
 0x5d1   : > { %v10329_v9 = vor.u32 %v10328_v27, %v10327_v49  ;;  %v10336_v0 = vrot.slane %v21262_v63, 5  ;;  %v21264_v15 = vshll.u32 %v19119_v29, 16  ;;  %v21265_v23 = vshrl.u32 %v19180_v28, 16 }
 0x5d2   : > { %v10339_v50 = vrot.slane %v21263_v13, 4  ;;  %v10333_v35 = vor.u32 %v10332_v51, %v10331_v4  ;;  %v21266_v27 = vshll.u32 %v19180_v28, 16  ;;  %v21267_v51 = vor.u32 %v19023_v34, %v19021_v19  ;;  %v15317_v34 = vld [vmem:[#allocation8 + $0x48] sm:$0xff]  }
 0x5d3   : > { %v10340_v20 = vrot.slane %v21264_v15, 5  ;;  %v10343_v48 = vrot.slane %v21265_v23, 4  ;;  %v19349_v53 = vsel %vm6423_vm12, %v10325_v5, %v10329_v9  ;;  %v10337_v49 = vor.u32 %v10336_v0, %v10335_v55  ;;  %v21272_v15 = vld [vmem:[#allocation55_spill] sm:$0xff] }
 0x5d4   : > { %v10344_v63 = vrot.slane %v21266_v27, 5  ;;  %v19354_v17 = vsel %vm6423_vm12, %v10329_v9, %v10333_v35  ;;  %v7054_v39 = vsel %vm6945_vm13, %v18672_v46, %v21267_v51  ;;  %v7406_v5 = vsel %vm7394_vm2, %v19035_v45, %v18691_v24  ;;  %v21268_v46 = vld [vmem:[#allocation50_spill] sm:$0xff]  ;;  %v15318_v9 = vld [vmem:[#allocation8 + $0x50] sm:$0xff]   ;;  %v15319_v24 = vld [vmem:[#allocation8 + $0x58] sm:$0xff]  }
 0x5d5   : > { %v10341_v13 = vor.u32 %v10340_v20, %v10339_v50  ;;  %v19362_v4 = vsel %vm6423_vm12, %v10333_v35, %v10337_v49  ;;  %13701 = vmatmul.mubr.bf16.gmra.mrb[44].mxu1 %v7054_v39  ;;  %v21269_v45 = vld [vmem:[#allocation53_spill] sm:$0xff]  ;;  %v21271_v35 = vld [vmem:[#allocation46_spill] sm:$0xff]  ;;  %v21273_v20 = vshrl.u32 %v21272_v15, 16  ;;  %v21277_v39 = vld [vmem:[#allocation47_spill] sm:$0xff] }
 0x5d6   : > { %v19364_v23 = vor.u32 %v10344_v63, %v10343_v48  ;;  %13720 = vmatprep.mubr.bf16.mxu1 %v7406_v5  ;;  %v21270_v0 = vshrl.u32 %v21269_v45, 16  ;;  %v21276_v63 = vshll.u32 %v21272_v15, 16  ;;  %v15321_v51 = vld [vmem:[#allocation8 + $0x68] sm:$0xff]   ;;  %v21278_v5 = vrot.slane %v21277_v39, 7  ;;  %v15322_v15 = vld [vmem:[#allocation8 + $0x70] sm:$0xff]  }
 0x5d7   : > { %v19370_v55 = vsel %vm6423_vm12, %v10337_v49, %v10341_v13  ;;  %v7450_v48 = vrot.slane %v21273_v20, 7  ;;  %v21274_v49 = vld [vmem:[#allocation49_spill] sm:$0xff]  ;;  %v21281_v20 = vld [vmem:[#allocation54_spill] sm:$0xff] }
 0x5d8   : > { %v19374_v19 = vsel %vm6423_vm12, %v10341_v13, %v19364_v23  ;;  %v7442_v50 = vrot.slane %v21270_v0, 7 }
 0x5d9   : > { %v7453_v13 = vor.u32 %v21276_v63, %v7450_v48  ;;  %v21284_v63 = vshll.u32 %v21281_v20, 16 }
 0x5dd   : > { %13721 = vmatmul.mubr.bf16.vlgmr.msra.gmra.mrb[0].mxu1 %v18705_v54  ;;  %v15320_v54 = vld [vmem:[#allocation8 + $0x60] sm:$0xff]  }
 0x5de   : > { %13724 = vmatprep.mubr.bf16.mxu1 %v21268_v46  ;;  %13769 = vmatpush3.bf16.msra.mxu1 %v19012_v59  ;;  %v21275_v59 = vshll.u32 %v21269_v45, 16  ;;  %v21279_v46 = vld [vmem:[#allocation52_spill] sm:$0xff] }
 0x5df   : > { %13770 = vmatprep.subr.bf16.mxu1 %v15317_v34  ;;  %v21280_v0 = vshrl.u32 %v21279_v46, 16 }
 0x5e0   : > { %v7445_v27 = vor.u32 %v21275_v59, %v7442_v50 }
 0x5e2   : > { %13771 = vmatpush3.bf16.msra.mxu1 %v15317_v34  ;;  %v7446_v34 = vsel %vm7394_vm2, %v21278_v5, %v7445_v27  ;;  %v15323_v27 = vld [vmem:[#allocation8 + $0x78] sm:$0xff]  }
 0x5e3   : > { %13772 = vmatprep.subr.bf16.mxu1 %v15318_v9 }
 0x5e5   : > { %13725 = vmatmul.mubr.bf16.gmra.mrb[4].mxu1 %v21271_v35  ;;  %v7458_v35 = vrot.slane %v21280_v0, 7 }
 0x5e6   : > { %13728 = vmatprep.mubr.bf16.mxu1 %v21274_v49  ;;  %13773 = vmatpush3.bf16.msra.mxu1 %v15318_v9  ;;  %v7454_v9 = vsel %vm7394_vm2, %v7442_v50, %v7453_v13  ;;  %v21282_v49 = vshrl.u32 %v21281_v20, 16 }
 0x5e7   : > { %13774 = vmatprep.subr.bf16.mxu1 %v15319_v24 }
 0x5e8   : > { %v7466_v45 = vrot.slane %v21282_v49, 7 }
 0x5ea   : > { %13775 = vmatpush3.bf16.msra.mxu1 %v15319_v24  ;;  %v21283_v24 = vshll.u32 %v21279_v46, 16  ;;  %v7469_v39 = vor.u32 %v21284_v63, %v7466_v45  ;;  %v19407_v46 = vld [vmem:[#allocation8 + $0x100] sm:$0xff]  }
 0x5eb   : > { %13776 = vmatprep.subr.bf16.mxu1 %v15320_v54 }
 0x5ec   : > { %v7461_v59 = vor.u32 %v21283_v24, %v7458_v35  ;;  %v7470_v0 = vsel %vm7394_vm2, %v7458_v35, %v7469_v39  ;;  %v21291_v35 = vshrl.u32 %v18766_v31, 16  ;;  %v21292_v39 = vshrl.u32 %v18768_v7, 16 }
 0x5ed   : > { %13729 = vmatmul.mubr.bf16.gmra.mrb[8].mxu1 %v7446_v34  ;;  %v21285_v34 = vld [vmem:[#allocation59_spill] sm:$0xff] }
 0x5ee   : > { %13732 = vmatprep.mubr.bf16.mxu1 %v7454_v9  ;;  %13777 = vmatpush3.bf16.msra.mxu1 %v15320_v54  ;;  %v7462_v5 = vsel %vm7394_vm2, %v7450_v48, %v7461_v59  ;;  %v21286_v50 = vshrl.u32 %v21285_v34, 16  ;;  %v21287_v54 = vld [vmem:[#allocation61_spill] sm:$0xff]  ;;  %v7490_v63 = vrot.slane %v21291_v35, 7 }
 0x5ef   : > { %13778 = vmatprep.subr.bf16.mxu1 %v15321_v51  ;;  %v21288_v9 = vshrl.u32 %v21287_v54, 16  ;;  %v21290_v24 = vshll.u32 %v21287_v54, 16 }
 0x5f0   : > { %v7474_v13 = vrot.slane %v21286_v50, 7 }
 0x5f1   : > { %v7482_v49 = vrot.slane %v21288_v9, 7 }
 0x5f2   : > { %13779 = vmatpush3.bf16.msra.mxu1 %v15321_v51  ;;  %v21289_v51 = vshll.u32 %v21285_v34, 16  ;;  %v21293_v34 = vshll.u32 %v18766_v31, 16  ;;  %v21298_v31 = vshll.u32 %v18776_v33, 16 }
 0x5f3   : > { %13780 = vmatprep.subr.bf16.mxu1 %v15322_v15  ;;  %v7485_v48 = vor.u32 %v21290_v24, %v7482_v49  ;;  %v21297_v24 = vshll.u32 %v18774_v26, 16 }
 0x5f4   : > { %v7477_v20 = vor.u32 %v21289_v51, %v7474_v13  ;;  %v7493_v50 = vor.u32 %v21293_v34, %v7490_v63  ;;  %v21301_v34 = vshll.u32 %v18782_v61, 16 }
 0x5f5   : > { %13733 = vmatmul.mubr.bf16.gmra.mrb[12].mxu1 %v7462_v5  ;;  %v7498_v5 = vrot.slane %v21292_v39, 7 }
 0x5f6   : > { %13736 = vmatprep.mubr.bf16.mxu1 %v7470_v0  ;;  %13781 = vmatpush3.bf16.msra.mxu1 %v15322_v15  ;;  %v7478_v59 = vsel %vm7394_vm2, %v7466_v45, %v7477_v20  ;;  %v7486_v15 = vsel %vm7394_vm2, %v7474_v13, %v7485_v48  ;;  %v21294_v0 = vshll.u32 %v18768_v7, 16  ;;  %v7494_v54 = vsel %vm7394_vm2, %v7482_v49, %v7493_v50 }
 0x5f7   : > { %13782 = vmatprep.subr.bf16.mxu1 %v15323_v27  ;;  %v21295_v45 = vshrl.u32 %v18774_v26, 16  ;;  %v21296_v13 = vshrl.u32 %v18776_v33, 16  ;;  %v21299_v49 = vshrl.u32 %v18782_v61, 16  ;;  %v21302_v26 = vshll.u32 %v18784_v25, 16 }
 0x5f8   : > { %v21306_v61 = vshll.u32 %v18792_v38, 16 }
 0x5f9   : > { %v7506_v9 = vrot.slane %v21295_v45, 7  ;;  %v7514_v20 = vrot.slane %v21296_v13, 7  ;;  %v7522_v35 = vrot.slane %v21299_v49, 7  ;;  %v21304_v45 = vshrl.u32 %v18792_v38, 16 }
 0x5fa   : > { %13783 = vmatpush3.bf16.msra.mxu1 %v15323_v27  ;;  %v7501_v27 = vor.u32 %v21294_v0, %v7498_v5  ;;  %v21309_v49 = vshll.u32 %v18798_v22, 16 }
 0x5fb   : > { %13832 = vmatprep.subr.bf16.mxu1 %v19407_v46  ;;  %v7509_v48 = vor.u32 %v21297_v24, %v7506_v9  ;;  %v7525_v50 = vor.u32 %v21301_v34, %v7522_v35 }
 0x5fc   : > { %v7502_v51 = vsel %vm7394_vm2, %v7490_v63, %v7501_v27  ;;  %v21300_v63 = vshrl.u32 %v18784_v25, 16 }
 0x5fd   : > { %13737 = vmatmul.mubr.bf16.gmra.mrb[16].mxu1 %v7478_v59  ;;  %v7517_v59 = vor.u32 %v21298_v31, %v7514_v20  ;;  %v7510_v7 = vsel %vm7394_vm2, %v7498_v5, %v7509_v48  ;;  %v7526_v33 = vsel %vm7394_vm2, %v7514_v20, %v7525_v50  ;;  %v21303_v5 = vshrl.u32 %v18790_v60, 16 }
 0x5fe   : > { %13740 = vmatprep.mubr.bf16.mxu1 %v7486_v15  ;;  %v7530_v39 = vrot.slane %v21300_v63, 7  ;;  %v21307_v20 = vshrl.u32 %v18798_v22, 16  ;;  %v21311_v63 = vld [vmem:[#allocation58_spill] sm:$0xff] }
 0x5ff   : > { %v7518_v15 = vsel %vm7394_vm2, %v7506_v9, %v7517_v59  ;;  %v7538_v27 = vrot.slane %v21303_v5, 7  ;;  %v7546_v9 = vrot.slane %v21304_v45, 7  ;;  %v21308_v59 = vshrl.u32 %v18800_v11, 16  ;;  %v21317_v45 = vld [vmem:[#allocation65_spill] sm:$0xff] }
 0x600   : > { %v7533_v0 = vor.u32 %v21302_v26, %v7530_v39  ;;  %v7554_v48 = vrot.slane %v21307_v20, 7  ;;  %v21313_v26 = vld [vmem:[#allocation60_spill] sm:$0xff]  ;;  %v21315_v5 = vshll.u32 %v21311_v63, 16 }
 0x601   : > { %v7549_v24 = vor.u32 %v21306_v61, %v7546_v9  ;;  %v21316_v22 = vshll.u32 %v21313_v26, 16  ;;  %v15393_v61 = vld [vmem:[#allocation2] sm:$0xf0] }
 0x603   : > { %v7550_v31 = vsel %vm7394_vm2, %v7538_v27, %v7549_v24  ;;  %v7914_v24 = vrot.slane %v15393_v61, 4  ;;  %v15330_v61 = vld [vmem:[#allocation8 + $0x130] sm:$0xff]  }
 0x605   : > { %13741 = vmatmul.mubr.bf16.gmra.mrb[20].mxu1 %v7494_v54  ;;  %v7534_v54 = vsel %vm7394_vm2, %v7522_v35, %v7533_v0  ;;  %v7557_v35 = vor.u32 %v21309_v49, %v7554_v48  ;;  %v21314_v0 = vshrl.u32 %v21313_v26, 16  ;;  %v19495_v26 = vld [vmem:[#allocation2 + $0x28] sm:$0xff] }
 0x606   : > { %13744 = vmatprep.mubr.bf16.mxu1 %v7502_v51  ;;  %v21305_v51 = vshll.u32 %v18790_v60, 16  ;;  %v21310_v60 = vshll.u32 %v18800_v11, 16 }
 0x607   : > { %v7558_v38 = vsel %vm7394_vm2, %v7546_v9, %v7557_v35  ;;  %v21318_v9 = vshrl.u32 %v21317_v45, 16  ;;  %v19486_v35 = vld [vmem:[#allocation2 + $0x18] sm:$0xff] }
 0x608   : > { %v7541_v13 = vor.u32 %v21305_v51, %v7538_v27 }
 0x609   : > { %v7586_v51 = vrot.slane %v21318_v9, 7  ;;  %v15329_v9 = vld [vmem:[#allocation8 + $0x128] sm:$0xff]  }
 0x60a   : > { %v7542_v25 = vsel %vm7394_vm2, %v7530_v39, %v7541_v13  ;;  %v21312_v39 = vshrl.u32 %v21311_v63, 16 }
 0x60c   : > { %v7570_v34 = vrot.slane %v21312_v39, 7  ;;  %v15326_v39 = vld [vmem:[#allocation8 + $0x110] sm:$0xff]  }
 0x60d   : > { %13745 = vmatmul.mubr.bf16.gmra.mrb[24].mxu1 %v7510_v7  ;;  %v7562_v7 = vrot.slane %v21308_v59, 7 }
 0x60e   : > { %13748 = vmatprep.mubr.bf16.mxu1 %v7518_v15  ;;  %v7573_v27 = vor.u32 %v21315_v5, %v7570_v34 }
 0x60f   : > { %v7565_v15 = vor.u32 %v21310_v60, %v7562_v7  ;;  %v7919_v60 = vrot.slane %v19486_v35, 4 }
 0x610   : > { %v7574_v11 = vsel %vm7394_vm2, %v7562_v7, %v7573_v27  ;;  %v19483_v7 = vld [vmem:[#allocation2 + $0x10] sm:$0xff] }
 0x611   : > { %v7566_v50 = vsel %vm7394_vm2, %v7554_v48, %v7565_v15  ;;  %v7915_v48 = vrot.slane %v19180_v28, 4  ;;  %v7917_v49 = vrot.slane %v19483_v7, 4  ;;  %v15325_v15 = vld [vmem:[#allocation8 + $0x108] sm:$0xff]  }
 0x613   : > { %v7920_v63 = vsel %vm7913_vm3, %v7917_v49, %v7919_v60 }
 0x615   : > { %13749 = vmatmul.mubr.bf16.gmra.mrb[28].mxu1 %v7526_v33  ;;  %v7578_v33 = vrot.slane %v21314_v0, 7  ;;  %v7923_v0 = vrot.slane %v19495_v26, 4 }
 0x616   : > { %13752 = vmatprep.mubr.bf16.mxu1 %v7534_v54 }
 0x617   : > { %v7581_v54 = vor.u32 %v21316_v22, %v7578_v33  ;;  %v19500_v22 = vld [vmem:[#allocation2 + $0x30] sm:$0xff] }
 0x619   : > { %v7582_v13 = vsel %vm7394_vm2, %v7570_v34, %v7581_v54  ;;  %v19492_v34 = vld [vmem:[#allocation2 + $0x20] sm:$0xff]  ;;  %v7925_v54 = vrot.slane %v19500_v22, 4 }
 0x61d   : > { %13753 = vmatmul.mubr.bf16.gmra.mrb[32].mxu1 %v7542_v25  ;;  %v21319_v25 = vshll.u32 %v21317_v45, 16 }
 0x61e   : > { %13756 = vmatprep.mubr.bf16.mxu1 %v7550_v31  ;;  %v7916_v31 = vsel %vm7913_vm3, %v7914_v24, %v7915_v48  ;;  %v15400_v24 = vld [vmem:[#allocation2 + $0x40] sm:$0xff] }
 0x61f   : > { %v7589_v20 = vor.u32 %v21319_v25, %v7586_v51  ;;  %v7926_v51 = vsel %vm7913_vm3, %v7923_v0, %v7925_v54  ;;  %v7929_v25 = vrot.slane %v15400_v24, 4 }
 0x621   : > { %v7590_v59 = vsel %vm7394_vm2, %v7578_v33, %v7589_v20  ;;  %v15327_v33 = vld [vmem:[#allocation8 + $0x118] sm:$0xff]   ;;  %v15401_v20 = vld [vmem:[#allocation2 + $0x48] sm:$0xff] }
 0x625   : > { %13757 = vmatmul.mubr.bf16.gmra.mrb[36].mxu1 %v7558_v38  ;;  %v7918_v38 = vsel %vm7913_vm3, %v7915_v48, %v7917_v49  ;;  %v7931_v48 = vrot.slane %v15401_v20, 4 }
 0x626   : > { %13760 = vmatprep.mubr.bf16.mxu1 %v7566_v50  ;;  %v7921_v50 = vrot.slane %v19492_v34, 4 }
 0x627   : > { %v7932_v49 = vsel %vm7913_vm3, %v7929_v25, %v7931_v48 }
 0x628   : > { %v7922_v5 = vsel %vm7913_vm3, %v7919_v60, %v7921_v50  ;;  %v7924_v27 = vsel %vm7913_vm3, %v7921_v50, %v7923_v0  ;;  %v19507_v60 = vld [vmem:[#allocation8 + $0x140] sm:$0xff]  }
 0x62d   : > { %13761 = vmatmul.mubr.bf16.gmra.mrb[40].mxu1 %v7574_v11  ;;  %v15399_v11 = vld [vmem:[#allocation2 + $0x38] sm:$0xff] }
 0x62e   : > { %13764 = vmatprep.mubr.bf16.mxu1 %v7582_v13  ;;  %v7927_v45 = vrot.slane %v15399_v11, 4 }
 0x630   : > { %v7928_v13 = vsel %vm7913_vm3, %v7925_v54, %v7927_v45 }
 0x635   : > { %13765 = vmatmul.mubr.bf16.gmra.mrb[44].mxu1 %v7590_v59  ;;  %v7930_v59 = vsel %vm7913_vm3, %v7927_v45, %v7929_v25  ;;  %v15406_v45 = vld [vmem:[#allocation2 + $0x70] sm:$0xff]  ;;  %v15408_v25 = vld [vmem:[#allocation2 + $0x80] sm:$0xff] }
 0x636   : > { %13784 = vmatprep.mubr.bf16.mxu1 %v7916_v31  ;;  %v15331_v31 = vld [vmem:[#allocation8 + $0x138] sm:$0xff]   ;;  %v7945_v20 = vrot.slane %v15408_v25, 4 }
 0x637   : > { %v21320_v25 = vld [vmem:[#allocation104_spill] sm:$0xff] }
 0x63d   : > { %13785 = vmatmul.mubr.bf16.vlgmr.msra.gmra.mrb[0].mxu1 %v7918_v38 }
 0x63e   : > { %13788 = vmatprep.mubr.bf16.mxu1 %v7920_v63  ;;  %13833 = vmatpush3.bf16.msra.mxu1 %v19407_v46  ;;  %v15328_v46 = vld [vmem:[#allocation8 + $0x120] sm:$0xff]   ;;  %v15403_v63 = vld [vmem:[#allocation2 + $0x58] sm:$0xff] }
 0x63f   : > { %13834 = vmatprep.subr.bf16.mxu1 %v15325_v15 }
 0x642   : > { %13835 = vmatpush3.bf16.msra.mxu1 %v15325_v15  ;;  %v15402_v15 = vld [vmem:[#allocation2 + $0x50] sm:$0xff] }
 0x643   : > { %13836 = vmatprep.subr.bf16.mxu1 %v15326_v39  ;;  %v7933_v38 = vrot.slane %v15402_v15, 4  ;;  %v15410_v15 = vld [vmem:[#allocation2 + $0x90] sm:$0xff] }
 0x645   : > { %13789 = vmatmul.mubr.bf16.gmra.mrb[4].mxu1 %v7922_v5  ;;  %v7934_v50 = vsel %vm7913_vm3, %v7931_v48, %v7933_v38  ;;  %v15409_v48 = vld [vmem:[#allocation2 + $0x88] sm:$0xff] }
 0x646   : > { %13792 = vmatprep.mubr.bf16.mxu1 %v7924_v27  ;;  %13837 = vmatpush3.bf16.msra.mxu1 %v15326_v39  ;;  %v7935_v39 = vrot.slane %v15403_v63, 4  ;;  %v15405_v27 = vld [vmem:[#allocation2 + $0x68] sm:$0xff]  ;;  %v15411_v63 = vld [vmem:[#allocation2 + $0x98] sm:$0xff] }
 0x647   : > { %13838 = vmatprep.subr.bf16.mxu1 %v15327_v33 }
 0x648   : > { %v7936_v0 = vsel %vm7913_vm3, %v7933_v38, %v7935_v39  ;;  %v7949_v38 = vrot.slane %v15410_v15, 4  ;;  %v15336_v15 = vld [vmem:[#allocation8 + $0x160] sm:$0xff]  }
 0x64a   : > { %13839 = vmatpush3.bf16.msra.mxu1 %v15327_v33  ;;  %v15404_v33 = vld [vmem:[#allocation2 + $0x60] sm:$0xff] }
 0x64b   : > { %13840 = vmatprep.subr.bf16.mxu1 %v15328_v46  ;;  %v7937_v5 = vrot.slane %v15404_v33, 4  ;;  %v15412_v33 = vld [vmem:[#allocation2 + $0xa0] sm:$0xff] }
 0x64d   : > { %13793 = vmatmul.mubr.bf16.gmra.mrb[8].mxu1 %v7926_v51  ;;  %v7938_v54 = vsel %vm7913_vm3, %v7935_v39, %v7937_v5  ;;  %v15407_v51 = vld [vmem:[#allocation2 + $0x78] sm:$0xff]  ;;  %v7951_v39 = vrot.slane %v15411_v63, 4  ;;  %v15418_v63 = vld [vmem:[#allocation2 + $0x48] sm:$0xff] }
 0x64e   : > { %13796 = vmatprep.mubr.bf16.mxu1 %v7928_v13  ;;  %13841 = vmatpush3.bf16.msra.mxu1 %v15328_v46  ;;  %v7939_v46 = vrot.slane %v15405_v27, 4  ;;  %v7943_v13 = vrot.slane %v15407_v51, 4  ;;  %v15413_v27 = vld [vmem:[#allocation2 + $0xa8] sm:$0xff]  ;;  %v15415_v51 = vld [vmem:[#allocation2 + $0xb8] sm:$0xff] }
 0x64f   : > { %13842 = vmatprep.subr.bf16.mxu1 %v15329_v9 }
 0x650   : > { %v7940_v11 = vsel %vm7913_vm3, %v7937_v5, %v7939_v46  ;;  %v7953_v5 = vrot.slane %v15412_v33, 4  ;;  %v15423_v33 = vld [vmem:[#allocation2 + $0x70] sm:$0xff] }
 0x652   : > { %13843 = vmatpush3.bf16.msra.mxu1 %v15329_v9  ;;  %v7941_v9 = vrot.slane %v15406_v45, 4  ;;  %v15414_v45 = vld [vmem:[#allocation2 + $0xb0] sm:$0xff] }
 0x653   : > { %13844 = vmatprep.subr.bf16.mxu1 %v15330_v61 }
 0x654   : > { %v7944_v24 = vsel %vm7913_vm3, %v7941_v9, %v7943_v13 }
 0x655   : > { %13797 = vmatmul.mubr.bf16.gmra.mrb[12].mxu1 %v7930_v59  ;;  %v7946_v59 = vsel %vm7913_vm3, %v7943_v13, %v7945_v20  ;;  %v7959_v13 = vrot.slane %v15415_v51, 4  ;;  %v15431_v51 = vld [vmem:[#allocation2 + $0xb0] sm:$0xff] }
 0x656   : > { %13800 = vmatprep.mubr.bf16.mxu1 %v7932_v49  ;;  %13845 = vmatpush3.bf16.msra.mxu1 %v15330_v61  ;;  %v7942_v61 = vsel %vm7913_vm3, %v7939_v46, %v7941_v9  ;;  %v7955_v46 = vrot.slane %v15413_v27, 4  ;;  %v7957_v9 = vrot.slane %v15414_v45, 4  ;;  %v15425_v27 = vld [vmem:[#allocation2 + $0x80] sm:$0xff] }
 0x657   : > { %13846 = vmatprep.subr.bf16.mxu1 %v15331_v31  ;;  %v15429_v45 = vld [vmem:[#allocation2 + $0xa0] sm:$0xff] }
 0x65a   : > { %13847 = vmatpush3.bf16.msra.mxu1 %v15331_v31  ;;  %v7947_v31 = vrot.slane %v15409_v48, 4 }
 0x65b   : > { %13896 = vmatprep.subr.bf16.mxu1 %v19507_v60 }
 0x65c   : > { %v7948_v49 = vsel %vm7913_vm3, %v7945_v20, %v7947_v31  ;;  %v7961_v20 = vrot.slane %v21320_v25, 4  ;;  %v15432_v25 = vld [vmem:[#allocation2 + $0xb8] sm:$0xff] }
 0x65d   : > { %13801 = vmatmul.mubr.bf16.gmra.mrb[16].mxu1 %v7934_v50  ;;  %v7950_v50 = vsel %vm7913_vm3, %v7947_v31, %v7949_v38  ;;  %v15333_v31 = vld [vmem:[#allocation8 + $0x148] sm:$0xff]  }
 0x65e   : > { %13804 = vmatprep.mubr.bf16.mxu1 %v7936_v0  ;;  %v7952_v0 = vsel %vm7913_vm3, %v7949_v38, %v7951_v39  ;;  %v7962_v48 = vsel %vm7913_vm3, %v7959_v13, %v7961_v20  ;;  %v15339_v38 = vld [vmem:[#allocation8 + $0x178] sm:$0xff]  }
 0x665   : > { %13805 = vmatmul.mubr.bf16.gmra.mrb[20].mxu1 %v7938_v54  ;;  %v7954_v54 = vsel %vm7913_vm3, %v7951_v39, %v7953_v5  ;;  %v15420_v39 = vld [vmem:[#allocation2 + $0x58] sm:$0xff] }
 0x666   : > { %13808 = vmatprep.mubr.bf16.mxu1 %v7940_v11  ;;  %v7956_v11 = vsel %vm7913_vm3, %v7953_v5, %v7955_v46  ;;  %v15424_v5 = vld [vmem:[#allocation2 + $0x78] sm:$0xff] }
 0x66d   : > { %13809 = vmatmul.mubr.bf16.gmra.mrb[24].mxu1 %v7942_v61  ;;  %v7958_v61 = vsel %vm7913_vm3, %v7955_v46, %v7957_v9  ;;  %v15426_v46 = vld [vmem:[#allocation2 + $0x88] sm:$0xff] }
 0x66e   : > { %13812 = vmatprep.mubr.bf16.mxu1 %v7944_v24  ;;  %v7960_v24 = vsel %vm7913_vm3, %v7957_v9, %v7959_v13  ;;  %v15430_v9 = vld [vmem:[#allocation2 + $0xa8] sm:$0xff]  ;;  %v8598_v13 = vld [vmem:[#allocation2 + $0x10] sm:$0xff] }
 0x675   : > { %13813 = vmatmul.mubr.bf16.gmra.mrb[28].mxu1 %v7946_v59  ;;  %v15334_v59 = vld [vmem:[#allocation8 + $0x150] sm:$0xff]  }
 0x676   : > { %13816 = vmatprep.mubr.bf16.mxu1 %v7948_v49  ;;  %v15335_v49 = vld [vmem:[#allocation8 + $0x158] sm:$0xff]  }
 0x67d   : > { %13817 = vmatmul.mubr.bf16.gmra.mrb[32].mxu1 %v7950_v50  ;;  %v15421_v50 = vld [vmem:[#allocation2 + $0x60] sm:$0xff] }
 0x67e   : > { %13820 = vmatprep.mubr.bf16.mxu1 %v7952_v0  ;;  %v15422_v0 = vld [vmem:[#allocation2 + $0x68] sm:$0xff] }
 0x685   : > { %13821 = vmatmul.mubr.bf16.gmra.mrb[36].mxu1 %v7954_v54  ;;  %v15427_v54 = vld [vmem:[#allocation2 + $0x90] sm:$0xff] }
 0x686   : > { %13824 = vmatprep.mubr.bf16.mxu1 %v7956_v11  ;;  %v15428_v11 = vld [vmem:[#allocation2 + $0x98] sm:$0xff] }
 0x68d   : > { %13825 = vmatmul.mubr.bf16.gmra.mrb[40].mxu1 %v7958_v61  ;;  %v8643_v61 = vshll.u32 %v8598_v13, 16 }
 0x68e   : > { %13828 = vmatprep.mubr.bf16.mxu1 %v7960_v24  ;;  %v8599_v24 = vld [vmem:[#allocation2 + $0x18] sm:$0xff] }
 0x68f   : > { %v8645_v20 = vrot.slane %v8643_v61, 1 }
 0x695   : > { %13829 = vmatmul.mubr.bf16.gmra.mrb[44].mxu1 %v7962_v48  ;;  %v15433_v48 = vld [vmem:[#allocation2 + $0xc0] sm:$0xff] }
 0x696   : > { %13848 = vmatprep.mubr.bf16.mxu1 %v19483_v7  ;;  %v15337_v7 = vld [vmem:[#allocation8 + $0x168] sm:$0xff]  }
 0x69d   : > { %13849 = vmatmul.mubr.bf16.vlgmr.msra.gmra.mrb[0].mxu1 %v19486_v35  ;;  %v15416_v35 = vld [vmem:[#allocation2 + $0x38] sm:$0xff] }
 0x69e   : > { %13852 = vmatprep.mubr.bf16.mxu1 %v19492_v34  ;;  %13897 = vmatpush3.bf16.msra.mxu1 %v19507_v60  ;;  %v15417_v34 = vld [vmem:[#allocation2 + $0x40] sm:$0xff]  ;;  %v15338_v60 = vld [vmem:[#allocation8 + $0x170] sm:$0xff]  }
 0x69f   : > { %13898 = vmatprep.subr.bf16.mxu1 %v15333_v31 }
 0x6a2   : > { %13899 = vmatpush3.bf16.msra.mxu1 %v15333_v31  ;;  %v8641_v31 = vshrl.u32 %v8598_v13, 16  ;;  %v15343_v13 = vld [vmem:[#allocation8 + $0x198] sm:$0xff]  }
 0x6a3   : > { %13900 = vmatprep.subr.bf16.mxu1 %v15334_v59 }
 0x6a5   : > { %13853 = vmatmul.mubr.bf16.gmra.mrb[4].mxu1 %v19495_v26  ;;  %v15419_v26 = vld [vmem:[#allocation2 + $0x50] sm:$0xff] }
 0x6a6   : > { %13856 = vmatprep.mubr.bf16.mxu1 %v19500_v22  ;;  %13901 = vmatpush3.bf16.msra.mxu1 %v15334_v59  ;;  %v15340_v22 = vld [vmem:[#allocation8 + $0x180] sm:$0xff]   ;;  %v8648_v59 = vshll.u32 %v8599_v24, 16 }
 0x6a7   : > { %13902 = vmatprep.subr.bf16.mxu1 %v15335_v49 }
 0x6aa   : > { %13903 = vmatpush3.bf16.msra.mxu1 %v15335_v49  ;;  %v8646_v49 = vor.u32 %v8645_v20, %v8641_v31  ;;  %v21327_v20 = vld [vmem:[#allocation73_spill] sm:$0xff]  ;;  %v15346_v31 = vld [vmem:[#allocation8 + $0x1b0] sm:$0xff]  }
 0x6ab   : > { %13904 = vmatprep.subr.bf16.mxu1 %v15336_v15 }
 0x6ad   : > { %13857 = vmatmul.mubr.bf16.gmra.mrb[8].mxu1 %v15416_v35 }
 0x6ae   : > { %13860 = vmatprep.mubr.bf16.mxu1 %v15417_v34  ;;  %13905 = vmatpush3.bf16.msra.mxu1 %v15336_v15  ;;  %v8650_v15 = vrot.slane %v8648_v59, 1  ;;  %v21321_v34 = vld [vmem:[#allocation66_spill] sm:$0xff]  ;;  %v15347_v59 = vld [vmem:[#allocation8 + $0x1b8] sm:$0xff]  }
 0x6af   : > { %13906 = vmatprep.subr.bf16.mxu1 %v15337_v7 }
 0x6b0   : > { %v8651_v35 = vsel %vm2532_vm1, %v8646_v49, %v8650_v15  ;;  %v21329_v49 = vld [vmem:[#allocation82_spill] sm:$0xff] }
 0x6b2   : > { %13907 = vmatpush3.bf16.msra.mxu1 %v15337_v7  ;;  %v15434_v7 = vld [vmem:[#allocation2 + $0xc8] sm:$0xff] }
 0x6b3   : > { %13908 = vmatprep.subr.bf16.mxu1 %v15338_v60 }
 0x6b5   : > { %13861 = vmatmul.mubr.bf16.gmra.mrb[12].mxu1 %v15418_v63 }
 0x6b6   : > { %13864 = vmatprep.mubr.bf16.mxu1 %v15419_v26  ;;  %13909 = vmatpush3.bf16.msra.mxu1 %v15338_v60  ;;  %v8658_v60 = vrot.slane %v21321_v34, 1  ;;  %v21322_v26 = vld [vmem:[#allocation68_spill] sm:$0xff]  ;;  %v21332_v34 = vld [vmem:[#allocation85_spill] sm:$0xff] }
 0x6b7   : > { %13910 = vmatprep.subr.bf16.mxu1 %v15339_v38 }
 0x6ba   : > { %13911 = vmatpush3.bf16.msra.mxu1 %v15339_v38  ;;  %v8652_v38 = vshrl.u32 %v8599_v24, 16  ;;  %v21326_v24 = vld [vmem:[#allocation63_spill] sm:$0xff] }
 0x6bb   : > { %13960 = vmatprep.subr.bf16.mxu1 %v15340_v22 }
 0x6bc   : > { %v8654_v63 = vor.u32 %v8652_v38, %v8650_v15  ;;  %v21330_v15 = vld [vmem:[#allocation83_spill] sm:$0xff] }
 0x6bd   : > { %13865 = vmatmul.mubr.bf16.gmra.mrb[16].mxu1 %v15420_v39  ;;  %v8662_v39 = vor.u32 %v21322_v26, %v8658_v60  ;;  %v21334_v38 = vld [vmem:[#allocation87_spill] sm:$0xff]  ;;  %v21336_v26 = vld [vmem:[#allocation89_spill] sm:$0xff] }
 0x6be   : > { %13868 = vmatprep.mubr.bf16.mxu1 %v15421_v50  ;;  %v21323_v50 = vld [vmem:[#allocation69_spill] sm:$0xff] }
 0x6c5   : > { %13869 = vmatmul.mubr.bf16.gmra.mrb[20].mxu1 %v15422_v0  ;;  %v8666_v0 = vrot.slane %v21323_v50, 1  ;;  %v21338_v50 = vld [vmem:[#allocation91_spill] sm:$0xff] }
 0x6c6   : > { %13872 = vmatprep.mubr.bf16.mxu1 %v15423_v33  ;;  %v15341_v33 = vld [vmem:[#allocation8 + $0x188] sm:$0xff]  }
 0x6cd   : > { %13873 = vmatmul.mubr.bf16.gmra.mrb[24].mxu1 %v15424_v5  ;;  %v8659_v5 = vsel %vm2532_vm1, %v8654_v63, %v8658_v60  ;;  %v21333_v60 = vld [vmem:[#allocation86_spill] sm:$0xff]  ;;  %v21335_v63 = vld [vmem:[#allocation88_spill] sm:$0xff] }
 0x6ce   : > { %13876 = vmatprep.mubr.bf16.mxu1 %v15425_v27  ;;  %v8667_v27 = vsel %vm2532_vm1, %v8662_v39, %v8666_v0  ;;  %v21337_v39 = vld [vmem:[#allocation90_spill] sm:$0xff] }
 0x6d5   : > { %13877 = vmatmul.mubr.bf16.gmra.mrb[28].mxu1 %v15426_v46  ;;  %v8674_v46 = vrot.slane %v18872_v62, 1  ;;  %v15344_v62 = vld [vmem:[#allocation8 + $0x1a0] sm:$0xff]  }
 0x6d6   : > { %13880 = vmatprep.mubr.bf16.mxu1 %v15427_v54  ;;  %v15342_v54 = vld [vmem:[#allocation8 + $0x190] sm:$0xff]  }
 0x6dd   : > { %13881 = vmatmul.mubr.bf16.gmra.mrb[32].mxu1 %v15428_v11  ;;  %v21324_v11 = vld [vmem:[#allocation80_spill] sm:$0xff] }
 0x6de   : > { %13884 = vmatprep.mubr.bf16.mxu1 %v15429_v45  ;;  %v8670_v45 = vor.u32 %v21324_v11, %v8666_v0  ;;  %v21339_v0 = vld [vmem:[#allocation93_spill] sm:$0xff] }
 0x6e0   : > { %v8675_v61 = vsel %vm2532_vm1, %v8670_v45, %v8674_v46 }
 0x6e5   : > { %13885 = vmatmul.mubr.bf16.gmra.mrb[36].mxu1 %v15430_v9  ;;  %v21325_v9 = vld [vmem:[#allocation92_spill] sm:$0xff] }
 0x6e6   : > { %13888 = vmatprep.mubr.bf16.mxu1 %v15431_v51  ;;  %v8678_v51 = vor.u32 %v21325_v9, %v8674_v46  ;;  %v9181_v46 = vld [vmem:[#allocation2 + $0x18] sm:$0xf8] }
 0x6e7   : > { %v9224_v11 = vshrl.u32 %v9181_v46, 16  ;;  %v9227_v45 = vshll.u32 %v9181_v46, 16  ;;  %v15351_v46 = vld [vmem:[#allocation8 + $0x1d8] sm:$0xff]  }
 0x6ed   : > { %13889 = vmatmul.mubr.bf16.gmra.mrb[40].mxu1 %v15432_v25  ;;  %v8683_v25 = vsel %vm2532_vm1, %v8678_v51, %v21326_v24  ;;  %v21343_v51 = vld [vmem:[#allocation98_spill] sm:$0xff]  ;;  %v21344_v24 = vld [vmem:[#allocation99_spill] sm:$0xff] }
 0x6ee   : > { %13892 = vmatprep.mubr.bf16.mxu1 %v15433_v48  ;;  %v21328_v48 = vld [vmem:[#allocation81_spill] sm:$0xff] }
 0x6f5   : > { %13893 = vmatmul.mubr.bf16.gmra.mrb[44].mxu1 %v15434_v7  ;;  %v15348_v7 = vld [vmem:[#allocation8 + $0x1c0] sm:$0xff]  }
 0x6f6   : > { %13912 = vmatprep.mubr.bf16.mxu1 %v8651_v35  ;;  %v21331_v35 = vld [vmem:[#allocation84_spill] sm:$0xff] }
 0x6fd   : > { %13913 = vmatmul.mubr.bf16.vlgmr.msra.gmra.mrb[0].mxu1 %v8659_v5  ;;  %v21341_v5 = vld [vmem:[#allocation95_spill] sm:$0xff] }
 0x6fe   : > { %13916 = vmatprep.mubr.bf16.mxu1 %v8667_v27  ;;  %13961 = vmatpush3.bf16.msra.mxu1 %v15340_v22  ;;  %v15345_v22 = vld [vmem:[#allocation8 + $0x1a8] sm:$0xff]   ;;  %v21342_v27 = vld [vmem:[#allocation96_spill] sm:$0xff] }
 0x6ff   : > { %13962 = vmatprep.subr.bf16.mxu1 %v15341_v33 }
 0x702   : > { %13963 = vmatpush3.bf16.msra.mxu1 %v15341_v33  ;;  %v21340_v33 = vld [vmem:[#allocation94_spill] sm:$0xff] }
 0x703   : > { %13964 = vmatprep.subr.bf16.mxu1 %v15342_v54 }
 0x705   : > { %13917 = vmatmul.mubr.bf16.gmra.mrb[4].mxu1 %v8675_v61  ;;  %v9229_v61 = vrot.slane %v9227_v45, 4  ;;  %v21355_v45 = vshrl.u32 %v19030_v57, 16 }
 0x706   : > { %13920 = vmatprep.mubr.bf16.mxu1 %v8683_v25  ;;  %13965 = vmatpush3.bf16.msra.mxu1 %v15342_v54  ;;  %v8622_v54 = vld [vmem:[#allocation2 + $0xd0] sm:$0x1] }
 0x707   : > { %13966 = vmatprep.subr.bf16.mxu1 %v15343_v13  ;;  %v8832_v9 = vshll.u32 %v8622_v54, 16  ;;  %v21354_v54 = vld [vmem:[#allocation101_spill] sm:$0xff] }
 0x709   : > { %v8834_v25 = vrot.slane %v8832_v9, 1  ;;  %v9279_v9 = vrot.slane %v21355_v45, 3 }
 0x70a   : > { %13967 = vmatpush3.bf16.msra.mxu1 %v15343_v13  ;;  %v9226_v13 = vrot.slane %v9224_v11, 3 }
 0x70b   : > { %13968 = vmatprep.subr.bf16.mxu1 %v15344_v62 }
 0x70d   : > { %13921 = vmatmul.mubr.bf16.gmra.mrb[8].mxu1 %v21327_v20 }
 0x70e   : > { %13924 = vmatprep.mubr.bf16.mxu1 %v21328_v48  ;;  %13969 = vmatpush3.bf16.msra.mxu1 %v15344_v62  ;;  %v9230_v62 = vor.u32 %v9229_v61, %v9226_v13  ;;  %v21346_v48 = vld [vmem:[#allocation100_spill] sm:$0xff] }
 0x70f   : > { %13970 = vmatprep.subr.bf16.mxu1 %v15345_v22 }
 0x712   : > { %13971 = vmatpush3.bf16.msra.mxu1 %v15345_v22  ;;  %v21345_v22 = vld [vmem:[#allocation97_spill] sm:$0xff] }
 0x713   : > { %13972 = vmatprep.subr.bf16.mxu1 %v15346_v31  ;;  %v8835_v20 = vsel %vm2532_vm1, %v21345_v22, %v8834_v25 }
 0x715   : > { %13925 = vmatmul.mubr.bf16.gmra.mrb[12].mxu1 %v21329_v49  ;;  %v21347_v49 = vld [vmem:[#allocation105_spill] sm:$0xff] }
 0x716   : > { %13928 = vmatprep.mubr.bf16.mxu1 %v21330_v15  ;;  %13973 = vmatpush3.bf16.msra.mxu1 %v15346_v31  ;;  %v9239_v31 = vsel %vm6945_vm13, %v9230_v62, %v21346_v48  ;;  %v21348_v15 = vshrl.u32 %v21347_v49, 16  ;;  %v15352_v62 = vld [vmem:[#allocation8 + $0x1e0] sm:$0xff]   ;;  %v15353_v48 = vld [vmem:[#allocation8 + $0x1e8] sm:$0xff]  }
 0x717   : > { %13974 = vmatprep.subr.bf16.mxu1 %v15347_v59 }
 0x71a   : > { %13975 = vmatpush3.bf16.msra.mxu1 %v15347_v59  ;;  %v15349_v59 = vld [vmem:[#allocation8 + $0x1c8] sm:$0xff]  }
 0x71b   : > { %14024 = vmatprep.subr.bf16.mxu1 %v15348_v7 }
 0x71d   : > { %13929 = vmatmul.mubr.bf16.gmra.mrb[16].mxu1 %v21331_v35  ;;  %v9261_v35 = vrot.slane %v21348_v15, 3 }
 0x71e   : > { %13932 = vmatprep.mubr.bf16.mxu1 %v21332_v34  ;;  %v21349_v34 = vshll.u32 %v21347_v49, 16  ;;  %v21360_v49 = vshll.u32 %v19037_v6, 16 }
 0x720   : > { %v9300_v15 = vrot.slane %v21360_v49, 4 }
 0x725   : > { %13933 = vmatmul.mubr.bf16.gmra.mrb[20].mxu1 %v21333_v60  ;;  %v9264_v60 = vrot.slane %v21349_v34, 4 }
 0x726   : > { %13936 = vmatprep.mubr.bf16.mxu1 %v21334_v38  ;;  %v21350_v38 = vld [vmem:[#allocation102_spill] sm:$0xff] }
 0x72d   : > { %13937 = vmatmul.mubr.bf16.gmra.mrb[24].mxu1 %v21335_v63  ;;  %v21351_v63 = vshrl.u32 %v19027_v36, 16 }
 0x72e   : > { %13940 = vmatprep.mubr.bf16.mxu1 %v21336_v26 }
 0x72f   : > { %v9270_v26 = vrot.slane %v21351_v63, 3  ;;  %v15354_v63 = vld [vmem:[#allocation8 + $0x1f0] sm:$0xff]  }
 0x735   : > { %13941 = vmatmul.mubr.bf16.gmra.mrb[28].mxu1 %v21337_v39  ;;  %v21352_v39 = vshll.u32 %v19027_v36, 16 }
 0x736   : > { %13944 = vmatprep.mubr.bf16.mxu1 %v21338_v50 }
 0x737   : > { %v9273_v50 = vrot.slane %v21352_v39, 4 }
 0x73d   : > { %13945 = vmatmul.mubr.bf16.gmra.mrb[32].mxu1 %v21339_v0  ;;  %v21353_v0 = vld [vmem:[#allocation103_spill] sm:$0xff] }
 0x73e   : > { %13948 = vmatprep.mubr.bf16.mxu1 %v21340_v33  ;;  %v15350_v33 = vld [vmem:[#allocation8 + $0x1d0] sm:$0xff]  }
 0x745   : > { %13949 = vmatmul.mubr.bf16.gmra.mrb[36].mxu1 %v21341_v5  ;;  %v9265_v5 = vor.u32 %v9264_v60, %v9261_v35  ;;  %v21361_v35 = vshrl.u32 %v19039_v37, 16  ;;  %v21362_v60 = vshll.u32 %v19039_v37, 16 }
 0x746   : > { %13952 = vmatprep.mubr.bf16.mxu1 %v21342_v27  ;;  %v9274_v27 = vor.u32 %v9273_v50, %v9270_v26  ;;  %v15355_v50 = vld [vmem:[#allocation8 + $0x1f8] sm:$0xff]  }
 0x747   : > { %v9266_v11 = vsel %vm6945_vm13, %v21354_v54, %v9265_v5  ;;  %v9306_v34 = vrot.slane %v21361_v35, 3  ;;  %v21373_v35 = vshrl.u32 %v19064_v21, 16 }
 0x748   : > { %v9275_v13 = vsel %vm6945_vm13, %v9265_v5, %v9274_v27  ;;  %v21364_v5 = vshll.u32 %v19046_v47, 16 }
 0x74d   : > { %13953 = vmatmul.mubr.bf16.gmra.mrb[40].mxu1 %v21343_v51  ;;  %v21356_v51 = vshll.u32 %v19030_v57, 16 }
 0x74e   : > { %13956 = vmatprep.mubr.bf16.mxu1 %v21344_v24  ;;  %v21358_v24 = vshll.u32 %v19032_v43, 16 }
 0x74f   : > { %v9282_v36 = vrot.slane %v21356_v51, 4 }
 0x750   : > { %v9291_v25 = vrot.slane %v21358_v24, 4 }
 0x751   : > { %v9283_v22 = vor.u32 %v9282_v36, %v9279_v9  ;;  %v19607_v9 = vld [vmem:[#allocation8 + $0x200] sm:$0xff]  }
 0x753   : > { %v9284_v57 = vsel %vm6945_vm13, %v9274_v27, %v9283_v22  ;;  %v9318_v27 = vrot.slane %v21364_v5, 4 }
 0x755   : > { %13957 = vmatmul.mubr.bf16.gmra.mrb[44].mxu1 %v8835_v20 }
 0x756   : > { %13976 = vmatprep.mubr.bf16.mxu1 %v9239_v31  ;;  %v21359_v31 = vshrl.u32 %v19037_v6, 16 }
 0x75d   : > { %13977 = vmatmul.mubr.bf16.vlgmr.msra.gmra.mrb[0].mxu1 %v21350_v38  ;;  %v9309_v38 = vrot.slane %v21362_v60, 4 }
 0x75e   : > { %13980 = vmatprep.mubr.bf16.mxu1 %v21353_v0  ;;  %14025 = vmatpush3.bf16.msra.mxu1 %v15348_v7  ;;  %v21357_v7 = vshrl.u32 %v19032_v43, 16  ;;  %v21363_v0 = vshrl.u32 %v19046_v47, 16 }
 0x75f   : > { %14026 = vmatprep.subr.bf16.mxu1 %v15349_v59  ;;  %v9310_v39 = vor.u32 %v9309_v38, %v9306_v34  ;;  %v9360_v34 = vrot.slane %v21373_v35, 3  ;;  %v21388_v35 = vshll.u32 %v19119_v29, 16 }
 0x760   : > { %v9288_v61 = vrot.slane %v21357_v7, 3 }
 0x762   : > { %14027 = vmatpush3.bf16.msra.mxu1 %v15349_v59  ;;  %v9292_v20 = vor.u32 %v9291_v25, %v9288_v61  ;;  %v9297_v59 = vrot.slane %v21359_v31, 3  ;;  %v21368_v61 = vshll.u32 %v19054_v16, 16  ;;  %v21369_v25 = vshrl.u32 %v19056_v8, 16 }
 0x763   : > { %14028 = vmatprep.subr.bf16.mxu1 %v15350_v33 }
 0x764   : > { %v9293_v43 = vsel %vm6945_vm13, %v9283_v22, %v9292_v20  ;;  %v9301_v26 = vor.u32 %v9300_v15, %v9297_v59  ;;  %v9336_v24 = vrot.slane %v21368_v61, 4  ;;  %v21370_v22 = vshll.u32 %v19056_v8, 16 }
 0x765   : > { %13981 = vmatmul.mubr.bf16.gmra.mrb[4].mxu1 %v9266_v11  ;;  %v21366_v11 = vshll.u32 %v19048_v2, 16  ;;  %v21371_v59 = vshrl.u32 %v19062_v42, 16  ;;  %v21374_v8 = vshll.u32 %v19064_v21, 16  ;;  %v21378_v21 = vshll.u32 %v19076_v1, 16 }
 0x766   : > { %13984 = vmatprep.mubr.bf16.mxu1 %v9275_v13  ;;  %14029 = vmatpush3.bf16.msra.mxu1 %v15350_v33  ;;  %v9302_v6 = vsel %vm6945_vm13, %v9292_v20, %v9301_v26  ;;  %v9315_v33 = vrot.slane %v21363_v0, 3  ;;  %v9311_v37 = vsel %vm6945_vm13, %v9301_v26, %v9310_v39  ;;  %v21367_v13 = vshrl.u32 %v19054_v16, 16 }
 0x767   : > { %14030 = vmatprep.subr.bf16.mxu1 %v15351_v46  ;;  %v9327_v45 = vrot.slane %v21366_v11, 4  ;;  %v9345_v20 = vrot.slane %v21370_v22, 4  ;;  %v9351_v49 = vrot.slane %v21371_v59, 3  ;;  %v21372_v16 = vshll.u32 %v19062_v42, 16 }
 0x768   : > { %v9319_v51 = vor.u32 %v9318_v27, %v9315_v33  ;;  %v9333_v7 = vrot.slane %v21367_v13, 3  ;;  %v9363_v60 = vrot.slane %v21374_v8, 4  ;;  %v21376_v42 = vshll.u32 %v19070_v32, 16 }
 0x769   : > { %v9354_v15 = vrot.slane %v21372_v16, 4  ;;  %v21377_v33 = vshrl.u32 %v19076_v1, 16  ;;  %v9381_v27 = vrot.slane %v21378_v21, 4  ;;  %v21379_v11 = vshrl.u32 %v19078_v12, 16  ;;  %v19660_v16 = vld [vmem:[#allocation2 + $0xd8] sm:$0xf] }
 0x76a   : > { %14031 = vmatpush3.bf16.msra.mxu1 %v15351_v46  ;;  %v21365_v46 = vshrl.u32 %v19048_v2, 16  ;;  %v9320_v47 = vsel %vm6945_vm13, %v9310_v39, %v9319_v51  ;;  %v21375_v39 = vshrl.u32 %v19070_v32, 16  ;;  %v21380_v32 = vshll.u32 %v19078_v12, 16 }
 0x76b   : > { %14032 = vmatprep.subr.bf16.mxu1 %v15352_v62  ;;  %v9355_v38 = vor.u32 %v9354_v15, %v9351_v49  ;;  %v9378_v5 = vrot.slane %v21377_v33, 3  ;;  %v21382_v1 = vshll.u32 %v19084_v18, 16  ;;  %v21384_v12 = vshll.u32 %v19090_v3, 16 }
 0x76c   : > { %v9324_v54 = vrot.slane %v21365_v46, 3 }
 0x76d   : > { %13985 = vmatmul.mubr.bf16.gmra.mrb[8].mxu1 %v9284_v57  ;;  %v9382_v46 = vor.u32 %v9381_v27, %v9378_v5  ;;  %v9408_v22 = vrot.slane %v21384_v12, 4  ;;  %v15435_v27 = vld [vmem:[#allocation2 + $0x18] sm:$0xf0]  ;;  %v21400_v12 = vld [vmem:[#allocation113_spill] sm:$0xff] }
 0x76e   : > { %13988 = vmatprep.mubr.bf16.mxu1 %v9293_v43  ;;  %14033 = vmatpush3.bf16.msra.mxu1 %v15352_v62  ;;  %v9328_v36 = vor.u32 %v9327_v45, %v9324_v54  ;;  %v9342_v62 = vrot.slane %v21369_v25, 3  ;;  %v9387_v45 = vrot.slane %v21379_v11, 3  ;;  %v21383_v25 = vshrl.u32 %v19090_v3, 16 }
 0x76f   : > { %14034 = vmatprep.subr.bf16.mxu1 %v15353_v48 }
 0x770   : > { %v9329_v2 = vsel %vm6945_vm13, %v9319_v51, %v9328_v36  ;;  %v9346_v57 = vor.u32 %v9345_v20, %v9342_v62  ;;  %v9390_v51 = vrot.slane %v21380_v32, 4  ;;  %v9405_v62 = vrot.slane %v21383_v25, 3  ;;  %v21393_v32 = vld [vmem:[#allocation106_spill] sm:$0xff]  ;;  %v15363_v25 = vld [vmem:[#allocation8 + $0x238] sm:$0xff]  }
 0x772   : > { %14035 = vmatpush3.bf16.msra.mxu1 %v15353_v48  ;;  %v9337_v48 = vor.u32 %v9336_v24, %v9333_v7  ;;  %v9356_v26 = vsel %vm6945_vm13, %v9346_v57, %v9355_v38  ;;  %v9399_v7 = vrot.slane %v21382_v1, 4  ;;  %v9391_v61 = vor.u32 %v9390_v51, %v9387_v45  ;;  %v15357_v45 = vld [vmem:[#allocation8 + $0x208] sm:$0xff]   ;;  %v21394_v51 = vld [vmem:[#allocation107_spill] sm:$0xff]  ;;  %v21396_v1 = vld [vmem:[#allocation109_spill] sm:$0xff] }
 0x773   : > { %14036 = vmatprep.subr.bf16.mxu1 %v15354_v63  ;;  %v9409_v59 = vor.u32 %v9408_v22, %v9405_v62  ;;  %v21399_v62 = vld [vmem:[#allocation112_spill] sm:$0xff]  ;;  %v21401_v22 = vld [vmem:[#allocation114_spill] sm:$0xff] }
 0x774   : > { %v9338_v31 = vsel %vm6945_vm13, %v9328_v36, %v9337_v48  ;;  %v9347_v43 = vsel %vm6945_vm13, %v9337_v48, %v9346_v57  ;;  %v21385_v48 = vshrl.u32 %v19101_v58, 16 }
 0x775   : > { %13989 = vmatmul.mubr.bf16.gmra.mrb[12].mxu1 %v9302_v6  ;;  %v9372_v6 = vrot.slane %v21376_v42, 4 }
 0x776   : > { %13992 = vmatprep.mubr.bf16.mxu1 %v9311_v37  ;;  %14037 = vmatpush3.bf16.msra.mxu1 %v15354_v63  ;;  %v9364_v63 = vor.u32 %v9363_v60, %v9360_v34  ;;  %v9414_v57 = vrot.slane %v21385_v48, 3  ;;  %v9426_v34 = vrot.slane %v21388_v35, 4  ;;  %v21389_v60 = vshrl.u32 %v19180_v28, 16  ;;  %v21403_v48 = vld [vmem:[#allocation116_spill] sm:$0xff]  ;;  %v21412_v35 = vld [vmem:[#allocation125_spill] sm:$0xff] }
 0x777   : > { %14038 = vmatprep.subr.bf16.mxu1 %v15355_v50 }
 0x778   : > { %v9365_v0 = vsel %vm6945_vm13, %v9355_v38, %v9364_v63  ;;  %v21390_v38 = vshll.u32 %v19180_v28, 16 }
 0x77a   : > { %14039 = vmatpush3.bf16.msra.mxu1 %v15355_v50  ;;  %v9369_v50 = vrot.slane %v21375_v39, 3  ;;  %v9442_v39 = vshll.u32 %v19660_v16, 16 }
 0x77b   : > { %14088 = vmatprep.subr.bf16.mxu1 %v19607_v9 }
 0x77c   : > { %v9373_v37 = vor.u32 %v9372_v6, %v9369_v50 }
 0x77d   : > { %13993 = vmatmul.mubr.bf16.gmra.mrb[16].mxu1 %v9320_v47  ;;  %v21381_v47 = vshrl.u32 %v19084_v18, 16  ;;  %v21386_v18 = vshll.u32 %v19101_v58, 16  ;;  %v9432_v58 = vrot.slane %v21389_v60, 3  ;;  %v21413_v60 = vld [vmem:[#allocation126_spill] sm:$0xff] }
 0x77e   : > { %13996 = vmatprep.mubr.bf16.mxu1 %v9329_v2  ;;  %v9374_v54 = vsel %vm6945_vm13, %v9364_v63, %v9373_v37  ;;  %v9383_v36 = vsel %vm6945_vm13, %v9373_v37, %v9382_v46  ;;  %v9392_v2 = vsel %vm6945_vm13, %v9382_v46, %v9391_v61  ;;  %v9435_v63 = vrot.slane %v21390_v38, 4  ;;  %v21391_v46 = vld [vmem:[#allocation67_spill] sm:$0xff] }
 0x77f   : > { %v9396_v13 = vrot.slane %v21381_v47, 3  ;;  %v9835_v37 = vrot.slane %v15435_v27, 4  ;;  %v15359_v47 = vld [vmem:[#allocation8 + $0x218] sm:$0xff]  }
 0x780   : > { %v9436_v42 = vor.u32 %v9435_v63, %v9432_v58  ;;  %v21414_v58 = vrot.slane %v19119_v29, 4  ;;  %v9882_v63 = vrot.slane %v19660_v16, 4 }
 0x781   : > { %v9400_v24 = vor.u32 %v9399_v7, %v9396_v13  ;;  %v21395_v13 = vld [vmem:[#allocation108_spill] sm:$0xff]  ;;  %v15360_v7 = vld [vmem:[#allocation8 + $0x220] sm:$0xff]  }
 0x783   : > { %v9401_v20 = vsel %vm6945_vm13, %v9391_v61, %v9400_v24  ;;  %v9410_v15 = vsel %vm6945_vm13, %v9400_v24, %v9409_v59  ;;  %v15361_v61 = vld [vmem:[#allocation8 + $0x228] sm:$0xff]  }
 0x784   : > { %v21397_v24 = vld [vmem:[#allocation110_spill] sm:$0xff] }
 0x785   : > { %13997 = vmatmul.mubr.bf16.gmra.mrb[20].mxu1 %v9338_v31  ;;  %v9417_v31 = vrot.slane %v21386_v18, 4  ;;  %v21405_v18 = vld [vmem:[#allocation118_spill] sm:$0xff] }
 0x786   : > { %14000 = vmatprep.mubr.bf16.mxu1 %v9347_v43  ;;  %v21387_v43 = vshrl.u32 %v19119_v29, 16  ;;  %v21416_v29 = vld [vmem:[#allocation128_spill] sm:$0xff] }
 0x787   : > { %v9418_v49 = vor.u32 %v9417_v31, %v9414_v57  ;;  %v21404_v57 = vld [vmem:[#allocation117_spill] sm:$0xff]  ;;  %v21406_v31 = vld [vmem:[#allocation119_spill] sm:$0xff] }
 0x788   : > { %v9423_v3 = vrot.slane %v21387_v43, 3  ;;  %v21410_v43 = vld [vmem:[#allocation123_spill] sm:$0xff] }
 0x789   : > { %v9419_v8 = vsel %vm6945_vm13, %v9409_v59, %v9418_v49  ;;  %v21407_v59 = vld [vmem:[#allocation120_spill] sm:$0xff] }
 0x78a   : > { %v9427_v50 = vor.u32 %v9426_v34, %v9423_v3  ;;  %v21411_v3 = vld [vmem:[#allocation124_spill] sm:$0xff]  ;;  %v15436_v34 = vld [vmem:[#allocation2] sm:$0xff] }
 0x78c   : > { %v9428_v33 = vsel %vm6945_vm13, %v9418_v49, %v9427_v50  ;;  %v9437_v5 = vsel %vm6945_vm13, %v9427_v50, %v9436_v42  ;;  %v21408_v49 = vld [vmem:[#allocation121_spill] sm:$0xff] }
 0x78d   : > { %14001 = vmatmul.mubr.bf16.gmra.mrb[24].mxu1 %v9356_v26  ;;  %v9439_v26 = vshrl.u32 %v19660_v16, 16  ;;  %v21417_v50 = vld [vmem:[#allocation129_spill] sm:$0xff]  ;;  %v21418_v16 = vld [vmem:[#allocation130_spill] sm:$0xff] }
 0x78e   : > { %14004 = vmatprep.mubr.bf16.mxu1 %v9365_v0  ;;  %v9444_v0 = vrot.slane %v9442_v39, 4  ;;  %v21415_v39 = vld [vmem:[#allocation127_spill] sm:$0xff] }
 0x78f   : > { %v9441_v6 = vrot.slane %v9439_v26, 3 }
 0x791   : > { %v9445_v21 = vor.u32 %v9444_v0, %v9441_v6  ;;  %v21420_v6 = vld [vmem:[#allocation132_spill] sm:$0xff] }
 0x793   : > { %v9446_v28 = vsel %vm6945_vm13, %v9436_v42, %v9445_v21  ;;  %v21419_v42 = vld [vmem:[#allocation131_spill] sm:$0xff] }
 0x795   : > { %14005 = vmatmul.mubr.bf16.gmra.mrb[28].mxu1 %v9374_v54  ;;  %v21392_v54 = vrot.slane %v21391_v46, 4 }
 0x796   : > { %14008 = vmatprep.mubr.bf16.mxu1 %v9383_v36  ;;  %v15358_v36 = vld [vmem:[#allocation8 + $0x210] sm:$0xff]  }
 0x797   : > { %v9837_v11 = vsel %vm7913_vm3, %v9835_v37, %v21392_v54 }
 0x79d   : > { %14009 = vmatmul.mubr.bf16.gmra.mrb[32].mxu1 %v9392_v2  ;;  %v21398_v2 = vld [vmem:[#allocation111_spill] sm:$0xff] }
 0x79e   : > { %14012 = vmatprep.mubr.bf16.mxu1 %v9401_v20  ;;  %v21402_v20 = vld [vmem:[#allocation115_spill] sm:$0xff] }
 0x7a5   : > { %14013 = vmatmul.mubr.bf16.gmra.mrb[36].mxu1 %v9410_v15  ;;  %v21409_v15 = vld [vmem:[#allocation122_spill] sm:$0xff] }
 0x7a6   : > { %14016 = vmatprep.mubr.bf16.mxu1 %v9419_v8  ;;  %v9880_v8 = vrot.slane %v15436_v34, 4 }
 0x7a8   : > { %v9881_v38 = vsel %vm7913_vm3, %v21414_v58, %v9880_v8  ;;  %v9883_v26 = vsel %vm7913_vm3, %v9880_v8, %v9882_v63 }
 0x7ad   : > { %14017 = vmatmul.mubr.bf16.gmra.mrb[40].mxu1 %v9428_v33 }
 0x7ae   : > { %14020 = vmatprep.mubr.bf16.mxu1 %v9437_v5 }
 0x7b5   : > { %14021 = vmatmul.mubr.bf16.gmra.mrb[44].mxu1 %v9446_v28  ;;  %v21426_v28 = vld [vmem:[#allocation13_spill] sm:$0xff] }
 0x7b6   : > { %14040 = vmatprep.mubr.bf16.mxu1 %v9837_v11 }
 0x7bd   : > { %14041 = vmatmul.mubr.bf16.vlgmr.msra.gmra.mrb[0].mxu1 %v21393_v32 }
 0x7be   : > { %14044 = vmatprep.mubr.bf16.mxu1 %v21394_v51  ;;  %14089 = vmatpush3.bf16.msra.mxu1 %v19607_v9  ;;  %v15362_v9 = vld [vmem:[#allocation8 + $0x230] sm:$0xff]  }
 0x7bf   : > { %14090 = vmatprep.subr.bf16.mxu1 %v15357_v45 }
 0x7c2   : > { %14091 = vmatpush3.bf16.msra.mxu1 %v15357_v45 }
 0x7c3   : > { %14092 = vmatprep.subr.bf16.mxu1 %v15358_v36 }
 0x7c5   : > { %14045 = vmatmul.mubr.bf16.gmra.mrb[4].mxu1 %v21395_v13 }
 0x7c6   : > { %14048 = vmatprep.mubr.bf16.mxu1 %v21396_v1  ;;  %14093 = vmatpush3.bf16.msra.mxu1 %v15358_v36 }
 0x7c7   : > { %14094 = vmatprep.subr.bf16.mxu1 %v15359_v47 }
 0x7ca   : > { %14095 = vmatpush3.bf16.msra.mxu1 %v15359_v47 }
 0x7cb   : > { %14096 = vmatprep.subr.bf16.mxu1 %v15360_v7 }
 0x7cd   : > { %14049 = vmatmul.mubr.bf16.gmra.mrb[8].mxu1 %v21397_v24  ;;  %v21429_v24 = vld [vmem:[#allocation18_spill] sm:$0xff] }
 0x7ce   : > { %14052 = vmatprep.mubr.bf16.mxu1 %v21398_v2  ;;  %14097 = vmatpush3.bf16.msra.mxu1 %v15360_v7 }
 0x7cf   : > { %14098 = vmatprep.subr.bf16.mxu1 %v15361_v61 }
 0x7d2   : > { %14099 = vmatpush3.bf16.msra.mxu1 %v15361_v61 }
 0x7d3   : > { %14100 = vmatprep.subr.bf16.mxu1 %v15362_v9 }
 0x7d5   : > { %14053 = vmatmul.mubr.bf16.gmra.mrb[12].mxu1 %v21399_v62  ;;  %v21430_v62 = vld [vmem:[#allocation17_spill] sm:$0xff] }
 0x7d6   : > { %14056 = vmatprep.mubr.bf16.mxu1 %v21400_v12  ;;  %14101 = vmatpush3.bf16.msra.mxu1 %v15362_v9 }
 0x7d7   : > { %14102 = vmatprep.subr.bf16.mxu1 %v15363_v25 }
 0x7da   : > { %14103 = vmatpush3.bf16.msra.mxu1 %v15363_v25 }
 0x7dd   : > { %14057 = vmatmul.mubr.bf16.gmra.mrb[16].mxu1 %v21401_v22 }
 0x7de   : > { %14060 = vmatprep.mubr.bf16.mxu1 %v21402_v20 }
 0x7e5   : > { %14061 = vmatmul.mubr.bf16.gmra.mrb[20].mxu1 %v21403_v48 }
 0x7e6   : > { %14064 = vmatprep.mubr.bf16.mxu1 %v21404_v57 }
 0x7ed   : > { %14065 = vmatmul.mubr.bf16.gmra.mrb[24].mxu1 %v21405_v18  ;;  %v21431_v18 = vld [vmem:[#allocation20_spill] sm:$0xff] }
 0x7ee   : > { %14068 = vmatprep.mubr.bf16.mxu1 %v21406_v31 }
 0x7f5   : > { %14069 = vmatmul.mubr.bf16.gmra.mrb[28].mxu1 %v21407_v59 }
 0x7f6   : > { %14072 = vmatprep.mubr.bf16.mxu1 %v21408_v49  ;;  %v21432_v49 = vld [vmem:[#allocation19_spill] sm:$0xff] }
 0x7fd   : > { %14073 = vmatmul.mubr.bf16.gmra.mrb[32].mxu1 %v21409_v15 }
 0x7fe   : > { %14076 = vmatprep.mubr.bf16.mxu1 %v21410_v43 }
 0x805   : > { %14077 = vmatmul.mubr.bf16.gmra.mrb[36].mxu1 %v21411_v3 }
 0x806   : > { %14080 = vmatprep.mubr.bf16.mxu1 %v21412_v35 }
 0x80d   : > { %14081 = vmatmul.mubr.bf16.gmra.mrb[40].mxu1 %v21413_v60 }
 0x80e   : > { %14084 = vmatprep.mubr.bf16.mxu1 %v9881_v38 }
 0x815   : > { %14085 = vmatmul.mubr.bf16.gmra.mrb[44].mxu1 %v9883_v26  ;;  %v21433_v26 = vld [vmem:[#allocation22_spill] sm:$0xff] }
 0x816   : > { %14104 = vmatprep.mubr.bf16.mxu1 %v19230_v14  ;;  %v21422_v14 = vld [vmem:[#allocation134_spill] sm:$0xff] }
 0x81d   : > { %14105 = vmatmul.mubr.bf16.vlgmr.msra.gmra.mrb[0].mxu1 %v19225_v52  ;;  %v21421_v52 = vld [vmem:[#allocation133_spill] sm:$0xff] }
 0x81e   : > { %14108 = vmatprep.mubr.bf16.mxu1 %v19233_v44  ;;  %v21423_v44 = vld [vmem:[#allocation135_spill] sm:$0xff] }
 0x825   : > { %14109 = vmatmul.mubr.bf16.gmra.mrb[4].mxu1 %v19238_v10  ;;  %v21424_v10 = vld [vmem:[#allocation136_spill] sm:$0xff] }
 0x826   : > { %14112 = vmatprep.mubr.bf16.mxu1 %v19241_v41  ;;  %v10229_v41 = vld [vmem:[#allocation2 + $0xd8] sm:$0x1f] }
 0x827   : > { %v10351_v0 = vshll.u32 %v10229_v41, 16 }
 0x829   : > { %v10353_v33 = vrot.slane %v10351_v0, 5  ;;  %v21436_v0 = vld [vmem:[#allocation23_spill] sm:$0xff] }
 0x82d   : > { %14113 = vmatmul.mubr.bf16.gmra.mrb[8].mxu1 %v21415_v39 }
 0x82e   : > { %14116 = vmatprep.mubr.bf16.mxu1 %v21416_v29 }
 0x835   : > { %14117 = vmatmul.mubr.bf16.gmra.mrb[12].mxu1 %v21417_v50 }
 0x836   : > { %14120 = vmatprep.mubr.bf16.mxu1 %v21418_v16  ;;  %v21434_v16 = vld [vmem:[#allocation21_spill] sm:$0xff] }
 0x83d   : > { %14121 = vmatmul.mubr.bf16.gmra.mrb[16].mxu1 %v21419_v42 }
 0x83e   : > { %14124 = vmatprep.mubr.bf16.mxu1 %v21420_v6 }
 0x845   : > { %14125 = vmatmul.mubr.bf16.gmra.mrb[20].mxu1 %v19298_v56  ;;  %v10348_v56 = vshrl.u32 %v10229_v41, 16 }
 0x846   : > { %14128 = vmatprep.mubr.bf16.mxu1 %v19305_v30 }
 0x847   : > { %v10350_v30 = vrot.slane %v10348_v56, 4 }
 0x849   : > { %v10354_v5 = vor.u32 %v10353_v33, %v10350_v30 }
 0x84b   : > { %v10355_v21 = vsel %vm6423_vm12, %v19364_v23, %v10354_v5  ;;  %v21428_v23 = vld [vmem:[#allocation15_spill] sm:$0xff] }
 0x84d   : > { %14129 = vmatmul.mubr.bf16.gmra.mrb[24].mxu1 %v21421_v52 }
 0x84e   : > { %14132 = vmatprep.mubr.bf16.mxu1 %v21422_v14 }
 0x855   : > { %14133 = vmatmul.mubr.bf16.gmra.mrb[28].mxu1 %v21423_v44 }
 0x856   : > { %14136 = vmatprep.mubr.bf16.mxu1 %v21424_v10  ;;  %v21435_v10 = vld [vmem:[#allocation24_spill] sm:$0xff] }
 0x85d   : > { %14137 = vmatmul.mubr.bf16.gmra.mrb[32].mxu1 %v19342_v40 }
 0x85e   : > { %14140 = vmatprep.mubr.bf16.mxu1 %v19349_v53 }
 0x865   : > { %14141 = vmatmul.mubr.bf16.gmra.mrb[36].mxu1 %v19354_v17  ;;  %v21425_v17 = vld [vmem:[#allocation14_spill] sm:$0xff] }
 0x866   : > { %14144 = vmatprep.mubr.bf16.mxu1 %v19362_v4 }
 0x86d   : > { %14145 = vmatmul.mubr.bf16.gmra.mrb[40].mxu1 %v19370_v55 }
 0x86e   : > { %14148 = vmatprep.mubr.bf16.mxu1 %v19374_v19  ;;  %v21427_v19 = vld [vmem:[#allocation16_spill] sm:$0xff] }
 0x875   : > { %14149 = vmatmul.mubr.bf16.gmra.mrb[44].mxu1 %v10355_v21 }
 0x8f0   : > { %v19732_v40 = vpop.f32.mrb[0].mxu1 }
 0x8f1   : > { %v19734_v53 = vpop.f32.mrb[1].mxu1  ;;  %v10751_v55 = vmul.f32 %v19732_v40, %v21426_v28 }
 0x8f2   : > { %v10749_v4 = vmul.f32 %v21425_v17, %v19734_v53  ;;  %v19738_v27 = vpop.f32.mrb[2].mxu1 }
 0x8f3   : > { %v19740_v37 = vpop.f32.mrb[3].mxu1  ;;  %v10752_v11 = vmul.f32 %v19738_v27, %v21428_v23  ;;  %v10853_v51 = vmul.f32 %v10751_v55, %v10751_v55 }
 0x8f4   : > { %v10750_v46 = vmul.f32 %v21427_v19, %v19740_v37  ;;  %v10851_v54 = vmul.f32 %v10749_v4, %v10749_v4 }
 0x8f5   : > { %v10854_v7 = vmul.f32 %v10752_v11, %v10752_v11 }
 0x8f6   : > { %v10797_v45 = vadd.f32 %v10750_v46, %v10749_v4  ;;  %v10852_v32 = vmul.f32 %v10750_v46, %v10750_v46 }
 0x8f8   : > { %v10798_v36 = vadd.f32 %v10797_v45, %v10751_v55  ;;  %v10899_v47 = vadd.f32 %v10852_v32, %v10851_v54  ;;  %v19748_v13 = vpop.f32.mrb[4].mxu1  ;;  %v21437_v54 = vld [vmem:[#allocation26_spill] sm:$0xff]  ;;  %v21438_v32 = vld [vmem:[#allocation25_spill] sm:$0xff] }
 0x8f9   : > { %v19750_v1 = vpop.f32.mrb[5].mxu1  ;;  %v10755_v12 = vmul.f32 %v19748_v13, %v21430_v62  ;;  %v21440_v62 = vld [vmem:[#allocation27_spill] sm:$0xff] }
 0x8fa   : > { %v10900_v61 = vadd.f32 %v10899_v47, %v10853_v51  ;;  %v10753_v2 = vmul.f32 %v21429_v24, %v19750_v1  ;;  %v10799_v9 = vadd.f32 %v10798_v36, %v10752_v11  ;;  %v19754_v25 = vpop.f32.mrb[6].mxu1  ;;  %v21439_v24 = vld [vmem:[#allocation28_spill] sm:$0xff] }
 0x8fb   : > { %v19758_v22 = vpop.f32.mrb[7].mxu1  ;;  %v10756_v15 = vmul.f32 %v19754_v25, %v21432_v49  ;;  %v10857_v35 = vmul.f32 %v10755_v12, %v10755_v12 }
 0x8fc   : > { %v10800_v20 = vadd.f32 %v10799_v9, %v10753_v2  ;;  %v10855_v48 = vmul.f32 %v10753_v2, %v10753_v2  ;;  %v10901_v57 = vadd.f32 %v10900_v61, %v10854_v7  ;;  %v10754_v31 = vmul.f32 %v21431_v18, %v19758_v22 }
 0x8fd   : > { %v10858_v38 = vmul.f32 %v10756_v15, %v10756_v15 }
 0x8fe   : > { %v10902_v59 = vadd.f32 %v10901_v57, %v10855_v48  ;;  %v10801_v43 = vadd.f32 %v10800_v20, %v10754_v31  ;;  %v10856_v3 = vmul.f32 %v10754_v31, %v10754_v31 }
 0x900   : > { %v10802_v34 = vadd.f32 %v10801_v43, %v10755_v12  ;;  %v10903_v8 = vadd.f32 %v10902_v59, %v10856_v3  ;;  %v19764_v60 = vpop.f32.mrb[8].mxu1  ;;  %v21441_v3 = vld [vmem:[#allocation30_spill] sm:$0xff] }
 0x901   : > { %v19766_v58 = vpop.f32.mrb[9].mxu1  ;;  %v10759_v42 = vmul.f32 %v19764_v60, %v21434_v16 }
 0x902   : > { %v10904_v63 = vadd.f32 %v10903_v8, %v10857_v35  ;;  %v10757_v39 = vmul.f32 %v21433_v26, %v19766_v58  ;;  %v10803_v29 = vadd.f32 %v10802_v34, %v10756_v15  ;;  %v19770_v50 = vpop.f32.mrb[10].mxu1 }
 0x903   : > { %v19774_v6 = vpop.f32.mrb[11].mxu1  ;;  %v10760_v30 = vmul.f32 %v19770_v50, %v21436_v0  ;;  %v10861_v21 = vmul.f32 %v10759_v42, %v10759_v42 }
 0x904   : > { %v10804_v52 = vadd.f32 %v10803_v29, %v10757_v39  ;;  %v10859_v14 = vmul.f32 %v10757_v39, %v10757_v39  ;;  %v10905_v44 = vadd.f32 %v10904_v63, %v10858_v38  ;;  %v10758_v41 = vmul.f32 %v21435_v10, %v19774_v6  ;;  %v21442_v38 = vld [vmem:[#allocation29_spill] sm:$0xff] }
 0x905   : > { %v10862_v19 = vmul.f32 %v10760_v30, %v10760_v30 }
 0x906   : > { %v10906_v56 = vadd.f32 %v10905_v44, %v10859_v14  ;;  %v10805_v33 = vadd.f32 %v10804_v52, %v10758_v41  ;;  %v10860_v5 = vmul.f32 %v10758_v41, %v10758_v41  ;;  %v21444_v44 = vld [vmem:[#allocation31_spill] sm:$0xff] }
 0x908   : > { %v10806_v17 = vadd.f32 %v10805_v33, %v10759_v42  ;;  %v10907_v4 = vadd.f32 %v10906_v56, %v10860_v5  ;;  %v19780_v28 = vpop.f32.mrb[12].mxu1  ;;  %v21443_v42 = vld [vmem:[#allocation32_spill] sm:$0xff] }
 0x909   : > { %v19782_v55 = vpop.f32.mrb[13].mxu1  ;;  %v10763_v51 = vmul.f32 %v19780_v28, %v21438_v32 }
 0x90a   : > { %v10908_v46 = vadd.f32 %v10907_v4, %v10861_v21  ;;  %v10761_v23 = vmul.f32 %v21437_v54, %v19782_v55  ;;  %v10807_v11 = vadd.f32 %v10806_v17, %v10760_v30  ;;  %v19786_v45 = vpop.f32.mrb[14].mxu1 }
 0x90b   : > { %v19790_v36 = vpop.f32.mrb[15].mxu1  ;;  %v10764_v12 = vmul.f32 %v19786_v45, %v21440_v62  ;;  %v10865_v57 = vmul.f32 %v10763_v51, %v10763_v51  ;;  %v21448_v62 = vld [vmem:[#allocation35_spill] sm:$0xff] }
 0x90c   : > { %v10808_v47 = vadd.f32 %v10807_v11, %v10761_v23  ;;  %v10863_v7 = vmul.f32 %v10761_v23, %v10761_v23  ;;  %v10909_v61 = vadd.f32 %v10908_v46, %v10862_v19  ;;  %v10762_v2 = vmul.f32 %v21439_v24, %v19790_v36  ;;  %v21445_v19 = vld [vmem:[#allocation34_spill] sm:$0xff]  ;;  %v21446_v11 = vld [vmem:[#allocation33_spill] sm:$0xff]  ;;  %v21447_v24 = vld [vmem:[#allocation36_spill] sm:$0xff] }
 0x90d   : > { %v10866_v15 = vmul.f32 %v10764_v12, %v10764_v12 }
 0x90e   : > { %v10910_v9 = vadd.f32 %v10909_v61, %v10863_v7  ;;  %v10809_v20 = vadd.f32 %v10808_v47, %v10762_v2  ;;  %v10864_v48 = vmul.f32 %v10762_v2, %v10762_v2 }
 0x910   : > { %v10810_v18 = vadd.f32 %v10809_v20, %v10763_v51  ;;  %v10911_v31 = vadd.f32 %v10910_v9, %v10864_v48  ;;  %v19796_v59 = vpop.f32.mrb[16].mxu1 }
 0x911   : > { %v19798_v49 = vpop.f32.mrb[17].mxu1  ;;  %v10767_v63 = vmul.f32 %v19796_v59, %v21442_v38  ;;  %v21450_v38 = vld [vmem:[#allocation38_spill] sm:$0xff] }
 0x912   : > { %v10912_v43 = vadd.f32 %v10911_v31, %v10865_v57  ;;  %v10765_v35 = vmul.f32 %v21441_v3, %v19798_v49  ;;  %v10811_v34 = vadd.f32 %v10810_v18, %v10764_v12  ;;  %v19802_v8 = vpop.f32.mrb[18].mxu1  ;;  %v12378_v3 = vld [vmem:[%s15810_s5 + $0x10] sm:$0xff]  }
 0x913   : > { %v19806_v26 = vpop.f32.mrb[19].mxu1  ;;  %v10768_v10 = vmul.f32 %v19802_v8, %v21444_v44  ;;  %v10869_v0 = vmul.f32 %v10767_v63, %v10767_v63  ;;  %v11053_v44 = vld [vmem:[%s15810_s5 + $0xc] sm:$0xf] }
 0x914   : > { %v10812_v39 = vadd.f32 %v10811_v34, %v10765_v35  ;;  %v10867_v29 = vmul.f32 %v10765_v35, %v10765_v35  ;;  %v10913_v16 = vadd.f32 %v10912_v43, %v10866_v15  ;;  %v10766_v52 = vmul.f32 %v21443_v42, %v19806_v26 }
 0x915   : > { %v10870_v17 = vmul.f32 %v10768_v10, %v10768_v10 }
 0x916   : > { %v10914_v14 = vadd.f32 %v10913_v16, %v10867_v29  ;;  %v10813_v41 = vadd.f32 %v10812_v39, %v10766_v52  ;;  %v10868_v56 = vmul.f32 %v10766_v52, %v10766_v52  ;;  %v21452_v16 = vld [vmem:[#allocation37_spill] sm:$0xff] }
 0x918   : > { %v10814_v30 = vadd.f32 %v10813_v41, %v10767_v63  ;;  %v10915_v33 = vadd.f32 %v10914_v14, %v10868_v56  ;;  %v19812_v5 = vpop.f32.mrb[20].mxu1  ;;  %v12379_v14 = vld [vmem:[%s15810_s5 + $0x18] sm:$0xff]  }
 0x919   : > { %v19814_v21 = vpop.f32.mrb[21].mxu1  ;;  %v10771_v32 = vmul.f32 %v19812_v5, %v21446_v11  ;;  %v12172_v11 = vunpack.c.l.bf16 %v12379_v14 }
 0x91a   : > { %v10916_v4 = vadd.f32 %v10915_v33, %v10869_v0  ;;  %v10769_v46 = vmul.f32 %v21445_v19, %v19814_v21  ;;  %v10815_v54 = vadd.f32 %v10814_v30, %v10768_v10  ;;  %v19818_v23 = vpop.f32.mrb[22].mxu1  ;;  %v21454_v0 = vld [vmem:[#allocation40_spill] sm:$0xff]  ;;  %v12169_v33 = vunpack.c.h.bf16 %v12378_v3 }
 0x91b   : > { %v19822_v51 = vpop.f32.mrb[23].mxu1  ;;  %v10772_v12 = vmul.f32 %v19818_v23, %v21448_v62  ;;  %v10873_v57 = vmul.f32 %v10771_v32, %v10771_v32  ;;  %v12173_v62 = vunpack.c.h.bf16 %v12379_v14 }
 0x91c   : > { %v10816_v47 = vadd.f32 %v10815_v54, %v10769_v46  ;;  %v10871_v7 = vmul.f32 %v10769_v46, %v10769_v46  ;;  %v10917_v61 = vadd.f32 %v10916_v4, %v10870_v17  ;;  %v10770_v2 = vmul.f32 %v21447_v24, %v19822_v51  ;;  %v21455_v4 = vld [vmem:[#allocation39_spill] sm:$0xff] }
 0x91d   : > { %v10874_v35 = vmul.f32 %v10772_v12, %v10772_v12 }
 0x91e   : > { %v10918_v9 = vadd.f32 %v10917_v61, %v10871_v7  ;;  %v10817_v20 = vadd.f32 %v10816_v47, %v10770_v2  ;;  %v10872_v48 = vmul.f32 %v10770_v2, %v10770_v2  ;;  %v11102_v47 = vunpack.c.l.bf16 %v11053_v44 }
 0x920   : > { %v10818_v18 = vadd.f32 %v10817_v20, %v10771_v32  ;;  %v10919_v31 = vadd.f32 %v10918_v9, %v10872_v48  ;;  %v19828_v15 = vpop.f32.mrb[24].mxu1  ;;  %v12168_v32 = vunpack.c.l.bf16 %v12378_v3  ;;  %v11204_v9 = vrot.slane %v12169_v33, 1  ;;  %v12380_v20 = vld [vmem:[%s15810_s5 + $0x20] sm:$0xff]   ;;  %v12381_v48 = vld [vmem:[%s15810_s5 + $0x28] sm:$0xff]  }
 0x921   : > { %21449 = vst [vmem:[#allocation50_spill] sm:$0xff] %v19828_v15  ;;  %v19830_v43 = vpop.f32.mrb[25].mxu1  ;;  %v10775_v42 = vmul.f32 %v19828_v15, %v21452_v16  ;;  %v11206_v3 = vrot.slane %v12172_v11, 1  ;;  %v21460_v16 = vld [vmem:[#allocation41_spill] sm:$0xff]  ;;  %v12177_v33 = vunpack.c.h.bf16 %v12380_v20 }
 0x922   : > { %v10920_v34 = vadd.f32 %v10919_v31, %v10873_v57  ;;  %v10773_v63 = vmul.f32 %v21450_v38, %v19830_v43  ;;  %v10819_v39 = vadd.f32 %v10818_v18, %v10772_v12  ;;  %v19835_v29 = vpop.f32.mrb[26].mxu1  ;;  %v21458_v31 = vld [vmem:[#allocation42_spill] sm:$0xff] }
 0x923   : > { %21451 = vst [vmem:[#allocation53_spill] sm:$0xff] %v19835_v29  ;;  %v19839_v52 = vpop.f32.mrb[27].mxu1  ;;  %v10776_v19 = vmul.f32 %v19835_v29, %v21455_v4  ;;  %v10877_v7 = vmul.f32 %v10775_v42, %v10775_v42 }
 0x924   : > { %21453 = vst [vmem:[#allocation46_spill] sm:$0xff] %v19839_v52  ;;  %v10820_v10 = vadd.f32 %v10819_v39, %v10773_v63  ;;  %v10875_v41 = vmul.f32 %v10773_v63, %v10773_v63  ;;  %v10921_v56 = vadd.f32 %v10920_v34, %v10874_v35  ;;  %v10774_v30 = vmul.f32 %v21454_v0, %v19839_v52 }
 0x925   : > { %v10878_v57 = vmul.f32 %v10776_v19, %v10776_v19  ;;  %v11201_v63 = vrot.slane %v11102_v47, 1  ;;  %v11202_v39 = vrot.slane %v12168_v32, 1  ;;  %v19866_v32 = vsel %vm1403_vm0, %v11204_v9, %v11206_v3 }
 0x926   : > { %v10922_v17 = vadd.f32 %v10921_v56, %v10875_v41  ;;  %v10821_v46 = vadd.f32 %v10820_v10, %v10774_v30  ;;  %v10876_v54 = vmul.f32 %v10774_v30, %v10774_v30  ;;  %v21462_v56 = vld [vmem:[#allocation44_spill] sm:$0xff]  ;;  %v11208_v30 = vrot.slane %v12173_v62, 1  ;;  %21464 = vst [vmem:[#allocation54_spill] sm:$0xff] %v19866_v32 }
 0x927   : > { %v12176_v47 = vunpack.c.l.bf16 %v12380_v20 }
 0x928   : > { %v10822_v61 = vadd.f32 %v10821_v46, %v10775_v42  ;;  %v10923_v24 = vadd.f32 %v10922_v17, %v10876_v54  ;;  %v19847_v2 = vpop.f32.mrb[28].mxu1  ;;  %v12180_v17 = vunpack.c.l.bf16 %v12381_v48 }
 0x929   : > { %21456 = vst [vmem:[#allocation55_spill] sm:$0xff] %v19847_v2  ;;  %v19849_v12 = vpop.f32.mrb[29].mxu1  ;;  %v10779_v42 = vmul.f32 %v19847_v2, %v21460_v16  ;;  %v11212_v16 = vrot.slane %v12177_v33, 1  ;;  %v12384_v33 = vld [vmem:[%s15810_s5 + $0x40] sm:$0xff]  }
 0x92a   : > { %21457 = vst [vmem:[#allocation49_spill] sm:$0xff] %v19849_v12  ;;  %v10924_v18 = vadd.f32 %v10923_v24, %v10877_v7  ;;  %v10777_v35 = vmul.f32 %v21458_v31, %v19849_v12  ;;  %v10823_v34 = vadd.f32 %v10822_v61, %v10776_v19  ;;  %v19855_v38 = vpop.f32.mrb[30].mxu1  ;;  %v21463_v19 = vld [vmem:[#allocation43_spill] sm:$0xff]  ;;  %v12181_v7 = vunpack.c.h.bf16 %v12381_v48 }
 0x92b   : > { %21459 = vst [vmem:[#allocation47_spill] sm:$0xff] %v19855_v38  ;;  %v19859_v44 = vpop.f32.mrb[31].mxu1  ;;  %v10780_v46 = vmul.f32 %v19855_v38, %v21463_v19  ;;  %v19869_v61 = vsel %vm1403_vm0, %v11201_v63, %v11202_v39  ;;  %v12382_v24 = vld [vmem:[%s15810_s5 + $0x30] sm:$0xff]   ;;  %v11214_v20 = vrot.slane %v12180_v17, 1  ;;  %v12383_v63 = vld [vmem:[%s15810_s5 + $0x38] sm:$0xff]   ;;  %v12385_v17 = vld [vmem:[%s15810_s5 + $0x48] sm:$0xff]  }
 0x92c   : > { %21461 = vst [vmem:[#allocation52_spill] sm:$0xff] %v19859_v44  ;;  %v10824_v14 = vadd.f32 %v10823_v34, %v10777_v35  ;;  %v10879_v10 = vmul.f32 %v10777_v35, %v10777_v35  ;;  %v10925_v41 = vadd.f32 %v10924_v18, %v10878_v57  ;;  %v10778_v0 = vmul.f32 %v21462_v56, %v19859_v44 }
 0x92d   : > { %21465 = vst [vmem:[#allocation59_spill] sm:$0xff] %v19869_v61  ;;  %v10881_v57 = vmul.f32 %v10779_v42, %v10779_v42  ;;  %v19875_v35 = vsel %vm1403_vm0, %v11206_v3, %v11208_v30  ;;  %v19878_v34 = vsel %vm1403_vm0, %v11202_v39, %v11204_v9  ;;  %v11210_v3 = vrot.slane %v12176_v47, 1 }
 0x92e   : > { %v10926_v4 = vadd.f32 %v10925_v41, %v10879_v10  ;;  %v10825_v54 = vadd.f32 %v10824_v14, %v10778_v0  ;;  %v10880_v11 = vmul.f32 %v10778_v0, %v10778_v0  ;;  %21467 = vst [vmem:[#allocation58_spill] sm:$0xff] %v19875_v35  ;;  %21468 = vst [vmem:[#allocation60_spill] sm:$0xff] %v19878_v34  ;;  %v12185_v19 = vunpack.c.h.bf16 %v12382_v24  ;;  %v21476_v34 = vld [vmem:[#allocation51_spill] sm:$0xff] }
 0x92f   : > { %v10882_v14 = vmul.f32 %v10780_v46, %v10780_v46  ;;  %v12184_v47 = vunpack.c.l.bf16 %v12382_v24 }
 0x930   : > { %v10826_v62 = vadd.f32 %v10825_v54, %v10779_v42  ;;  %v10927_v18 = vadd.f32 %v10926_v4, %v10880_v11  ;;  %v19872_v31 = vpop.f32.mrb[32].mxu1  ;;  %v21470_v42 = vld [vmem:[#allocation48_spill] sm:$0xff]  ;;  %v11216_v4 = vrot.slane %v12181_v7, 1  ;;  %v21472_v54 = vld [vmem:[#allocation45_spill] sm:$0xff]  ;;  %v12189_v7 = vunpack.c.h.bf16 %v12383_v63 }
 0x931   : > { %21466 = vst [vmem:[#allocation61_spill] sm:$0xff] %v19872_v31  ;;  %v19880_v48 = vpop.f32.mrb[33].mxu1  ;;  %v10783_v9 = vmul.f32 %v19872_v31, %v21472_v54 }
 0x932   : > { %21469 = vst [vmem:[#allocation65_spill] sm:$0xff] %v19880_v48  ;;  %v10928_v10 = vadd.f32 %v10927_v18, %v10881_v57  ;;  %v10781_v41 = vmul.f32 %v21470_v42, %v19880_v48  ;;  %v10827_v56 = vadd.f32 %v10826_v62, %v10780_v46  ;;  %v19885_v0 = vpop.f32.mrb[34].mxu1  ;;  %v21474_v57 = vld [vmem:[#allocation56_spill] sm:$0xff]  ;;  %v19896_v46 = vsel %vm1403_vm0, %v11212_v16, %v11214_v20 }
 0x933   : > { %21471 = vst [vmem:[#allocation104_spill] sm:$0xff] %v19885_v0  ;;  %v19889_v39 = vpop.f32.mrb[35].mxu1  ;;  %21475 = vst [vmem:[#allocation68_spill] sm:$0xff] %v19896_v46  ;;  %v12188_v62 = vunpack.c.l.bf16 %v12383_v63  ;;  %v10784_v54 = vmul.f32 %v19885_v0, %v21476_v34  ;;  %v19901_v48 = vsel %vm1403_vm0, %v11208_v30, %v11210_v3  ;;  %v11224_v34 = vrot.slane %v12189_v7, 1 }
 0x934   : > { %21473 = vst [vmem:[#allocation66_spill] sm:$0xff] %v19889_v39  ;;  %v10828_v11 = vadd.f32 %v10827_v56, %v10781_v41  ;;  %v10883_v35 = vmul.f32 %v10781_v41, %v10781_v41  ;;  %v10929_v32 = vadd.f32 %v10928_v10, %v10882_v14  ;;  %v10782_v18 = vmul.f32 %v21474_v57, %v19889_v39 }
 0x935   : > { %21477 = vst [vmem:[#allocation69_spill] sm:$0xff] %v19901_v48  ;;  %v19904_v14 = vsel %vm1403_vm0, %v11214_v20, %v11216_v4  ;;  %v12193_v10 = vunpack.c.h.bf16 %v12384_v33  ;;  %v12196_v41 = vunpack.c.l.bf16 %v12385_v17  ;;  %v11220_v56 = vrot.slane %v12185_v19, 1  ;;  %v21481_v20 = vld [vmem:[#allocation62_spill] sm:$0xff] }
 0x936   : > { %v10930_v42 = vadd.f32 %v10929_v32, %v10883_v35  ;;  %v10829_v61 = vadd.f32 %v10828_v11, %v10782_v18  ;;  %v10884_v31 = vmul.f32 %v10782_v18, %v10782_v18  ;;  %21478 = vst [vmem:[#allocation80_spill] sm:$0xff] %v19904_v14  ;;  %v10885_v57 = vmul.f32 %v10783_v9, %v10783_v9 }
 0x937   : > { %v11222_v32 = vrot.slane %v12188_v62, 1  ;;  %v11218_v35 = vrot.slane %v12184_v47, 1  ;;  %v12192_v63 = vunpack.c.l.bf16 %v12384_v33  ;;  %v10886_v30 = vmul.f32 %v10784_v54, %v10784_v54  ;;  %v12386_v33 = vld [vmem:[%s15810_s5 + $0x50] sm:$0xff]  }
 0x938   : > { %v10830_v46 = vadd.f32 %v10829_v61, %v10783_v9  ;;  %v10931_v39 = vadd.f32 %v10930_v42, %v10884_v31  ;;  %v19906_v24 = vpop.f32.mrb[36].mxu1  ;;  %v11228_v61 = vrot.slane %v12193_v10, 1  ;;  %v11230_v31 = vrot.slane %v12196_v41, 1  ;;  %v21483_v42 = vld [vmem:[#allocation57_spill] sm:$0xff]  ;;  %v12387_v41 = vld [vmem:[%s15810_s5 + $0x58] sm:$0xff]  }
 0x939   : > { %21479 = vst [vmem:[#allocation92_spill] sm:$0xff] %v19906_v24  ;;  %v19908_v11 = vpop.f32.mrb[37].mxu1  ;;  %v12197_v9 = vunpack.c.h.bf16 %v12385_v17  ;;  %v10787_v62 = vmul.f32 %v19906_v24, %v21483_v42  ;;  %v19928_v17 = vsel %vm1403_vm0, %v11216_v4, %v11218_v35  ;;  %v11226_v10 = vrot.slane %v12192_v63, 1  ;;  %v12389_v63 = vld [vmem:[%s15810_s5 + $0x68] sm:$0xff]  }
 0x93a   : > { %21480 = vst [vmem:[#allocation63_spill] sm:$0xff] %v19908_v11  ;;  %v10932_v18 = vadd.f32 %v10931_v39, %v10885_v57  ;;  %v10785_v14 = vmul.f32 %v21481_v20, %v19908_v11  ;;  %v10831_v48 = vadd.f32 %v10830_v46, %v10784_v54  ;;  %v19912_v19 = vpop.f32.mrb[38].mxu1  ;;  %v21485_v39 = vld [vmem:[#allocation70_spill] sm:$0xff]  ;;  %v19922_v46 = vsel %vm1403_vm0, %v11210_v3, %v11212_v16 }
 0x93b   : > { %21482 = vst [vmem:[#allocation73_spill] sm:$0xff] %v19912_v19  ;;  %v19916_v47 = vpop.f32.mrb[39].mxu1  ;;  %21486 = vst [vmem:[#allocation82_spill] sm:$0xff] %v19922_v46  ;;  %v19925_v54 = vsel %vm1403_vm0, %v11220_v56, %v11222_v32  ;;  %v19934_v42 = vsel %vm1403_vm0, %v11222_v32, %v11224_v34  ;;  %v19937_v16 = vsel %vm1403_vm0, %v11218_v35, %v11220_v56  ;;  %v11232_v4 = vrot.slane %v12197_v9, 1 }
 0x93c   : > { %21484 = vst [vmem:[#allocation81_spill] sm:$0xff] %v19916_v47  ;;  %v10832_v7 = vadd.f32 %v10831_v48, %v10785_v14  ;;  %v10887_v0 = vmul.f32 %v10785_v14, %v10785_v14  ;;  %v10933_v38 = vadd.f32 %v10932_v18, %v10886_v30  ;;  %v10786_v57 = vmul.f32 %v21485_v39, %v19916_v47  ;;  %v21489_v48 = vld [vmem:[#allocation64_spill] sm:$0xff]  ;;  %v21500_v47 = vld [vmem:[#allocation74_spill] sm:$0xff] }
 0x93d   : > { %21487 = vst [vmem:[#allocation83_spill] sm:$0xff] %v19925_v54  ;;  %21488 = vst [vmem:[#allocation84_spill] sm:$0xff] %v19928_v17  ;;  %v10788_v14 = vmul.f32 %v19912_v19, %v21489_v48  ;;  %v19940_v3 = vsel %vm1403_vm0, %v11228_v61, %v11230_v31  ;;  %v12201_v39 = vunpack.c.h.bf16 %v12386_v33  ;;  %v12388_v54 = vld [vmem:[%s15810_s5 + $0x60] sm:$0xff]   ;;  %v10889_v17 = vmul.f32 %v10787_v62, %v10787_v62 }
 0x93e   : > { %v10934_v20 = vadd.f32 %v10933_v38, %v10887_v0  ;;  %v10833_v30 = vadd.f32 %v10832_v7, %v10786_v57  ;;  %v10888_v18 = vmul.f32 %v10786_v57, %v10786_v57  ;;  %21490 = vst [vmem:[#allocation85_spill] sm:$0xff] %v19934_v42  ;;  %21491 = vst [vmem:[#allocation86_spill] sm:$0xff] %v19937_v16  ;;  %v12204_v32 = vunpack.c.l.bf16 %v12387_v41 }
 0x93f   : > { %21492 = vst [vmem:[#allocation87_spill] sm:$0xff] %v19940_v3  ;;  %v19947_v7 = vsel %vm1403_vm0, %v11224_v34, %v11226_v10  ;;  %v12200_v57 = vunpack.c.l.bf16 %v12386_v33  ;;  %v12205_v48 = vunpack.c.h.bf16 %v12387_v41  ;;  %v10890_v35 = vmul.f32 %v10788_v14, %v10788_v14  ;;  %v21496_v3 = vld [vmem:[#allocation72_spill] sm:$0xff] }
 0x940   : > { %v10834_v38 = vadd.f32 %v10833_v30, %v10787_v62  ;;  %v10935_v0 = vadd.f32 %v10934_v20, %v10888_v18  ;;  %v19944_v46 = vpop.f32.mrb[40].mxu1  ;;  %21494 = vst [vmem:[#allocation89_spill] sm:$0xff] %v19947_v7  ;;  %v11236_v62 = vrot.slane %v12201_v39, 1  ;;  %v12209_v20 = vunpack.c.h.bf16 %v12388_v54  ;;  %v21498_v18 = vld [vmem:[#allocation71_spill] sm:$0xff] }
 0x941   : > { %21493 = vst [vmem:[#allocation88_spill] sm:$0xff] %v19944_v46  ;;  %v19949_v56 = vpop.f32.mrb[41].mxu1  ;;  %v12212_v30 = vunpack.c.l.bf16 %v12389_v63  ;;  %v10791_v34 = vmul.f32 %v19944_v46, %v21498_v18  ;;  %v11234_v11 = vrot.slane %v12200_v57, 1  ;;  %v19964_v18 = vsel %vm1403_vm0, %v11230_v31, %v11232_v4 }
 0x942   : > { %21495 = vst [vmem:[#allocation90_spill] sm:$0xff] %v19949_v56  ;;  %v10936_v42 = vadd.f32 %v10935_v0, %v10889_v17  ;;  %v10789_v9 = vmul.f32 %v21496_v3, %v19949_v56  ;;  %v10835_v16 = vadd.f32 %v10834_v38, %v10788_v14  ;;  %v19953_v19 = vpop.f32.mrb[42].mxu1  ;;  %v11238_v0 = vrot.slane %v12204_v32, 1  ;;  %v21501_v56 = vld [vmem:[#allocation75_spill] sm:$0xff]  ;;  %21502 = vst [vmem:[#allocation94_spill] sm:$0xff] %v19964_v18 }
 0x943   : > { %21497 = vst [vmem:[#allocation91_spill] sm:$0xff] %v19953_v19  ;;  %v19957_v7 = vpop.f32.mrb[43].mxu1  ;;  %v11240_v3 = vrot.slane %v12205_v48, 1  ;;  %v12208_v14 = vunpack.c.l.bf16 %v12388_v54  ;;  %v10792_v39 = vmul.f32 %v19953_v19, %v21501_v56  ;;  %v10893_v32 = vmul.f32 %v10791_v34, %v10791_v34 }
 0x944   : > { %21499 = vst [vmem:[#allocation93_spill] sm:$0xff] %v19957_v7  ;;  %v10836_v33 = vadd.f32 %v10835_v16, %v10789_v9  ;;  %v10891_v41 = vmul.f32 %v10789_v9, %v10789_v9  ;;  %v10937_v24 = vadd.f32 %v10936_v42, %v10890_v35  ;;  %v10790_v17 = vmul.f32 %v21500_v47, %v19957_v7 }
 0x945   : > { %v19966_v16 = vrot.slane %v12209_v20, 1  ;;  %v11246_v42 = vrot.slane %v12212_v30, 1  ;;  %v12213_v35 = vunpack.c.h.bf16 %v12389_v63  ;;  %v19969_v47 = vsel %vm1403_vm0, %v11226_v10, %v11228_v61  ;;  %v12390_v61 = vld [vmem:[%s15810_s5 + $0x70] sm:$0xff]   ;;  %v12391_v10 = vld [vmem:[%s15810_s5 + $0x78] sm:$0xff]   ;;  %v21508_v20 = vld [vmem:[#allocation77_spill] sm:$0xff] }
 0x946   : > { %v10938_v38 = vadd.f32 %v10937_v24, %v10891_v41  ;;  %v10837_v2 = vadd.f32 %v10836_v33, %v10790_v17  ;;  %v10892_v44 = vmul.f32 %v10790_v17, %v10790_v17  ;;  %21503 = vst [vmem:[#allocation95_spill] sm:$0xff] %v19969_v47  ;;  %v19974_v48 = vsel %vm1403_vm0, %v11236_v62, %v11238_v0 }
 0x947   : > { %21505 = vst [vmem:[#allocation98_spill] sm:$0xff] %v19974_v48  ;;  %v19977_v56 = vsel %vm1403_vm0, %v11232_v4, %v11234_v11  ;;  %v19980_v31 = vsel %vm1403_vm0, %v11238_v0, %v11240_v3  ;;  %v11242_v63 = vrot.slane %v12208_v14, 1  ;;  %v19991_v4 = vsel %vm1403_vm0, %v11234_v11, %v11236_v62  ;;  %v21512_v0 = vld [vmem:[#allocation76_spill] sm:$0xff] }
 0x948   : > { %v10838_v54 = vadd.f32 %v10837_v2, %v10791_v34  ;;  %v10939_v24 = vadd.f32 %v10938_v38, %v10892_v44  ;;  %v19971_v57 = vpop.f32.mrb[44].mxu1  ;;  %21506 = vst [vmem:[#allocation99_spill] sm:$0xff] %v19977_v56  ;;  %21507 = vst [vmem:[#allocation97_spill] sm:$0xff] %v19980_v31  ;;  %v10894_v2 = vmul.f32 %v10792_v39, %v10792_v39  ;;  %v11248_v17 = vrot.slane %v12213_v35, 1  ;;  %v21513_v31 = vld [vmem:[#allocation78_spill] sm:$0xff]  ;;  %v12394_v35 = vld [vmem:[%s15810_s5 + $0x90] sm:$0xff]  }
 0x949   : > { %21504 = vst [vmem:[#allocation96_spill] sm:$0xff] %v19971_v57  ;;  %v19982_v9 = vpop.f32.mrb[45].mxu1  ;;  %21510 = vst [vmem:[#allocation105_spill] sm:$0xff] %v19991_v4  ;;  %v19995_v41 = vsel %vm1403_vm0, %v19966_v16, %v11246_v42  ;;  %v10795_v14 = vmul.f32 %v19971_v57, %v21512_v0  ;;  %v20006_v62 = vsel %vm1403_vm0, %v11240_v3, %v11242_v63  ;;  %v12217_v48 = vunpack.c.h.bf16 %v12390_v61  ;;  %v12395_v56 = vld [vmem:[%s15810_s5 + $0x98] sm:$0xff]   ;;  %v21515_v0 = vld [vmem:[#allocation79_spill] sm:$0xff] }
 0x94a   : > { %v10940_v44 = vadd.f32 %v10939_v24, %v10893_v32  ;;  %v10793_v30 = vmul.f32 %v21508_v20, %v19982_v9  ;;  %v10839_v34 = vadd.f32 %v10838_v54, %v10792_v39  ;;  %v19988_v33 = vpop.f32.mrb[46].mxu1  ;;  %21511 = vst [vmem:[#allocation102_spill] sm:$0xff] %v19995_v41  ;;  %v12392_v32 = vld [vmem:[%s15810_s5 + $0x80] sm:$0xff]   ;;  %v12393_v24 = vld [vmem:[%s15810_s5 + $0x88] sm:$0xff]   ;;  %21514 = vst [vmem:[#allocation103_spill] sm:$0xff] %v20006_v62  ;;  %v12220_v4 = vunpack.c.l.bf16 %v12391_v10 }
 0x94b   : > { %21509 = vst [vmem:[#allocation100_spill] sm:$0xff] %v19988_v33  ;;  %v19999_v38 = vpop.f32.mrb[47].mxu1  ;;  %v12216_v41 = vunpack.c.l.bf16 %v12390_v61  ;;  %v10796_v47 = vmul.f32 %v19988_v33, %v21515_v0  ;;  %v12229_v46 = vunpack.c.h.bf16 %v12393_v24  ;;  %v20013_v62 = vsel %vm1403_vm0, %v11246_v42, %v11248_v17 }
 0x94c   : > { %v10840_v39 = vadd.f32 %v10839_v34, %v10793_v30  ;;  %v10895_v54 = vmul.f32 %v10793_v30, %v10793_v30  ;;  %v10941_v20 = vadd.f32 %v10940_v44, %v10894_v2  ;;  %v10794_v11 = vmul.f32 %v21513_v31, %v19999_v38  ;;  %21516 = vst [vmem:[#allocation101_spill] sm:$0xff] %v20013_v62  ;;  %v21544_v62 = vld [vmem:[#allocation88_spill] sm:$0xff] }
 0x94d   : > { %v12221_v34 = vunpack.c.h.bf16 %v12391_v10  ;;  %v12225_v30 = vunpack.c.h.bf16 %v12392_v32  ;;  %v12228_v2 = vunpack.c.l.bf16 %v12393_v24  ;;  %v12224_v44 = vunpack.c.l.bf16 %v12392_v32  ;;  %v12398_v24 = vld [vmem:[%s15810_s5 + $0xb0] sm:$0xff]  }
 0x94e   : > { %v10942_v18 = vadd.f32 %v10941_v20, %v10895_v54  ;;  %v10841_v57 = vadd.f32 %v10840_v39, %v10794_v11  ;;  %v10896_v19 = vmul.f32 %v10794_v11, %v10794_v11  ;;  %v10897_v31 = vmul.f32 %v10795_v14, %v10795_v14 }
 0x94f   : > { %v11252_v61 = vrot.slane %v12217_v48, 1  ;;  %v12233_v12 = vunpack.c.h.bf16 %v12394_v35  ;;  %v12236_v29 = vunpack.c.l.bf16 %v12395_v56  ;;  %v11254_v54 = vrot.slane %v12220_v4, 1 }
 0x950   : > { %v10842_v7 = vadd.f32 %v10841_v57, %v10795_v14  ;;  %v10943_v3 = vadd.f32 %v10942_v18, %v10896_v19  ;;  %v10898_v20 = vmul.f32 %v10796_v47, %v10796_v47  ;;  %v11250_v39 = vrot.slane %v12216_v41, 1 }
 0x951   : > { %v11256_v11 = vrot.slane %v12221_v34, 1  ;;  %v11260_v10 = vrot.slane %v12225_v30, 1  ;;  %v11262_v33 = vrot.slane %v12228_v2, 1  ;;  %v11258_v52 = vrot.slane %v12224_v44, 1 }
 0x952   : > { %v10843_v15 = vadd.f32 %v10842_v7, %v10796_v47  ;;  %v10944_v0 = vadd.f32 %v10943_v3, %v10897_v31  ;;  %v20015_v32 = vrot.slane %v12229_v46, 1  ;;  %v20017_v42 = vrot.slane %v12233_v12, 1 }
 0x953   : > { %v20019_v57 = vrot.slane %v12236_v29, 1  ;;  %v12232_v48 = vunpack.c.l.bf16 %v12394_v35  ;;  %v12237_v7 = vunpack.c.h.bf16 %v12395_v56  ;;  %v20023_v47 = vsel %vm1403_vm0, %v11242_v63, %v19966_v16  ;;  %v12396_v16 = vld [vmem:[%s15810_s5 + $0xa0] sm:$0xff]   ;;  %v12397_v63 = vld [vmem:[%s15810_s5 + $0xa8] sm:$0xff]   ;;  %v12399_v35 = vld [vmem:[%s15810_s5 + $0xb8] sm:$0xff]  }
 0x954   : > { %v10844_v19 = vrot.slane %v10843_v15, 4  ;;  %v10945_v18 = vadd.f32 %v10944_v0, %v10898_v20  ;;  %21517 = vst [vmem:[#allocation67_spill] sm:$0xff] %v20023_v47  ;;  %v20026_v4 = vsel %vm1403_vm0, %v11252_v61, %v11254_v54  ;;  %v20029_v14 = vsel %vm1403_vm0, %v11248_v17, %v11250_v39  ;;  %v11100_v20 = vld [vmem:[%s15810_s5 + $0xc8] sm:$0xf]  ;;  %v11101_v0 = vld [vmem:[%s15810_s5 + $0xcc] sm:$0x1] }
 0x955   : > { %21518 = vst [vmem:[#allocation106_spill] sm:$0xff] %v20026_v4  ;;  %21519 = vst [vmem:[#allocation107_spill] sm:$0xff] %v20029_v14  ;;  %v20032_v12 = vsel %vm1403_vm0, %v11254_v54, %v11256_v11  ;;  %v20035_v29 = vsel %vm1403_vm0, %v11250_v39, %v11252_v61  ;;  %v20038_v56 = vsel %vm1403_vm0, %v11260_v10, %v11262_v33  ;;  %v20059_v31 = vrot.slane %v12232_v48, 1  ;;  %v21545_v47 = vld [vmem:[#allocation91_spill] sm:$0xff] }
 0x956   : > { %v10845_v46 = vadd.f32 %v10844_v19, %v10843_v15  ;;  %v10946_v41 = vrot.slane %v10945_v18, 4  ;;  %21520 = vst [vmem:[#allocation108_spill] sm:$0xff] %v20032_v12  ;;  %21521 = vst [vmem:[#allocation109_spill] sm:$0xff] %v20035_v29  ;;  %v20043_v15 = vsel %vm1403_vm0, %v11256_v11, %v11258_v52  ;;  %v20047_v17 = vsel %vm1403_vm0, %v11262_v33, %v20015_v32  ;;  %v12400_v33 = vld [vmem:[%s15810_s5 + $0xc0] sm:$0xff]  }
 0x957   : > { %21522 = vst [vmem:[#allocation110_spill] sm:$0xff] %v20038_v56  ;;  %21523 = vst [vmem:[#allocation111_spill] sm:$0xff] %v20043_v15  ;;  %v20052_v2 = vsel %vm1403_vm0, %v11258_v52, %v11260_v10  ;;  %v20057_v44 = vsel %vm1403_vm0, %v20017_v42, %v20019_v57  ;;  %v20061_v3 = vrot.slane %v12237_v7, 1  ;;  %v12241_v61 = vunpack.c.h.bf16 %v12396_v16 }
 0x958   : > { %21524 = vst [vmem:[#allocation112_spill] sm:$0xff] %v20047_v17  ;;  %v10846_v34 = vrot.slane %v10845_v46, 2  ;;  %v10947_v30 = vadd.f32 %v10946_v41, %v10945_v18  ;;  %21525 = vst [vmem:[#allocation113_spill] sm:$0xff] %v20052_v2  ;;  %v12244_v54 = vunpack.c.l.bf16 %v12397_v63  ;;  %v12240_v19 = vunpack.c.l.bf16 %v12396_v16 }
 0x959   : > { %21526 = vst [vmem:[#allocation114_spill] sm:$0xff] %v20057_v44  ;;  %v12245_v18 = vunpack.c.h.bf16 %v12397_v63  ;;  %v12249_v52 = vunpack.c.h.bf16 %v12398_v24  ;;  %v12252_v10 = vunpack.c.l.bf16 %v12399_v35  ;;  %v12248_v41 = vunpack.c.l.bf16 %v12398_v24 }
 0x95a   : > { %v10847_v39 = vadd.f32 %v10846_v34, %v10845_v46  ;;  %v10948_v11 = vrot.slane %v10947_v30, 2  ;;  %v12253_v17 = vunpack.c.h.bf16 %v12399_v35  ;;  %v12257_v44 = vunpack.c.h.bf16 %v12400_v33 }
 0x95b   : > { %v11149_v48 = vunpack.c.l.bf16 %v11100_v20  ;;  %v12256_v15 = vunpack.c.l.bf16 %v12400_v33  ;;  %v11150_v7 = vunpack.c.l.bf16 %v11101_v0  ;;  %v20066_v12 = vrot.slane %v12241_v61, 1 }
 0x95c   : > { %v10848_v56 = vrot.slane %v10847_v39, 1  ;;  %v10949_v2 = vadd.f32 %v10948_v11, %v10947_v30  ;;  %v20068_v4 = vrot.slane %v12244_v54, 1  ;;  %v20070_v46 = vrot.slane %v12240_v19, 1  ;;  %v21543_v11 = vld [vmem:[#allocation93_spill] sm:$0xff] }
 0x95d   : > { %v20072_v16 = vrot.slane %v12245_v18, 1  ;;  %v20074_v63 = vrot.slane %v12249_v52, 1  ;;  %v20076_v24 = vrot.slane %v12252_v10, 1  ;;  %v20078_v35 = vrot.slane %v12248_v41, 1  ;;  %v21529_v52 = vld [vmem:[#allocation53_spill] sm:$0xff]  ;;  %v21531_v41 = vld [vmem:[#allocation52_spill] sm:$0xff] }
 0x95e   : > { %v10849_v29 = vadd.f32 %v10848_v56, %v10847_v39  ;;  %v10950_v14 = vrot.slane %v10949_v2, 1  ;;  %v20080_v34 = vrot.slane %v12253_v17, 1  ;;  %v20084_v33 = vrot.slane %v12257_v44, 1  ;;  %v21530_v10 = vld [vmem:[#allocation49_spill] sm:$0xff]  ;;  %v21540_v17 = vld [vmem:[#allocation92_spill] sm:$0xff] }
 0x95f   : > { %v20086_v54 = vrot.slane %v11149_v48, 1  ;;  %v20088_v56 = vrot.slane %v12256_v15, 1  ;;  %v20090_v20 = vrot.slane %v11150_v7, 1  ;;  %v21546_v48 = vld [vmem:[#allocation96_spill] sm:$0xff]  ;;  %v20196_v7 = vsel %vm1403_vm0, %v20019_v57, %v20061_v3 }
 0x960   : > { %v20082_v30 = vmul.f32 0.00390625, %v10849_v29  ;;  %v10951_v61 = vadd.f32 %v10950_v14, %v10949_v2  ;;  %v21541_v14 = vld [vmem:[#allocation73_spill] sm:$0xff]  ;;  %v21542_v29 = vld [vmem:[#allocation90_spill] sm:$0xff]  ;;  %21548 = vst [vmem:[#allocation116_spill] sm:$0xff] %v20196_v7  ;;  %v20201_v19 = vsel %vm1403_vm0, %v20059_v31, %v20017_v42  ;;  %v21550_v2 = vld [vmem:[#allocation100_spill] sm:$0xff]  ;;  %v20208_v15 = vsel %vm1403_vm0, %v20066_v12, %v20068_v4 }
 0x961   : > { %21549 = vst [vmem:[#allocation117_spill] sm:$0xff] %v20201_v19  ;;  %21551 = vst [vmem:[#allocation118_spill] sm:$0xff] %v20208_v15  ;;  %v20218_v57 = vsel %vm1403_vm0, %v20068_v4, %v20072_v16  ;;  %v20223_v42 = vsel %vm1403_vm0, %v20070_v46, %v20066_v12  ;;  %v20238_v4 = vsel %vm1403_vm0, %v20076_v24, %v20080_v34  ;;  %v21617_v15 = vld [vmem:[#allocation59_spill] sm:$0xff]  ;;  %v21621_v19 = vld [vmem:[#allocation69_spill] sm:$0xff] }
 0x962   : > { %v10952_v0 = vmul.f32 0.00390625, %v10951_v61  ;;  %v10953_v39 = vmul.f32 %v20082_v30, %v20082_v30  ;;  %21553 = vst [vmem:[#allocation120_spill] sm:$0xff] %v20218_v57  ;;  %21554 = vst [vmem:[#allocation121_spill] sm:$0xff] %v20223_v42  ;;  %v20243_v12 = vsel %vm1403_vm0, %v20078_v35, %v20074_v63  ;;  %v20249_v18 = vsel %vm1403_vm0, %v20084_v33, %v20086_v54  ;;  %v21607_v57 = vld [vmem:[#allocation81_spill] sm:$0xff] }
 0x963   : > { %21557 = vst [vmem:[#allocation124_spill] sm:$0xff] %v20238_v4  ;;  %21558 = vst [vmem:[#allocation125_spill] sm:$0xff] %v20243_v12 }
 0x964   : > { %v10954_v44 = vsub.f32 %v10952_v0, %v10953_v39  ;;  %v21527_v0 = vld [vmem:[#allocation46_spill] sm:$0xff]  ;;  %21559 = vst [vmem:[#allocation126_spill] sm:$0xff] %v20249_v18  ;;  %v21562_v18 = vsub.f32 %v19999_v38, %v20082_v30  ;;  %v21567_v38 = vsub.f32 %v19750_v1, %v20082_v30  ;;  %v21572_v1 = vsub.f32 %v19774_v6, %v20082_v30 }
 0x965   : > { %v21528_v39 = vld [vmem:[#allocation50_spill] sm:$0xff]  ;;  %v21577_v6 = vsub.f32 %v19780_v28, %v20082_v30  ;;  %v21582_v28 = vsub.f32 %v19802_v8, %v20082_v30  ;;  %v21587_v8 = vsub.f32 %v19830_v43, %v20082_v30  ;;  %v21592_v43 = vsub.f32 %v21531_v41, %v20082_v30 }
 0x966   : > { %v11003_v61 = vadd.f32 1e-05, %v10954_v44  ;;  %v20191_v44 = vsel %vm1403_vm0, %v20015_v32, %v20059_v31  ;;  %v20213_v32 = vsel %vm1403_vm0, %v20061_v3, %v20070_v46  ;;  %v20228_v31 = vsel %vm1403_vm0, %v20074_v63, %v20076_v24 }
 0x967   : > { %21547 = vst [vmem:[#allocation115_spill] sm:$0xff] %v20191_v44  ;;  %21552 = vst [vmem:[#allocation119_spill] sm:$0xff] %v20213_v32  ;;  %v20233_v3 = vsel %vm1403_vm0, %v20072_v16, %v20078_v35  ;;  %v11291_v16 = vsel %vm1403_vm0, %v20080_v34, %v20088_v56  ;;  %v20257_v24 = vsel %vm1403_vm0, %v20086_v54, %v20090_v20  ;;  %v21619_v32 = vld [vmem:[#allocation54_spill] sm:$0xff] }
 0x968   : > { %15366 = vrsqrt.f32 %v11003_v61  ;;  %21555 = vst [vmem:[#allocation122_spill] sm:$0xff] %v20228_v31  ;;  %21556 = vst [vmem:[#allocation123_spill] sm:$0xff] %v20233_v3  ;;  %v11293_v63 = vsel %vm1403_vm0, %v20088_v56, %v20084_v33  ;;  %v21561_v35 = vsub.f32 %v19982_v9, %v20082_v30  ;;  %v21563_v34 = vsub.f32 %v19734_v53, %v20082_v30  ;;  %v21605_v3 = vld [vmem:[#allocation63_spill] sm:$0xff] }
 0x969   : > { %21560 = vst [vmem:[#allocation127_spill] sm:$0xff] %v20257_v24  ;;  %v21564_v54 = vsub.f32 %v19740_v37, %v20082_v30  ;;  %v21565_v24 = vsub.f32 %v19732_v40, %v20082_v30  ;;  %v21566_v9 = vsub.f32 %v19738_v27, %v20082_v30  ;;  %v21568_v53 = vsub.f32 %v19758_v22, %v20082_v30 }
 0x96a   : > { %v21569_v37 = vsub.f32 %v19748_v13, %v20082_v30  ;;  %v21570_v40 = vsub.f32 %v19754_v25, %v20082_v30  ;;  %v21571_v27 = vsub.f32 %v19766_v58, %v20082_v30  ;;  %v21573_v22 = vsub.f32 %v19764_v60, %v20082_v30 }
 0x96b   : > { %v21574_v13 = vsub.f32 %v19770_v50, %v20082_v30  ;;  %v21575_v25 = vsub.f32 %v19782_v55, %v20082_v30  ;;  %v21576_v58 = vsub.f32 %v19790_v36, %v20082_v30  ;;  %v21578_v60 = vsub.f32 %v19786_v45, %v20082_v30 }
 0x96c   : > { %v21579_v50 = vsub.f32 %v19798_v49, %v20082_v30  ;;  %v21580_v55 = vsub.f32 %v19806_v26, %v20082_v30  ;;  %v21581_v36 = vsub.f32 %v19796_v59, %v20082_v30  ;;  %v21583_v49 = vsub.f32 %v19814_v21, %v20082_v30 }
 0x96d   : > { %v21584_v26 = vsub.f32 %v19822_v51, %v20082_v30  ;;  %v21585_v59 = vsub.f32 %v19812_v5, %v20082_v30  ;;  %v21588_v21 = vsub.f32 %v21527_v0, %v20082_v30  ;;  %v21589_v51 = vsub.f32 %v21528_v39, %v20082_v30 }
 0x96e   : > { %v21590_v5 = vsub.f32 %v21529_v52, %v20082_v30 }
 0x972   : > { %v15367_v46 = vpop.eup %15366 }
 0x973   : > { %v11049_v61 = vmul.f32 %v15367_v46, %v21561_v35  ;;  %v11050_v4 = vmul.f32 %v15367_v46, %v21562_v18  ;;  %v11005_v31 = vmul.f32 %v15367_v46, %v21563_v34  ;;  %v11006_v20 = vmul.f32 %v15367_v46, %v21564_v54 }
 0x974   : > { %v11007_v33 = vmul.f32 %v15367_v46, %v21565_v24  ;;  %v11008_v56 = vmul.f32 %v15367_v46, %v21566_v9  ;;  %v11009_v18 = vmul.f32 %v15367_v46, %v21567_v38  ;;  %v11010_v35 = vmul.f32 %v15367_v46, %v21568_v53 }
 0x975   : > { %v11390_v34 = vadd.f32 %v11291_v16, %v11049_v61  ;;  %v11391_v12 = vadd.f32 %v11293_v63, %v11050_v4  ;;  %v11011_v54 = vmul.f32 %v15367_v46, %v21569_v37  ;;  %v11012_v24 = vmul.f32 %v15367_v46, %v21570_v40 }
 0x976   : > { %v11013_v9 = vmul.f32 %v15367_v46, %v21571_v27  ;;  %v11014_v38 = vmul.f32 %v15367_v46, %v21572_v1  ;;  %v11015_v61 = vmul.f32 %v15367_v46, %v21573_v22  ;;  %v11016_v4 = vmul.f32 %v15367_v46, %v21574_v13 }
 0x977   : > { %v12371_v16 = vpack.c.bf16 %v11391_v12, %v11390_v34  ;;  %v11017_v63 = vmul.f32 %v15367_v46, %v21575_v25  ;;  %v11018_v53 = vmul.f32 %v15367_v46, %v21576_v58  ;;  %v11019_v37 = vmul.f32 %v15367_v46, %v21577_v6 }
 0x978   : > { %v11020_v40 = vmul.f32 %v15367_v46, %v21578_v60  ;;  %v11021_v12 = vmul.f32 %v15367_v46, %v21579_v50  ;;  %v11022_v34 = vmul.f32 %v15367_v46, %v21580_v55  ;;  %v11023_v27 = vmul.f32 %v15367_v46, %v21581_v36 }
 0x979   : > { %12422 = vst [vmem:[%s20325_s20 + $0xb0] sm:$0xff] %v12371_v16   ;;  %v11024_v45 = vmul.f32 %v15367_v46, %v21582_v28  ;;  %v11025_v1 = vmul.f32 %v15367_v46, %v21583_v49  ;;  %v11026_v22 = vmul.f32 %v15367_v46, %v21584_v26  ;;  %v11027_v13 = vmul.f32 %v15367_v46, %v21585_v59  ;;  %v21593_v28 = vld [vmem:[#allocation55_spill] sm:$0xff] }
 0x97a   : > { %v21586_v25 = vsub.f32 %v19818_v23, %v20082_v30  ;;  %v11029_v58 = vmul.f32 %v15367_v46, %v21587_v8  ;;  %v11030_v6 = vmul.f32 %v15367_v46, %v21588_v21  ;;  %v11031_v60 = vmul.f32 %v15367_v46, %v21589_v51  ;;  %v21595_v26 = vld [vmem:[#allocation47_spill] sm:$0xff]  ;;  %v21599_v21 = vld [vmem:[#allocation66_spill] sm:$0xff] }
 0x97b   : > { %v11032_v50 = vmul.f32 %v15367_v46, %v21590_v5  ;;  %v21591_v23 = vsub.f32 %v21530_v10, %v20082_v30  ;;  %v11034_v36 = vmul.f32 %v15367_v46, %v21592_v43  ;;  %v21594_v0 = vsub.f32 %v21593_v28, %v20082_v30  ;;  %v21601_v5 = vld [vmem:[#allocation61_spill] sm:$0xff]  ;;  %v21603_v43 = vld [vmem:[#allocation104_spill] sm:$0xff] }
 0x97c   : > { %v11028_v16 = vmul.f32 %v15367_v46, %v21586_v25  ;;  %v21596_v39 = vsub.f32 %v21595_v26, %v20082_v30  ;;  %v21597_v25 = vld [vmem:[#allocation65_spill] sm:$0xff]  ;;  %v21600_v10 = vsub.f32 %v21599_v21, %v20082_v30  ;;  %v21602_v41 = vsub.f32 %v21601_v5, %v20082_v30 }
 0x97d   : > { %v11033_v55 = vmul.f32 %v15367_v46, %v21591_v23  ;;  %v11035_v49 = vmul.f32 %v15367_v46, %v21594_v0  ;;  %v21598_v52 = vsub.f32 %v21597_v25, %v20082_v30  ;;  %v21604_v28 = vsub.f32 %v21603_v43, %v20082_v30 }
 0x97e   : > { %v11036_v59 = vmul.f32 %v15367_v46, %v21596_v39  ;;  %v11038_v51 = vmul.f32 %v15367_v46, %v21600_v10  ;;  %v11039_v23 = vmul.f32 %v15367_v46, %v21602_v41  ;;  %v21606_v26 = vsub.f32 %v21605_v3, %v20082_v30 }
 0x97f   : > { %v11037_v8 = vmul.f32 %v15367_v46, %v21598_v52  ;;  %v11040_v0 = vmul.f32 %v15367_v46, %v21604_v28  ;;  %v21608_v25 = vsub.f32 %v21607_v57, %v20082_v30  ;;  %v21609_v21 = vsub.f32 %v21540_v17, %v20082_v30 }
 0x980   : > { %v11041_v39 = vmul.f32 %v15367_v46, %v21606_v26  ;;  %v21610_v5 = vsub.f32 %v21541_v14, %v20082_v30  ;;  %v21611_v43 = vsub.f32 %v21542_v29, %v20082_v30  ;;  %v21612_v3 = vsub.f32 %v21543_v11, %v20082_v30  ;;  %v21618_v11 = vld [vmem:[#allocation60_spill] sm:$0xff] }
 0x981   : > { %v11042_v52 = vmul.f32 %v15367_v46, %v21608_v25  ;;  %v11043_v10 = vmul.f32 %v15367_v46, %v21609_v21  ;;  %v21613_v57 = vsub.f32 %v21544_v62, %v20082_v30  ;;  %v21614_v17 = vsub.f32 %v21545_v47, %v20082_v30  ;;  %v21620_v62 = vld [vmem:[#allocation58_spill] sm:$0xff] }
 0x982   : > { %v11044_v41 = vmul.f32 %v15367_v46, %v21610_v5  ;;  %v11045_v28 = vmul.f32 %v15367_v46, %v21611_v43  ;;  %v11046_v26 = vmul.f32 %v15367_v46, %v21612_v3  ;;  %v21615_v14 = vsub.f32 %v21546_v48, %v20082_v30  ;;  %v21622_v47 = vld [vmem:[#allocation82_spill] sm:$0xff]  ;;  %v21623_v48 = vld [vmem:[#allocation68_spill] sm:$0xff] }
 0x983   : > { %v11047_v25 = vmul.f32 %v15367_v46, %v21613_v57  ;;  %v11048_v21 = vmul.f32 %v15367_v46, %v21614_v17  ;;  %v21616_v29 = vsub.f32 %v21550_v2, %v20082_v30  ;;  %v11346_v42 = vadd.f32 %v21617_v15, %v11005_v31  ;;  %v21624_v2 = vld [vmem:[#allocation80_spill] sm:$0xff]  ;;  %v21626_v15 = vld [vmem:[#allocation86_spill] sm:$0xff] }
 0x984   : > { %v11051_v5 = vmul.f32 %v15367_v46, %v21615_v14  ;;  %v11347_v3 = vadd.f32 %v21618_v11, %v11006_v20  ;;  %v11348_v7 = vadd.f32 %v21619_v32, %v11007_v33  ;;  %v11349_v57 = vadd.f32 %v21620_v62, %v11008_v56  ;;  %v21627_v11 = vld [vmem:[#allocation83_spill] sm:$0xff]  ;;  %v21628_v32 = vld [vmem:[#allocation85_spill] sm:$0xff] }
 0x985   : > { %v11052_v43 = vmul.f32 %v15367_v46, %v21616_v29  ;;  %v11350_v44 = vadd.f32 %v21621_v19, %v11009_v18  ;;  %v11351_v17 = vadd.f32 %v21622_v47, %v11010_v35  ;;  %v11352_v14 = vadd.f32 %v21623_v48, %v11011_v54  ;;  %v21625_v29 = vld [vmem:[#allocation84_spill] sm:$0xff]  ;;  %v21629_v56 = vld [vmem:[#allocation89_spill] sm:$0xff]  ;;  %v21630_v18 = vld [vmem:[#allocation95_spill] sm:$0xff] }
 0x986   : > { %v11353_v30 = vadd.f32 %v21624_v2, %v11012_v24  ;;  %v11354_v46 = vadd.f32 %v21625_v29, %v11013_v9  ;;  %v11355_v31 = vadd.f32 %v21626_v15, %v11014_v38  ;;  %v11356_v20 = vadd.f32 %v21627_v11, %v11015_v61  ;;  %v21631_v35 = vld [vmem:[#allocation87_spill] sm:$0xff]  ;;  %v21632_v48 = vld [vmem:[#allocation94_spill] sm:$0xff]  ;;  %v21634_v9 = vld [vmem:[#allocation105_spill] sm:$0xff] }
 0x987   : > { %v11357_v33 = vadd.f32 %v21628_v32, %v11016_v4  ;;  %v11358_v62 = vadd.f32 %v21629_v56, %v11017_v63  ;;  %v11359_v19 = vadd.f32 %v21630_v18, %v11018_v53  ;;  %v11360_v47 = vadd.f32 %v21631_v35, %v11019_v37  ;;  %v21633_v2 = vld [vmem:[#allocation99_spill] sm:$0xff]  ;;  %v21635_v15 = vld [vmem:[#allocation98_spill] sm:$0xff]  ;;  %v21636_v11 = vld [vmem:[#allocation97_spill] sm:$0xff] }
 0x988   : > { %v11361_v54 = vadd.f32 %v21632_v48, %v11020_v40  ;;  %v11362_v24 = vadd.f32 %v21633_v2, %v11021_v12  ;;  %v11363_v29 = vadd.f32 %v21634_v9, %v11022_v34  ;;  %v11364_v38 = vadd.f32 %v21635_v15, %v11023_v27  ;;  %v21637_v4 = vld [vmem:[#allocation103_spill] sm:$0xff]  ;;  %v21639_v18 = vld [vmem:[#allocation102_spill] sm:$0xff]  ;;  %v21640_v35 = vld [vmem:[#allocation101_spill] sm:$0xff] }
 0x989   : > { %v11365_v61 = vadd.f32 %v21636_v11, %v11024_v45  ;;  %v11366_v32 = vadd.f32 %v21637_v4, %v11025_v1  ;;  %v21638_v56 = vld [vmem:[#allocation67_spill] sm:$0xff]  ;;  %v11368_v53 = vadd.f32 %v21639_v18, %v11027_v13  ;;  %v11369_v37 = vadd.f32 %v21640_v35, %v11028_v16  ;;  %v21642_v2 = vld [vmem:[#allocation109_spill] sm:$0xff]  ;;  %v21643_v9 = vld [vmem:[#allocation106_spill] sm:$0xff] }
 0x98a   : > { %v11367_v63 = vadd.f32 %v21638_v56, %v11026_v22  ;;  %v21641_v40 = vld [vmem:[#allocation107_spill] sm:$0xff]  ;;  %v11371_v12 = vadd.f32 %v21642_v2, %v11030_v6  ;;  %v11372_v34 = vadd.f32 %v21643_v9, %v11031_v60  ;;  %v21644_v15 = vld [vmem:[#allocation108_spill] sm:$0xff]  ;;  %v21646_v1 = vld [vmem:[#allocation113_spill] sm:$0xff] }
 0x98b   : > { %v11370_v48 = vadd.f32 %v21641_v40, %v11029_v58  ;;  %v11373_v27 = vadd.f32 %v21644_v15, %v11032_v50  ;;  %v21645_v11 = vld [vmem:[#allocation111_spill] sm:$0xff]  ;;  %v11375_v4 = vadd.f32 %v21646_v1, %v11034_v36  ;;  %v21647_v22 = vld [vmem:[#allocation110_spill] sm:$0xff]  ;;  %v21648_v13 = vld [vmem:[#allocation112_spill] sm:$0xff] }
 0x98c   : > { %v11374_v45 = vadd.f32 %v21645_v11, %v11033_v55  ;;  %v11376_v56 = vadd.f32 %v21647_v22, %v11035_v49  ;;  %v11377_v18 = vadd.f32 %v21648_v13, %v11036_v59  ;;  %v21649_v16 = vld [vmem:[#allocation115_spill] sm:$0xff]  ;;  %v21650_v40 = vld [vmem:[#allocation117_spill] sm:$0xff]  ;;  %v21651_v2 = vld [vmem:[#allocation114_spill] sm:$0xff] }
 0x98d   : > { %v11378_v35 = vadd.f32 %v21649_v16, %v11037_v8  ;;  %v11379_v58 = vadd.f32 %v21650_v40, %v11038_v51  ;;  %v11380_v6 = vadd.f32 %v21651_v2, %v11039_v23  ;;  %v21652_v9 = vld [vmem:[#allocation116_spill] sm:$0xff]  ;;  %v21653_v15 = vld [vmem:[#allocation119_spill] sm:$0xff]  ;;  %v21654_v11 = vld [vmem:[#allocation121_spill] sm:$0xff] }
 0x98e   : > { %v11381_v60 = vadd.f32 %v21652_v9, %v11040_v0  ;;  %v11382_v50 = vadd.f32 %v21653_v15, %v11041_v39  ;;  %v11383_v55 = vadd.f32 %v21654_v11, %v11042_v52  ;;  %v21655_v1 = vld [vmem:[#allocation118_spill] sm:$0xff]  ;;  %v21656_v22 = vld [vmem:[#allocation120_spill] sm:$0xff]  ;;  %v21657_v13 = vld [vmem:[#allocation123_spill] sm:$0xff]  ;;  %v12261_v52 = vpack.c.bf16 %v11347_v3, %v11346_v42 }
 0x98f   : > { %v11384_v36 = vadd.f32 %v21655_v1, %v11043_v10  ;;  %v11385_v49 = vadd.f32 %v21656_v22, %v11044_v41  ;;  %v11386_v59 = vadd.f32 %v21657_v13, %v11045_v28  ;;  %v21658_v8 = vld [vmem:[#allocation125_spill] sm:$0xff]  ;;  %v21659_v16 = vld [vmem:[#allocation122_spill] sm:$0xff]  ;;  %v21660_v23 = vld [vmem:[#allocation124_spill] sm:$0xff]  ;;  %v12266_v10 = vpack.c.bf16 %v11349_v57, %v11348_v7 }
 0x990   : > { %v11387_v51 = vadd.f32 %v21658_v8, %v11046_v26  ;;  %v11388_v40 = vadd.f32 %v21659_v16, %v11047_v25  ;;  %v11389_v2 = vadd.f32 %v21660_v23, %v11048_v21  ;;  %v21661_v0 = vld [vmem:[#allocation126_spill] sm:$0xff]  ;;  %v21662_v39 = vld [vmem:[#allocation127_spill] sm:$0xff]  ;;  %v12271_v41 = vpack.c.bf16 %v11351_v17, %v11350_v44  ;;  %12262 = vst [vmem:[%s20325_s20] sm:$0xff] %v12261_v52  }
 0x991   : > { %v11392_v9 = vadd.f32 %v21661_v0, %v11051_v5  ;;  %v11393_v15 = vadd.f32 %v21662_v39, %v11052_v43  ;;  %v12276_v28 = vpack.c.bf16 %v11353_v30, %v11352_v14  ;;  %v12281_v11 = vpack.c.bf16 %v11355_v31, %v11354_v46  ;;  %12401 = vst [vmem:[%s20325_s20 + $0x8] sm:$0xff] %v12266_v10  }
 0x992   : > { %v12286_v26 = vpack.c.bf16 %v11357_v33, %v11356_v20  ;;  %v12291_v1 = vpack.c.bf16 %v11359_v19, %v11358_v62  ;;  %12402 = vst [vmem:[%s20325_s20 + $0x10] sm:$0xff] %v12271_v41   ;;  %v12296_v25 = vpack.c.bf16 %v11361_v54, %v11360_v47  ;;  %v12301_v42 = vpack.c.bf16 %v11363_v29, %v11362_v24 }
 0x993   : > { %v12306_v21 = vpack.c.bf16 %v11365_v61, %v11364_v38  ;;  %v12311_v7 = vpack.c.bf16 %v11367_v63, %v11366_v32  ;;  %12403 = vst [vmem:[%s20325_s20 + $0x18] sm:$0xff] %v12276_v28   ;;  %12404 = vst [vmem:[%s20325_s20 + $0x20] sm:$0xff] %v12281_v11   ;;  %v12316_v44 = vpack.c.bf16 %v11369_v37, %v11368_v53 }
 0x994   : > { %12405 = vst [vmem:[%s20325_s20 + $0x28] sm:$0xff] %v12286_v26   ;;  %12406 = vst [vmem:[%s20325_s20 + $0x30] sm:$0xff] %v12291_v1   ;;  %v12321_v5 = vpack.c.bf16 %v11371_v12, %v11370_v48  ;;  %v12326_v43 = vpack.c.bf16 %v11373_v27, %v11372_v34  ;;  %v12331_v3 = vpack.c.bf16 %v11375_v4, %v11374_v45 }
 0x995   : > { %12407 = vst [vmem:[%s20325_s20 + $0x38] sm:$0xff] %v12296_v25   ;;  %12408 = vst [vmem:[%s20325_s20 + $0x40] sm:$0xff] %v12301_v42   ;;  %v12336_v57 = vpack.c.bf16 %v11377_v18, %v11376_v56  ;;  %v12341_v17 = vpack.c.bf16 %v11379_v58, %v11378_v35  ;;  %v12346_v14 = vpack.c.bf16 %v11381_v60, %v11380_v6 }
 0x996   : > { %12409 = vst [vmem:[%s20325_s20 + $0x48] sm:$0xff] %v12306_v21   ;;  %12410 = vst [vmem:[%s20325_s20 + $0x50] sm:$0xff] %v12311_v7   ;;  %v12351_v30 = vpack.c.bf16 %v11383_v55, %v11382_v50  ;;  %v12356_v46 = vpack.c.bf16 %v11385_v49, %v11384_v36  ;;  %v12361_v31 = vpack.c.bf16 %v11387_v51, %v11386_v59 }
 0x997   : > { %12411 = vst [vmem:[%s20325_s20 + $0x58] sm:$0xff] %v12316_v44   ;;  %12412 = vst [vmem:[%s20325_s20 + $0x60] sm:$0xff] %v12321_v5   ;;  %v12366_v20 = vpack.c.bf16 %v11389_v2, %v11388_v40  ;;  %v12376_v33 = vpack.c.bf16 %v11393_v15, %v11392_v9 }
 0x998   : > { %12413 = vst [vmem:[%s20325_s20 + $0x68] sm:$0xff] %v12326_v43   ;;  %12414 = vst [vmem:[%s20325_s20 + $0x70] sm:$0xff] %v12331_v3  }
 0x999   : > { %12415 = vst [vmem:[%s20325_s20 + $0x78] sm:$0xff] %v12336_v57   ;;  %12416 = vst [vmem:[%s20325_s20 + $0x80] sm:$0xff] %v12341_v17  }
 0x99a   : > { %12417 = vst [vmem:[%s20325_s20 + $0x88] sm:$0xff] %v12346_v14   ;;  %12418 = vst [vmem:[%s20325_s20 + $0x90] sm:$0xff] %v12351_v30  }
 0x99b   : > { %12419 = vst [vmem:[%s20325_s20 + $0x98] sm:$0xff] %v12356_v46   ;;  %12420 = vst [vmem:[%s20325_s20 + $0xa0] sm:$0xff] %v12361_v31  }
 0x99c   : > { %12421 = vst [vmem:[%s20325_s20 + $0xa8] sm:$0xff] %v12366_v20   ;;  %12423 = vst [vmem:[%s20325_s20 + $0xb8] sm:$0xff] %v12376_v33  }
 0x99d   : > { %15536 = shalt.err (!%p15533_p1)
}
 0x99e   : > { %s15537_s11 = scalar_lea.hbm %s20473_s28, 3072  ;;  %s15541_s30 = scalar_lea.hbm %s20534_s3, 6144 }
 0x99f   : > { %p15538_p13 = scmp.ne.s32.totalorder %s20473_s28, %s15537_s11  ;;  %p15542_p4 = scmp.lt.u32.totalorder %s20473_s28, %s20534_s3 }
 0x9a0   : > { %p15543_p5 = scmp.lt.u32.totalorder %s15541_s30, %s15537_s11  ;;  %p15545_p11 = scmp.lt.u32.totalorder %s15537_s11, %s20473_s28 }
 0x9a1   : > { %p15539_p6 = pnand %p15538_p13, %p21663_p0 }
 0x9a2   : > { %p15544_p8 = por %p15543_p5, %p15542_p4 }
 0x9a3   : > { %p15540_p10 = pneg %p15539_p6 }
 0x9a4   : > { %p15546_p2 = por %p15545_p11, %p15544_p8 }
 0x9a6   : > { %p15547_p3 = pnand %p15546_p2, %p15540_p10 }
 0x9a8   : > { %15550 = shalt.err (!%p15547_p3)
}
 0x9a9   : > { %s15603_s18 = smov 64   ;;  %s15604_s20 = smov 4  }
 0x9aa   : > { %15031 = dma.vmem_to_hbm [thread:$0]  (%p21663_p0), %s20479_s8, 3072, %s20473_s28, %s11635_s16, %s15603_s18, %s15603_s18, %s15604_s20  }
 0x9ab PF: > { %s11663_s7 = sand.u32 1, %s15581_s12   ;;  %p21664_p7 = scmp.ne.s32.totalorder %s20754_s19, 0 }
 0x9ac   : > { %p21665_p9 = scmp.ge.s32.totalorder %s15593_s15, 2  ;;  %s11664_s17 = scalar_lea.sflag [#allocation5], %s11663_s7 }
 0x9ae   : > { %p15045_p12 = pnand %p21665_p9, %p21664_p7 }
 0x9b0   : > { %15576 = dma.done.wait (!%p15045_p12), %s11664_s17, 3072  }
 0x9b1   : > { %15578 = vsyncadd (!%p15045_p12), %s11664_s17, 4294964224  ;;  %p17_p1 = scmp.ge.s32.totalorder %s15741_s23, 4   ;;  %s21666_s12 = smov %s15585_s13 }
 0x9b2   : > { %s21667_s13 = smov %s15589_s14  ;;  %s21668_s14 = smov %s15757_s9 }
 0x9b3   : > { %s21669_s15 = smov %s15741_s23  ;;  %19 = sbr.rel (!%p17_p1) target bundleno = 6 (0x6), region = 101 }
 0x9ba   :  { %11669 = vsyncpa [#allocation4], 1 }
 0x9bb   :  { %11671 = vsyncpa [#allocation4 + $0x1], 1 }
 0x9bc   :  { %11672 = vsyncpa [#allocation7], 1 }
 0x9bd   :  { %11673 = vsyncpa [#allocation5], 1 }
 0x9be   :  { %11675 = vsyncpa [#allocation5 + $0x1], 1 }

</bundles_post_ra>
